<compile_context>
chip_gen: v7x
topology: tpu7x:2x2x1
jax: 0.10.0
libtpu: 0.0.40
codegen_flags: <defaults>
</compile_context>

<pallas_src>
import functools

import jax
import jax.numpy as jnp
from jax.experimental import pallas as pl
from jax.experimental.pallas import tpu as pltpu

EPS = 1e-5
F32 = jnp.float32

# Tiling knobs (sized so double-buffered tiles stay well inside v7x's 64 MiB VMEM and the
# default scoped limits on v5e/v6e).
ROW_BLOCK = 1024            # rows (= batch*points) per matmul tile
POINT_BLOCK = 512           # points per max-pool tile
VMEM_LIMIT = 48 * 1024 * 1024
MM_BF16_MIN_CIN = 64        # cast matmul inputs to bf16 (f32 accumulate) when Cin >= this


# ---------------------------------------------------------------------------
# Kernels
# ---------------------------------------------------------------------------
def _mm_kernel(x_ref, w_ref, b_ref, y_ref, s_ref, ss_ref, *,
               do_relu, do_stats, rows_total, block_rows, mm_dtype):
    """Row-tiled 1x1-conv matmul + bias (+ReLU), emitting per-tile BN partial stats."""
    y = jnp.dot(x_ref[...].astype(mm_dtype), w_ref[...],
                preferred_element_type=jnp.float32) + b_ref[...]
    if do_relu:
        y = jnp.maximum(y, 0.0)
    y_ref[...] = y
    if do_stats:
        if rows_total % block_rows != 0:
            row = (jax.lax.broadcasted_iota(jnp.int32, (block_rows, 1), 0)
                   + pl.program_id(0) * block_rows)
            y = jnp.where(row < rows_total, y, 0.0)      # mask padded rows of last tile
        s_ref[...] = jnp.sum(y, axis=0, keepdims=True)[None]
        ss_ref[...] = jnp.sum(y * y, axis=0, keepdims=True)[None]
    else:
        s_ref[...] = jnp.zeros_like(s_ref)
        ss_ref[...] = jnp.zeros_like(ss_ref)


def _bmm_kernel(x_ref, w_ref, b_ref, y_ref, s_ref, ss_ref, *,
                do_relu, do_stats, points_total, block_rows, mm_dtype):
    """Per-batch matmul (per-batch weight/bias, e.g. a T-Net transform folded into a conv)."""
    y = jnp.dot(x_ref[0].astype(mm_dtype), w_ref[0],
                preferred_element_type=jnp.float32) + b_ref[0]
    if do_relu:
        y = jnp.maximum(y, 0.0)
    y_ref[0] = y
    if do_stats:
        if points_total % block_rows != 0:
            row = (jax.lax.broadcasted_iota(jnp.int32, (block_rows, 1), 0)
                   + pl.program_id(1) * block_rows)
            y = jnp.where(row < points_total, y, 0.0)
        s_ref[0, 0] = jnp.sum(y, axis=0, keepdims=True)
        ss_ref[0, 0] = jnp.sum(y * y, axis=0, keepdims=True)
    else:
        s_ref[...] = jnp.zeros_like(s_ref)
        ss_ref[...] = jnp.zeros_like(ss_ref)


def _maxpool_kernel(x_ref, scale_ref, shift_ref, *out_refs,
                    with_idx, points_total, block_points):
    """Tiled max over points with the preceding BN affine fused in.  Running max (and
    first-occurrence argmax) live in the resident output block; points axis is 'arbitrary'."""
    t = pl.program_id(1)
    v = x_ref[0] * scale_ref[...] + shift_ref[...]                 # (block_points, C)
    row0 = t * block_points
    if points_total % block_points != 0:
        rows = jax.lax.broadcasted_iota(jnp.int32, (block_points, 1), 0) + row0
        v = jnp.where(rows < points_total, v, -jnp.inf)
    tile_max = jnp.max(v, axis=0, keepdims=True)                   # (1, C)

    val_ref = out_refs[0]
    if with_idx:
        idx_ref = out_refs[1]
        rows_c = jax.lax.broadcasted_iota(jnp.int32, v.shape, 0) + row0
        tile_idx = jnp.min(jnp.where(v == tile_max, rows_c, jnp.int32(2 ** 30)),
                           axis=0, keepdims=True).astype(jnp.int32)

    @pl.when(t == 0)
    def _():
        val_ref[0] = tile_max
        if with_idx:
            idx_ref[0] = tile_idx

    @pl.when(t > 0)
    def _():
        prev = val_ref[0]
        better = tile_max > prev                                   # strict > keeps first max
        val_ref[0] = jnp.where(better, tile_max, prev)
        if with_idx:
            idx_ref[0] = jnp.where(better, tile_idx, idx_ref[0])


# ---------------------------------------------------------------------------
# Pallas wrappers
# ---------------------------------------------------------------------------
def conv_mm(x, w, b, *, do_relu=True, do_stats=True):
    """x:(R,Cin) @ w:(Cin,Cout) + b, optional ReLU; returns (y, partial_sum, partial_sumsq)."""
    R, cin = x.shape
    cout = w.shape[1]
    br = R if R <= ROW_BLOCK else ROW_BLOCK
    nt = pl.cdiv(R, br)
    mm_dtype = jnp.bfloat16 if cin >= MM_BF16_MIN_CIN else jnp.float32
    kern = functools.partial(_mm_kernel, do_relu=do_relu, do_stats=do_stats,
                             rows_total=R, block_rows=br, mm_dtype=mm_dtype)
    return pl.pallas_call(
        kern,
        grid=(nt,),
        in_specs=[
            pl.BlockSpec((br, cin), lambda i: (i, 0)),
            pl.BlockSpec((cin, cout), lambda i: (0, 0)),    # weights stay resident
            pl.BlockSpec((1, cout), lambda i: (0, 0)),
        ],
        out_specs=(
            pl.BlockSpec((br, cout), lambda i: (i, 0)),
            pl.BlockSpec((1, 1, cout), lambda i: (i, 0, 0)),
            pl.BlockSpec((1, 1, cout), lambda i: (i, 0, 0)),
        ),
        out_shape=(
            jax.ShapeDtypeStruct((R, cout), F32),
            jax.ShapeDtypeStruct((nt, 1, cout), F32),
            jax.ShapeDtypeStruct((nt, 1, cout), F32),
        ),
        compiler_params=pltpu.CompilerParams(
            dimension_semantics=("parallel",), vmem_limit_bytes=VMEM_LIMIT),
    )(x, w.astype(mm_dtype), b)


def batched_conv_mm(x, w, b, *, do_relu, do_stats):
    """Per-batch weight matmul: x:(bs,N,Cin) @ w:(bs,Cin,Cout) + b:(bs,1,Cout)."""
    bs, n, cin = x.shape
    cout = w.shape[-1]
    br = n if n <= ROW_BLOCK else ROW_BLOCK
    nt = pl.cdiv(n, br)
    mm_dtype = jnp.float32          # tiny-K, memory-bound: keep f32
    kern = functools.partial(_bmm_kernel, do_relu=do_relu, do_stats=do_stats,
                             points_total=n, block_rows=br, mm_dtype=mm_dtype)
    return pl.pallas_call(
        kern,
        grid=(bs, nt),
        in_specs=[
            pl.BlockSpec((1, br, cin), lambda bi, ti: (bi, ti, 0)),
            pl.BlockSpec((1, cin, cout), lambda bi, ti: (bi, 0, 0)),
            pl.BlockSpec((1, 1, cout), lambda bi, ti: (bi, 0, 0)),
        ],
        out_specs=(
            pl.BlockSpec((1, br, cout), lambda bi, ti: (bi, ti, 0)),
            pl.BlockSpec((1, 1, 1, cout), lambda bi, ti: (bi, ti, 0, 0)),
            pl.BlockSpec((1, 1, 1, cout), lambda bi, ti: (bi, ti, 0, 0)),
        ),
        out_shape=(
            jax.ShapeDtypeStruct((bs, n, cout), F32),
            jax.ShapeDtypeStruct((bs, nt, 1, cout), F32),
            jax.ShapeDtypeStruct((bs, nt, 1, cout), F32),
        ),
        compiler_params=pltpu.CompilerParams(
            dimension_semantics=("parallel", "parallel"),
            vmem_limit_bytes=VMEM_LIMIT),
    )(x, w.astype(mm_dtype), b)


def maxpool_affine(x, scale, shift, *, with_idx):
    """Max over points of x*scale+shift (per-channel affine = the preceding BatchNorm)."""
    bs, n, c = x.shape
    bp = n if n <= POINT_BLOCK else POINT_BLOCK
    nt = pl.cdiv(n, bp)
    kern = functools.partial(_maxpool_kernel, with_idx=with_idx,
                             points_total=n, block_points=bp)
    out_shape = [jax.ShapeDtypeStruct((bs, 1, c), F32)]
    out_specs = [pl.BlockSpec((1, 1, c), lambda bi, ti: (bi, 0, 0))]
    if with_idx:
        out_shape.append(jax.ShapeDtypeStruct((bs, 1, c), jnp.int32))
        out_specs.append(pl.BlockSpec((1, 1, c), lambda bi, ti: (bi, 0, 0)))
    res = pl.pallas_call(
        kern,
        grid=(bs, nt),
        in_specs=[
            pl.BlockSpec((1, bp, c), lambda bi, ti: (bi, ti, 0)),
            pl.BlockSpec((1, c), lambda bi, ti: (0, 0)),
            pl.BlockSpec((1, c), lambda bi, ti: (0, 0)),
        ],
        out_specs=tuple(out_specs),
        out_shape=tuple(out_shape),
        compiler_params=pltpu.CompilerParams(
            dimension_semantics=("parallel", "arbitrary"),
            vmem_limit_bytes=VMEM_LIMIT),
    )(x, scale, shift)
    if with_idx:
        vals, idx = res
        return vals[:, 0, :], idx[:, 0, :]
    vals = res[0] if isinstance(res, (tuple, list)) else res
    return vals[:, 0, :]


# ---------------------------------------------------------------------------
# BN helpers (tiny jnp glue on (1, C) vectors)
# ---------------------------------------------------------------------------
def bn_affine_from_stats(psum, psumsq, count, gamma, beta):
    """Training-mode BatchNorm (biased var) as a per-channel affine y = x*scale + shift."""
    mean = psum / count
    var = jnp.maximum(psumsq / count - mean * mean, 0.0)
    scale = gamma * jax.lax.rsqrt(var + EPS)
    return scale, beta - mean * scale


def fold_affine_into_matmul(scale, shift, w, b):
    """(x*scale + shift) @ w + b  ==  x @ (scale^T * w) + (shift @ w + b)."""
    return scale.reshape(-1, 1) * w, shift @ w + b


def dense_relu_bn(x, layer):
    """Tiny (rows == batch) linear + ReLU + BN: plain jnp, not worth a pallas_call."""
    y = jnp.maximum(x @ layer["w"] + layer["b"], 0.0)
    mean = jnp.mean(y, axis=0, keepdims=True)
    var = jnp.mean(jnp.square(y - mean), axis=0, keepdims=True)
    return (y - mean) * jax.lax.rsqrt(var + EPS) * layer["gamma"] + layer["beta"]


def conv_relu_bn(x_flat, layer, pending=None):
    """Shared-weight 1x1 conv + ReLU; returns pre-BN output and this layer's BN affine.
    `pending` is the (scale, shift) BN affine of the producing layer, folded into the weight."""
    w, b = layer["w"], layer["b"]
    if pending is not None:
        w, b = fold_affine_into_matmul(pending[0], pending[1], w, b)
    y, s, ss = conv_mm(x_flat, w, b, do_relu=True, do_stats=True)
    scale, shift = bn_affine_from_stats(jnp.sum(s, axis=0), jnp.sum(ss, axis=0),
                                        x_flat.shape[0], layer["gamma"], layer["beta"])
    return y, (scale, shift)


# ---------------------------------------------------------------------------
# Parameters (deterministic synthetic init; weights stored as W^T of the PyTorch conv/linear)
# ---------------------------------------------------------------------------
def make_layer(key, cin, cout, scale=0.1):
    kw, kb = jax.random.split(key)
    return dict(
        w=jax.random.normal(kw, (cin, cout), F32) * scale,
        b=jax.random.normal(kb, (1, cout), F32) * scale,
        gamma=jnp.ones((1, cout), F32),       # BatchNorm weight
        beta=jnp.zeros((1, cout), F32),       # BatchNorm bias
    )


def make_tnet_params(key, dim):
    ks = jax.random.split(key, 6)
    return dict(
        conv1=make_layer(ks[0], dim, 64),
        conv2=make_layer(ks[1], 64, 128),
        conv3=make_layer(ks[2], 128, 1024),
        lin1=make_layer(ks[3], 1024, 512),
        lin2=make_layer(ks[4], 512, 256),
        lin3=make_layer(ks[5], 256, dim * dim),
    )


def make_backbone_params(key, num_global_feats=512):
    ks = jax.random.split(key, 7)
    return dict(
        tnet1=make_tnet_params(ks[0], 3),
        tnet2=make_tnet_params(ks[1], 64),
        conv1=make_layer(ks[2], 3, 64),
        conv2=make_layer(ks[3], 64, 64),
        conv3=make_layer(ks[4], 64, 64),
        conv4=make_layer(ks[5], 64, 128),
        conv5=make_layer(ks[6], 128, num_global_feats),
    )


# ---------------------------------------------------------------------------
# Forward passes (glue in jnp, heavy lifting in the Pallas kernels)
# ---------------------------------------------------------------------------
def tnet_forward(x_flat, pending, p, dim, bs, n):
    """x_flat: (bs*n, dim) pre-BN activation, `pending` its producing BN affine (or None).
    Returns the (bs, dim, dim) learned transform."""
    y1, a1 = conv_relu_bn(x_flat, p["conv1"], pending)            # -> 64
    y2, a2 = conv_relu_bn(y1, p["conv2"], a1)                     # -> 128
    y3, a3 = conv_relu_bn(y2, p["conv3"], a2)                     # -> 1024
    pooled = maxpool_affine(y3.reshape(bs, n, 1024), a3[0], a3[1], with_idx=False)
    g = dense_relu_bn(pooled, p["lin1"])                          # -> 512
    g = dense_relu_bn(g, p["lin2"])                               # -> 256
    g = g @ p["lin3"]["w"] + p["lin3"]["b"]                       # -> dim*dim
    return g.reshape(bs, dim, dim) + jnp.eye(dim, dtype=F32)[None]


def pointnet_backbone_forward(x_ncw, params, *, local_feat=True):
    """x_ncw: (bs, 3, N) in PyTorch NCW layout."""
    bs, _, n = x_ncw.shape
    x = jnp.transpose(x_ncw, (0, 2, 1))                           # (bs, N, 3)

    # ---- input T-Net; its 3x3 transform is folded straight into conv1's weight ----
    a_input = tnet_forward(x.reshape(bs * n, 3), None, params["tnet1"], 3, bs, n)
    w1 = jnp.einsum("bij,jk->bik", a_input, params["conv1"]["w"])       # (bs, 3, 64)
    b1 = jnp.broadcast_to(params["conv1"]["b"][None], (bs, 1, 64))
    y1, s1, ss1 = batched_conv_mm(x, w1, b1, do_relu=True, do_stats=True)
    a1 = bn_affine_from_stats(jnp.sum(s1, axis=(0, 1)), jnp.sum(ss1, axis=(0, 1)),
                              bs * n, params["conv1"]["gamma"], params["conv1"]["beta"])

    # ---- conv2 (bn1 folded into its weight) ----
    y2, a2 = conv_relu_bn(y1.reshape(bs * n, 64), params["conv2"], a1)

    # ---- feature T-Net on the bn2 output (bn2 carried as the pending affine) ----
    a_feat = tnet_forward(y2, a2, params["tnet2"], 64, bs, n)

    # ---- local features: bn2(y2) @ A_feat, with bn2 folded into the per-batch matrix ----
    wf = a2[0][0][None, :, None] * a_feat                         # (bs, 64, 64)
    bf = jnp.einsum("oc,bcd->bod", a2[1], a_feat)                 # (bs, 1, 64)
    local_features, _, _ = batched_conv_mm(y2.reshape(bs, n, 64), wf, bf,
                                           do_relu=False, do_stats=False)

    # ---- shared MLP up to the global features ----
    y3, a3 = conv_relu_bn(local_features.reshape(bs * n, 64), params["conv3"])
    y4, a4 = conv_relu_bn(y3, params["conv4"], a3)
    y5, a5 = conv_relu_bn(y4, params["conv5"], a4)
    nfeat = params["conv5"]["w"].shape[1]

    # ---- global max pool (bn5 affine fused into the pool) with critical point indices ----
    global_features, critical_indexes = maxpool_affine(
        y5.reshape(bs, n, nfeat), a5[0], a5[1], with_idx=True)

    if local_feat:
        feat_bnc = jnp.concatenate(
            [local_features,
             jnp.broadcast_to(global_features[:, None, :], (bs, n, nfeat))], axis=-1)
        features = jnp.transpose(feat_bnc, (0, 2, 1))             # (bs, 64+F, N) NCW
        return features, critical_indexes, a_feat
    return global_features, critical_indexes, a_feat


# ---------------------------------------------------------------------------
# Main
# ---------------------------------------------------------------------------
if __name__ == "__main__":
    bs = 2
    num_points = 128          # small stand-in for the module default of 10000
    num_global_feats = 512

    key_params, key_x = jax.random.split(jax.random.PRNGKey(0))
    params = make_backbone_params(key_params, num_global_feats)
    x = jax.random.normal(key_x, (bs, 3, num_points), F32)

    fwd = jax.jit(functools.partial(pointnet_backbone_forward, local_feat=True))
    features, critical_indexes, a_feat = fwd(x, params)
    jax.block_until_ready((features, critical_indexes, a_feat))

    assert features.shape == (bs, 64 + num_global_feats, num_points)
    assert critical_indexes.shape == (bs, num_global_feats)
    assert critical_indexes.dtype == jnp.int32
    assert a_feat.shape == (bs, 64, 64)
    assert bool(jnp.all(jnp.isfinite(features)))
    print("KERNEL_OK")
</pallas_src>

<mosaic_0001>
module attributes {stable_mosaic.version = 11 : i64} {
  func.func @_mm_kernel(%arg0: i32, %arg1: memref<256x3xf32, #tpu.memory_space<vmem>>, %arg2: memref<3x64xf32, #tpu.memory_space<vmem>>, %arg3: memref<1x64xf32, #tpu.memory_space<vmem>>, %arg4: memref<256x64xf32, #tpu.memory_space<vmem>>, %arg5: memref<1x1x64xf32, #tpu.memory_space<vmem>>, %arg6: memref<1x1x64xf32, #tpu.memory_space<vmem>>) attributes {dimension_semantics = [#tpu.dimension_semantics<parallel>], iteration_bounds = array<i64: 1>, scalar_prefetch = 0 : i64, scratch_operands = 0 : i64, tpu.core_type = #tpu.core_type<tc>, window_params = [{transform_indices = @transform_0, window_bounds = array<i64: 256, 3>}, {pipeline_mode = #tpu.pipeline_mode<synchronous>, transform_indices = @transform_1, window_bounds = array<i64: 3, 64>}, {pipeline_mode = #tpu.pipeline_mode<synchronous>, transform_indices = @transform_2, window_bounds = array<i64: 1, 64>}, {transform_indices = @transform_3, window_bounds = array<i64: 256, 64>}, {transform_indices = @transform_4, window_bounds = array<i64: 1, 1, 64>}, {transform_indices = @transform_5, window_bounds = array<i64: 1, 1, 64>}]} {
    %c0 = arith.constant 0 : index
    %c0_0 = arith.constant 0 : index
    %0 = vector.load %arg1[%c0, %c0_0] : memref<256x3xf32, #tpu.memory_space<vmem>>, vector<256x3xf32>
    %c0_1 = arith.constant 0 : index
    %c0_2 = arith.constant 0 : index
    %1 = vector.load %arg2[%c0_1, %c0_2] : memref<3x64xf32, #tpu.memory_space<vmem>>, vector<3x64xf32>
    %cst = arith.constant dense<0.000000e+00> : vector<256x64xf32>
    %2 = tpu.matmul %0, %1, %cst {dimension_numbers = #tpu.dot_dimension_numbers<[1], [0], [0], [1], [0, 0, 1, 1], [], []>} : vector<256x3xf32>, vector<3x64xf32>, vector<256x64xf32> -> vector<256x64xf32>
    %c0_3 = arith.constant 0 : index
    %c0_4 = arith.constant 0 : index
    %3 = vector.load %arg3[%c0_3, %c0_4] : memref<1x64xf32, #tpu.memory_space<vmem>>, vector<1x64xf32>
    %4 = vector.broadcast %3 : vector<1x64xf32> to vector<256x64xf32>
    %5 = arith.addf %2, %4 : vector<256x64xf32>
    %cst_5 = arith.constant 0.000000e+00 : f32
    %6 = vector.broadcast %cst_5 : f32 to vector<256x64xf32>
    %7 = arith.maximumf %5, %6 : vector<256x64xf32>
    %c0_6 = arith.constant 0 : index
    %c0_7 = arith.constant 0 : index
    %8 = vector.load %arg4[%c0_6, %c0_7] : memref<256x64xf32, #tpu.memory_space<vmem>>, vector<256x64xf32>
    tpu.vector_store %arg4[%c0_6, %c0_7], %7 {strides = array<i32>} : memref<256x64xf32, #tpu.memory_space<vmem>>, vector<256x64xf32>,
    %cst_8 = arith.constant dense<0.000000e+00> : vector<64xf32>
    %9 = vector.multi_reduction <add>, %7, %cst_8 [0] : vector<256x64xf32> to vector<64xf32>
    %10 = vector.shape_cast %9 : vector<64xf32> to vector<1x64xf32>
    %11 = vector.shape_cast %10 : vector<1x64xf32> to vector<1x1x64xf32>
    %c0_9 = arith.constant 0 : index
    %c0_10 = arith.constant 0 : index
    %c0_11 = arith.constant 0 : index
    %12 = vector.load %arg5[%c0_9, %c0_10, %c0_11] : memref<1x1x64xf32, #tpu.memory_space<vmem>>, vector<1x1x64xf32>
    tpu.vector_store %arg5[%c0_9, %c0_10, %c0_11], %11 {strides = array<i32>} : memref<1x1x64xf32, #tpu.memory_space<vmem>>, vector<1x1x64xf32>,
    %13 = arith.mulf %7, %7 : vector<256x64xf32>
    %cst_12 = arith.constant dense<0.000000e+00> : vector<64xf32>
    %14 = vector.multi_reduction <add>, %13, %cst_12 [0] : vector<256x64xf32> to vector<64xf32>
    %15 = vector.shape_cast %14 : vector<64xf32> to vector<1x64xf32>
    %16 = vector.shape_cast %15 : vector<1x64xf32> to vector<1x1x64xf32>
    %c0_13 = arith.constant 0 : index
    %c0_14 = arith.constant 0 : index
    %c0_15 = arith.constant 0 : index
    %17 = vector.load %arg6[%c0_13, %c0_14, %c0_15] : memref<1x1x64xf32, #tpu.memory_space<vmem>>, vector<1x1x64xf32>
    tpu.vector_store %arg6[%c0_13, %c0_14, %c0_15], %16 {strides = array<i32>} : memref<1x1x64xf32, #tpu.memory_space<vmem>>, vector<1x1x64xf32>,
    return
  }
  func.func @transform_0(%arg0: i32) -> (i32, i32) {
    %c0_i32 = arith.constant 0 : i32
    %c0_i32_0 = arith.constant 0 : i32
    return %arg0, %c0_i32 : i32, i32
  }
  func.func @transform_1(%arg0: i32) -> (i32, i32) {
    %c0_i32 = arith.constant 0 : i32
    %c0_i32_0 = arith.constant 0 : i32
    %c0_i32_1 = arith.constant 0 : i32
    return %c0_i32, %c0_i32_0 : i32, i32
  }
  func.func @transform_2(%arg0: i32) -> (i32, i32) {
    %c0_i32 = arith.constant 0 : i32
    %c0_i32_0 = arith.constant 0 : i32
    %c0_i32_1 = arith.constant 0 : i32
    return %c0_i32, %c0_i32_0 : i32, i32
  }
  func.func @transform_3(%arg0: i32) -> (i32, i32) {
    %c0_i32 = arith.constant 0 : i32
    %c0_i32_0 = arith.constant 0 : i32
    return %arg0, %c0_i32 : i32, i32
  }
  func.func @transform_4(%arg0: i32) -> (i32, i32, i32) {
    %c0_i32 = arith.constant 0 : i32
    %c0_i32_0 = arith.constant 0 : i32
    %c0_i32_1 = arith.constant 0 : i32
    return %arg0, %c0_i32, %c0_i32_0 : i32, i32, i32
  }
  func.func @transform_5(%arg0: i32) -> (i32, i32, i32) {
    %c0_i32 = arith.constant 0 : i32
    %c0_i32_0 = arith.constant 0 : i32
    %c0_i32_1 = arith.constant 0 : i32
    return %arg0, %c0_i32, %c0_i32_0 : i32, i32, i32
  }
}

module attributes {stable_mosaic.version = 11 : i64} {
  func.func @_mm_kernel(%arg0: i32, %arg1: memref<256x64xf32, #tpu.memory_space<vmem>>, %arg2: memref<64x128xbf16, #tpu.memory_space<vmem>>, %arg3: memref<1x128xf32, #tpu.memory_space<vmem>>, %arg4: memref<256x128xf32, #tpu.memory_space<vmem>>, %arg5: memref<1x1x128xf32, #tpu.memory_space<vmem>>, %arg6: memref<1x1x128xf32, #tpu.memory_space<vmem>>) attributes {dimension_semantics = [#tpu.dimension_semantics<parallel>], iteration_bounds = array<i64: 1>, scalar_prefetch = 0 : i64, scratch_operands = 0 : i64, tpu.core_type = #tpu.core_type<tc>, window_params = [{transform_indices = @transform_0, window_bounds = array<i64: 256, 64>}, {pipeline_mode = #tpu.pipeline_mode<synchronous>, transform_indices = @transform_1, window_bounds = array<i64: 64, 128>}, {pipeline_mode = #tpu.pipeline_mode<synchronous>, transform_indices = @transform_2, window_bounds = array<i64: 1, 128>}, {transform_indices = @transform_3, window_bounds = array<i64: 256, 128>}, {transform_indices = @transform_4, window_bounds = array<i64: 1, 1, 128>}, {transform_indices = @transform_5, window_bounds = array<i64: 1, 1, 128>}]} {
    %c0 = arith.constant 0 : index
    %c0_0 = arith.constant 0 : index
    %0 = vector.load %arg1[%c0, %c0_0] : memref<256x64xf32, #tpu.memory_space<vmem>>, vector<256x64xf32>
    %1 = arith.truncf %0 : vector<256x64xf32> to vector<256x64xbf16>
    %c0_1 = arith.constant 0 : index
    %c0_2 = arith.constant 0 : index
    %2 = vector.load %arg2[%c0_1, %c0_2] : memref<64x128xbf16, #tpu.memory_space<vmem>>, vector<64x128xbf16>
    %cst = arith.constant dense<0.000000e+00> : vector<256x128xf32>
    %3 = tpu.matmul %1, %2, %cst {dimension_numbers = #tpu.dot_dimension_numbers<[1], [0], [0], [1], [0, 0, 1, 1], [], []>} : vector<256x64xbf16>, vector<64x128xbf16>, vector<256x128xf32> -> vector<256x128xf32>
    %c0_3 = arith.constant 0 : index
    %c0_4 = arith.constant 0 : index
    %4 = vector.load %arg3[%c0_3, %c0_4] : memref<1x128xf32, #tpu.memory_space<vmem>>, vector<1x128xf32>
    %5 = vector.broadcast %4 : vector<1x128xf32> to vector<256x128xf32>
    %6 = arith.addf %3, %5 : vector<256x128xf32>
    %cst_5 = arith.constant 0.000000e+00 : f32
    %7 = vector.broadcast %cst_5 : f32 to vector<256x128xf32>
    %8 = arith.maximumf %6, %7 : vector<256x128xf32>
    %c0_6 = arith.constant 0 : index
    %c0_7 = arith.constant 0 : index
    %9 = vector.load %arg4[%c0_6, %c0_7] : memref<256x128xf32, #tpu.memory_space<vmem>>, vector<256x128xf32>
    tpu.vector_store %arg4[%c0_6, %c0_7], %8 {strides = array<i32>} : memref<256x128xf32, #tpu.memory_space<vmem>>, vector<256x128xf32>,
    %cst_8 = arith.constant dense<0.000000e+00> : vector<128xf32>
    %10 = vector.multi_reduction <add>, %8, %cst_8 [0] : vector<256x128xf32> to vector<128xf32>
    %11 = vector.shape_cast %10 : vector<128xf32> to vector<1x128xf32>
    %12 = vector.shape_cast %11 : vector<1x128xf32> to vector<1x1x128xf32>
    %c0_9 = arith.constant 0 : index
    %c0_10 = arith.constant 0 : index
    %c0_11 = arith.constant 0 : index
    %13 = vector.load %arg5[%c0_9, %c0_10, %c0_11] : memref<1x1x128xf32, #tpu.memory_space<vmem>>, vector<1x1x128xf32>
    tpu.vector_store %arg5[%c0_9, %c0_10, %c0_11], %12 {strides = array<i32>} : memref<1x1x128xf32, #tpu.memory_space<vmem>>, vector<1x1x128xf32>,
    %14 = arith.mulf %8, %8 : vector<256x128xf32>
    %cst_12 = arith.constant dense<0.000000e+00> : vector<128xf32>
    %15 = vector.multi_reduction <add>, %14, %cst_12 [0] : vector<256x128xf32> to vector<128xf32>
    %16 = vector.shape_cast %15 : vector<128xf32> to vector<1x128xf32>
    %17 = vector.shape_cast %16 : vector<1x128xf32> to vector<1x1x128xf32>
    %c0_13 = arith.constant 0 : index
    %c0_14 = arith.constant 0 : index
    %c0_15 = arith.constant 0 : index
    %18 = vector.load %arg6[%c0_13, %c0_14, %c0_15] : memref<1x1x128xf32, #tpu.memory_space<vmem>>, vector<1x1x128xf32>
    tpu.vector_store %arg6[%c0_13, %c0_14, %c0_15], %17 {strides = array<i32>} : memref<1x1x128xf32, #tpu.memory_space<vmem>>, vector<1x1x128xf32>,
    return
  }
  func.func @transform_0(%arg0: i32) -> (i32, i32) {
    %c0_i32 = arith.constant 0 : i32
    %c0_i32_0 = arith.constant 0 : i32
    return %arg0, %c0_i32 : i32, i32
  }
  func.func @transform_1(%arg0: i32) -> (i32, i32) {
    %c0_i32 = arith.constant 0 : i32
    %c0_i32_0 = arith.constant 0 : i32
    %c0_i32_1 = arith.constant 0 : i32
    return %c0_i32, %c0_i32_0 : i32, i32
  }
  func.func @transform_2(%arg0: i32) -> (i32, i32) {
    %c0_i32 = arith.constant 0 : i32
    %c0_i32_0 = arith.constant 0 : i32
    %c0_i32_1 = arith.constant 0 : i32
    return %c0_i32, %c0_i32_0 : i32, i32
  }
  func.func @transform_3(%arg0: i32) -> (i32, i32) {
    %c0_i32 = arith.constant 0 : i32
    %c0_i32_0 = arith.constant 0 : i32
    return %arg0, %c0_i32 : i32, i32
  }
  func.func @transform_4(%arg0: i32) -> (i32, i32, i32) {
    %c0_i32 = arith.constant 0 : i32
    %c0_i32_0 = arith.constant 0 : i32
    %c0_i32_1 = arith.constant 0 : i32
    return %arg0, %c0_i32, %c0_i32_0 : i32, i32, i32
  }
  func.func @transform_5(%arg0: i32) -> (i32, i32, i32) {
    %c0_i32 = arith.constant 0 : i32
    %c0_i32_0 = arith.constant 0 : i32
    %c0_i32_1 = arith.constant 0 : i32
    return %arg0, %c0_i32, %c0_i32_0 : i32, i32, i32
  }
}

module attributes {stable_mosaic.version = 11 : i64} {
  func.func @_mm_kernel(%arg0: i32, %arg1: memref<256x128xf32, #tpu.memory_space<vmem>>, %arg2: memref<128x1024xbf16, #tpu.memory_space<vmem>>, %arg3: memref<1x1024xf32, #tpu.memory_space<vmem>>, %arg4: memref<256x1024xf32, #tpu.memory_space<vmem>>, %arg5: memref<1x1x1024xf32, #tpu.memory_space<vmem>>, %arg6: memref<1x1x1024xf32, #tpu.memory_space<vmem>>) attributes {dimension_semantics = [#tpu.dimension_semantics<parallel>], iteration_bounds = array<i64: 1>, scalar_prefetch = 0 : i64, scratch_operands = 0 : i64, tpu.core_type = #tpu.core_type<tc>, window_params = [{transform_indices = @transform_0, window_bounds = array<i64: 256, 128>}, {pipeline_mode = #tpu.pipeline_mode<synchronous>, transform_indices = @transform_1, window_bounds = array<i64: 128, 1024>}, {pipeline_mode = #tpu.pipeline_mode<synchronous>, transform_indices = @transform_2, window_bounds = array<i64: 1, 1024>}, {transform_indices = @transform_3, window_bounds = array<i64: 256, 1024>}, {transform_indices = @transform_4, window_bounds = array<i64: 1, 1, 1024>}, {transform_indices = @transform_5, window_bounds = array<i64: 1, 1, 1024>}]} {
    %c0 = arith.constant 0 : index
    %c0_0 = arith.constant 0 : index
    %0 = vector.load %arg1[%c0, %c0_0] : memref<256x128xf32, #tpu.memory_space<vmem>>, vector<256x128xf32>
    %1 = arith.truncf %0 : vector<256x128xf32> to vector<256x128xbf16>
    %c0_1 = arith.constant 0 : index
    %c0_2 = arith.constant 0 : index
    %2 = vector.load %arg2[%c0_1, %c0_2] : memref<128x1024xbf16, #tpu.memory_space<vmem>>, vector<128x1024xbf16>
    %cst = arith.constant dense<0.000000e+00> : vector<256x1024xf32>
    %3 = tpu.matmul %1, %2, %cst {dimension_numbers = #tpu.dot_dimension_numbers<[1], [0], [0], [1], [0, 0, 1, 1], [], []>} : vector<256x128xbf16>, vector<128x1024xbf16>, vector<256x1024xf32> -> vector<256x1024xf32>
    %c0_3 = arith.constant 0 : index
    %c0_4 = arith.constant 0 : index
    %4 = vector.load %arg3[%c0_3, %c0_4] : memref<1x1024xf32, #tpu.memory_space<vmem>>, vector<1x1024xf32>
    %5 = vector.broadcast %4 : vector<1x1024xf32> to vector<256x1024xf32>
    %6 = arith.addf %3, %5 : vector<256x1024xf32>
    %cst_5 = arith.constant 0.000000e+00 : f32
    %7 = vector.broadcast %cst_5 : f32 to vector<256x1024xf32>
    %8 = arith.maximumf %6, %7 : vector<256x1024xf32>
    %c0_6 = arith.constant 0 : index
    %c0_7 = arith.constant 0 : index
    %9 = vector.load %arg4[%c0_6, %c0_7] : memref<256x1024xf32, #tpu.memory_space<vmem>>, vector<256x1024xf32>
    tpu.vector_store %arg4[%c0_6, %c0_7], %8 {strides = array<i32>} : memref<256x1024xf32, #tpu.memory_space<vmem>>, vector<256x1024xf32>,
    %cst_8 = arith.constant dense<0.000000e+00> : vector<1024xf32>
    %10 = vector.multi_reduction <add>, %8, %cst_8 [0] : vector<256x1024xf32> to vector<1024xf32>
    %11 = vector.shape_cast %10 : vector<1024xf32> to vector<1x1024xf32>
    %12 = vector.shape_cast %11 : vector<1x1024xf32> to vector<1x1x1024xf32>
    %c0_9 = arith.constant 0 : index
    %c0_10 = arith.constant 0 : index
    %c0_11 = arith.constant 0 : index
    %13 = vector.load %arg5[%c0_9, %c0_10, %c0_11] : memref<1x1x1024xf32, #tpu.memory_space<vmem>>, vector<1x1x1024xf32>
    tpu.vector_store %arg5[%c0_9, %c0_10, %c0_11], %12 {strides = array<i32>} : memref<1x1x1024xf32, #tpu.memory_space<vmem>>, vector<1x1x1024xf32>,
    %14 = arith.mulf %8, %8 : vector<256x1024xf32>
    %cst_12 = arith.constant dense<0.000000e+00> : vector<1024xf32>
    %15 = vector.multi_reduction <add>, %14, %cst_12 [0] : vector<256x1024xf32> to vector<1024xf32>
    %16 = vector.shape_cast %15 : vector<1024xf32> to vector<1x1024xf32>
    %17 = vector.shape_cast %16 : vector<1x1024xf32> to vector<1x1x1024xf32>
    %c0_13 = arith.constant 0 : index
    %c0_14 = arith.constant 0 : index
    %c0_15 = arith.constant 0 : index
    %18 = vector.load %arg6[%c0_13, %c0_14, %c0_15] : memref<1x1x1024xf32, #tpu.memory_space<vmem>>, vector<1x1x1024xf32>
    tpu.vector_store %arg6[%c0_13, %c0_14, %c0_15], %17 {strides = array<i32>} : memref<1x1x1024xf32, #tpu.memory_space<vmem>>, vector<1x1x1024xf32>,
    return
  }
  func.func @transform_0(%arg0: i32) -> (i32, i32) {
    %c0_i32 = arith.constant 0 : i32
    %c0_i32_0 = arith.constant 0 : i32
    return %arg0, %c0_i32 : i32, i32
  }
  func.func @transform_1(%arg0: i32) -> (i32, i32) {
    %c0_i32 = arith.constant 0 : i32
    %c0_i32_0 = arith.constant 0 : i32
    %c0_i32_1 = arith.constant 0 : i32
    return %c0_i32, %c0_i32_0 : i32, i32
  }
  func.func @transform_2(%arg0: i32) -> (i32, i32) {
    %c0_i32 = arith.constant 0 : i32
    %c0_i32_0 = arith.constant 0 : i32
    %c0_i32_1 = arith.constant 0 : i32
    return %c0_i32, %c0_i32_0 : i32, i32
  }
  func.func @transform_3(%arg0: i32) -> (i32, i32) {
    %c0_i32 = arith.constant 0 : i32
    %c0_i32_0 = arith.constant 0 : i32
    return %arg0, %c0_i32 : i32, i32
  }
  func.func @transform_4(%arg0: i32) -> (i32, i32, i32) {
    %c0_i32 = arith.constant 0 : i32
    %c0_i32_0 = arith.constant 0 : i32
    %c0_i32_1 = arith.constant 0 : i32
    return %arg0, %c0_i32, %c0_i32_0 : i32, i32, i32
  }
  func.func @transform_5(%arg0: i32) -> (i32, i32, i32) {
    %c0_i32 = arith.constant 0 : i32
    %c0_i32_0 = arith.constant 0 : i32
    %c0_i32_1 = arith.constant 0 : i32
    return %arg0, %c0_i32, %c0_i32_0 : i32, i32, i32
  }
}

module attributes {stable_mosaic.version = 11 : i64} {
  func.func @_maxpool_kernel(%arg0: i32, %arg1: i32, %arg2: memref<1x128x1024xf32, #tpu.memory_space<vmem>>, %arg3: memref<1x1024xf32, #tpu.memory_space<vmem>>, %arg4: memref<1x1024xf32, #tpu.memory_space<vmem>>, %arg5: memref<1x1x1024xf32, #tpu.memory_space<vmem>>) attributes {dimension_semantics = [#tpu.dimension_semantics<parallel>, #tpu.dimension_semantics<arbitrary>], iteration_bounds = array<i64: 2, 1>, scalar_prefetch = 0 : i64, scratch_operands = 0 : i64, tpu.core_type = #tpu.core_type<tc>, window_params = [{transform_indices = @transform_0, window_bounds = array<i64: 1, 128, 1024>}, {pipeline_mode = #tpu.pipeline_mode<synchronous>, transform_indices = @transform_1, window_bounds = array<i64: 1, 1024>}, {pipeline_mode = #tpu.pipeline_mode<synchronous>, transform_indices = @transform_2, window_bounds = array<i64: 1, 1024>}, {transform_indices = @transform_3, window_bounds = array<i64: 1, 1, 1024>}]} {
    %c0 = arith.constant 0 : index
    %c0_0 = arith.constant 0 : index
    %c0_1 = arith.constant 0 : index
    %0 = vector.load %arg2[%c0, %c0_0, %c0_1] : memref<1x128x1024xf32, #tpu.memory_space<vmem>>, vector<1x128x1024xf32>
    %1 = vector.shape_cast %0 : vector<1x128x1024xf32> to vector<128x1024xf32>
    %c0_2 = arith.constant 0 : index
    %c0_3 = arith.constant 0 : index
    %2 = vector.load %arg3[%c0_2, %c0_3] : memref<1x1024xf32, #tpu.memory_space<vmem>>, vector<1x1024xf32>
    %3 = vector.broadcast %2 : vector<1x1024xf32> to vector<128x1024xf32>
    %4 = arith.mulf %1, %3 : vector<128x1024xf32>
    %c0_4 = arith.constant 0 : index
    %c0_5 = arith.constant 0 : index
    %5 = vector.load %arg4[%c0_4, %c0_5] : memref<1x1024xf32, #tpu.memory_space<vmem>>, vector<1x1024xf32>
    %6 = vector.broadcast %5 : vector<1x1024xf32> to vector<128x1024xf32>
    %7 = arith.addf %4, %6 : vector<128x1024xf32>
    %cst = arith.constant dense<0xFF800000> : vector<1024xf32>
    %8 = vector.multi_reduction <maximumf>, %7, %cst [0] : vector<128x1024xf32> to vector<1024xf32>
    %9 = vector.shape_cast %8 : vector<1024xf32> to vector<1x1024xf32>
    %c0_i32 = arith.constant 0 : i32
    %10 = arith.cmpi eq, %arg1, %c0_i32 : i32
    %11 = arith.extui %10 : i1 to i32
    %c0_i32_6 = arith.constant 0 : i32
    %12 = arith.cmpi ne, %11, %c0_i32_6 : i32
    scf.if %12 {
      %c0_9 = arith.constant 0 : index
      %c0_10 = arith.constant 0 : index
      %c0_11 = arith.constant 0 : index
      %16 = vector.load %arg5[%c0_9, %c0_10, %c0_11] : memref<1x1x1024xf32, #tpu.memory_space<vmem>>, vector<1x1x1024xf32>
      %17 = vector.shape_cast %16 : vector<1x1x1024xf32> to vector<1x1024xf32>
      %18 = vector.shape_cast %9 : vector<1x1024xf32> to vector<1x1x1024xf32>
      tpu.vector_store %arg5[%c0_9, %c0_10, %c0_11], %18 {strides = array<i32>} : memref<1x1x1024xf32, #tpu.memory_space<vmem>>, vector<1x1x1024xf32>,
    } else {
    }
    %c0_i32_7 = arith.constant 0 : i32
    %13 = arith.cmpi sgt, %arg1, %c0_i32_7 : i32
    %14 = arith.extui %13 : i1 to i32
    %c0_i32_8 = arith.constant 0 : i32
    %15 = arith.cmpi ne, %14, %c0_i32_8 : i32
    scf.if %15 {
      %c0_9 = arith.constant 0 : index
      %c0_10 = arith.constant 0 : index
      %c0_11 = arith.constant 0 : index
      %16 = vector.load %arg5[%c0_9, %c0_10, %c0_11] : memref<1x1x1024xf32, #tpu.memory_space<vmem>>, vector<1x1x1024xf32>
      %17 = vector.shape_cast %16 : vector<1x1x1024xf32> to vector<1x1024xf32>
      %18 = arith.cmpf ogt, %9, %17 : vector<1x1024xf32>
      %19 = arith.select %18, %9, %17 : vector<1x1024xi1>, vector<1x1024xf32>
      %c0_12 = arith.constant 0 : index
      %c0_13 = arith.constant 0 : index
      %c0_14 = arith.constant 0 : index
      %20 = vector.load %arg5[%c0_12, %c0_13, %c0_14] : memref<1x1x1024xf32, #tpu.memory_space<vmem>>, vector<1x1x1024xf32>
      %21 = vector.shape_cast %20 : vector<1x1x1024xf32> to vector<1x1024xf32>
      %22 = vector.shape_cast %19 : vector<1x1024xf32> to vector<1x1x1024xf32>
      tpu.vector_store %arg5[%c0_12, %c0_13, %c0_14], %22 {strides = array<i32>} : memref<1x1x1024xf32, #tpu.memory_space<vmem>>, vector<1x1x1024xf32>,
    } else {
    }
    return
  }
  func.func @transform_0(%arg0: i32, %arg1: i32) -> (i32, i32, i32) {
    %c0_i32 = arith.constant 0 : i32
    %c0_i32_0 = arith.constant 0 : i32
    return %arg0, %arg1, %c0_i32 : i32, i32, i32
  }
  func.func @transform_1(%arg0: i32, %arg1: i32) -> (i32, i32) {
    %c0_i32 = arith.constant 0 : i32
    %c0_i32_0 = arith.constant 0 : i32
    %c0_i32_1 = arith.constant 0 : i32
    return %c0_i32, %c0_i32_0 : i32, i32
  }
  func.func @transform_2(%arg0: i32, %arg1: i32) -> (i32, i32) {
    %c0_i32 = arith.constant 0 : i32
    %c0_i32_0 = arith.constant 0 : i32
    %c0_i32_1 = arith.constant 0 : i32
    return %c0_i32, %c0_i32_0 : i32, i32
  }
  func.func @transform_3(%arg0: i32, %arg1: i32) -> (i32, i32, i32) {
    %c0_i32 = arith.constant 0 : i32
    %c0_i32_0 = arith.constant 0 : i32
    %c0_i32_1 = arith.constant 0 : i32
    return %arg0, %c0_i32, %c0_i32_0 : i32, i32, i32
  }
}

module attributes {stable_mosaic.version = 11 : i64} {
  func.func @_bmm_kernel(%arg0: i32, %arg1: i32, %arg2: memref<1x128x3xf32, #tpu.memory_space<vmem>>, %arg3: memref<1x3x64xf32, #tpu.memory_space<vmem>>, %arg4: memref<1x1x64xf32, #tpu.memory_space<vmem>>, %arg5: memref<1x128x64xf32, #tpu.memory_space<vmem>>, %arg6: memref<1x1x1x64xf32, #tpu.memory_space<vmem>>, %arg7: memref<1x1x1x64xf32, #tpu.memory_space<vmem>>) attributes {dimension_semantics = [#tpu.dimension_semantics<parallel>, #tpu.dimension_semantics<parallel>], iteration_bounds = array<i64: 2, 1>, scalar_prefetch = 0 : i64, scratch_operands = 0 : i64, tpu.core_type = #tpu.core_type<tc>, window_params = [{transform_indices = @transform_0, window_bounds = array<i64: 1, 128, 3>}, {transform_indices = @transform_1, window_bounds = array<i64: 1, 3, 64>}, {transform_indices = @transform_2, window_bounds = array<i64: 1, 1, 64>}, {transform_indices = @transform_3, window_bounds = array<i64: 1, 128, 64>}, {transform_indices = @transform_4, window_bounds = array<i64: 1, 1, 1, 64>}, {transform_indices = @transform_5, window_bounds = array<i64: 1, 1, 1, 64>}]} {
    %c0 = arith.constant 0 : index
    %c0_0 = arith.constant 0 : index
    %c0_1 = arith.constant 0 : index
    %0 = vector.load %arg2[%c0, %c0_0, %c0_1] : memref<1x128x3xf32, #tpu.memory_space<vmem>>, vector<1x128x3xf32>
    %1 = vector.shape_cast %0 : vector<1x128x3xf32> to vector<128x3xf32>
    %c0_2 = arith.constant 0 : index
    %c0_3 = arith.constant 0 : index
    %c0_4 = arith.constant 0 : index
    %2 = vector.load %arg3[%c0_2, %c0_3, %c0_4] : memref<1x3x64xf32, #tpu.memory_space<vmem>>, vector<1x3x64xf32>
    %3 = vector.shape_cast %2 : vector<1x3x64xf32> to vector<3x64xf32>
    %cst = arith.constant dense<0.000000e+00> : vector<128x64xf32>
    %4 = tpu.matmul %1, %3, %cst {dimension_numbers = #tpu.dot_dimension_numbers<[1], [0], [0], [1], [0, 0, 1, 1], [], []>} : vector<128x3xf32>, vector<3x64xf32>, vector<128x64xf32> -> vector<128x64xf32>
    %c0_5 = arith.constant 0 : index
    %c0_6 = arith.constant 0 : index
    %c0_7 = arith.constant 0 : index
    %5 = vector.load %arg4[%c0_5, %c0_6, %c0_7] : memref<1x1x64xf32, #tpu.memory_space<vmem>>, vector<1x1x64xf32>
    %6 = vector.shape_cast %5 : vector<1x1x64xf32> to vector<1x64xf32>
    %7 = vector.broadcast %6 : vector<1x64xf32> to vector<128x64xf32>
    %8 = arith.addf %4, %7 : vector<128x64xf32>
    %cst_8 = arith.constant 0.000000e+00 : f32
    %9 = vector.broadcast %cst_8 : f32 to vector<128x64xf32>
    %10 = arith.maximumf %8, %9 : vector<128x64xf32>
    %c0_9 = arith.constant 0 : index
    %c0_10 = arith.constant 0 : index
    %c0_11 = arith.constant 0 : index
    %11 = vector.load %arg5[%c0_9, %c0_10, %c0_11] : memref<1x128x64xf32, #tpu.memory_space<vmem>>, vector<1x128x64xf32>
    %12 = vector.shape_cast %11 : vector<1x128x64xf32> to vector<128x64xf32>
    %13 = vector.shape_cast %10 : vector<128x64xf32> to vector<1x128x64xf32>
    tpu.vector_store %arg5[%c0_9, %c0_10, %c0_11], %13 {strides = array<i32>} : memref<1x128x64xf32, #tpu.memory_space<vmem>>, vector<1x128x64xf32>,
    %cst_12 = arith.constant dense<0.000000e+00> : vector<64xf32>
    %14 = vector.multi_reduction <add>, %10, %cst_12 [0] : vector<128x64xf32> to vector<64xf32>
    %15 = vector.shape_cast %14 : vector<64xf32> to vector<1x64xf32>
    %c0_13 = arith.constant 0 : index
    %c0_14 = arith.constant 0 : index
    %c0_15 = arith.constant 0 : index
    %c0_16 = arith.constant 0 : index
    %16 = vector.load %arg6[%c0_13, %c0_14, %c0_15, %c0_16] : memref<1x1x1x64xf32, #tpu.memory_space<vmem>>, vector<1x1x1x64xf32>
    %17 = vector.shape_cast %16 : vector<1x1x1x64xf32> to vector<1x64xf32>
    %18 = vector.shape_cast %15 : vector<1x64xf32> to vector<1x1x1x64xf32>
    tpu.vector_store %arg6[%c0_13, %c0_14, %c0_15, %c0_16], %18 {strides = array<i32>} : memref<1x1x1x64xf32, #tpu.memory_space<vmem>>, vector<1x1x1x64xf32>,
    %19 = arith.mulf %10, %10 : vector<128x64xf32>
    %cst_17 = arith.constant dense<0.000000e+00> : vector<64xf32>
    %20 = vector.multi_reduction <add>, %19, %cst_17 [0] : vector<128x64xf32> to vector<64xf32>
    %21 = vector.shape_cast %20 : vector<64xf32> to vector<1x64xf32>
    %c0_18 = arith.constant 0 : index
    %c0_19 = arith.constant 0 : index
    %c0_20 = arith.constant 0 : index
    %c0_21 = arith.constant 0 : index
    %22 = vector.load %arg7[%c0_18, %c0_19, %c0_20, %c0_21] : memref<1x1x1x64xf32, #tpu.memory_space<vmem>>, vector<1x1x1x64xf32>
    %23 = vector.shape_cast %22 : vector<1x1x1x64xf32> to vector<1x64xf32>
    %24 = vector.shape_cast %21 : vector<1x64xf32> to vector<1x1x1x64xf32>
    tpu.vector_store %arg7[%c0_18, %c0_19, %c0_20, %c0_21], %24 {strides = array<i32>} : memref<1x1x1x64xf32, #tpu.memory_space<vmem>>, vector<1x1x1x64xf32>,
    return
  }
  func.func @transform_0(%arg0: i32, %arg1: i32) -> (i32, i32, i32) {
    %c0_i32 = arith.constant 0 : i32
    %c0_i32_0 = arith.constant 0 : i32
    return %arg0, %arg1, %c0_i32 : i32, i32, i32
  }
  func.func @transform_1(%arg0: i32, %arg1: i32) -> (i32, i32, i32) {
    %c0_i32 = arith.constant 0 : i32
    %c0_i32_0 = arith.constant 0 : i32
    %c0_i32_1 = arith.constant 0 : i32
    return %arg0, %c0_i32, %c0_i32_0 : i32, i32, i32
  }
  func.func @transform_2(%arg0: i32, %arg1: i32) -> (i32, i32, i32) {
    %c0_i32 = arith.constant 0 : i32
    %c0_i32_0 = arith.constant 0 : i32
    %c0_i32_1 = arith.constant 0 : i32
    return %arg0, %c0_i32, %c0_i32_0 : i32, i32, i32
  }
  func.func @transform_3(%arg0: i32, %arg1: i32) -> (i32, i32, i32) {
    %c0_i32 = arith.constant 0 : i32
    %c0_i32_0 = arith.constant 0 : i32
    return %arg0, %arg1, %c0_i32 : i32, i32, i32
  }
  func.func @transform_4(%arg0: i32, %arg1: i32) -> (i32, i32, i32, i32) {
    %c0_i32 = arith.constant 0 : i32
    %c0_i32_0 = arith.constant 0 : i32
    %c0_i32_1 = arith.constant 0 : i32
    return %arg0, %arg1, %c0_i32, %c0_i32_0 : i32, i32, i32, i32
  }
  func.func @transform_5(%arg0: i32, %arg1: i32) -> (i32, i32, i32, i32) {
    %c0_i32 = arith.constant 0 : i32
    %c0_i32_0 = arith.constant 0 : i32
    %c0_i32_1 = arith.constant 0 : i32
    return %arg0, %arg1, %c0_i32, %c0_i32_0 : i32, i32, i32, i32
  }
}

module attributes {stable_mosaic.version = 11 : i64} {
  func.func @_mm_kernel(%arg0: i32, %arg1: memref<256x64xf32, #tpu.memory_space<vmem>>, %arg2: memref<64x64xbf16, #tpu.memory_space<vmem>>, %arg3: memref<1x64xf32, #tpu.memory_space<vmem>>, %arg4: memref<256x64xf32, #tpu.memory_space<vmem>>, %arg5: memref<1x1x64xf32, #tpu.memory_space<vmem>>, %arg6: memref<1x1x64xf32, #tpu.memory_space<vmem>>) attributes {dimension_semantics = [#tpu.dimension_semantics<parallel>], iteration_bounds = array<i64: 1>, scalar_prefetch = 0 : i64, scratch_operands = 0 : i64, tpu.core_type = #tpu.core_type<tc>, window_params = [{transform_indices = @transform_0, window_bounds = array<i64: 256, 64>}, {pipeline_mode = #tpu.pipeline_mode<synchronous>, transform_indices = @transform_1, window_bounds = array<i64: 64, 64>}, {pipeline_mode = #tpu.pipeline_mode<synchronous>, transform_indices = @transform_2, window_bounds = array<i64: 1, 64>}, {transform_indices = @transform_3, window_bounds = array<i64: 256, 64>}, {transform_indices = @transform_4, window_bounds = array<i64: 1, 1, 64>}, {transform_indices = @transform_5, window_bounds = array<i64: 1, 1, 64>}]} {
    %c0 = arith.constant 0 : index
    %c0_0 = arith.constant 0 : index
    %0 = vector.load %arg1[%c0, %c0_0] : memref<256x64xf32, #tpu.memory_space<vmem>>, vector<256x64xf32>
    %1 = arith.truncf %0 : vector<256x64xf32> to vector<256x64xbf16>
    %c0_1 = arith.constant 0 : index
    %c0_2 = arith.constant 0 : index
    %2 = vector.load %arg2[%c0_1, %c0_2] : memref<64x64xbf16, #tpu.memory_space<vmem>>, vector<64x64xbf16>
    %cst = arith.constant dense<0.000000e+00> : vector<256x64xf32>
    %3 = tpu.matmul %1, %2, %cst {dimension_numbers = #tpu.dot_dimension_numbers<[1], [0], [0], [1], [0, 0, 1, 1], [], []>} : vector<256x64xbf16>, vector<64x64xbf16>, vector<256x64xf32> -> vector<256x64xf32>
    %c0_3 = arith.constant 0 : index
    %c0_4 = arith.constant 0 : index
    %4 = vector.load %arg3[%c0_3, %c0_4] : memref<1x64xf32, #tpu.memory_space<vmem>>, vector<1x64xf32>
    %5 = vector.broadcast %4 : vector<1x64xf32> to vector<256x64xf32>
    %6 = arith.addf %3, %5 : vector<256x64xf32>
    %cst_5 = arith.constant 0.000000e+00 : f32
    %7 = vector.broadcast %cst_5 : f32 to vector<256x64xf32>
    %8 = arith.maximumf %6, %7 : vector<256x64xf32>
    %c0_6 = arith.constant 0 : index
    %c0_7 = arith.constant 0 : index
    %9 = vector.load %arg4[%c0_6, %c0_7] : memref<256x64xf32, #tpu.memory_space<vmem>>, vector<256x64xf32>
    tpu.vector_store %arg4[%c0_6, %c0_7], %8 {strides = array<i32>} : memref<256x64xf32, #tpu.memory_space<vmem>>, vector<256x64xf32>,
    %cst_8 = arith.constant dense<0.000000e+00> : vector<64xf32>
    %10 = vector.multi_reduction <add>, %8, %cst_8 [0] : vector<256x64xf32> to vector<64xf32>
    %11 = vector.shape_cast %10 : vector<64xf32> to vector<1x64xf32>
    %12 = vector.shape_cast %11 : vector<1x64xf32> to vector<1x1x64xf32>
    %c0_9 = arith.constant 0 : index
    %c0_10 = arith.constant 0 : index
    %c0_11 = arith.constant 0 : index
    %13 = vector.load %arg5[%c0_9, %c0_10, %c0_11] : memref<1x1x64xf32, #tpu.memory_space<vmem>>, vector<1x1x64xf32>
    tpu.vector_store %arg5[%c0_9, %c0_10, %c0_11], %12 {strides = array<i32>} : memref<1x1x64xf32, #tpu.memory_space<vmem>>, vector<1x1x64xf32>,
    %14 = arith.mulf %8, %8 : vector<256x64xf32>
    %cst_12 = arith.constant dense<0.000000e+00> : vector<64xf32>
    %15 = vector.multi_reduction <add>, %14, %cst_12 [0] : vector<256x64xf32> to vector<64xf32>
    %16 = vector.shape_cast %15 : vector<64xf32> to vector<1x64xf32>
    %17 = vector.shape_cast %16 : vector<1x64xf32> to vector<1x1x64xf32>
    %c0_13 = arith.constant 0 : index
    %c0_14 = arith.constant 0 : index
    %c0_15 = arith.constant 0 : index
    %18 = vector.load %arg6[%c0_13, %c0_14, %c0_15] : memref<1x1x64xf32, #tpu.memory_space<vmem>>, vector<1x1x64xf32>
    tpu.vector_store %arg6[%c0_13, %c0_14, %c0_15], %17 {strides = array<i32>} : memref<1x1x64xf32, #tpu.memory_space<vmem>>, vector<1x1x64xf32>,
    return
  }
  func.func @transform_0(%arg0: i32) -> (i32, i32) {
    %c0_i32 = arith.constant 0 : i32
    %c0_i32_0 = arith.constant 0 : i32
    return %arg0, %c0_i32 : i32, i32
  }
  func.func @transform_1(%arg0: i32) -> (i32, i32) {
    %c0_i32 = arith.constant 0 : i32
    %c0_i32_0 = arith.constant 0 : i32
    %c0_i32_1 = arith.constant 0 : i32
    return %c0_i32, %c0_i32_0 : i32, i32
  }
  func.func @transform_2(%arg0: i32) -> (i32, i32) {
    %c0_i32 = arith.constant 0 : i32
    %c0_i32_0 = arith.constant 0 : i32
    %c0_i32_1 = arith.constant 0 : i32
    return %c0_i32, %c0_i32_0 : i32, i32
  }
  func.func @transform_3(%arg0: i32) -> (i32, i32) {
    %c0_i32 = arith.constant 0 : i32
    %c0_i32_0 = arith.constant 0 : i32
    return %arg0, %c0_i32 : i32, i32
  }
  func.func @transform_4(%arg0: i32) -> (i32, i32, i32) {
    %c0_i32 = arith.constant 0 : i32
    %c0_i32_0 = arith.constant 0 : i32
    %c0_i32_1 = arith.constant 0 : i32
    return %arg0, %c0_i32, %c0_i32_0 : i32, i32, i32
  }
  func.func @transform_5(%arg0: i32) -> (i32, i32, i32) {
    %c0_i32 = arith.constant 0 : i32
    %c0_i32_0 = arith.constant 0 : i32
    %c0_i32_1 = arith.constant 0 : i32
    return %arg0, %c0_i32, %c0_i32_0 : i32, i32, i32
  }
}

module attributes {stable_mosaic.version = 11 : i64} {
  func.func @_bmm_kernel(%arg0: i32, %arg1: i32, %arg2: memref<1x128x64xf32, #tpu.memory_space<vmem>>, %arg3: memref<1x64x64xf32, #tpu.memory_space<vmem>>, %arg4: memref<1x1x64xf32, #tpu.memory_space<vmem>>, %arg5: memref<1x128x64xf32, #tpu.memory_space<vmem>>, %arg6: memref<1x1x1x64xf32, #tpu.memory_space<vmem>>, %arg7: memref<1x1x1x64xf32, #tpu.memory_space<vmem>>) attributes {dimension_semantics = [#tpu.dimension_semantics<parallel>, #tpu.dimension_semantics<parallel>], iteration_bounds = array<i64: 2, 1>, scalar_prefetch = 0 : i64, scratch_operands = 0 : i64, tpu.core_type = #tpu.core_type<tc>, window_params = [{transform_indices = @transform_0, window_bounds = array<i64: 1, 128, 64>}, {transform_indices = @transform_1, window_bounds = array<i64: 1, 64, 64>}, {transform_indices = @transform_2, window_bounds = array<i64: 1, 1, 64>}, {transform_indices = @transform_3, window_bounds = array<i64: 1, 128, 64>}, {transform_indices = @transform_4, window_bounds = array<i64: 1, 1, 1, 64>}, {transform_indices = @transform_5, window_bounds = array<i64: 1, 1, 1, 64>}]} {
    %c0 = arith.constant 0 : index
    %c0_0 = arith.constant 0 : index
    %c0_1 = arith.constant 0 : index
    %0 = vector.load %arg2[%c0, %c0_0, %c0_1] : memref<1x128x64xf32, #tpu.memory_space<vmem>>, vector<1x128x64xf32>
    %1 = vector.shape_cast %0 : vector<1x128x64xf32> to vector<128x64xf32>
    %c0_2 = arith.constant 0 : index
    %c0_3 = arith.constant 0 : index
    %c0_4 = arith.constant 0 : index
    %2 = vector.load %arg3[%c0_2, %c0_3, %c0_4] : memref<1x64x64xf32, #tpu.memory_space<vmem>>, vector<1x64x64xf32>
    %3 = vector.shape_cast %2 : vector<1x64x64xf32> to vector<64x64xf32>
    %cst = arith.constant dense<0.000000e+00> : vector<128x64xf32>
    %4 = tpu.matmul %1, %3, %cst {dimension_numbers = #tpu.dot_dimension_numbers<[1], [0], [0], [1], [0, 0, 1, 1], [], []>} : vector<128x64xf32>, vector<64x64xf32>, vector<128x64xf32> -> vector<128x64xf32>
    %c0_5 = arith.constant 0 : index
    %c0_6 = arith.constant 0 : index
    %c0_7 = arith.constant 0 : index
    %5 = vector.load %arg4[%c0_5, %c0_6, %c0_7] : memref<1x1x64xf32, #tpu.memory_space<vmem>>, vector<1x1x64xf32>
    %6 = vector.shape_cast %5 : vector<1x1x64xf32> to vector<1x64xf32>
    %7 = vector.broadcast %6 : vector<1x64xf32> to vector<128x64xf32>
    %8 = arith.addf %4, %7 : vector<128x64xf32>
    %c0_8 = arith.constant 0 : index
    %c0_9 = arith.constant 0 : index
    %c0_10 = arith.constant 0 : index
    %9 = vector.load %arg5[%c0_8, %c0_9, %c0_10] : memref<1x128x64xf32, #tpu.memory_space<vmem>>, vector<1x128x64xf32>
    %10 = vector.shape_cast %9 : vector<1x128x64xf32> to vector<128x64xf32>
    %11 = vector.shape_cast %8 : vector<128x64xf32> to vector<1x128x64xf32>
    tpu.vector_store %arg5[%c0_8, %c0_9, %c0_10], %11 {strides = array<i32>} : memref<1x128x64xf32, #tpu.memory_space<vmem>>, vector<1x128x64xf32>,
    %cst_11 = arith.constant 0.000000e+00 : f32
    %12 = vector.broadcast %cst_11 : f32 to vector<1x1x1x64xf32>
    %c0_12 = arith.constant 0 : index
    %c0_13 = arith.constant 0 : index
    %c0_14 = arith.constant 0 : index
    %c0_15 = arith.constant 0 : index
    %13 = vector.load %arg6[%c0_12, %c0_13, %c0_14, %c0_15] : memref<1x1x1x64xf32, #tpu.memory_space<vmem>>, vector<1x1x1x64xf32>
    tpu.vector_store %arg6[%c0_12, %c0_13, %c0_14, %c0_15], %12 {strides = array<i32>} : memref<1x1x1x64xf32, #tpu.memory_space<vmem>>, vector<1x1x1x64xf32>,
    %cst_16 = arith.constant 0.000000e+00 : f32
    %14 = vector.broadcast %cst_16 : f32 to vector<1x1x1x64xf32>
    %c0_17 = arith.constant 0 : index
    %c0_18 = arith.constant 0 : index
    %c0_19 = arith.constant 0 : index
    %c0_20 = arith.constant 0 : index
    %15 = vector.load %arg7[%c0_17, %c0_18, %c0_19, %c0_20] : memref<1x1x1x64xf32, #tpu.memory_space<vmem>>, vector<1x1x1x64xf32>
    tpu.vector_store %arg7[%c0_17, %c0_18, %c0_19, %c0_20], %14 {strides = array<i32>} : memref<1x1x1x64xf32, #tpu.memory_space<vmem>>, vector<1x1x1x64xf32>,
    return
  }
  func.func @transform_0(%arg0: i32, %arg1: i32) -> (i32, i32, i32) {
    %c0_i32 = arith.constant 0 : i32
    %c0_i32_0 = arith.constant 0 : i32
    return %arg0, %arg1, %c0_i32 : i32, i32, i32
  }
  func.func @transform_1(%arg0: i32, %arg1: i32) -> (i32, i32, i32) {
    %c0_i32 = arith.constant 0 : i32
    %c0_i32_0 = arith.constant 0 : i32
    %c0_i32_1 = arith.constant 0 : i32
    return %arg0, %c0_i32, %c0_i32_0 : i32, i32, i32
  }
  func.func @transform_2(%arg0: i32, %arg1: i32) -> (i32, i32, i32) {
    %c0_i32 = arith.constant 0 : i32
    %c0_i32_0 = arith.constant 0 : i32
    %c0_i32_1 = arith.constant 0 : i32
    return %arg0, %c0_i32, %c0_i32_0 : i32, i32, i32
  }
  func.func @transform_3(%arg0: i32, %arg1: i32) -> (i32, i32, i32) {
    %c0_i32 = arith.constant 0 : i32
    %c0_i32_0 = arith.constant 0 : i32
    return %arg0, %arg1, %c0_i32 : i32, i32, i32
  }
  func.func @transform_4(%arg0: i32, %arg1: i32) -> (i32, i32, i32, i32) {
    %c0_i32 = arith.constant 0 : i32
    %c0_i32_0 = arith.constant 0 : i32
    %c0_i32_1 = arith.constant 0 : i32
    return %arg0, %arg1, %c0_i32, %c0_i32_0 : i32, i32, i32, i32
  }
  func.func @transform_5(%arg0: i32, %arg1: i32) -> (i32, i32, i32, i32) {
    %c0_i32 = arith.constant 0 : i32
    %c0_i32_0 = arith.constant 0 : i32
    %c0_i32_1 = arith.constant 0 : i32
    return %arg0, %arg1, %c0_i32, %c0_i32_0 : i32, i32, i32, i32
  }
}

module attributes {stable_mosaic.version = 11 : i64} {
  func.func @_maxpool_kernel(%arg0: i32, %arg1: i32, %arg2: memref<1x128x512xf32, #tpu.memory_space<vmem>>, %arg3: memref<1x512xf32, #tpu.memory_space<vmem>>, %arg4: memref<1x512xf32, #tpu.memory_space<vmem>>, %arg5: memref<1x1x512xf32, #tpu.memory_space<vmem>>, %arg6: memref<1x1x512xi32, #tpu.memory_space<vmem>>) attributes {dimension_semantics = [#tpu.dimension_semantics<parallel>, #tpu.dimension_semantics<arbitrary>], iteration_bounds = array<i64: 2, 1>, scalar_prefetch = 0 : i64, scratch_operands = 0 : i64, tpu.core_type = #tpu.core_type<tc>, window_params = [{transform_indices = @transform_0, window_bounds = array<i64: 1, 128, 512>}, {pipeline_mode = #tpu.pipeline_mode<synchronous>, transform_indices = @transform_1, window_bounds = array<i64: 1, 512>}, {pipeline_mode = #tpu.pipeline_mode<synchronous>, transform_indices = @transform_2, window_bounds = array<i64: 1, 512>}, {transform_indices = @transform_3, window_bounds = array<i64: 1, 1, 512>}, {transform_indices = @transform_4, window_bounds = array<i64: 1, 1, 512>}]} {
    %c0 = arith.constant 0 : index
    %c0_0 = arith.constant 0 : index
    %c0_1 = arith.constant 0 : index
    %0 = vector.load %arg2[%c0, %c0_0, %c0_1] : memref<1x128x512xf32, #tpu.memory_space<vmem>>, vector<1x128x512xf32>
    %1 = vector.shape_cast %0 : vector<1x128x512xf32> to vector<128x512xf32>
    %c0_2 = arith.constant 0 : index
    %c0_3 = arith.constant 0 : index
    %2 = vector.load %arg3[%c0_2, %c0_3] : memref<1x512xf32, #tpu.memory_space<vmem>>, vector<1x512xf32>
    %3 = vector.broadcast %2 : vector<1x512xf32> to vector<128x512xf32>
    %4 = arith.mulf %1, %3 : vector<128x512xf32>
    %c0_4 = arith.constant 0 : index
    %c0_5 = arith.constant 0 : index
    %5 = vector.load %arg4[%c0_4, %c0_5] : memref<1x512xf32, #tpu.memory_space<vmem>>, vector<1x512xf32>
    %6 = vector.broadcast %5 : vector<1x512xf32> to vector<128x512xf32>
    %7 = arith.addf %4, %6 : vector<128x512xf32>
    %c128_i32 = arith.constant 128 : i32
    %8 = arith.muli %arg1, %c128_i32 : i32
    %cst = arith.constant dense<0xFF800000> : vector<512xf32>
    %9 = vector.multi_reduction <maximumf>, %7, %cst [0] : vector<128x512xf32> to vector<512xf32>
    %10 = vector.shape_cast %9 : vector<512xf32> to vector<1x512xf32>
    %11 = tpu.iota {dimensions = array<i32: 0>} : vector<128x512xi32>
    %12 = vector.broadcast %8 : i32 to vector<128x512xi32>
    %13 = arith.addi %11, %12 : vector<128x512xi32>
    %14 = vector.broadcast %10 : vector<1x512xf32> to vector<128x512xf32>
    %15 = arith.cmpf oeq, %7, %14 : vector<128x512xf32>
    %c1073741824_i32 = arith.constant 1073741824 : i32
    %16 = vector.broadcast %c1073741824_i32 : i32 to vector<128x512xi32>
    %17 = arith.select %15, %13, %16 : vector<128x512xi1>, vector<128x512xi32>
    %cst_6 = arith.constant dense<2147483647> : vector<512xi32>
    %18 = vector.multi_reduction <minsi>, %17, %cst_6 [0] : vector<128x512xi32> to vector<512xi32>
    %19 = vector.shape_cast %18 : vector<512xi32> to vector<1x512xi32>
    %c0_i32 = arith.constant 0 : i32
    %20 = arith.cmpi eq, %arg1, %c0_i32 : i32
    %21 = arith.extui %20 : i1 to i32
    %c0_i32_7 = arith.constant 0 : i32
    %22 = arith.cmpi ne, %21, %c0_i32_7 : i32
    scf.if %22 {
      %c0_10 = arith.constant 0 : index
      %c0_11 = arith.constant 0 : index
      %c0_12 = arith.constant 0 : index
      %26 = vector.load %arg5[%c0_10, %c0_11, %c0_12] : memref<1x1x512xf32, #tpu.memory_space<vmem>>, vector<1x1x512xf32>
      %27 = vector.shape_cast %26 : vector<1x1x512xf32> to vector<1x512xf32>
      %28 = vector.shape_cast %10 : vector<1x512xf32> to vector<1x1x512xf32>
      tpu.vector_store %arg5[%c0_10, %c0_11, %c0_12], %28 {strides = array<i32>} : memref<1x1x512xf32, #tpu.memory_space<vmem>>, vector<1x1x512xf32>,
      %c0_13 = arith.constant 0 : index
      %c0_14 = arith.constant 0 : index
      %c0_15 = arith.constant 0 : index
      %29 = vector.load %arg6[%c0_13, %c0_14, %c0_15] : memref<1x1x512xi32, #tpu.memory_space<vmem>>, vector<1x1x512xi32>
      %30 = vector.shape_cast %29 : vector<1x1x512xi32> to vector<1x512xi32>
      %31 = vector.shape_cast %19 : vector<1x512xi32> to vector<1x1x512xi32>
      tpu.vector_store %arg6[%c0_13, %c0_14, %c0_15], %31 {strides = array<i32>} : memref<1x1x512xi32, #tpu.memory_space<vmem>>, vector<1x1x512xi32>,
    } else {
    }
    %c0_i32_8 = arith.constant 0 : i32
    %23 = arith.cmpi sgt, %arg1, %c0_i32_8 : i32
    %24 = arith.extui %23 : i1 to i32
    %c0_i32_9 = arith.constant 0 : i32
    %25 = arith.cmpi ne, %24, %c0_i32_9 : i32
    scf.if %25 {
      %c0_10 = arith.constant 0 : index
      %c0_11 = arith.constant 0 : index
      %c0_12 = arith.constant 0 : index
      %26 = vector.load %arg5[%c0_10, %c0_11, %c0_12] : memref<1x1x512xf32, #tpu.memory_space<vmem>>, vector<1x1x512xf32>
      %27 = vector.shape_cast %26 : vector<1x1x512xf32> to vector<1x512xf32>
      %28 = arith.cmpf ogt, %10, %27 : vector<1x512xf32>
      %29 = arith.select %28, %10, %27 : vector<1x512xi1>, vector<1x512xf32>
      %c0_13 = arith.constant 0 : index
      %c0_14 = arith.constant 0 : index
      %c0_15 = arith.constant 0 : index
      %30 = vector.load %arg5[%c0_13, %c0_14, %c0_15] : memref<1x1x512xf32, #tpu.memory_space<vmem>>, vector<1x1x512xf32>
      %31 = vector.shape_cast %30 : vector<1x1x512xf32> to vector<1x512xf32>
      %32 = vector.shape_cast %29 : vector<1x512xf32> to vector<1x1x512xf32>
      tpu.vector_store %arg5[%c0_13, %c0_14, %c0_15], %32 {strides = array<i32>} : memref<1x1x512xf32, #tpu.memory_space<vmem>>, vector<1x1x512xf32>,
      %c0_16 = arith.constant 0 : index
      %c0_17 = arith.constant 0 : index
      %c0_18 = arith.constant 0 : index
      %33 = vector.load %arg6[%c0_16, %c0_17, %c0_18] : memref<1x1x512xi32, #tpu.memory_space<vmem>>, vector<1x1x512xi32>
      %34 = vector.shape_cast %33 : vector<1x1x512xi32> to vector<1x512xi32>
      %35 = arith.select %28, %19, %34 : vector<1x512xi1>, vector<1x512xi32>
      %c0_19 = arith.constant 0 : index
      %c0_20 = arith.constant 0 : index
      %c0_21 = arith.constant 0 : index
      %36 = vector.load %arg6[%c0_19, %c0_20, %c0_21] : memref<1x1x512xi32, #tpu.memory_space<vmem>>, vector<1x1x512xi32>
      %37 = vector.shape_cast %36 : vector<1x1x512xi32> to vector<1x512xi32>
      %38 = vector.shape_cast %35 : vector<1x512xi32> to vector<1x1x512xi32>
      tpu.vector_store %arg6[%c0_19, %c0_20, %c0_21], %38 {strides = array<i32>} : memref<1x1x512xi32, #tpu.memory_space<vmem>>, vector<1x1x512xi32>,
    } else {
    }
    return
  }
  func.func @transform_0(%arg0: i32, %arg1: i32) -> (i32, i32, i32) {
    %c0_i32 = arith.constant 0 : i32
    %c0_i32_0 = arith.constant 0 : i32
    return %arg0, %arg1, %c0_i32 : i32, i32, i32
  }
  func.func @transform_1(%arg0: i32, %arg1: i32) -> (i32, i32) {
    %c0_i32 = arith.constant 0 : i32
    %c0_i32_0 = arith.constant 0 : i32
    %c0_i32_1 = arith.constant 0 : i32
    return %c0_i32, %c0_i32_0 : i32, i32
  }
  func.func @transform_2(%arg0: i32, %arg1: i32) -> (i32, i32) {
    %c0_i32 = arith.constant 0 : i32
    %c0_i32_0 = arith.constant 0 : i32
    %c0_i32_1 = arith.constant 0 : i32
    return %c0_i32, %c0_i32_0 : i32, i32
  }
  func.func @transform_3(%arg0: i32, %arg1: i32) -> (i32, i32, i32) {
    %c0_i32 = arith.constant 0 : i32
    %c0_i32_0 = arith.constant 0 : i32
    %c0_i32_1 = arith.constant 0 : i32
    return %arg0, %c0_i32, %c0_i32_0 : i32, i32, i32
  }
  func.func @transform_4(%arg0: i32, %arg1: i32) -> (i32, i32, i32) {
    %c0_i32 = arith.constant 0 : i32
    %c0_i32_0 = arith.constant 0 : i32
    %c0_i32_1 = arith.constant 0 : i32
    return %arg0, %c0_i32, %c0_i32_0 : i32, i32, i32
  }
}

module attributes {stable_mosaic.version = 11 : i64} {
  func.func @_mm_kernel(%arg0: i32, %arg1: memref<256x128xf32, #tpu.memory_space<vmem>>, %arg2: memref<128x512xbf16, #tpu.memory_space<vmem>>, %arg3: memref<1x512xf32, #tpu.memory_space<vmem>>, %arg4: memref<256x512xf32, #tpu.memory_space<vmem>>, %arg5: memref<1x1x512xf32, #tpu.memory_space<vmem>>, %arg6: memref<1x1x512xf32, #tpu.memory_space<vmem>>) attributes {dimension_semantics = [#tpu.dimension_semantics<parallel>], iteration_bounds = array<i64: 1>, scalar_prefetch = 0 : i64, scratch_operands = 0 : i64, tpu.core_type = #tpu.core_type<tc>, window_params = [{transform_indices = @transform_0, window_bounds = array<i64: 256, 128>}, {pipeline_mode = #tpu.pipeline_mode<synchronous>, transform_indices = @transform_1, window_bounds = array<i64: 128, 512>}, {pipeline_mode = #tpu.pipeline_mode<synchronous>, transform_indices = @transform_2, window_bounds = array<i64: 1, 512>}, {transform_indices = @transform_3, window_bounds = array<i64: 256, 512>}, {transform_indices = @transform_4, window_bounds = array<i64: 1, 1, 512>}, {transform_indices = @transform_5, window_bounds = array<i64: 1, 1, 512>}]} {
    %c0 = arith.constant 0 : index
    %c0_0 = arith.constant 0 : index
    %0 = vector.load %arg1[%c0, %c0_0] : memref<256x128xf32, #tpu.memory_space<vmem>>, vector<256x128xf32>
    %1 = arith.truncf %0 : vector<256x128xf32> to vector<256x128xbf16>
    %c0_1 = arith.constant 0 : index
    %c0_2 = arith.constant 0 : index
    %2 = vector.load %arg2[%c0_1, %c0_2] : memref<128x512xbf16, #tpu.memory_space<vmem>>, vector<128x512xbf16>
    %cst = arith.constant dense<0.000000e+00> : vector<256x512xf32>
    %3 = tpu.matmul %1, %2, %cst {dimension_numbers = #tpu.dot_dimension_numbers<[1], [0], [0], [1], [0, 0, 1, 1], [], []>} : vector<256x128xbf16>, vector<128x512xbf16>, vector<256x512xf32> -> vector<256x512xf32>
    %c0_3 = arith.constant 0 : index
    %c0_4 = arith.constant 0 : index
    %4 = vector.load %arg3[%c0_3, %c0_4] : memref<1x512xf32, #tpu.memory_space<vmem>>, vector<1x512xf32>
    %5 = vector.broadcast %4 : vector<1x512xf32> to vector<256x512xf32>
    %6 = arith.addf %3, %5 : vector<256x512xf32>
    %cst_5 = arith.constant 0.000000e+00 : f32
    %7 = vector.broadcast %cst_5 : f32 to vector<256x512xf32>
    %8 = arith.maximumf %6, %7 : vector<256x512xf32>
    %c0_6 = arith.constant 0 : index
    %c0_7 = arith.constant 0 : index
    %9 = vector.load %arg4[%c0_6, %c0_7] : memref<256x512xf32, #tpu.memory_space<vmem>>, vector<256x512xf32>
    tpu.vector_store %arg4[%c0_6, %c0_7], %8 {strides = array<i32>} : memref<256x512xf32, #tpu.memory_space<vmem>>, vector<256x512xf32>,
    %cst_8 = arith.constant dense<0.000000e+00> : vector<512xf32>
    %10 = vector.multi_reduction <add>, %8, %cst_8 [0] : vector<256x512xf32> to vector<512xf32>
    %11 = vector.shape_cast %10 : vector<512xf32> to vector<1x512xf32>
    %12 = vector.shape_cast %11 : vector<1x512xf32> to vector<1x1x512xf32>
    %c0_9 = arith.constant 0 : index
    %c0_10 = arith.constant 0 : index
    %c0_11 = arith.constant 0 : index
    %13 = vector.load %arg5[%c0_9, %c0_10, %c0_11] : memref<1x1x512xf32, #tpu.memory_space<vmem>>, vector<1x1x512xf32>
    tpu.vector_store %arg5[%c0_9, %c0_10, %c0_11], %12 {strides = array<i32>} : memref<1x1x512xf32, #tpu.memory_space<vmem>>, vector<1x1x512xf32>,
    %14 = arith.mulf %8, %8 : vector<256x512xf32>
    %cst_12 = arith.constant dense<0.000000e+00> : vector<512xf32>
    %15 = vector.multi_reduction <add>, %14, %cst_12 [0] : vector<256x512xf32> to vector<512xf32>
    %16 = vector.shape_cast %15 : vector<512xf32> to vector<1x512xf32>
    %17 = vector.shape_cast %16 : vector<1x512xf32> to vector<1x1x512xf32>
    %c0_13 = arith.constant 0 : index
    %c0_14 = arith.constant 0 : index
    %c0_15 = arith.constant 0 : index
    %18 = vector.load %arg6[%c0_13, %c0_14, %c0_15] : memref<1x1x512xf32, #tpu.memory_space<vmem>>, vector<1x1x512xf32>
    tpu.vector_store %arg6[%c0_13, %c0_14, %c0_15], %17 {strides = array<i32>} : memref<1x1x512xf32, #tpu.memory_space<vmem>>, vector<1x1x512xf32>,
    return
  }
  func.func @transform_0(%arg0: i32) -> (i32, i32) {
    %c0_i32 = arith.constant 0 : i32
    %c0_i32_0 = arith.constant 0 : i32
    return %arg0, %c0_i32 : i32, i32
  }
  func.func @transform_1(%arg0: i32) -> (i32, i32) {
    %c0_i32 = arith.constant 0 : i32
    %c0_i32_0 = arith.constant 0 : i32
    %c0_i32_1 = arith.constant 0 : i32
    return %c0_i32, %c0_i32_0 : i32, i32
  }
  func.func @transform_2(%arg0: i32) -> (i32, i32) {
    %c0_i32 = arith.constant 0 : i32
    %c0_i32_0 = arith.constant 0 : i32
    %c0_i32_1 = arith.constant 0 : i32
    return %c0_i32, %c0_i32_0 : i32, i32
  }
  func.func @transform_3(%arg0: i32) -> (i32, i32) {
    %c0_i32 = arith.constant 0 : i32
    %c0_i32_0 = arith.constant 0 : i32
    return %arg0, %c0_i32 : i32, i32
  }
  func.func @transform_4(%arg0: i32) -> (i32, i32, i32) {
    %c0_i32 = arith.constant 0 : i32
    %c0_i32_0 = arith.constant 0 : i32
    %c0_i32_1 = arith.constant 0 : i32
    return %arg0, %c0_i32, %c0_i32_0 : i32, i32, i32
  }
  func.func @transform_5(%arg0: i32) -> (i32, i32, i32) {
    %c0_i32 = arith.constant 0 : i32
    %c0_i32_0 = arith.constant 0 : i32
    %c0_i32_1 = arith.constant 0 : i32
    return %arg0, %c0_i32, %c0_i32_0 : i32, i32, i32
  }
}

</mosaic_0001>

<bundles_post_ra>
// kernel: pointnet_backbone_forward.15
= control target key start
LH: loop header
LB: loop body
LE: loop exit
PB: predicated region body
PF: predicated region fallthrough
CT: control target
= control target key end

     0   :  { %11 = vsyncpa [#allocation3], 0  ;;  %s1316_s0 = inlined_call_operand.vmem [shape: f32[256,3], index: 0, kind: input, shape index: {}]   ;;  %s1317_s1 = inlined_call_operand.hbm [shape: f32[3,64], index: 1, kind: input, shape index: {}]   ;;  %s1318_s2 = inlined_call_operand.hbm [shape: f32[1,64], index: 2, kind: input, shape index: {}]   ;;  %s1319_s3 = inlined_call_operand.vmem [shape: f32[256,64], index: 3, kind: output, shape index: {0}]   ;;  %s1320_s4 = inlined_call_operand.vmem [shape: f32[1,1,64], index: 4, kind: output, shape index: {1}]   ;;  %s1321_s5 = inlined_call_operand.vmem [shape: f32[1,1,64], index: 5, kind: output, shape index: {2}]  }
   0x1   :  { %12 = vsyncpa [#allocation5], 0  ;;  %s828_s18 = smov [#allocation2]   ;;  %s829_s20 = smov [#allocation4]  }
   0x2   :  { %s21_s19 = sshll.u32 %s828_s18, 4  ;;  %s31_s21 = sshll.u32 %s829_s20, 4  ;;  %s22_s19 = int_to_ptr.vmem [resolvable:$true] %s21_s19  ;;  %s32_s21 = int_to_ptr.vmem [resolvable:$true] %s31_s21 }
   0x3   :  { %s780_s24 = scalar_lea.hbm %s1317_s1, 64 }
   0x4   :  { %p781_p0 = scmp.ne.s32.totalorder %s1317_s1, %s780_s24  ;;  %p784_p1 = scmp.lt.u32.totalorder %s780_s24, %s1317_s1 }
   0x6   :  { %p786_p2 = pnand %p784_p1, %p781_p0 }
   0x8   :  { %789 = shalt.err (!%p786_p2)
}
   0x9   :  { %s790_s29 = scalar_lea.vmem %s22_s19, 64  ;;  %p795_p4 = scmp.lt.s32.totalorder %s22_s19, %s22_s19 }
   0xa   :  { %p791_p3 = scmp.ne.s32.totalorder %s22_s19, %s790_s29  ;;  %p796_p5 = scmp.lt.s32.totalorder %s790_s29, %s790_s29 }
   0xc   :  { %p797_p6 = por %p796_p5, %p795_p4 }
   0xe   :  { %p798_p7 = pnand %p797_p6, %p791_p3 }
  0x10   :  { %801 = shalt.err (!%p798_p7)
}
  0x11   :  { %24 = dma.hbm_to_vmem [thread:$0]  %s1317_s1, 64, %s22_s19, [#allocation3]  }
  0x12   :  { %s802_s9 = scalar_lea.hbm %s1318_s2, 16 }
  0x13   :  { %p803_p8 = scmp.ne.s32.totalorder %s1318_s2, %s802_s9  ;;  %p806_p9 = scmp.lt.u32.totalorder %s802_s9, %s1318_s2 }
  0x15   :  { %p808_p10 = pnand %p806_p9, %p803_p8 }
  0x17   :  { %811 = shalt.err (!%p808_p10)
}
  0x18   :  { %s812_s14 = scalar_lea.vmem %s32_s21, 16  ;;  %s816_s15 = scalar_lea.vmem %s32_s21, 32 }
  0x19   :  { %p813_p11 = scmp.ne.s32.totalorder %s32_s21, %s812_s14  ;;  %p817_p12 = scmp.lt.s32.totalorder %s32_s21, %s32_s21 }
  0x1a   :  { %p818_p13 = scmp.lt.s32.totalorder %s816_s15, %s812_s14 }
  0x1c   :  { %p819_p0 = por %p818_p13, %p817_p12 }
  0x1e   :  { %p820_p1 = pnand %p819_p0, %p813_p11 }
  0x20   :  { %823 = shalt.err (!%p820_p1)
}
  0x21   :  { %34 = dma.hbm_to_vmem [thread:$0]  %s1318_s2, 16, %s32_s21, [#allocation5]  }
  0x22   :  { %824 = dma.done.wait [#allocation3], 64  }
  0x23   :  { %825 = vsyncadd [#allocation3], 4294967232 }
  0x24   :  { %826 = dma.done.wait [#allocation5], 16  }
  0x25   :  { %827 = vsyncadd [#allocation5], 4294967280  ;;  %vm178_vm0 = vcmask 1042432   ;;  %vm81_vm1 = vcmask 23552   ;;  %v73_v0 = vld [vmem:[#allocation2] sm:$0x7] }
  0x26   :  { %v41_v1 = vld [vmem:[%s1316_s0] sm:$0xff]  ;;  %v42_v2 = vld [vmem:[%s1316_s0 + $0x8] sm:$0xff]  ;;  %726 = vmatprep.subr.msk.mxu0 %vm178_vm0, %v73_v0  ;;  %v43_v3 = vld [vmem:[%s1316_s0 + $0x10] sm:$0xff]  ;;  %776 = vmatprep.subr.msk.mxu1 %vm178_vm0, %v73_v0  ;;  %vm439_vm2 = vcmask 523264   ;;  %vm541_vm3 = vcmask 516096  }
  0x27   :  { %728 = vmatprep.mubr.msk.f32.mxu0 %vm81_vm1, %v41_v1  ;;  %727 = vmatpush3.msk.msra.mxu0 %vm178_vm0, %v73_v0  ;;  %v44_v4 = vld [vmem:[%s1316_s0 + $0x18] sm:$0xff]  ;;  %v45_v5 = vld [vmem:[%s1316_s0 + $0x20] sm:$0xff]  ;;  %v58_v7 = vld [vmem:[%s1316_s0 + $0x88] sm:$0xff] }
  0x28   :  { %729 = vmatmul.mubr.msk.f32.vlgmr.msra.gmra.mrb[0].mxu0 %vm81_vm1, %v42_v2  ;;  %777 = vmatpush3.msk.msra.mxu1 %vm178_vm0, %v73_v0  ;;  %v57_v6 = vld [vmem:[%s1316_s0 + $0x80] sm:$0xff]  ;;  %v59_v8 = vld [vmem:[%s1316_s0 + $0x90] sm:$0xff]  ;;  %v46_v9 = vld [vmem:[%s1316_s0 + $0x28] sm:$0xff] }
  0x29   :  { %731 = vmatprep.mubr.msk.f32.mxu0 %vm81_vm1, %v43_v3  ;;  %752 = vmatprep.mubr.msk.f32.mxu1 %vm81_vm1, %v57_v6  ;;  %v60_v10 = vld [vmem:[%s1316_s0 + $0x98] sm:$0xff]  ;;  %v47_v11 = vld [vmem:[%s1316_s0 + $0x30] sm:$0xff]  ;;  %v61_v12 = vld [vmem:[%s1316_s0 + $0xa0] sm:$0xff] }
  0x2a   :  { %753 = vmatmul.mubr.msk.f32.vlgmr.msra.gmra.mrb[0].mxu1 %vm81_vm1, %v58_v7  ;;  %v48_v13 = vld [vmem:[%s1316_s0 + $0x38] sm:$0xff]  ;;  %v62_v14 = vld [vmem:[%s1316_s0 + $0xa8] sm:$0xff]  ;;  %v49_v15 = vld [vmem:[%s1316_s0 + $0x40] sm:$0xff] }
  0x2b   :  { %755 = vmatprep.mubr.msk.f32.mxu1 %vm81_vm1, %v59_v8  ;;  %v63_v16 = vld [vmem:[%s1316_s0 + $0xb0] sm:$0xff]  ;;  %v50_v17 = vld [vmem:[%s1316_s0 + $0x48] sm:$0xff]  ;;  %v64_v18 = vld [vmem:[%s1316_s0 + $0xb8] sm:$0xff] }
  0x2c   :  { %732 = vmatmul.mubr.msk.f32.gmra.mrb[2].mxu0 %vm81_vm1, %v44_v4  ;;  %v51_v19 = vld [vmem:[%s1316_s0 + $0x50] sm:$0xff]  ;;  %v65_v20 = vld [vmem:[%s1316_s0 + $0xc0] sm:$0xff]  ;;  %v52_v21 = vld [vmem:[%s1316_s0 + $0x58] sm:$0xff] }
  0x2d   :  { %734 = vmatprep.mubr.msk.f32.mxu0 %vm81_vm1, %v45_v5  ;;  %v66_v22 = vld [vmem:[%s1316_s0 + $0xc8] sm:$0xff]  ;;  %v53_v23 = vld [vmem:[%s1316_s0 + $0x60] sm:$0xff]  ;;  %v67_v24 = vld [vmem:[%s1316_s0 + $0xd0] sm:$0xff] }
  0x2e   :  { %756 = vmatmul.mubr.msk.f32.gmra.mrb[2].mxu1 %vm81_vm1, %v60_v10  ;;  %v54_v25 = vld [vmem:[%s1316_s0 + $0x68] sm:$0xff]  ;;  %v68_v26 = vld [vmem:[%s1316_s0 + $0xd8] sm:$0xff]  ;;  %v55_v27 = vld [vmem:[%s1316_s0 + $0x70] sm:$0xff] }
  0x2f   :  { %758 = vmatprep.mubr.msk.f32.mxu1 %vm81_vm1, %v61_v12  ;;  %v69_v28 = vld [vmem:[%s1316_s0 + $0xe0] sm:$0xff]  ;;  %v56_v29 = vld [vmem:[%s1316_s0 + $0x78] sm:$0xff]  ;;  %v70_v30 = vld [vmem:[%s1316_s0 + $0xe8] sm:$0xff] }
  0x30   :  { %735 = vmatmul.mubr.msk.f32.gmra.mrb[4].mxu0 %vm81_vm1, %v46_v9  ;;  %v71_v31 = vld [vmem:[%s1316_s0 + $0xf0] sm:$0xff]  ;;  %v72_v32 = vld [vmem:[%s1316_s0 + $0xf8] sm:$0xff]  ;;  %v1012_v33 = vld [vmem:[#allocation4] ss:$0 sm:$0xff] }
  0x31   :  { %737 = vmatprep.mubr.msk.f32.mxu0 %vm81_vm1, %v47_v11 }
  0x32   :  { %759 = vmatmul.mubr.msk.f32.gmra.mrb[4].mxu1 %vm81_vm1, %v62_v14 }
  0x33   :  { %761 = vmatprep.mubr.msk.f32.mxu1 %vm81_vm1, %v63_v16 }
  0x34   :  { %738 = vmatmul.mubr.msk.f32.gmra.mrb[6].mxu0 %vm81_vm1, %v48_v13 }
  0x35   :  { %740 = vmatprep.mubr.msk.f32.mxu0 %vm81_vm1, %v49_v15 }
  0x36   :  { %762 = vmatmul.mubr.msk.f32.gmra.mrb[6].mxu1 %vm81_vm1, %v64_v18 }
  0x37   :  { %764 = vmatprep.mubr.msk.f32.mxu1 %vm81_vm1, %v65_v20 }
  0x38   :  { %741 = vmatmul.mubr.msk.f32.gmra.mrb[8].mxu0 %vm81_vm1, %v50_v17 }
  0x39   :  { %743 = vmatprep.mubr.msk.f32.mxu0 %vm81_vm1, %v51_v19 }
  0x3a   :  { %765 = vmatmul.mubr.msk.f32.gmra.mrb[8].mxu1 %vm81_vm1, %v66_v22 }
  0x3b   :  { %767 = vmatprep.mubr.msk.f32.mxu1 %vm81_vm1, %v67_v24 }
  0x3c   :  { %744 = vmatmul.mubr.msk.f32.gmra.mrb[10].mxu0 %vm81_vm1, %v52_v21 }
  0x3d   :  { %746 = vmatprep.mubr.msk.f32.mxu0 %vm81_vm1, %v53_v23 }
  0x3e   :  { %768 = vmatmul.mubr.msk.f32.gmra.mrb[10].mxu1 %vm81_vm1, %v68_v26 }
  0x3f   :  { %770 = vmatprep.mubr.msk.f32.mxu1 %vm81_vm1, %v69_v28 }
  0x40   :  { %747 = vmatmul.mubr.msk.f32.gmra.mrb[12].mxu0 %vm81_vm1, %v54_v25 }
  0x41   :  { %749 = vmatprep.mubr.msk.f32.mxu0 %vm81_vm1, %v55_v27 }
  0x42   :  { %771 = vmatmul.mubr.msk.f32.gmra.mrb[12].mxu1 %vm81_vm1, %v70_v30 }
  0x43   :  { %773 = vmatprep.mubr.msk.f32.mxu1 %vm81_vm1, %v71_v31 }
  0x44   :  { %750 = vmatmul.mubr.msk.f32.gmra.mrb[14].mxu0 %vm81_vm1, %v56_v29 }
  0x46   :  { %774 = vmatmul.mubr.msk.f32.gmra.mrb[14].mxu1 %vm81_vm1, %v72_v32 }
  0xfb   :  { %v730_v34 = vpop.f32.mrb[0].mxu0 }
  0xfc   :  { %v254_v35 = vadd.f32 %v730_v34, %v1012_v33  ;;  %v248_v36 = vpop.f32.mrb[1].mxu0 }
  0xfd   :  { %v249_v37 = vadd.f32 %v1012_v33, %v248_v36  ;;  %v754_v41 = vpop.f32.mrb[0].mxu1 }
  0xfe   :  { %v408_v38 = vmax.f32 %v254_v35, 0.0  ;;  %v334_v46 = vadd.f32 %v754_v41, %v1012_v33  ;;  %v328_v47 = vpop.f32.mrb[1].mxu1 }
  0xff   :  { %v407_v39 = vmax.f32 %v249_v37, 0.0  ;;  %v733_v40 = vpop.f32.mrb[2].mxu0  ;;  %v329_v51 = vadd.f32 %v1012_v33, %v328_v47 }
 0x100   :  { %441 = vst.msk [vmem:[%s1319_s3 + $0x8] sm:$0xff] %vm439_vm2, %v408_v38  ;;  %v473_v42 = vsel %vm439_vm2, %v408_v38, 0.0  ;;  %v544_v43 = vmul.f32 %v408_v38, %v408_v38  ;;  %v264_v44 = vadd.f32 %v733_v40, %v1012_v33  ;;  %v258_v45 = vpop.f32.mrb[3].mxu0  ;;  %v1031_v55 = vmax.f32 %v334_v46, 0.0 }
 0x101   :  { %440 = vst.msk [vmem:[%s1319_s3] sm:$0xff] %vm439_vm2, %v407_v39  ;;  %v472_v48 = vsel %vm439_vm2, %v407_v39, 0.0  ;;  %v543_v49 = vmul.f32 %v407_v39, %v407_v39  ;;  %v259_v50 = vadd.f32 %v1012_v33, %v258_v45  ;;  %v1034_v59 = vmax.f32 %v329_v51, 0.0  ;;  %v757_v60 = vpop.f32.mrb[2].mxu1 }
 0x102   :  { %v576_v52 = vsel %vm439_vm2, %v544_v43, 0.0  ;;  %v474_v53 = vadd.f32 %v473_v42, %v472_v48  ;;  %v410_v54 = vmax.f32 %v264_v44, 0.0  ;;  %457 = vst.msk [vmem:[%s1319_s3 + $0x88] sm:$0xff] %vm439_vm2, %v1031_v55  ;;  %v338_v1 = vpop.f32.mrb[3].mxu1  ;;  %v344_v35 = vadd.f32 %v757_v60, %v1012_v33 }
 0x103   :  { %v575_v56 = vsel %vm439_vm2, %v543_v49, 0.0  ;;  %v409_v57 = vmax.f32 %v259_v50, 0.0  ;;  %v736_v58 = vpop.f32.mrb[4].mxu0  ;;  %456 = vst.msk [vmem:[%s1319_s3 + $0x80] sm:$0xff] %vm439_vm2, %v1034_v59 }
 0x104   :  { %v577_v61 = vadd.f32 %v576_v52, %v575_v56  ;;  %443 = vst.msk [vmem:[%s1319_s3 + $0x18] sm:$0xff] %vm439_vm2, %v410_v54  ;;  %v546_v62 = vmul.f32 %v410_v54, %v410_v54  ;;  %v274_v63 = vadd.f32 %v736_v58, %v1012_v33  ;;  %v268_v0 = vpop.f32.mrb[5].mxu0  ;;  %v477_v7 = vsel %vm439_vm2, %v410_v54, 0.0 }
 0x105   :  { %442 = vst.msk [vmem:[%s1319_s3 + $0x10] sm:$0xff] %vm439_vm2, %v409_v57  ;;  %v475_v2 = vsel %vm439_vm2, %v409_v57, 0.0  ;;  %v545_v3 = vmul.f32 %v409_v57, %v409_v57  ;;  %v269_v4 = vadd.f32 %v1012_v33, %v268_v0  ;;  %v1059_v11 = vpop.f32.mrb[4].mxu1  ;;  %v1096_v48 = vmax.f32 %v344_v35, 0.0 }
 0x106   :  { %v476_v5 = vadd.f32 %v475_v2, %v474_v53  ;;  %v412_v6 = vmax.f32 %v274_v63, 0.0  ;;  %v580_v12 = vsel %vm439_vm2, %v546_v62, 0.0  ;;  %v1066_v17 = vpop.f32.mrb[5].mxu1  ;;  %v339_v54 = vadd.f32 %v1012_v33, %v338_v1 }
 0x107   :  { %v578_v8 = vsel %vm439_vm2, %v545_v3, 0.0  ;;  %v411_v9 = vmax.f32 %v269_v4, 0.0  ;;  %v739_v10 = vpop.f32.mrb[6].mxu0  ;;  %459 = vst.msk [vmem:[%s1319_s3 + $0x98] sm:$0xff] %vm439_vm2, %v1096_v48 }
 0x108   :  { %v579_v13 = vadd.f32 %v578_v8, %v577_v61  ;;  %445 = vst.msk [vmem:[%s1319_s3 + $0x28] sm:$0xff] %vm439_vm2, %v412_v6  ;;  %v548_v14 = vmul.f32 %v412_v6, %v412_v6  ;;  %v478_v15 = vadd.f32 %v477_v7, %v476_v5  ;;  %v278_v16 = vpop.f32.mrb[7].mxu0  ;;  %v284_v20 = vadd.f32 %v739_v10, %v1012_v33 }
 0x109   :  { %444 = vst.msk [vmem:[%s1319_s3 + $0x20] sm:$0xff] %vm439_vm2, %v411_v9  ;;  %v479_v18 = vsel %vm439_vm2, %v411_v9, 0.0  ;;  %v547_v19 = vmul.f32 %v411_v9, %v411_v9  ;;  %v279_v21 = vadd.f32 %v1012_v33, %v278_v16  ;;  %v481_v24 = vsel %vm439_vm2, %v412_v6, 0.0  ;;  %v1077_v29 = vpop.f32.mrb[6].mxu1 }
 0x10a   :  { %v480_v22 = vadd.f32 %v479_v18, %v478_v15  ;;  %v581_v23 = vadd.f32 %v580_v12, %v579_v13  ;;  %v414_v26 = vmax.f32 %v284_v20, 0.0  ;;  %v1081_v36 = vpop.f32.mrb[7].mxu1  ;;  %v584_v37 = vsel %vm439_vm2, %v548_v14, 0.0 }
 0x10b   :  { %v582_v25 = vsel %vm439_vm2, %v547_v19, 0.0  ;;  %v413_v27 = vmax.f32 %v279_v21, 0.0  ;;  %v742_v28 = vpop.f32.mrb[8].mxu0  ;;  %v1125_v10 = vmax.f32 %v339_v54, 0.0 }
 0x10c   :  { %v583_v30 = vadd.f32 %v582_v25, %v581_v23  ;;  %v482_v31 = vadd.f32 %v481_v24, %v480_v22  ;;  %v294_v32 = vadd.f32 %v742_v28, %v1012_v33  ;;  %v288_v34 = vpop.f32.mrb[9].mxu0  ;;  %447 = vst.msk [vmem:[%s1319_s3 + $0x38] sm:$0xff] %vm439_vm2, %v414_v26  ;;  %v550_v38 = vmul.f32 %v414_v26, %v414_v26 }
 0x10d   :  { %446 = vst.msk [vmem:[%s1319_s3 + $0x30] sm:$0xff] %vm439_vm2, %v413_v27  ;;  %v483_v39 = vsel %vm439_vm2, %v413_v27, 0.0  ;;  %v549_v40 = vmul.f32 %v413_v27, %v413_v27  ;;  %v289_v44 = vadd.f32 %v1012_v33, %v288_v34  ;;  %v485_v45 = vsel %vm439_vm2, %v414_v26, 0.0  ;;  %v1098_v49 = vpop.f32.mrb[8].mxu1  ;;  %458 = vst.msk [vmem:[%s1319_s3 + $0x90] sm:$0xff] %vm439_vm2, %v1125_v10 }
 0x10e   :  { %v484_v41 = vadd.f32 %v483_v39, %v482_v31  ;;  %v585_v42 = vadd.f32 %v584_v37, %v583_v30  ;;  %v416_v43 = vmax.f32 %v294_v32, 0.0  ;;  %v588_v50 = vsel %vm439_vm2, %v550_v38, 0.0  ;;  %v1106_v56 = vpop.f32.mrb[9].mxu1 }
 0x10f   :  { %v586_v46 = vsel %vm439_vm2, %v549_v40, 0.0  ;;  %v745_v47 = vpop.f32.mrb[10].mxu0  ;;  %v415_v52 = vmax.f32 %v289_v44, 0.0  ;;  %v354_v31 = vadd.f32 %v1059_v11, %v1012_v33 }
 0x110   :  { %v587_v51 = vadd.f32 %v586_v46, %v585_v42  ;;  %449 = vst.msk [vmem:[%s1319_s3 + $0x48] sm:$0xff] %vm439_vm2, %v416_v43  ;;  %v298_v53 = vpop.f32.mrb[11].mxu0  ;;  %v552_v57 = vmul.f32 %v416_v43, %v416_v43  ;;  %v486_v58 = vadd.f32 %v485_v45, %v484_v41  ;;  %v304_v60 = vadd.f32 %v745_v47, %v1012_v33 }
 0x111   :  { %v299_v61 = vadd.f32 %v1012_v33, %v298_v53  ;;  %448 = vst.msk [vmem:[%s1319_s3 + $0x40] sm:$0xff] %vm439_vm2, %v415_v52  ;;  %v487_v62 = vsel %vm439_vm2, %v415_v52, 0.0  ;;  %v551_v63 = vmul.f32 %v415_v52, %v415_v52  ;;  %v1120_v5 = vpop.f32.mrb[10].mxu1  ;;  %v489_v6 = vsel %vm439_vm2, %v416_v43, 0.0 }
 0x112   :  { %v589_v0 = vadd.f32 %v588_v50, %v587_v51  ;;  %v488_v1 = vadd.f32 %v487_v62, %v486_v58  ;;  %v418_v2 = vmax.f32 %v304_v60, 0.0  ;;  %v1127_v12 = vpop.f32.mrb[11].mxu1  ;;  %v592_v13 = vsel %vm439_vm2, %v552_v57, 0.0 }
 0x113   :  { %v417_v3 = vmax.f32 %v299_v61, 0.0  ;;  %v748_v4 = vpop.f32.mrb[12].mxu0  ;;  %v590_v7 = vsel %vm439_vm2, %v551_v63, 0.0  ;;  %v1169_v51 = vmax.f32 %v354_v31, 0.0  ;;  %v349_v52 = vadd.f32 %v1012_v33, %v1066_v17 }
 0x114   :  { %v314_v8 = vadd.f32 %v748_v4, %v1012_v33  ;;  %v308_v9 = vpop.f32.mrb[13].mxu0  ;;  %v591_v14 = vadd.f32 %v590_v7, %v589_v0  ;;  %451 = vst.msk [vmem:[%s1319_s3 + $0x58] sm:$0xff] %vm439_vm2, %v418_v2  ;;  %v554_v15 = vmul.f32 %v418_v2, %v418_v2  ;;  %v490_v16 = vadd.f32 %v489_v6, %v488_v1 }
 0x115   :  { %450 = vst.msk [vmem:[%s1319_s3 + $0x50] sm:$0xff] %vm439_vm2, %v417_v3  ;;  %v491_v18 = vsel %vm439_vm2, %v417_v3, 0.0  ;;  %v553_v19 = vmul.f32 %v417_v3, %v417_v3  ;;  %v309_v21 = vadd.f32 %v1012_v33, %v308_v9  ;;  %v1145_v25 = vpop.f32.mrb[12].mxu1  ;;  %v493_v26 = vsel %vm439_vm2, %v418_v2, 0.0  ;;  %461 = vst.msk [vmem:[%s1319_s3 + $0xa8] sm:$0xff] %vm439_vm2, %v1169_v51 }
 0x116   :  { %v420_v20 = vmax.f32 %v314_v8, 0.0  ;;  %v492_v22 = vadd.f32 %v491_v18, %v490_v16  ;;  %v593_v23 = vadd.f32 %v592_v13, %v591_v14  ;;  %v1155_v32 = vpop.f32.mrb[13].mxu1  ;;  %v596_v39 = vsel %vm439_vm2, %v554_v15, 0.0 }
 0x117   :  { %v751_v24 = vpop.f32.mrb[14].mxu0  ;;  %v594_v27 = vsel %vm439_vm2, %v553_v19, 0.0  ;;  %v419_v28 = vmax.f32 %v309_v21, 0.0  ;;  %v560_v58 = vmul.f32 %v1031_v55, %v1031_v55  ;;  %v559_v17 = vmul.f32 %v1034_v59, %v1034_v59 }
 0x118   :  { %453 = vst.msk [vmem:[%s1319_s3 + $0x68] sm:$0xff] %vm439_vm2, %v420_v20  ;;  %v318_v30 = vpop.f32.mrb[15].mxu0  ;;  %v595_v34 = vadd.f32 %v594_v27, %v593_v23  ;;  %v494_v35 = vadd.f32 %v493_v26, %v492_v22  ;;  %v324_v37 = vadd.f32 %v751_v24, %v1012_v33  ;;  %v556_v40 = vmul.f32 %v420_v20, %v420_v20 }
 0x119   :  { %v319_v38 = vadd.f32 %v1012_v33, %v318_v30  ;;  %452 = vst.msk [vmem:[%s1319_s3 + $0x60] sm:$0xff] %vm439_vm2, %v419_v28  ;;  %v495_v41 = vsel %vm439_vm2, %v419_v28, 0.0  ;;  %v555_v42 = vmul.f32 %v419_v28, %v419_v28  ;;  %v1165_v46 = vpop.f32.mrb[14].mxu1  ;;  %v497_v47 = vsel %vm439_vm2, %v420_v20, 0.0 }
 0x11a   :  { %v496_v11 = vadd.f32 %v495_v41, %v494_v35  ;;  %v597_v43 = vadd.f32 %v596_v39, %v595_v34  ;;  %v422_v44 = vmax.f32 %v324_v37, 0.0  ;;  %v1173_v53 = vpop.f32.mrb[15].mxu1  ;;  %v600_v60 = vsel %vm439_vm2, %v556_v40, 0.0 }
 0x11b   :  { %v421_v45 = vmax.f32 %v319_v38, 0.0  ;;  %v598_v50 = vsel %vm439_vm2, %v555_v42, 0.0  ;;  %v503_v3 = vsel %vm439_vm2, %v1034_v59, 0.0  ;;  %v427_v6 = vmax.f32 %v349_v52, 0.0 }
 0x11c   :  { %v599_v54 = vadd.f32 %v598_v50, %v597_v43  ;;  %455 = vst.msk [vmem:[%s1319_s3 + $0x78] sm:$0xff] %vm439_vm2, %v422_v44  ;;  %v498_v57 = vadd.f32 %v497_v47, %v496_v11  ;;  %v558_v61 = vmul.f32 %v422_v44, %v422_v44  ;;  %v501_v0 = vsel %vm439_vm2, %v422_v44, 0.0 }
 0x11d   :  { %454 = vst.msk [vmem:[%s1319_s3 + $0x70] sm:$0xff] %vm439_vm2, %v421_v45  ;;  %v499_v62 = vsel %vm439_vm2, %v421_v45, 0.0  ;;  %v557_v63 = vmul.f32 %v421_v45, %v421_v45  ;;  %v364_v7 = vadd.f32 %v1077_v29, %v1012_v33  ;;  %v359_v8 = vadd.f32 %v1012_v33, %v1081_v36  ;;  %460 = vst.msk [vmem:[%s1319_s3 + $0xa0] sm:$0xff] %vm439_vm2, %v427_v6 }
 0x11e   :  { %v500_v1 = vadd.f32 %v499_v62, %v498_v57  ;;  %v601_v2 = vadd.f32 %v600_v60, %v599_v54  ;;  %v606_v14 = vsel %vm439_vm2, %v559_v17, 0.0  ;;  %v374_v15 = vadd.f32 %v1098_v49, %v1012_v33 }
 0x11f   :  { %v602_v4 = vsel %vm439_vm2, %v557_v63, 0.0  ;;  %v604_v16 = vsel %vm439_vm2, %v558_v61, 0.0  ;;  %v561_v59 = vmul.f32 %v1125_v10, %v1125_v10  ;;  %v430_v29 = vmax.f32 %v364_v7, 0.0 }
 0x120   :  { %v603_v9 = vadd.f32 %v602_v4, %v601_v2  ;;  %v502_v13 = vadd.f32 %v501_v0, %v500_v1  ;;  %v429_v18 = vmax.f32 %v359_v8, 0.0  ;;  %v1212_v20 = vmax.f32 %v374_v15, 0.0 }
 0x121   :  { %v369_v21 = vadd.f32 %v1012_v33, %v1106_v56  ;;  %v505_v49 = vsel %vm439_vm2, %v1031_v55, 0.0  ;;  %v562_v22 = vmul.f32 %v1096_v48, %v1096_v48  ;;  %v507_v23 = vsel %vm439_vm2, %v1125_v10, 0.0  ;;  %463 = vst.msk [vmem:[%s1319_s3 + $0xb8] sm:$0xff] %vm439_vm2, %v430_v29 }
 0x122   :  { %v504_v36 = vadd.f32 %v503_v3, %v502_v13  ;;  %v605_v19 = vadd.f32 %v604_v16, %v603_v9  ;;  %462 = vst.msk [vmem:[%s1319_s3 + $0xb0] sm:$0xff] %vm439_vm2, %v429_v18  ;;  %v608_v56 = vsel %vm439_vm2, %v560_v58, 0.0  ;;  %465 = vst.msk [vmem:[%s1319_s3 + $0xc8] sm:$0xff] %vm439_vm2, %v1212_v20  ;;  %v610_v10 = vsel %vm439_vm2, %v561_v59, 0.0 }
 0x123   :  { %v563_v26 = vmul.f32 %v427_v6, %v427_v6  ;;  %v431_v27 = vmax.f32 %v369_v21, 0.0  ;;  %v384_v28 = vadd.f32 %v1120_v5, %v1012_v33  ;;  %v379_v34 = vadd.f32 %v1012_v33, %v1127_v12 }
 0x124   :  { %v607_v24 = vadd.f32 %v606_v14, %v605_v19  ;;  %v506_v55 = vadd.f32 %v505_v49, %v504_v36  ;;  %v509_v35 = vsel %vm439_vm2, %v1096_v48, 0.0  ;;  %v612_v37 = vsel %vm439_vm2, %v562_v22, 0.0 }
 0x125   :  { %v511_v38 = vsel %vm439_vm2, %v427_v6, 0.0  ;;  %464 = vst.msk [vmem:[%s1319_s3 + $0xc0] sm:$0xff] %vm439_vm2, %v431_v27  ;;  %v434_v39 = vmax.f32 %v384_v28, 0.0  ;;  %v433_v41 = vmax.f32 %v379_v34, 0.0  ;;  %v394_v42 = vadd.f32 %v1145_v25, %v1012_v33 }
 0x126   :  { %v508_v30 = vadd.f32 %v507_v23, %v506_v55  ;;  %v609_v31 = vadd.f32 %v608_v56, %v607_v24  ;;  %v564_v12 = vmul.f32 %v1169_v51, %v1169_v51  ;;  %v614_v48 = vsel %vm439_vm2, %v563_v26, 0.0 }
 0x127   :  { %v565_v11 = vmul.f32 %v429_v18, %v429_v18  ;;  %467 = vst.msk [vmem:[%s1319_s3 + $0xd8] sm:$0xff] %vm439_vm2, %v434_v39  ;;  %v389_v43 = vadd.f32 %v1012_v33, %v1155_v32  ;;  %v513_v44 = vsel %vm439_vm2, %v1169_v51, 0.0  ;;  %v566_v25 = vmul.f32 %v430_v29, %v430_v29  ;;  %466 = vst.msk [vmem:[%s1319_s3 + $0xd0] sm:$0xff] %vm439_vm2, %v433_v41 }
 0x128   :  { %v611_v40 = vadd.f32 %v610_v10, %v609_v31  ;;  %v510_v5 = vadd.f32 %v509_v35, %v508_v30  ;;  %v515_v50 = vsel %vm439_vm2, %v429_v18, 0.0  ;;  %v436_v52 = vmax.f32 %v394_v42, 0.0 }
 0x129   :  { %v435_v54 = vmax.f32 %v389_v43, 0.0  ;;  %v404_v57 = vadd.f32 %v1165_v46, %v1012_v33  ;;  %v399_v51 = vadd.f32 %v1012_v33, %v1173_v53  ;;  %v616_v17 = vsel %vm439_vm2, %v564_v12, 0.0 }
 0x12a   :  { %v512_v45 = vadd.f32 %v511_v38, %v510_v5  ;;  %v613_v47 = vadd.f32 %v612_v37, %v611_v40  ;;  %v618_v60 = vsel %vm439_vm2, %v565_v11, 0.0  ;;  %v567_v61 = vmul.f32 %v431_v27, %v431_v27  ;;  %469 = vst.msk [vmem:[%s1319_s3 + $0xe8] sm:$0xff] %vm439_vm2, %v436_v52 }
 0x12b   :  { %468 = vst.msk [vmem:[%s1319_s3 + $0xe0] sm:$0xff] %vm439_vm2, %v435_v54  ;;  %v438_v63 = vmax.f32 %v404_v57, 0.0  ;;  %v437_v0 = vmax.f32 %v399_v51, 0.0  ;;  %v517_v33 = vsel %vm439_vm2, %v430_v29, 0.0  ;;  %v620_v53 = vsel %vm439_vm2, %v566_v25, 0.0 }
 0x12c   :  { %v615_v58 = vadd.f32 %v614_v48, %v613_v47  ;;  %v514_v32 = vadd.f32 %v513_v44, %v512_v45  ;;  %v519_v1 = vsel %vm439_vm2, %v431_v27, 0.0  ;;  %v568_v7 = vmul.f32 %v1212_v20, %v1212_v20 }
 0x12d   :  { %471 = vst.msk [vmem:[%s1319_s3 + $0xf8] sm:$0xff] %vm439_vm2, %v438_v63  ;;  %v533_v4 = vsel %vm439_vm2, %v438_v63, 0.0  ;;  %v574_v6 = vmul.f32 %v438_v63, %v438_v63  ;;  %470 = vst.msk [vmem:[%s1319_s3 + $0xf0] sm:$0xff] %vm439_vm2, %v437_v0  ;;  %v622_v8 = vsel %vm439_vm2, %v567_v61, 0.0  ;;  %v569_v9 = vmul.f32 %v433_v41, %v433_v41 }
 0x12e   :  { %v516_v46 = vadd.f32 %v515_v50, %v514_v32  ;;  %v617_v62 = vadd.f32 %v616_v17, %v615_v58  ;;  %v573_v13 = vmul.f32 %v437_v0, %v437_v0  ;;  %v521_v59 = vsel %vm439_vm2, %v1212_v20, 0.0 }
 0x12f   :  { %v636_v16 = vsel %vm439_vm2, %v574_v6, 0.0  ;;  %v523_v29 = vsel %vm439_vm2, %v433_v41, 0.0  ;;  %v624_v21 = vsel %vm439_vm2, %v568_v7, 0.0  ;;  %v570_v49 = vmul.f32 %v434_v39, %v434_v39 }
 0x130   :  { %v619_v2 = vadd.f32 %v618_v60, %v617_v62  ;;  %v518_v3 = vadd.f32 %v517_v33, %v516_v46  ;;  %v634_v18 = vsel %vm439_vm2, %v573_v13, 0.0  ;;  %v626_v22 = vsel %vm439_vm2, %v569_v9, 0.0 }
 0x131   :  { %v571_v23 = vmul.f32 %v435_v54, %v435_v54  ;;  %v525_v55 = vsel %vm439_vm2, %v434_v39, 0.0  ;;  %v527_v10 = vsel %vm439_vm2, %v435_v54, 0.0  ;;  %v628_v27 = vsel %vm439_vm2, %v570_v49, 0.0 }
 0x132   :  { %v520_v14 = vadd.f32 %v519_v1, %v518_v3  ;;  %v621_v15 = vadd.f32 %v620_v53, %v619_v2  ;;  %v572_v28 = vmul.f32 %v436_v52, %v436_v52  ;;  %v529_v35 = vsel %vm439_vm2, %v436_v52, 0.0 }
 0x133   :  { %v630_v30 = vsel %vm439_vm2, %v571_v23, 0.0  ;;  %v531_v37 = vsel %vm439_vm2, %v437_v0, 0.0 }
 0x134   :  { %v623_v36 = vadd.f32 %v622_v8, %v621_v15  ;;  %v522_v19 = vadd.f32 %v521_v59, %v520_v14  ;;  %v632_v5 = vsel %vm439_vm2, %v572_v28, 0.0 }
 0x136   :  { %v524_v56 = vadd.f32 %v523_v29, %v522_v19  ;;  %v625_v24 = vadd.f32 %v624_v21, %v623_v36 }
 0x138   :  { %v627_v26 = vadd.f32 %v626_v22, %v625_v24  ;;  %v526_v20 = vadd.f32 %v525_v55, %v524_v56 }
 0x13a   :  { %v528_v31 = vadd.f32 %v527_v10, %v526_v20  ;;  %v629_v34 = vadd.f32 %v628_v27, %v627_v26 }
 0x13c   :  { %v631_v38 = vadd.f32 %v630_v30, %v629_v34  ;;  %v530_v40 = vadd.f32 %v529_v35, %v528_v31 }
 0x13e   :  { %v532_v39 = vadd.f32 %v531_v37, %v530_v40  ;;  %v633_v41 = vadd.f32 %v632_v5, %v631_v38 }
 0x140   :  { %v534_v42 = vadd.f32 %v533_v4, %v532_v39  ;;  %v635_v12 = vadd.f32 %v634_v18, %v633_v41 }
 0x142   :  { %v535_v48 = vrot.slane %v534_v42, 4  ;;  %v637_v11 = vadd.f32 %v636_v16, %v635_v12 }
 0x144   :  { %v536_v43 = vadd.f32 %v535_v48, %v534_v42  ;;  %v638_v44 = vrot.slane %v637_v11, 4 }
 0x146   :  { %v537_v45 = vrot.slane %v536_v43, 2  ;;  %v639_v47 = vadd.f32 %v638_v44, %v637_v11 }
 0x148   :  { %v538_v25 = vadd.f32 %v537_v45, %v536_v43  ;;  %v640_v50 = vrot.slane %v639_v47, 2 }
 0x14a   :  { %v539_v54 = vrot.slane %v538_v25, 1  ;;  %v641_v52 = vadd.f32 %v640_v50, %v639_v47 }
 0x14c   :  { %v540_v57 = vadd.f32 %v539_v54, %v538_v25  ;;  %v642_v58 = vrot.slane %v641_v52, 1 }
 0x14e   :  { %542 = vst.msk [vmem:[%s1320_s4] sm:$0x1] %vm541_vm3, %v540_v57  ;;  %v643_v32 = vadd.f32 %v642_v58, %v641_v52 }
 0x150   :  { %644 = vst.msk [vmem:[%s1321_s5] sm:$0x1] %vm541_vm3, %v643_v32 }
 0x151   :  { %657 = vsyncpa [#allocation3], 1 }
 0x152   :  { %658 = vsyncpa [#allocation5], 1 }

// kernel: pointnet_backbone_forward.16
= control target key start
LH: loop header
LB: loop body
LE: loop exit
PB: predicated region body
PF: predicated region fallthrough
CT: control target
= control target key end

     0   :  { %vm105_vm0 = vcmask 523264   ;;  %s963_s1 = inlined_call_operand.vmem [shape: bf16[64,128], index: 1, kind: input, shape index: {}]   ;;  %s964_s0 = inlined_call_operand.vmem [shape: f32[256,64], index: 0, kind: input, shape index: {}]   ;;  %s965_s2 = inlined_call_operand.vmem [shape: f32[1,128], index: 2, kind: input, shape index: {}]   ;;  %s966_s3 = inlined_call_operand.vmem [shape: f32[256,128], index: 3, kind: output, shape index: {0}]   ;;  %s967_s4 = inlined_call_operand.vmem [shape: f32[1,1,128], index: 4, kind: output, shape index: {1}]   ;;  %s968_s5 = inlined_call_operand.vmem [shape: f32[1,1,128], index: 5, kind: output, shape index: {2}]  }
   0x1   :  { %v588_v0 = vld [vmem:[%s963_s1] sm:$0xff]   ;;  %v589_v1 = vld [vmem:[%s963_s1 + $0x8] sm:$0xff]   ;;  %v590_v2 = vld [vmem:[%s963_s1 + $0x10] sm:$0xff]  }
   0x2   :  { %540 = vmatprep.subr.bf16.mxu0 %v588_v0  ;;  %580 = vmatprep.subr.bf16.mxu1 %v588_v0  ;;  %v18_v3 = vld [vmem:[%s964_s0] sm:$0xff]  ;;  %v19_v4 = vld [vmem:[%s964_s0 + $0x8] sm:$0xff]  ;;  %v591_v6 = vld [vmem:[%s963_s1 + $0x18] sm:$0xff]  }
   0x3   :  { %541 = vmatpush3.bf16.msra.mxu0 %v588_v0  ;;  %584 = vmatpush3.bf16.msra.mxu1 %v588_v0  ;;  %v50_v5 = vpack.c.bf16 %v19_v4, %v18_v3  ;;  %v34_v7 = vld [vmem:[%s964_s0 + $0x80] sm:$0xff]  ;;  %v35_v8 = vld [vmem:[%s964_s0 + $0x88] sm:$0xff]  ;;  %v20_v10 = vld [vmem:[%s964_s0 + $0x10] sm:$0xff] }
   0x4   :  { %542 = vmatprep.subr.bf16.mxu0 %v589_v1  ;;  %581 = vmatprep.subr.bf16.mxu1 %v589_v1  ;;  %v58_v9 = vpack.c.bf16 %v35_v8, %v34_v7  ;;  %v21_v11 = vld [vmem:[%s964_s0 + $0x18] sm:$0xff]  ;;  %v22_v12 = vld [vmem:[%s964_s0 + $0x20] sm:$0xff]  ;;  %v23_v13 = vld [vmem:[%s964_s0 + $0x28] sm:$0xff] }
   0x5   :  { %548 = vmatprep.mubr.msk.bf16.mxu0 %vm105_vm0, %v50_v5  ;;  %v36_v14 = vld [vmem:[%s964_s0 + $0x90] sm:$0xff]  ;;  %v37_v15 = vld [vmem:[%s964_s0 + $0x98] sm:$0xff]  ;;  %v38_v16 = vld [vmem:[%s964_s0 + $0xa0] sm:$0xff]  ;;  %v51_v18 = vpack.c.bf16 %v21_v11, %v20_v10  ;;  %v52_v19 = vpack.c.bf16 %v23_v13, %v22_v12 }
   0x6   :  { %564 = vmatprep.mubr.msk.bf16.mxu1 %vm105_vm0, %v58_v9  ;;  %v39_v17 = vld [vmem:[%s964_s0 + $0xa8] sm:$0xff]  ;;  %v59_v20 = vpack.c.bf16 %v37_v15, %v36_v14  ;;  %v24_v22 = vld [vmem:[%s964_s0 + $0x30] sm:$0xff]  ;;  %v25_v23 = vld [vmem:[%s964_s0 + $0x38] sm:$0xff] }
   0x7   :  { %543 = vmatpush3.bf16.msra.mxu0 %v589_v1  ;;  %585 = vmatpush3.bf16.msra.mxu1 %v589_v1  ;;  %v60_v21 = vpack.c.bf16 %v39_v17, %v38_v16  ;;  %v26_v24 = vld [vmem:[%s964_s0 + $0x40] sm:$0xff]  ;;  %v27_v25 = vld [vmem:[%s964_s0 + $0x48] sm:$0xff]  ;;  %v40_v26 = vld [vmem:[%s964_s0 + $0xb0] sm:$0xff]  ;;  %v53_v30 = vpack.c.bf16 %v25_v23, %v24_v22 }
   0x8   :  { %544 = vmatprep.subr.bf16.mxu0 %v590_v2  ;;  %582 = vmatprep.subr.bf16.mxu1 %v590_v2  ;;  %v41_v27 = vld [vmem:[%s964_s0 + $0xb8] sm:$0xff]  ;;  %v42_v28 = vld [vmem:[%s964_s0 + $0xc0] sm:$0xff]  ;;  %v43_v29 = vld [vmem:[%s964_s0 + $0xc8] sm:$0xff]  ;;  %v54_v31 = vpack.c.bf16 %v27_v25, %v26_v24 }
   0x9   :  { %v61_v32 = vpack.c.bf16 %v41_v27, %v40_v26  ;;  %v62_v33 = vpack.c.bf16 %v43_v29, %v42_v28  ;;  %v28_v34 = vld [vmem:[%s964_s0 + $0x50] sm:$0xff]  ;;  %v29_v35 = vld [vmem:[%s964_s0 + $0x58] sm:$0xff]  ;;  %v30_v36 = vld [vmem:[%s964_s0 + $0x60] sm:$0xff] }
   0xa   :  { %v31_v37 = vld [vmem:[%s964_s0 + $0x68] sm:$0xff]  ;;  %v44_v38 = vld [vmem:[%s964_s0 + $0xd0] sm:$0xff]  ;;  %v45_v39 = vld [vmem:[%s964_s0 + $0xd8] sm:$0xff]  ;;  %v55_v42 = vpack.c.bf16 %v29_v35, %v28_v34 }
   0xb   :  { %545 = vmatpush3.bf16.msra.mxu0 %v590_v2  ;;  %586 = vmatpush3.bf16.msra.mxu1 %v590_v2  ;;  %v46_v40 = vld [vmem:[%s964_s0 + $0xe0] sm:$0xff]  ;;  %v47_v41 = vld [vmem:[%s964_s0 + $0xe8] sm:$0xff]  ;;  %v56_v43 = vpack.c.bf16 %v31_v37, %v30_v36  ;;  %v63_v44 = vpack.c.bf16 %v45_v39, %v44_v38  ;;  %v32_v46 = vld [vmem:[%s964_s0 + $0x70] sm:$0xff] }
   0xc   :  { %546 = vmatprep.subr.bf16.mxu0 %v591_v6  ;;  %583 = vmatprep.subr.bf16.mxu1 %v591_v6  ;;  %v64_v45 = vpack.c.bf16 %v47_v41, %v46_v40  ;;  %v33_v47 = vld [vmem:[%s964_s0 + $0x78] sm:$0xff]  ;;  %v48_v48 = vld [vmem:[%s964_s0 + $0xf0] sm:$0xff]  ;;  %v749_v52 = vld [vmem:[%s965_s2] ss:$0 sm:$0xff] }
   0xd   :  { %v49_v49 = vld [vmem:[%s964_s0 + $0xf8] sm:$0xff]  ;;  %v57_v50 = vpack.c.bf16 %v33_v47, %v32_v46 }
   0xe   :  { %v65_v51 = vpack.c.bf16 %v49_v49, %v48_v48 }
   0xf   :  { %547 = vmatpush3.bf16.msra.mxu0 %v591_v6  ;;  %587 = vmatpush3.bf16.msra.mxu1 %v591_v6 }
  0x12   :  { %549 = vmatmul.mubr.msk.bf16.vlgmr.msra.gmra.mrb[0].mxu0 %vm105_vm0, %v51_v18  ;;  %565 = vmatmul.mubr.msk.bf16.vlgmr.msra.gmra.mrb[0].mxu1 %vm105_vm0, %v59_v20 }
  0x13   :  { %552 = vmatprep.mubr.msk.bf16.mxu0 %vm105_vm0, %v52_v19  ;;  %568 = vmatprep.mubr.msk.bf16.mxu1 %vm105_vm0, %v60_v21 }
  0x1a   :  { %553 = vmatmul.mubr.msk.bf16.gmra.mrb[4].mxu0 %vm105_vm0, %v53_v30  ;;  %569 = vmatmul.mubr.msk.bf16.gmra.mrb[4].mxu1 %vm105_vm0, %v61_v32 }
  0x1b   :  { %556 = vmatprep.mubr.msk.bf16.mxu0 %vm105_vm0, %v54_v31  ;;  %572 = vmatprep.mubr.msk.bf16.mxu1 %vm105_vm0, %v62_v33 }
  0x22   :  { %557 = vmatmul.mubr.msk.bf16.gmra.mrb[8].mxu0 %vm105_vm0, %v55_v42  ;;  %573 = vmatmul.mubr.msk.bf16.gmra.mrb[8].mxu1 %vm105_vm0, %v63_v44 }
  0x23   :  { %560 = vmatprep.mubr.msk.bf16.mxu0 %vm105_vm0, %v56_v43  ;;  %576 = vmatprep.mubr.msk.bf16.mxu1 %vm105_vm0, %v64_v45 }
  0x2a   :  { %561 = vmatmul.mubr.msk.bf16.gmra.mrb[12].mxu0 %vm105_vm0, %v57_v50  ;;  %577 = vmatmul.mubr.msk.bf16.gmra.mrb[12].mxu1 %vm105_vm0, %v65_v51 }
  0xe5   :  { %v550_v53 = vpop.f32.mrb[0].mxu0  ;;  %v566_v56 = vpop.f32.mrb[0].mxu1 }
  0xe6   :  { %v197_v54 = vadd.f32 %v550_v53, %v749_v52  ;;  %v188_v55 = vpop.f32.mrb[1].mxu0  ;;  %v261_v59 = vadd.f32 %v566_v56, %v749_v52  ;;  %v252_v60 = vpop.f32.mrb[1].mxu1 }
  0xe7   :  { %v189_v57 = vadd.f32 %v749_v52, %v188_v55  ;;  %v551_v58 = vpop.f32.mrb[2].mxu0  ;;  %v253_v0 = vadd.f32 %v749_v52, %v252_v60  ;;  %v567_v1 = vpop.f32.mrb[2].mxu1 }
  0xe8   :  { %v317_v61 = vmax.f32 %v197_v54, 0.0  ;;  %v200_v62 = vadd.f32 %v551_v58, %v749_v52  ;;  %v191_v63 = vpop.f32.mrb[3].mxu0  ;;  %v757_v4 = vmax.f32 %v261_v59, 0.0  ;;  %v264_v5 = vadd.f32 %v567_v1, %v749_v52  ;;  %v255_v6 = vpop.f32.mrb[3].mxu1 }
  0xe9   :  { %v315_v2 = vmax.f32 %v189_v57, 0.0  ;;  %v192_v3 = vadd.f32 %v749_v52, %v191_v63  ;;  %v763_v8 = vmax.f32 %v253_v0, 0.0  ;;  %v256_v9 = vadd.f32 %v749_v52, %v255_v6 }
  0xea   :  { %349 = vst [vmem:[%s966_s3 + $0x10] sm:$0xff] %v317_v61  ;;  %v318_v7 = vmax.f32 %v200_v62, 0.0  ;;  %365 = vst [vmem:[%s966_s3 + $0x90] sm:$0xff] %v757_v4  ;;  %v773_v11 = vmax.f32 %v264_v5, 0.0  ;;  %v419_v17 = vmul.f32 %v317_v61, %v317_v61 }
  0xeb   :  { %347 = vst [vmem:[%s966_s3] sm:$0xff] %v315_v2  ;;  %v316_v10 = vmax.f32 %v192_v3, 0.0  ;;  %363 = vst [vmem:[%s966_s3 + $0x80] sm:$0xff] %v763_v8  ;;  %v782_v12 = vmax.f32 %v256_v9, 0.0  ;;  %v417_v13 = vmul.f32 %v315_v2, %v315_v2 }
  0xec   :  { %350 = vst [vmem:[%s966_s3 + $0x18] sm:$0xff] %v318_v7  ;;  %366 = vst [vmem:[%s966_s3 + $0x98] sm:$0xff] %v773_v11  ;;  %v420_v27 = vmul.f32 %v318_v7, %v318_v7 }
  0xed   :  { %348 = vst [vmem:[%s966_s3 + $0x8] sm:$0xff] %v316_v10  ;;  %v379_v14 = vadd.f32 %v316_v10, %v315_v2  ;;  %v418_v15 = vmul.f32 %v316_v10, %v316_v10  ;;  %v554_v16 = vpop.f32.mrb[4].mxu0  ;;  %364 = vst [vmem:[%s966_s3 + $0x88] sm:$0xff] %v782_v12  ;;  %v570_v20 = vpop.f32.mrb[4].mxu1 }
  0xee   :  { %v213_v18 = vadd.f32 %v554_v16, %v749_v52  ;;  %v204_v19 = vpop.f32.mrb[5].mxu0  ;;  %v277_v25 = vadd.f32 %v570_v20, %v749_v52  ;;  %v268_v26 = vpop.f32.mrb[5].mxu1 }
  0xef   :  { %v380_v21 = vadd.f32 %v379_v14, %v317_v61  ;;  %v449_v22 = vadd.f32 %v418_v15, %v417_v13  ;;  %v205_v23 = vadd.f32 %v749_v52, %v204_v19  ;;  %v555_v24 = vpop.f32.mrb[6].mxu0  ;;  %v269_v31 = vadd.f32 %v749_v52, %v268_v26  ;;  %v571_v32 = vpop.f32.mrb[6].mxu1 }
  0xf0   :  { %v321_v28 = vmax.f32 %v213_v18, 0.0  ;;  %v216_v29 = vadd.f32 %v555_v24, %v749_v52  ;;  %v207_v30 = vpop.f32.mrb[7].mxu0  ;;  %v271_v37 = vpop.f32.mrb[7].mxu1  ;;  %v804_v39 = vmax.f32 %v277_v25, 0.0  ;;  %v280_v45 = vadd.f32 %v571_v32, %v749_v52 }
  0xf1   :  { %v450_v33 = vadd.f32 %v449_v22, %v419_v17  ;;  %v319_v34 = vmax.f32 %v205_v23, 0.0  ;;  %v381_v35 = vadd.f32 %v380_v21, %v318_v7  ;;  %v208_v36 = vadd.f32 %v749_v52, %v207_v30 }
  0xf2   :  { %353 = vst [vmem:[%s966_s3 + $0x30] sm:$0xff] %v321_v28  ;;  %v322_v38 = vmax.f32 %v216_v29, 0.0  ;;  %v806_v40 = vmax.f32 %v269_v31, 0.0  ;;  %369 = vst [vmem:[%s966_s3 + $0xb0] sm:$0xff] %v804_v39  ;;  %v272_v50 = vadd.f32 %v749_v52, %v271_v37  ;;  %v423_v51 = vmul.f32 %v321_v28, %v321_v28 }
  0xf3   :  { %351 = vst [vmem:[%s966_s3 + $0x20] sm:$0xff] %v319_v34  ;;  %v382_v41 = vadd.f32 %v381_v35, %v319_v34  ;;  %v421_v42 = vmul.f32 %v319_v34, %v319_v34  ;;  %v451_v43 = vadd.f32 %v450_v33, %v420_v27  ;;  %v320_v44 = vmax.f32 %v208_v36, 0.0 }
  0xf4   :  { %354 = vst [vmem:[%s966_s3 + $0x38] sm:$0xff] %v322_v38  ;;  %367 = vst [vmem:[%s966_s3 + $0xa0] sm:$0xff] %v806_v40  ;;  %v828_v55 = vmax.f32 %v280_v45, 0.0  ;;  %v831_v61 = vmax.f32 %v272_v50, 0.0  ;;  %v424_v63 = vmul.f32 %v322_v38, %v322_v38 }
  0xf5   :  { %v452_v46 = vadd.f32 %v451_v43, %v421_v42  ;;  %352 = vst [vmem:[%s966_s3 + $0x28] sm:$0xff] %v320_v44  ;;  %v383_v47 = vadd.f32 %v382_v41, %v320_v44  ;;  %v422_v48 = vmul.f32 %v320_v44, %v320_v44  ;;  %v558_v49 = vpop.f32.mrb[8].mxu0  ;;  %v574_v56 = vpop.f32.mrb[8].mxu1 }
  0xf6   :  { %v229_v53 = vadd.f32 %v558_v49, %v749_v52  ;;  %v220_v54 = vpop.f32.mrb[9].mxu0  ;;  %v284_v62 = vpop.f32.mrb[9].mxu1  ;;  %370 = vst [vmem:[%s966_s3 + $0xb8] sm:$0xff] %v828_v55  ;;  %v293_v3 = vadd.f32 %v574_v56, %v749_v52  ;;  %368 = vst [vmem:[%s966_s3 + $0xa8] sm:$0xff] %v831_v61 }
  0xf7   :  { %v384_v57 = vadd.f32 %v383_v47, %v321_v28  ;;  %v453_v58 = vadd.f32 %v452_v46, %v422_v48  ;;  %v221_v59 = vadd.f32 %v749_v52, %v220_v54  ;;  %v559_v60 = vpop.f32.mrb[10].mxu0  ;;  %v575_v5 = vpop.f32.mrb[10].mxu1  ;;  %v285_v20 = vadd.f32 %v749_v52, %v284_v62 }
  0xf8   :  { %v325_v0 = vmax.f32 %v229_v53, 0.0  ;;  %v232_v1 = vadd.f32 %v559_v60, %v749_v52  ;;  %v223_v2 = vpop.f32.mrb[11].mxu0  ;;  %v287_v13 = vpop.f32.mrb[11].mxu1  ;;  %v847_v15 = vmax.f32 %v293_v3, 0.0  ;;  %v296_v21 = vadd.f32 %v575_v5, %v749_v52 }
  0xf9   :  { %v454_v6 = vadd.f32 %v453_v58, %v423_v51  ;;  %v323_v7 = vmax.f32 %v221_v59, 0.0  ;;  %v385_v9 = vadd.f32 %v384_v57, %v322_v38  ;;  %v224_v10 = vadd.f32 %v749_v52, %v223_v2 }
  0xfa   :  { %357 = vst [vmem:[%s966_s3 + $0x50] sm:$0xff] %v325_v0  ;;  %v326_v14 = vmax.f32 %v232_v1, 0.0  ;;  %373 = vst [vmem:[%s966_s3 + $0xd0] sm:$0xff] %v847_v15  ;;  %v288_v26 = vadd.f32 %v749_v52, %v287_v13  ;;  %v427_v27 = vmul.f32 %v325_v0, %v325_v0  ;;  %v866_v30 = vmax.f32 %v285_v20, 0.0 }
  0xfb   :  { %355 = vst [vmem:[%s966_s3 + $0x40] sm:$0xff] %v323_v7  ;;  %v386_v16 = vadd.f32 %v385_v9, %v323_v7  ;;  %v425_v17 = vmul.f32 %v323_v7, %v323_v7  ;;  %v455_v18 = vadd.f32 %v454_v6, %v424_v63  ;;  %v324_v19 = vmax.f32 %v224_v10, 0.0 }
  0xfc   :  { %358 = vst [vmem:[%s966_s3 + $0x58] sm:$0xff] %v326_v14  ;;  %v868_v31 = vmax.f32 %v296_v21, 0.0  ;;  %v871_v37 = vmax.f32 %v288_v26, 0.0  ;;  %v428_v41 = vmul.f32 %v326_v14, %v326_v14  ;;  %371 = vst [vmem:[%s966_s3 + $0xc0] sm:$0xff] %v866_v30  ;;  %v434_v21 = vmul.f32 %v782_v12, %v782_v12 }
  0xfd   :  { %v456_v22 = vadd.f32 %v455_v18, %v425_v17  ;;  %356 = vst [vmem:[%s966_s3 + $0x48] sm:$0xff] %v324_v19  ;;  %v387_v23 = vadd.f32 %v386_v16, %v324_v19  ;;  %v426_v24 = vmul.f32 %v324_v19, %v324_v19  ;;  %v562_v25 = vpop.f32.mrb[12].mxu0  ;;  %v578_v32 = vpop.f32.mrb[12].mxu1  ;;  %v433_v16 = vmul.f32 %v763_v8, %v763_v8 }
  0xfe   :  { %v245_v28 = vadd.f32 %v562_v25, %v749_v52  ;;  %v236_v29 = vpop.f32.mrb[13].mxu0  ;;  %v300_v38 = vpop.f32.mrb[13].mxu1  ;;  %374 = vst [vmem:[%s966_s3 + $0xd8] sm:$0xff] %v868_v31  ;;  %372 = vst [vmem:[%s966_s3 + $0xc8] sm:$0xff] %v871_v37  ;;  %v309_v53 = vadd.f32 %v578_v32, %v749_v52  ;;  %v436_v25 = vmul.f32 %v773_v11, %v773_v11 }
  0xff   :  { %v388_v33 = vadd.f32 %v387_v23, %v325_v0  ;;  %v457_v34 = vadd.f32 %v456_v22, %v426_v24  ;;  %v237_v35 = vadd.f32 %v749_v52, %v236_v29  ;;  %v563_v36 = vpop.f32.mrb[14].mxu0  ;;  %v579_v45 = vpop.f32.mrb[14].mxu1  ;;  %v301_v60 = vadd.f32 %v749_v52, %v300_v38 }
 0x100   :  { %v329_v42 = vmax.f32 %v245_v28, 0.0  ;;  %v248_v43 = vadd.f32 %v563_v36, %v749_v52  ;;  %v239_v44 = vpop.f32.mrb[15].mxu0  ;;  %v303_v50 = vpop.f32.mrb[15].mxu1  ;;  %v897_v59 = vmax.f32 %v309_v53, 0.0  ;;  %v312_v62 = vadd.f32 %v579_v45, %v749_v52 }
 0x101   :  { %v458_v46 = vadd.f32 %v457_v34, %v427_v27  ;;  %v327_v47 = vmax.f32 %v237_v35, 0.0  ;;  %v389_v48 = vadd.f32 %v388_v33, %v326_v14  ;;  %v240_v49 = vadd.f32 %v749_v52, %v239_v44 }
 0x102   :  { %361 = vst [vmem:[%s966_s3 + $0x70] sm:$0xff] %v329_v42  ;;  %v330_v51 = vmax.f32 %v248_v43, 0.0  ;;  %v304_v2 = vadd.f32 %v749_v52, %v303_v50  ;;  %377 = vst [vmem:[%s966_s3 + $0xf0] sm:$0xff] %v897_v59  ;;  %v343_v3 = vmax.f32 %v301_v60, 0.0  ;;  %v346_v5 = vmax.f32 %v312_v62, 0.0 }
 0x103   :  { %359 = vst [vmem:[%s966_s3 + $0x60] sm:$0xff] %v327_v47  ;;  %v390_v54 = vadd.f32 %v389_v48, %v327_v47  ;;  %v429_v56 = vmul.f32 %v327_v47, %v327_v47  ;;  %v459_v57 = vadd.f32 %v458_v46, %v428_v41  ;;  %v328_v58 = vmax.f32 %v240_v49, 0.0 }
 0x104   :  { %362 = vst [vmem:[%s966_s3 + $0x78] sm:$0xff] %v330_v51  ;;  %v431_v6 = vmul.f32 %v329_v42, %v329_v42  ;;  %v344_v10 = vmax.f32 %v304_v2, 0.0  ;;  %375 = vst [vmem:[%s966_s3 + $0xe0] sm:$0xff] %v343_v3  ;;  %v432_v52 = vmul.f32 %v330_v51, %v330_v51  ;;  %v435_v22 = vmul.f32 %v757_v4, %v757_v4 }
 0x105   :  { %v460_v63 = vadd.f32 %v459_v57, %v429_v56  ;;  %360 = vst [vmem:[%s966_s3 + $0x68] sm:$0xff] %v328_v58  ;;  %v391_v0 = vadd.f32 %v390_v54, %v328_v58  ;;  %v430_v1 = vmul.f32 %v328_v58, %v328_v58  ;;  %378 = vst [vmem:[%s966_s3 + $0xf8] sm:$0xff] %v346_v5 }
 0x106   :  { %376 = vst [vmem:[%s966_s3 + $0xe8] sm:$0xff] %v344_v10  ;;  %v438_v33 = vmul.f32 %v831_v61, %v831_v61  ;;  %v442_v44 = vmul.f32 %v871_v37, %v871_v37  ;;  %v446_v54 = vmul.f32 %v344_v10, %v344_v10 }
 0x107   :  { %v392_v7 = vadd.f32 %v391_v0, %v329_v42  ;;  %v461_v9 = vadd.f32 %v460_v63, %v430_v1 }
 0x109   :  { %v462_v13 = vadd.f32 %v461_v9, %v431_v6  ;;  %v393_v14 = vadd.f32 %v392_v7, %v330_v51 }
 0x10b   :  { %v394_v17 = vadd.f32 %v393_v14, %v763_v8  ;;  %v463_v18 = vadd.f32 %v462_v13, %v432_v52  ;;  %v437_v8 = vmul.f32 %v806_v40, %v806_v40 }
 0x10d   :  { %v464_v19 = vadd.f32 %v463_v18, %v433_v16  ;;  %v395_v20 = vadd.f32 %v394_v17, %v782_v12 }
 0x10f   :  { %v396_v23 = vadd.f32 %v395_v20, %v757_v4  ;;  %v465_v24 = vadd.f32 %v464_v19, %v434_v21  ;;  %v439_v4 = vmul.f32 %v804_v39, %v804_v39 }
 0x111   :  { %v466_v26 = vadd.f32 %v465_v24, %v435_v22  ;;  %v397_v27 = vadd.f32 %v396_v23, %v773_v11  ;;  %v440_v11 = vmul.f32 %v828_v55, %v828_v55 }
 0x113   :  { %v398_v28 = vadd.f32 %v397_v27, %v806_v40  ;;  %v467_v29 = vadd.f32 %v466_v26, %v436_v25  ;;  %v441_v40 = vmul.f32 %v866_v30, %v866_v30 }
 0x115   :  { %v468_v32 = vadd.f32 %v467_v29, %v437_v8  ;;  %v399_v12 = vadd.f32 %v398_v28, %v831_v61 }
 0x117   :  { %v400_v34 = vadd.f32 %v399_v12, %v804_v39  ;;  %v469_v35 = vadd.f32 %v468_v32, %v438_v33  ;;  %v443_v39 = vmul.f32 %v847_v15, %v847_v15 }
 0x119   :  { %v470_v36 = vadd.f32 %v469_v35, %v439_v4  ;;  %v401_v38 = vadd.f32 %v400_v34, %v828_v55  ;;  %v444_v55 = vmul.f32 %v868_v31, %v868_v31 }
 0x11b   :  { %v402_v41 = vadd.f32 %v401_v38, %v866_v30  ;;  %v471_v42 = vadd.f32 %v470_v36, %v440_v11  ;;  %v445_v30 = vmul.f32 %v343_v3, %v343_v3 }
 0x11d   :  { %v472_v43 = vadd.f32 %v471_v42, %v441_v40  ;;  %v403_v61 = vadd.f32 %v402_v41, %v871_v37  ;;  %v447_v37 = vmul.f32 %v897_v59, %v897_v59 }
 0x11f   :  { %v404_v45 = vadd.f32 %v403_v61, %v847_v15  ;;  %v473_v46 = vadd.f32 %v472_v43, %v442_v44  ;;  %v448_v15 = vmul.f32 %v346_v5, %v346_v5 }
 0x121   :  { %v474_v47 = vadd.f32 %v473_v46, %v443_v39  ;;  %v405_v48 = vadd.f32 %v404_v45, %v868_v31 }
 0x123   :  { %v406_v49 = vadd.f32 %v405_v48, %v343_v3  ;;  %v475_v50 = vadd.f32 %v474_v47, %v444_v55 }
 0x125   :  { %v476_v51 = vadd.f32 %v475_v50, %v445_v30  ;;  %v407_v53 = vadd.f32 %v406_v49, %v344_v10 }
 0x127   :  { %v408_v56 = vadd.f32 %v407_v53, %v897_v59  ;;  %v477_v57 = vadd.f32 %v476_v51, %v446_v54 }
 0x129   :  { %v409_v58 = vadd.f32 %v408_v56, %v346_v5  ;;  %v478_v60 = vadd.f32 %v477_v57, %v447_v37 }
 0x12b   :  { %v410_v62 = vrot.slane %v409_v58, 4  ;;  %v479_v63 = vadd.f32 %v478_v60, %v448_v15 }
 0x12d   :  { %v411_v0 = vadd.f32 %v410_v62, %v409_v58  ;;  %v480_v1 = vrot.slane %v479_v63, 4 }
 0x12f   :  { %v412_v31 = vrot.slane %v411_v0, 2  ;;  %v481_v2 = vadd.f32 %v480_v1, %v479_v63 }
 0x131   :  { %v413_v3 = vadd.f32 %v412_v31, %v411_v0  ;;  %v482_v6 = vrot.slane %v481_v2, 2 }
 0x133   :  { %v414_v7 = vrot.slane %v413_v3, 1  ;;  %v483_v9 = vadd.f32 %v482_v6, %v481_v2 }
 0x135   :  { %v415_v10 = vadd.f32 %v414_v7, %v413_v3  ;;  %v484_v52 = vrot.slane %v483_v9, 1 }
 0x137   :  { %416 = vst [vmem:[%s967_s4] sm:$0x1] %v415_v10  ;;  %v485_v59 = vadd.f32 %v484_v52, %v483_v9 }
 0x139   :  { %486 = vst [vmem:[%s968_s5] sm:$0x1] %v485_v59 }

// kernel: pointnet_backbone_forward.18
= control target key start
LH: loop header
LB: loop body
LE: loop exit
PB: predicated region body
PF: predicated region fallthrough
CT: control target
= control target key end

     0   :  { %s1171_s12 = smov 0   ;;  %s1173_s13 = smov 0   ;;  %s2076_s0 = inlined_call_operand.vmem [shape: f32[2,128,1024], index: 0, kind: input, shape index: {}]   ;;  %s2077_s1 = inlined_call_operand.vmem [shape: f32[1,1024], index: 1, kind: input, shape index: {}]   ;;  %s2078_s2 = inlined_call_operand.vmem [shape: f32[1,1024], index: 2, kind: input, shape index: {}]   ;;  %s2079_s3 = inlined_call_operand.vmem [shape: f32[2,1,1024], index: 3, kind: output, shape index: {}]  }
   0x1   :  { %s1175_s14 = smov 0  }
   0x2 LB: > { %s25_s15 = sadd.s32 1, %s1144_s13  ;;  %p1094_p0 = scmp.ge.s32.totalorder %s1148_s14, 1  ;;  %s1148_s14 = sphi %s1175_s14, %s13_s14   ;;  %s1144_s13 = sphi %s1173_s13, %s2232_s13   ;;  %s1140_s12 = sphi %s1171_s12, %s2231_s12  }
   0x3   : > { %p27_p1 = scmp.ge.s32.totalorder %s25_s15, 2  ;;  %p157_p2 = scmp.lt.s32.totalorder %s1148_s14, 3 }
   0x5   : > { %s2234_s15 = smov (%p27_p1, %s25_s15), 0  ;;  %p158_p3 = pnand %p1094_p0, %p157_p2 }
   0x7   : > { %161 = sbr.rel (%p158_p3) target bundleno = 166 (0xa6), region = 32 }
   0xe   : > { %p186_p4 = scmp.lt.s32.totalorder %s1140_s12, 1  ;;  %v330_v0 = vlaneseq  ;;  %v328_v3 = vld [vmem:[%s2077_s1] sm:$0xff] }
   0xf   : > { %v1234_v24 = vld [vmem:[%s2078_s2] sm:$0xff] }
  0x10   : > { %s2236_s12 = smov (!%p186_p4, %s1140_s12), 1  ;;  %v1191_v1 = vshrl.u32 %v330_v0, 7 }
  0x11   : > { %s1100_s16 = sshll.u32 %s2236_s12, 10  ;;  %s1097_s24 = sshll.u32 %s2236_s12, 3 }
  0x12   : > { %2084 = vst [vmem:[#allocation2_spill] sm:$0xff] %v1191_v1  ;;  %v332_v2 = vsub.s32 0, %v1191_v1  ;;  %s1198_s19 = scalar_lea.vmem %s2076_s0, %s1100_s16  ;;  %v336_v4 = vsub.s32 1, %v1191_v1  ;;  %v340_v5 = vsub.s32 2, %v1191_v1  ;;  %v344_v6 = vsub.s32 3, %v1191_v1  ;;  %s199_s27 = scalar_lea.vmem %s2079_s3, %s1097_s24 }
  0x13   : > { %v348_v7 = vsub.s32 4, %v1191_v1  ;;  %v352_v8 = vsub.s32 5, %v1191_v1  ;;  %v356_v9 = vsub.s32 6, %v1191_v1  ;;  %v2080_v10 = vsub.s32 7, %v1191_v1  ;;  %v200_v11 = vld [vmem:[%s1198_s19] sm:$0xff]  ;;  %v201_v12 = vld [vmem:[%s1198_s19 + $0x8] sm:$0xff] }
  0x14   : > { %v202_v13 = vld [vmem:[%s1198_s19 + $0x10] sm:$0xff]  ;;  %v1213_v14 = vrot.slane %v328_v3, %v332_v2  ;;  %v203_v15 = vld [vmem:[%s1198_s19 + $0x18] sm:$0xff]  ;;  %v204_v16 = vld [vmem:[%s1198_s19 + $0x20] sm:$0xff]  ;;  %v1221_v21 = vrot.slane %v328_v3, %v336_v4  ;;  %v1225_v22 = vrot.slane %v328_v3, %v340_v5  ;;  %v1229_v23 = vrot.slane %v328_v3, %v344_v6 }
  0x15   : > { %v205_v17 = vld [vmem:[%s1198_s19 + $0x28] sm:$0xff]  ;;  %v206_v18 = vld [vmem:[%s1198_s19 + $0x30] sm:$0xff]  ;;  %v207_v19 = vld [vmem:[%s1198_s19 + $0x38] sm:$0xff]  ;;  %v1241_v28 = vrot.slane %v328_v3, %v348_v7  ;;  %v1245_v29 = vrot.slane %v328_v3, %v352_v8  ;;  %v1249_v30 = vrot.slane %v328_v3, %v356_v9  ;;  %v1253_v31 = vrot.slane %v328_v3, %v2080_v10 }
  0x16   : > { %2085 = vst [vmem:[#allocation3_spill] sm:$0xff] %v1213_v14  ;;  %v208_v20 = vld [vmem:[%s1198_s19 + $0x40] sm:$0xff]  ;;  %v209_v25 = vld [vmem:[%s1198_s19 + $0x48] sm:$0xff]  ;;  %v210_v26 = vld [vmem:[%s1198_s19 + $0x50] sm:$0xff]  ;;  %v1259_v35 = vmul.f32 %v1213_v14, %v200_v11  ;;  %v1262_v36 = vmul.f32 %v1221_v21, %v201_v12  ;;  %v1265_v37 = vmul.f32 %v1225_v22, %v202_v13  ;;  %v1268_v38 = vmul.f32 %v1229_v23, %v203_v15 }
  0x17   : > { %v211_v27 = vld [vmem:[%s1198_s19 + $0x58] sm:$0xff]  ;;  %v212_v32 = vld [vmem:[%s1198_s19 + $0x60] sm:$0xff]  ;;  %v213_v33 = vld [vmem:[%s1198_s19 + $0x68] sm:$0xff]  ;;  %v1274_v42 = vmul.f32 %v1241_v28, %v204_v16  ;;  %v1277_v43 = vmul.f32 %v1245_v29, %v205_v17  ;;  %v1280_v44 = vmul.f32 %v1249_v30, %v206_v18  ;;  %v1283_v45 = vmul.f32 %v1253_v31, %v207_v19 }
  0x18   : > { %v214_v34 = vld [vmem:[%s1198_s19 + $0x70] sm:$0xff]  ;;  %v215_v39 = vld [vmem:[%s1198_s19 + $0x78] sm:$0xff]  ;;  %v216_v40 = vld [vmem:[%s1198_s19 + $0x80] sm:$0xff]  ;;  %v1289_v49 = vmul.f32 %v1213_v14, %v208_v20  ;;  %v1292_v50 = vmul.f32 %v1221_v21, %v209_v25  ;;  %v1295_v51 = vmul.f32 %v1225_v22, %v210_v26  ;;  %v1298_v52 = vmul.f32 %v1229_v23, %v211_v27 }
  0x19   : > { %v217_v41 = vld [vmem:[%s1198_s19 + $0x88] sm:$0xff]  ;;  %v218_v46 = vld [vmem:[%s1198_s19 + $0x90] sm:$0xff]  ;;  %v219_v47 = vld [vmem:[%s1198_s19 + $0x98] sm:$0xff]  ;;  %v1304_v56 = vmul.f32 %v1241_v28, %v212_v32  ;;  %v1307_v57 = vmul.f32 %v1245_v29, %v213_v33  ;;  %v1310_v58 = vmul.f32 %v1249_v30, %v214_v34  ;;  %v1313_v59 = vrot.slane %v1234_v24, %v332_v2 }
  0x1a   : > { %v220_v48 = vld [vmem:[%s1198_s19 + $0xa0] sm:$0xff]  ;;  %v221_v53 = vld [vmem:[%s1198_s19 + $0xa8] sm:$0xff]  ;;  %v222_v54 = vld [vmem:[%s1198_s19 + $0xb0] sm:$0xff]  ;;  %v1319_v63 = vmul.f32 %v1253_v31, %v215_v39  ;;  %v1322_v0 = vmul.f32 %v1213_v14, %v216_v40  ;;  %v1325_v3 = vmul.f32 %v1221_v21, %v217_v41  ;;  %v1328_v11 = vrot.slane %v1234_v24, %v336_v4 }
  0x1b   : > { %v223_v55 = vld [vmem:[%s1198_s19 + $0xb8] sm:$0xff]  ;;  %v224_v60 = vld [vmem:[%s1198_s19 + $0xc0] sm:$0xff]  ;;  %v225_v61 = vld [vmem:[%s1198_s19 + $0xc8] sm:$0xff]  ;;  %v1334_v15 = vmul.f32 %v1225_v22, %v218_v46  ;;  %v1337_v16 = vmul.f32 %v1229_v23, %v219_v47  ;;  %v1340_v17 = vmul.f32 %v1241_v28, %v220_v48  ;;  %v1345_v4 = vrot.slane %v1234_v24, %v340_v5 }
  0x1c   : > { %v226_v62 = vld [vmem:[%s1198_s19 + $0xd0] sm:$0xff]  ;;  %v227_v2 = vld [vmem:[%s1198_s19 + $0xd8] sm:$0xff]  ;;  %v228_v12 = vld [vmem:[%s1198_s19 + $0xe0] sm:$0xff]  ;;  %v1351_v25 = vmul.f32 %v1245_v29, %v221_v53  ;;  %v1354_v26 = vmul.f32 %v1249_v30, %v222_v54  ;;  %v1357_v27 = vmul.f32 %v1253_v31, %v223_v55  ;;  %v1362_v5 = vrot.slane %v1234_v24, %v344_v6 }
  0x1d   : > { %v229_v13 = vld [vmem:[%s1198_s19 + $0xe8] sm:$0xff]  ;;  %v230_v18 = vld [vmem:[%s1198_s19 + $0xf0] sm:$0xff]  ;;  %v231_v19 = vld [vmem:[%s1198_s19 + $0xf8] sm:$0xff]  ;;  %v1368_v39 = vmul.f32 %v1213_v14, %v224_v60  ;;  %v1371_v40 = vmul.f32 %v1221_v21, %v225_v61  ;;  %v1374_v41 = vmul.f32 %v1225_v22, %v226_v62  ;;  %v1379_v6 = vrot.slane %v1234_v24, %v348_v7 }
  0x1e   : > { %v232_v20 = vld [vmem:[%s1198_s19 + $0x100] sm:$0xff]  ;;  %v233_v32 = vld [vmem:[%s1198_s19 + $0x108] sm:$0xff]  ;;  %v234_v33 = vld [vmem:[%s1198_s19 + $0x110] sm:$0xff]  ;;  %v1385_v53 = vmul.f32 %v1229_v23, %v227_v2  ;;  %v1388_v54 = vmul.f32 %v1241_v28, %v228_v12  ;;  %v1391_v55 = vmul.f32 %v1245_v29, %v229_v13  ;;  %v1396_v7 = vrot.slane %v1234_v24, %v352_v8 }
  0x1f   : > { %v235_v34 = vld [vmem:[%s1198_s19 + $0x118] sm:$0xff]  ;;  %2086 = vst [vmem:[#allocation4_spill] sm:$0xff] %v1368_v39  ;;  %v236_v46 = vld [vmem:[%s1198_s19 + $0x120] sm:$0xff]  ;;  %v237_v47 = vld [vmem:[%s1198_s19 + $0x128] sm:$0xff]  ;;  %v1402_v2 = vmul.f32 %v1249_v30, %v230_v18  ;;  %v1405_v12 = vmul.f32 %v1253_v31, %v231_v19  ;;  %v1408_v13 = vmul.f32 %v1213_v14, %v232_v20  ;;  %v1413_v8 = vrot.slane %v1234_v24, %v356_v9 }
  0x20   : > { %v238_v48 = vld [vmem:[%s1198_s19 + $0x130] sm:$0xff]  ;;  %2087 = vst [vmem:[#allocation5_spill] sm:$0xff] %v1388_v54  ;;  %2088 = vst [vmem:[#allocation6_spill] sm:$0xff] %v1391_v55  ;;  %v239_v60 = vld [vmem:[%s1198_s19 + $0x138] sm:$0xff]  ;;  %v1419_v18 = vmul.f32 %v1221_v21, %v233_v32  ;;  %v1422_v19 = vmul.f32 %v1225_v22, %v234_v33  ;;  %v1425_v20 = vmul.f32 %v1229_v23, %v235_v34 }
  0x21   : > { %v240_v61 = vld [vmem:[%s1198_s19 + $0x140] sm:$0xff]  ;;  %v241_v62 = vld [vmem:[%s1198_s19 + $0x148] sm:$0xff]  ;;  %2089 = vst [vmem:[#allocation7_spill] sm:$0xff] %v1402_v2  ;;  %2090 = vst [vmem:[#allocation8_spill] sm:$0xff] %v1405_v12  ;;  %v1436_v32 = vmul.f32 %v1241_v28, %v236_v46  ;;  %v1439_v33 = vmul.f32 %v1245_v29, %v237_v47  ;;  %v1442_v34 = vmul.f32 %v1249_v30, %v238_v48 }
  0x22   : > { %2091 = vst [vmem:[#allocation9_spill] sm:$0xff] %v1408_v13  ;;  %v242_v10 = vld [vmem:[%s1198_s19 + $0x150] sm:$0xff]  ;;  %v243_v39 = vld [vmem:[%s1198_s19 + $0x158] sm:$0xff]  ;;  %v244_v55 = vld [vmem:[%s1198_s19 + $0x160] sm:$0xff]  ;;  %v2094_v13 = vsub.s32 7, %v1191_v1  ;;  %v1446_v1 = vadd.f32 %v1313_v59, %v1259_v35  ;;  %v1455_v46 = vmul.f32 %v1213_v14, %v240_v61  ;;  %v1458_v47 = vmul.f32 %v1221_v21, %v241_v62 }
  0x23   : > { %2092 = vst [vmem:[#allocation10_spill] sm:$0xff] %v1422_v19  ;;  %2093 = vst [vmem:[#allocation11_spill] sm:$0xff] %v1425_v20  ;;  %v245_v12 = vld [vmem:[%s1198_s19 + $0x168] sm:$0xff]  ;;  %v246_v2 = vld [vmem:[%s1198_s19 + $0x170] sm:$0xff]  ;;  %v1452_v19 = vmul.f32 %v1253_v31, %v239_v60  ;;  %v1462_v48 = vadd.f32 %v1328_v11, %v1262_v36  ;;  %v1471_v60 = vmul.f32 %v1229_v23, %v243_v39 }
  0x24   : > { %v1430_v9 = vrot.slane %v1234_v24, %v2094_v13  ;;  %v247_v54 = vld [vmem:[%s1198_s19 + $0x178] sm:$0xff]  ;;  %2095 = vst [vmem:[#allocation12_spill] sm:$0xff] %v1439_v33  ;;  %2096 = vst [vmem:[#allocation13_spill] sm:$0xff] %v1442_v34  ;;  %v248_v24 = vld [vmem:[%s1198_s19 + $0x180] sm:$0xff]  ;;  %v1468_v33 = vmul.f32 %v1225_v22, %v242_v10  ;;  %v1474_v61 = vmul.f32 %v1241_v28, %v244_v55 }
  0x25   : > { %2097 = vst [vmem:[#allocation14_spill] sm:$0xff] %v1446_v1  ;;  %v249_v13 = vld [vmem:[%s1198_s19 + $0x188] sm:$0xff]  ;;  %v250_v20 = vld [vmem:[%s1198_s19 + $0x190] sm:$0xff]  ;;  %2098 = vst [vmem:[#allocation15_spill] sm:$0xff] %v1455_v46  ;;  %v1478_v62 = vadd.f32 %v1345_v4, %v1265_v37  ;;  %v1487_v10 = vmul.f32 %v1249_v30, %v246_v2  ;;  %v1490_v39 = vmul.f32 %v1253_v31, %v247_v54 }
  0x26   : > { %2099 = vst [vmem:[#allocation16_spill] sm:$0xff] %v1458_v47  ;;  %2100 = vst [vmem:[#allocation17_spill] sm:$0xff] %v1462_v48  ;;  %v251_v35 = vld [vmem:[%s1198_s19 + $0x198] sm:$0xff]  ;;  %v252_v1 = vld [vmem:[%s1198_s19 + $0x1a0] sm:$0xff]  ;;  %v1484_v47 = vmul.f32 %v1245_v29, %v245_v12  ;;  %v1494_v55 = vadd.f32 %v1362_v5, %v1268_v38  ;;  %v1503_v12 = vmul.f32 %v1221_v21, %v249_v13 }
  0x27   : > { %v253_v34 = vld [vmem:[%s1198_s19 + $0x1a8] sm:$0xff]  ;;  %2101 = vst [vmem:[#allocation18_spill] sm:$0xff] %v1471_v60  ;;  %2102 = vst [vmem:[#allocation19_spill] sm:$0xff] %v1474_v61  ;;  %v254_v36 = vld [vmem:[%s1198_s19 + $0x1b0] sm:$0xff]  ;;  %v1500_v60 = vmul.f32 %v1213_v14, %v248_v24  ;;  %v1506_v2 = vmul.f32 %v1225_v22, %v250_v20  ;;  %v1510_v54 = vadd.f32 %v1379_v6, %v1274_v42 }
  0x28   : > { %2103 = vst [vmem:[#allocation20_spill] sm:$0xff] %v1478_v62  ;;  %v255_v48 = vld [vmem:[%s1198_s19 + $0x1b8] sm:$0xff]  ;;  %v256_v46 = vld [vmem:[%s1198_s19 + $0x1c0] sm:$0xff]  ;;  %2104 = vst [vmem:[#allocation21_spill] sm:$0xff] %v1487_v10  ;;  %v1516_v10 = vmul.f32 %v1229_v23, %v251_v35  ;;  %v1519_v24 = vmul.f32 %v1241_v28, %v252_v1  ;;  %v1522_v13 = vmul.f32 %v1245_v29, %v253_v34 }
  0x29   : > { %2105 = vst [vmem:[#allocation22_spill] sm:$0xff] %v1490_v39  ;;  %2106 = vst [vmem:[#allocation23_spill] sm:$0xff] %v1494_v55  ;;  %v257_v37 = vld [vmem:[%s1198_s19 + $0x1c8] sm:$0xff]  ;;  %v258_v62 = vld [vmem:[%s1198_s19 + $0x1d0] sm:$0xff]  ;;  %v1526_v20 = vadd.f32 %v1396_v7, %v1277_v43  ;;  %v1535_v35 = vmul.f32 %v1253_v31, %v255_v48  ;;  %v1538_v1 = vmul.f32 %v1213_v14, %v256_v46 }
  0x2a   : > { %v259_v61 = vld [vmem:[%s1198_s19 + $0x1d8] sm:$0xff]  ;;  %2107 = vst [vmem:[#allocation24_spill] sm:$0xff] %v1500_v60  ;;  %2108 = vst [vmem:[#allocation25_spill] sm:$0xff] %v1506_v2  ;;  %v260_v38 = vld [vmem:[%s1198_s19 + $0x1e0] sm:$0xff]  ;;  %v1532_v2 = vmul.f32 %v1249_v30, %v254_v36  ;;  %v1542_v34 = vadd.f32 %v1413_v8, %v1280_v44  ;;  %v1551_v36 = vmul.f32 %v1225_v22, %v258_v62 }
  0x2b   : > { %2109 = vst [vmem:[#allocation26_spill] sm:$0xff] %v1510_v54  ;;  %v261_v55 = vld [vmem:[%s1198_s19 + $0x1e8] sm:$0xff]  ;;  %v262_v39 = vld [vmem:[%s1198_s19 + $0x1f0] sm:$0xff]  ;;  %2110 = vst [vmem:[#allocation27_spill] sm:$0xff] %v1519_v24  ;;  %v1548_v24 = vmul.f32 %v1221_v21, %v257_v37  ;;  %v1554_v48 = vmul.f32 %v1229_v23, %v259_v61  ;;  %v1558_v46 = vadd.f32 %v1430_v9, %v1283_v45 }
  0x2c   : > { %2111 = vst [vmem:[#allocation28_spill] sm:$0xff] %v1522_v13  ;;  %2112 = vst [vmem:[#allocation29_spill] sm:$0xff] %v1526_v20  ;;  %v263_v42 = vld [vmem:[%s1198_s19 + $0x1f8] sm:$0xff]  ;;  %v264_v60 = vld [vmem:[%s1198_s19 + $0x200] sm:$0xff]  ;;  %v1567_v37 = vmul.f32 %v1245_v29, %v261_v55  ;;  %v1570_v62 = vmul.f32 %v1249_v30, %v262_v39  ;;  %v1574_v61 = vadd.f32 %v1313_v59, %v1289_v49 }
  0x2d   : > { %v265_v54 = vld [vmem:[%s1198_s19 + $0x208] sm:$0xff]  ;;  %2113 = vst [vmem:[#allocation30_spill] sm:$0xff] %v1535_v35  ;;  %2114 = vst [vmem:[#allocation31_spill] sm:$0xff] %v1538_v1  ;;  %v266_v43 = vld [vmem:[%s1198_s19 + $0x210] sm:$0xff]  ;;  %v1564_v35 = vmul.f32 %v1241_v28, %v260_v38  ;;  %v1583_v38 = vmul.f32 %v1213_v14, %v264_v60  ;;  %v1590_v39 = vadd.f32 %v1328_v11, %v1292_v50 }
  0x2e   : > { %2115 = vst [vmem:[#allocation32_spill] sm:$0xff] %v1542_v34  ;;  %v267_v20 = vld [vmem:[%s1198_s19 + $0x218] sm:$0xff]  ;;  %v268_v13 = vld [vmem:[%s1198_s19 + $0x220] sm:$0xff]  ;;  %2116 = vst [vmem:[#allocation33_spill] sm:$0xff] %v1551_v36  ;;  %v1580_v36 = vmul.f32 %v1253_v31, %v263_v42  ;;  %v1586_v55 = vmul.f32 %v1221_v21, %v265_v54  ;;  %v1606_v54 = vadd.f32 %v1345_v4, %v1295_v51 }
  0x2f   : > { %2117 = vst [vmem:[#allocation34_spill] sm:$0xff] %v1554_v48  ;;  %2118 = vst [vmem:[#allocation35_spill] sm:$0xff] %v1558_v46  ;;  %v269_v44 = vld [vmem:[%s1198_s19 + $0x228] sm:$0xff]  ;;  %v270_v1 = vld [vmem:[%s1198_s19 + $0x230] sm:$0xff]  ;;  %v1599_v42 = vmul.f32 %v1229_v23, %v267_v20  ;;  %v1602_v60 = vmul.f32 %v1241_v28, %v268_v13  ;;  %v1622_v13 = vadd.f32 %v1362_v5, %v1298_v52 }
  0x30   : > { %v271_v34 = vld [vmem:[%s1198_s19 + $0x238] sm:$0xff]  ;;  %2119 = vst [vmem:[#allocation36_spill] sm:$0xff] %v1567_v37  ;;  %2120 = vst [vmem:[#allocation37_spill] sm:$0xff] %v1570_v62  ;;  %v273_v45 = vld [vmem:[%s1198_s19 + $0x248] sm:$0xff]  ;;  %v1596_v37 = vmul.f32 %v1225_v22, %v266_v43  ;;  %v1612_v14 = vmul.f32 %v1245_v29, %v269_v44  ;;  %v1615_v43 = vmul.f32 %v1249_v30, %v270_v1 }
  0x31   : > { %2121 = vst [vmem:[#allocation38_spill] sm:$0xff] %v1574_v61  ;;  %v274_v46 = vld [vmem:[%s1198_s19 + $0x250] sm:$0xff]  ;;  %v275_v48 = vld [vmem:[%s1198_s19 + $0x258] sm:$0xff]  ;;  %2122 = vst [vmem:[#allocation39_spill] sm:$0xff] %v1583_v38  ;;  %v1618_v20 = vmul.f32 %v1253_v31, %v271_v34  ;;  %v1638_v34 = vadd.f32 %v1379_v6, %v1304_v56 }
  0x32   : > { %2123 = vst [vmem:[#allocation40_spill] sm:$0xff] %v1586_v55  ;;  %2124 = vst [vmem:[#allocation41_spill] sm:$0xff] %v1590_v39  ;;  %v276_v49 = vld [vmem:[%s1198_s19 + $0x260] sm:$0xff]  ;;  %v277_v61 = vld [vmem:[%s1198_s19 + $0x268] sm:$0xff]  ;;  %v1631_v44 = vmul.f32 %v1225_v22, %v274_v46  ;;  %v1634_v1 = vmul.f32 %v1229_v23, %v275_v48  ;;  %v1654_v48 = vadd.f32 %v1396_v7, %v1307_v57 }
  0x33   : > { %v278_v62 = vld [vmem:[%s1198_s19 + $0x270] sm:$0xff]  ;;  %2125 = vst [vmem:[#allocation42_spill] sm:$0xff] %v1602_v60  ;;  %2126 = vst [vmem:[#allocation43_spill] sm:$0xff] %v1606_v54  ;;  %v279_v50 = vld [vmem:[%s1198_s19 + $0x278] sm:$0xff]  ;;  %v1628_v60 = vmul.f32 %v1221_v21, %v273_v45  ;;  %v1647_v45 = vmul.f32 %v1245_v29, %v277_v61 }
  0x34   : > { %v281_v38 = vld [vmem:[%s1198_s19 + $0x288] sm:$0xff]  ;;  %v282_v39 = vld [vmem:[%s1198_s19 + $0x290] sm:$0xff]  ;;  %2127 = vst [vmem:[#allocation44_spill] sm:$0xff] %v1615_v43  ;;  %2128 = vst [vmem:[#allocation45_spill] sm:$0xff] %v1618_v20  ;;  %v1644_v43 = vmul.f32 %v1241_v28, %v276_v49  ;;  %v1650_v46 = vmul.f32 %v1249_v30, %v278_v62  ;;  %v1670_v62 = vadd.f32 %v1413_v8, %v1310_v58 }
  0x35   : > { %2129 = vst [vmem:[#allocation46_spill] sm:$0xff] %v1622_v13  ;;  %v283_v51 = vld [vmem:[%s1198_s19 + $0x298] sm:$0xff]  ;;  %v284_v54 = vld [vmem:[%s1198_s19 + $0x2a0] sm:$0xff]  ;;  %v285_v55 = vld [vmem:[%s1198_s19 + $0x2a8] sm:$0xff]  ;;  %v1663_v49 = vmul.f32 %v1221_v21, %v281_v38  ;;  %v1666_v61 = vmul.f32 %v1225_v22, %v282_v39  ;;  %v1686_v39 = vadd.f32 %v1430_v9, %v1319_v63 }
  0x36   : > { %2130 = vst [vmem:[#allocation47_spill] sm:$0xff] %v1628_v60  ;;  %2131 = vst [vmem:[#allocation48_spill] sm:$0xff] %v1634_v1  ;;  %v286_v52 = vld [vmem:[%s1198_s19 + $0x2b0] sm:$0xff]  ;;  %v287_v13 = vld [vmem:[%s1198_s19 + $0x2b8] sm:$0xff]  ;;  %v1660_v1 = vmul.f32 %v1253_v31, %v279_v50  ;;  %v1679_v50 = vmul.f32 %v1241_v28, %v284_v54  ;;  %v1682_v38 = vmul.f32 %v1245_v29, %v285_v55 }
  0x37   : > { %2132 = vst [vmem:[#allocation49_spill] sm:$0xff] %v1638_v34  ;;  %v289_v20 = vld [vmem:[%s1198_s19 + $0x2c8] sm:$0xff]  ;;  %2133 = vst [vmem:[#allocation50_spill] sm:$0xff] %v1647_v45  ;;  %v290_v56 = vld [vmem:[%s1198_s19 + $0x2d0] sm:$0xff]  ;;  %v1676_v45 = vmul.f32 %v1229_v23, %v283_v51  ;;  %v1694_v51 = vmul.f32 %v1253_v31, %v287_v13  ;;  %v1701_v55 = vadd.f32 %v1313_v59, %v1322_v0 }
  0x38   : > { %2134 = vst [vmem:[#allocation51_spill] sm:$0xff] %v1650_v46  ;;  %2135 = vst [vmem:[#allocation52_spill] sm:$0xff] %v1654_v48  ;;  %v291_v34 = vld [vmem:[%s1198_s19 + $0x2d8] sm:$0xff]  ;;  %v292_v60 = vld [vmem:[%s1198_s19 + $0x2e0] sm:$0xff]  ;;  %v1697_v54 = vmul.f32 %v1221_v21, %v289_v20  ;;  %v557_v20 = vadd.f32 %v1328_v11, %v1325_v3 }
  0x39   : > { %2136 = vst [vmem:[#allocation53_spill] sm:$0xff] %v1663_v49  ;;  %2137 = vst [vmem:[#allocation54_spill] sm:$0xff] %v1670_v62  ;;  %v293_v57 = vld [vmem:[%s1198_s19 + $0x2e8] sm:$0xff]  ;;  %v294_v48 = vld [vmem:[%s1198_s19 + $0x2f0] sm:$0xff]  ;;  %v1691_v49 = vmul.f32 %v1249_v30, %v286_v52  ;;  %v1709_v52 = vmul.f32 %v1229_v23, %v291_v34  ;;  %v1712_v13 = vmul.f32 %v1241_v28, %v292_v60 }
  0x3a   : > { %v295_v46 = vld [vmem:[%s1198_s19 + $0x2f8] sm:$0xff]  ;;  %2138 = vst [vmem:[#allocation55_spill] sm:$0xff] %v1682_v38  ;;  %2139 = vst [vmem:[#allocation56_spill] sm:$0xff] %v1686_v39  ;;  %v297_v58 = vld [vmem:[%s1198_s19 + $0x308] sm:$0xff]  ;;  %v1706_v38 = vmul.f32 %v1225_v22, %v290_v56  ;;  %v1723_v56 = vmul.f32 %v1249_v30, %v294_v48  ;;  %v558_v60 = vadd.f32 %v1345_v4, %v1334_v15 }
  0x3b   : > { %v298_v62 = vld [vmem:[%s1198_s19 + $0x310] sm:$0xff]  ;;  %2140 = vst [vmem:[#allocation57_spill] sm:$0xff] %v1691_v49  ;;  %2141 = vst [vmem:[#allocation58_spill] sm:$0xff] %v1694_v51  ;;  %v299_v63 = vld [vmem:[%s1198_s19 + $0x318] sm:$0xff]  ;;  %v1720_v51 = vmul.f32 %v1245_v29, %v293_v57  ;;  %v1726_v34 = vmul.f32 %v1253_v31, %v295_v46  ;;  %v559_v48 = vadd.f32 %v1362_v5, %v1337_v16 }
  0x3c   : > { %2142 = vst [vmem:[#allocation59_spill] sm:$0xff] %v1697_v54  ;;  %2143 = vst [vmem:[#allocation60_spill] sm:$0xff] %v1701_v55  ;;  %v300_v39 = vld [vmem:[%s1198_s19 + $0x320] sm:$0xff]  ;;  %v301_v54 = vld [vmem:[%s1198_s19 + $0x328] sm:$0xff]  ;;  %v1737_v49 = vmul.f32 %v1225_v22, %v298_v62  ;;  %v560_v46 = vadd.f32 %v1379_v6, %v1340_v17  ;;  %v1746_v15 = vmul.f32 %v1229_v23, %v299_v63 }
  0x3d   : > { %2144 = vst [vmem:[#allocation61_spill] sm:$0xff] %v1706_v38  ;;  %2145 = vst [vmem:[#allocation62_spill] sm:$0xff] %v1709_v52  ;;  %v302_v0 = vld [vmem:[%s1198_s19 + $0x330] sm:$0xff]  ;;  %v303_v55 = vld [vmem:[%s1198_s19 + $0x338] sm:$0xff]  ;;  %v1734_v38 = vmul.f32 %v1221_v21, %v297_v58  ;;  %v565_v58 = vadd.f32 %v1328_v11, %v1371_v40  ;;  %v566_v62 = vadd.f32 %v1345_v4, %v1374_v41 }
  0x3e   : > { %2146 = vst [vmem:[#allocation63_spill] sm:$0xff] %v1712_v13  ;;  %2147 = vst [vmem:[#allocation64_spill] sm:$0xff] %v1723_v56  ;;  %v305_v13 = vld [vmem:[%s1198_s19 + $0x348] sm:$0xff]  ;;  %v306_v52 = vld [vmem:[%s1198_s19 + $0x350] sm:$0xff]  ;;  %v1749_v56 = vmul.f32 %v1241_v28, %v300_v39  ;;  %v1759_v16 = vmul.f32 %v1249_v30, %v302_v0  ;;  %v1762_v17 = vmul.f32 %v1253_v31, %v303_v55 }
  0x3f   : > { %2148 = vst [vmem:[#allocation65_spill] sm:$0xff] %v1726_v34  ;;  %v307_v3 = vld [vmem:[%s1198_s19 + $0x358] sm:$0xff]  ;;  %2149 = vst [vmem:[#allocation66_spill] sm:$0xff] %v1734_v38  ;;  %v308_v57 = vld [vmem:[%s1198_s19 + $0x360] sm:$0xff]  ;;  %v1756_v38 = vmul.f32 %v1245_v29, %v301_v54  ;;  %v561_v63 = vadd.f32 %v1396_v7, %v1351_v25  ;;  %v1771_v40 = vmul.f32 %v1225_v22, %v306_v52 }
  0x40   : > { %v309_v34 = vld [vmem:[%s1198_s19 + $0x368] sm:$0xff]  ;;  %2150 = vst [vmem:[#allocation67_spill] sm:$0xff] %v1746_v15  ;;  %2151 = vst [vmem:[#allocation68_spill] sm:$0xff] %v1759_v16  ;;  %v310_v39 = vld [vmem:[%s1198_s19 + $0x370] sm:$0xff]  ;;  %v1768_v15 = vmul.f32 %v1221_v21, %v305_v13  ;;  %v1774_v41 = vmul.f32 %v1229_v23, %v307_v3  ;;  %v562_v54 = vadd.f32 %v1413_v8, %v1354_v26 }
  0x41   : > { %2152 = vst [vmem:[#allocation69_spill] sm:$0xff] %v1762_v17  ;;  %2154 = vst [vmem:[#allocation71_spill] sm:$0xff] %v1771_v40  ;;  %v1779_v0 = vmul.f32 %v1241_v28, %v308_v57  ;;  %v1782_v55 = vmul.f32 %v1245_v29, %v309_v34  ;;  %v563_v25 = vadd.f32 %v1430_v9, %v1357_v27  ;;  %v2158_v40 = vld [vmem:[#allocation5_spill] sm:$0xff]  ;;  %v2160_v34 = vld [vmem:[#allocation7_spill] sm:$0xff] }
  0x42   : > { %2153 = vst [vmem:[#allocation70_spill] sm:$0xff] %v1768_v15  ;;  %2155 = vst [vmem:[#allocation72_spill] sm:$0xff] %v1774_v41  ;;  %v567_v13 = vadd.f32 %v1362_v5, %v1385_v53  ;;  %v690_v52 = vmax.f32 %v565_v58, %v557_v20  ;;  %v711_v15 = vmax.f32 %v566_v62, %v558_v60  ;;  %v2159_v41 = vld [vmem:[#allocation6_spill] sm:$0xff]  ;;  %v2161_v17 = vld [vmem:[#allocation8_spill] sm:$0xff] }
  0x43   : > { %2156 = vst [vmem:[#allocation73_spill] sm:$0xff] %v1779_v0  ;;  %2157 = vst [vmem:[#allocation74_spill] sm:$0xff] %v1782_v55  ;;  %v568_v3 = vadd.f32 %v1379_v6, %v2158_v40  ;;  %v569_v26 = vadd.f32 %v1396_v7, %v2159_v41  ;;  %v1793_v57 = vmul.f32 %v1249_v30, %v310_v39  ;;  %v2162_v60 = vld [vmem:[#allocation10_spill] sm:$0xff]  ;;  %v2163_v39 = vld [vmem:[#allocation11_spill] sm:$0xff] }
  0x44   : > { %v732_v0 = vmax.f32 %v567_v13, %v559_v48  ;;  %v570_v55 = vadd.f32 %v1413_v8, %v2160_v34  ;;  %v571_v27 = vadd.f32 %v1430_v9, %v2161_v17  ;;  %v573_v20 = vadd.f32 %v1328_v11, %v1419_v18  ;;  %v2164_v17 = vld [vmem:[#allocation12_spill] sm:$0xff] }
  0x45   : > { %v753_v16 = vmax.f32 %v568_v3, %v560_v46  ;;  %v774_v53 = vmax.f32 %v569_v26, %v561_v63  ;;  %v574_v58 = vadd.f32 %v1345_v4, %v2162_v60  ;;  %v575_v48 = vadd.f32 %v1362_v5, %v2163_v39  ;;  %v2165_v63 = vld [vmem:[#allocation13_spill] sm:$0xff]  ;;  %v2166_v18 = vld [vmem:[#allocation4_spill] sm:$0xff]  ;;  %v2168_v39 = vld [vmem:[#allocation18_spill] sm:$0xff] }
  0x46   : > { %v795_v62 = vmax.f32 %v570_v55, %v562_v54  ;;  %v816_v40 = vmax.f32 %v571_v27, %v563_v25  ;;  %v576_v41 = vadd.f32 %v1379_v6, %v1436_v32  ;;  %v691_v13 = vmax.f32 %v690_v52, %v573_v20  ;;  %v311_v27 = vld [vmem:[%s1198_s19 + $0x378] sm:$0xff] }
  0x47   : > { %v712_v34 = vmax.f32 %v711_v15, %v574_v58  ;;  %v577_v46 = vadd.f32 %v1396_v7, %v2164_v17  ;;  %v578_v3 = vadd.f32 %v1413_v8, %v2165_v63  ;;  %v1813_v26 = vadd.f32 %v1313_v59, %v2166_v18  ;;  %v2167_v15 = vld [vmem:[#allocation16_spill] sm:$0xff]  ;;  %v2169_v63 = vld [vmem:[#allocation19_spill] sm:$0xff] }
  0x48   : > { %v733_v54 = vmax.f32 %v732_v0, %v575_v48  ;;  %v754_v55 = vmax.f32 %v753_v16, %v576_v41  ;;  %v579_v25 = vadd.f32 %v1430_v9, %v1452_v19  ;;  %v581_v20 = vadd.f32 %v1328_v11, %v2167_v15  ;;  %v2171_v41 = vld [vmem:[#allocation22_spill] sm:$0xff] }
  0x49   : > { %v775_v32 = vmax.f32 %v774_v53, %v577_v46  ;;  %v796_v52 = vmax.f32 %v795_v62, %v578_v3  ;;  %v582_v60 = vadd.f32 %v1345_v4, %v1468_v33  ;;  %v583_v17 = vadd.f32 %v1362_v5, %v2168_v39  ;;  %v2170_v53 = vld [vmem:[#allocation21_spill] sm:$0xff]  ;;  %v313_v3 = vld [vmem:[%s1198_s19 + $0x388] sm:$0xff] }
  0x4a   : > { %v817_v58 = vmax.f32 %v816_v40, %v579_v25  ;;  %v584_v0 = vadd.f32 %v1379_v6, %v2169_v63  ;;  %v585_v16 = vadd.f32 %v1396_v7, %v1484_v47  ;;  %v692_v19 = vmax.f32 %v691_v13, %v581_v20  ;;  %v2172_v13 = vld [vmem:[#allocation25_spill] sm:$0xff]  ;;  %v2174_v63 = vld [vmem:[#allocation28_spill] sm:$0xff] }
  0x4b   : > { %v713_v48 = vmax.f32 %v712_v34, %v582_v60  ;;  %v586_v62 = vadd.f32 %v1413_v8, %v2170_v53  ;;  %v587_v46 = vadd.f32 %v1430_v9, %v2171_v41  ;;  %v1834_v33 = vmul.f32 %v1253_v31, %v311_v27  ;;  %v2173_v60 = vld [vmem:[#allocation27_spill] sm:$0xff] }
  0x4c   : > { %v734_v40 = vmax.f32 %v733_v54, %v583_v17  ;;  %v755_v18 = vmax.f32 %v754_v55, %v584_v0  ;;  %v776_v25 = vmax.f32 %v775_v32, %v585_v16  ;;  %v589_v47 = vadd.f32 %v1328_v11, %v1503_v12  ;;  %v314_v0 = vld [vmem:[%s1198_s19 + $0x390] sm:$0xff]  ;;  %v315_v16 = vld [vmem:[%s1198_s19 + $0x398] sm:$0xff] }
  0x4d   : > { %v797_v15 = vmax.f32 %v796_v52, %v586_v62  ;;  %v818_v39 = vmax.f32 %v817_v58, %v587_v46  ;;  %v590_v34 = vadd.f32 %v1345_v4, %v2172_v13  ;;  %v591_v20 = vadd.f32 %v1362_v5, %v1516_v10  ;;  %v2175_v58 = vld [vmem:[#allocation30_spill] sm:$0xff]  ;;  %v2176_v13 = vld [vmem:[#allocation33_spill] sm:$0xff] }
  0x4e   : > { %v592_v27 = vadd.f32 %v1379_v6, %v2173_v60  ;;  %v593_v54 = vadd.f32 %v1396_v7, %v2174_v63  ;;  %v594_v55 = vadd.f32 %v1413_v8, %v1532_v2  ;;  %v1849_v32 = vmul.f32 %v1221_v21, %v313_v3  ;;  %v317_v63 = vld [vmem:[%s1198_s19 + $0x3a8] sm:$0xff] }
  0x4f   : > { %v693_v52 = vmax.f32 %v692_v19, %v589_v47  ;;  %v714_v12 = vmax.f32 %v713_v48, %v590_v34  ;;  %v595_v17 = vadd.f32 %v1430_v9, %v2175_v58  ;;  %v735_v10 = vmax.f32 %v734_v40, %v591_v20  ;;  %v2177_v19 = vld [vmem:[#allocation34_spill] sm:$0xff]  ;;  %v2178_v34 = vld [vmem:[#allocation36_spill] sm:$0xff] }
  0x50   : > { %v756_v53 = vmax.f32 %v755_v18, %v592_v27  ;;  %v777_v62 = vmax.f32 %v776_v25, %v593_v54  ;;  %v798_v41 = vmax.f32 %v797_v15, %v594_v55  ;;  %v597_v2 = vadd.f32 %v1328_v11, %v1548_v24  ;;  %v2179_v18 = vld [vmem:[#allocation37_spill] sm:$0xff]  ;;  %v316_v27 = vld [vmem:[%s1198_s19 + $0x3a0] sm:$0xff] }
  0x51   : > { %v819_v46 = vmax.f32 %v818_v39, %v595_v17  ;;  %v598_v3 = vadd.f32 %v1345_v4, %v2176_v13  ;;  %v599_v48 = vadd.f32 %v1362_v5, %v2177_v19  ;;  %v600_v47 = vadd.f32 %v1379_v6, %v1564_v35  ;;  %v2181_v19 = vld [vmem:[#allocation40_spill] sm:$0xff] }
  0x52   : > { %v601_v40 = vadd.f32 %v1396_v7, %v2178_v34  ;;  %v602_v25 = vadd.f32 %v1413_v8, %v2179_v18  ;;  %v603_v15 = vadd.f32 %v1430_v9, %v1580_v36  ;;  %v1870_v24 = vmul.f32 %v1225_v22, %v314_v0  ;;  %v2180_v0 = vld [vmem:[#allocation42_spill] sm:$0xff]  ;;  %v2184_v18 = vld [vmem:[#allocation48_spill] sm:$0xff] }
  0x53   : > { %v1873_v39 = vmul.f32 %v1229_v23, %v315_v16  ;;  %v715_v20 = vmax.f32 %v714_v12, %v598_v3  ;;  %v736_v60 = vmax.f32 %v735_v10, %v599_v48  ;;  %v757_v35 = vmax.f32 %v756_v53, %v600_v47  ;;  %v2182_v53 = vld [vmem:[#allocation44_spill] sm:$0xff] }
  0x54   : > { %v778_v54 = vmax.f32 %v777_v62, %v601_v40  ;;  %v799_v55 = vmax.f32 %v798_v41, %v602_v25  ;;  %v820_v58 = vmax.f32 %v819_v46, %v603_v15  ;;  %v694_v17 = vmax.f32 %v693_v52, %v597_v2  ;;  %v2183_v41 = vld [vmem:[#allocation45_spill] sm:$0xff]  ;;  %v318_v3 = vld [vmem:[%s1198_s19 + $0x3b0] sm:$0xff] }
  0x55   : > { %v606_v13 = vadd.f32 %v1345_v4, %v1596_v37  ;;  %v607_v36 = vadd.f32 %v1362_v5, %v1599_v42  ;;  %v608_v16 = vadd.f32 %v1379_v6, %v2180_v0  ;;  %v605_v12 = vadd.f32 %v1328_v11, %v2181_v19  ;;  %v319_v0 = vld [vmem:[%s1198_s19 + $0x3b8] sm:$0xff] }
  0x56   : > { %v609_v10 = vadd.f32 %v1396_v7, %v1612_v14  ;;  %v610_v62 = vadd.f32 %v1413_v8, %v2182_v53  ;;  %v611_v52 = vadd.f32 %v1430_v9, %v2183_v41  ;;  %v1892_v37 = vmul.f32 %v1241_v28, %v316_v27  ;;  %v2185_v27 = vld [vmem:[#allocation50_spill] sm:$0xff]  ;;  %v2188_v53 = vld [vmem:[#allocation55_spill] sm:$0xff]  ;;  %v2189_v41 = vld [vmem:[#allocation57_spill] sm:$0xff] }
  0x57   : > { %v1895_v42 = vmul.f32 %v1245_v29, %v317_v63  ;;  %v716_v46 = vmax.f32 %v715_v20, %v606_v13  ;;  %v758_v2 = vmax.f32 %v757_v35, %v608_v16  ;;  %v737_v48 = vmax.f32 %v736_v60, %v607_v36  ;;  %v2186_v35 = vld [vmem:[#allocation47_spill] sm:$0xff] }
  0x58   : > { %v779_v47 = vmax.f32 %v778_v54, %v609_v10  ;;  %v800_v34 = vmax.f32 %v799_v55, %v610_v62  ;;  %v821_v14 = vmax.f32 %v820_v58, %v611_v52  ;;  %v614_v40 = vadd.f32 %v1345_v4, %v1631_v44  ;;  %v2187_v13 = vld [vmem:[#allocation51_spill] sm:$0xff] }
  0x59   : > { %v615_v25 = vadd.f32 %v1362_v5, %v2184_v18  ;;  %v616_v15 = vadd.f32 %v1379_v6, %v1644_v43  ;;  %v617_v63 = vadd.f32 %v1396_v7, %v2185_v27  ;;  %v695_v20 = vmax.f32 %v694_v17, %v605_v12 }
  0x5a   : > { %v613_v60 = vadd.f32 %v1328_v11, %v2186_v35  ;;  %v618_v54 = vadd.f32 %v1413_v8, %v2187_v13  ;;  %v619_v55 = vadd.f32 %v1430_v9, %v1660_v1  ;;  %v1913_v44 = vmul.f32 %v1249_v30, %v318_v3  ;;  %v324_v35 = vld [vmem:[%s1198_s19 + $0x3e0] sm:$0xff] }
  0x5b   : > { %v717_v58 = vmax.f32 %v716_v46, %v614_v40  ;;  %v759_v36 = vmax.f32 %v758_v2, %v616_v15  ;;  %v780_v43 = vmax.f32 %v779_v47, %v617_v63  ;;  %v738_v16 = vmax.f32 %v737_v48, %v615_v25  ;;  %v2190_v2 = vld [vmem:[#allocation53_spill] sm:$0xff]  ;;  %v2191_v47 = vld [vmem:[#allocation58_spill] sm:$0xff] }
  0x5c   : > { %v801_v19 = vmax.f32 %v800_v34, %v618_v54  ;;  %v822_v17 = vmax.f32 %v821_v14, %v619_v55  ;;  %v622_v12 = vadd.f32 %v1345_v4, %v1666_v61  ;;  %v623_v10 = vadd.f32 %v1362_v5, %v1676_v45  ;;  %v322_v34 = vld [vmem:[%s1198_s19 + $0x3d0] sm:$0xff]  ;;  %v2192_v15 = vld [vmem:[#allocation61_spill] sm:$0xff]  ;;  %v2193_v63 = vld [vmem:[#allocation62_spill] sm:$0xff] }
  0x5d   : > { %v624_v1 = vadd.f32 %v1379_v6, %v1679_v50  ;;  %v625_v62 = vadd.f32 %v1396_v7, %v2188_v53  ;;  %v626_v52 = vadd.f32 %v1413_v8, %v2189_v41  ;;  %v696_v46 = vmax.f32 %v695_v20, %v613_v60  ;;  %v2194_v60 = vld [vmem:[#allocation63_spill] sm:$0xff]  ;;  %v2195_v55 = vld [vmem:[#allocation64_spill] sm:$0xff] }
  0x5e   : > { %v621_v3 = vadd.f32 %v1328_v11, %v2190_v2  ;;  %v718_v48 = vmax.f32 %v717_v58, %v622_v12  ;;  %v627_v61 = vadd.f32 %v1430_v9, %v2191_v47  ;;  %v1932_v45 = vmul.f32 %v1253_v31, %v319_v0  ;;  %v326_v47 = vld [vmem:[%s1198_s19 + $0x3f0] sm:$0xff] }
  0x5f   : > { %v760_v50 = vmax.f32 %v759_v36, %v624_v1  ;;  %v781_v14 = vmax.f32 %v780_v43, %v625_v62  ;;  %v802_v40 = vmax.f32 %v801_v19, %v626_v52  ;;  %v739_v18 = vmax.f32 %v738_v16, %v623_v10  ;;  %v2196_v36 = vld [vmem:[#allocation65_spill] sm:$0xff]  ;;  %v2197_v19 = vld [vmem:[#allocation59_spill] sm:$0xff] }
  0x60   : > { %v823_v25 = vmax.f32 %v822_v17, %v627_v61  ;;  %v630_v27 = vadd.f32 %v1345_v4, %v2192_v15  ;;  %v631_v20 = vadd.f32 %v1362_v5, %v2193_v63  ;;  %v632_v13 = vadd.f32 %v1379_v6, %v2194_v60  ;;  %v325_v10 = vld [vmem:[%s1198_s19 + $0x3e8] sm:$0xff]  ;;  %v2199_v61 = vld [vmem:[#allocation68_spill] sm:$0xff]  ;;  %v2203_v60 = vld [vmem:[#allocation73_spill] sm:$0xff] }
  0x61   : > { %v633_v54 = vadd.f32 %v1396_v7, %v1720_v51  ;;  %v634_v58 = vadd.f32 %v1413_v8, %v2195_v55  ;;  %v635_v43 = vadd.f32 %v1430_v9, %v2196_v36  ;;  %v1948_v0 = vmul.f32 %v1225_v22, %v322_v34  ;;  %v327_v55 = vld [vmem:[%s1198_s19 + $0x3f8] sm:$0xff]  ;;  %v2205_v36 = vld [vmem:[#allocation72_spill] sm:$0xff] }
  0x62   : > { %v697_v16 = vmax.f32 %v696_v46, %v621_v3  ;;  %v629_v17 = vadd.f32 %v1328_v11, %v2197_v19  ;;  %v719_v12 = vmax.f32 %v718_v48, %v630_v27  ;;  %v761_v1 = vmax.f32 %v760_v50, %v632_v13  ;;  %v2198_v46 = vld [vmem:[#allocation67_spill] sm:$0xff]  ;;  %v2200_v50 = vld [vmem:[#allocation69_spill] sm:$0xff] }
  0x63   : > { %v782_v53 = vmax.f32 %v781_v14, %v633_v54  ;;  %v803_v62 = vmax.f32 %v802_v40, %v634_v58  ;;  %v824_v51 = vmax.f32 %v823_v25, %v635_v43  ;;  %v494_v41 = vmul.f32 %v1241_v28, %v324_v35  ;;  %v2201_v40 = vld [vmem:[#allocation66_spill] sm:$0xff]  ;;  %v323_v19 = vld [vmem:[%s1198_s19 + $0x3d8] sm:$0xff] }
  0x64   : > { %v740_v52 = vmax.f32 %v739_v18, %v631_v20  ;;  %v638_v2 = vadd.f32 %v1345_v4, %v1737_v49  ;;  %v640_v22 = vadd.f32 %v1379_v6, %v1749_v56  ;;  %v639_v3 = vadd.f32 %v1362_v5, %v2198_v46  ;;  %v2202_v20 = vld [vmem:[#allocation71_spill] sm:$0xff] }
  0x65   : > { %v641_v48 = vadd.f32 %v1396_v7, %v1756_v38  ;;  %v642_v34 = vadd.f32 %v1413_v8, %v2199_v61  ;;  %v643_v28 = vadd.f32 %v1430_v9, %v2200_v50  ;;  %v495_v14 = vmul.f32 %v1245_v29, %v325_v10  ;;  %v2204_v29 = vld [vmem:[#allocation74_spill] sm:$0xff] }
  0x66   : > { %v698_v49 = vmax.f32 %v697_v16, %v629_v17  ;;  %v637_v56 = vadd.f32 %v1328_v11, %v2201_v40  ;;  %v762_v18 = vmax.f32 %v761_v1, %v640_v22  ;;  %v720_v25 = vmax.f32 %v719_v12, %v638_v2  ;;  %v2206_v12 = vld [vmem:[#allocation70_spill] sm:$0xff] }
  0x67   : > { %v783_v15 = vmax.f32 %v782_v53, %v641_v48  ;;  %v804_v27 = vmax.f32 %v803_v62, %v642_v34  ;;  %v825_v63 = vmax.f32 %v824_v51, %v643_v28  ;;  %v496_v38 = vmul.f32 %v1249_v30, %v326_v47  ;;  %v321_v62 = vld [vmem:[%s1198_s19 + $0x3c8] sm:$0xff] }
  0x68   : > { %v646_v35 = vadd.f32 %v1345_v4, %v2202_v20  ;;  %v648_v13 = vadd.f32 %v1379_v6, %v2203_v60  ;;  %v649_v54 = vadd.f32 %v1396_v7, %v2204_v29  ;;  %v741_v58 = vmax.f32 %v740_v52, %v639_v3  ;;  %v2211_v20 = vld [vmem:[#allocation60_spill] sm:$0xff] }
  0x69   : > { %v647_v43 = vadd.f32 %v1362_v5, %v2205_v36  ;;  %v650_v16 = vadd.f32 %v1413_v8, %v1793_v57  ;;  %v651_v30 = vadd.f32 %v1430_v9, %v1834_v33  ;;  %v699_v17 = vmax.f32 %v698_v49, %v637_v56  ;;  %v2218_v36 = vld [vmem:[#allocation56_spill] sm:$0xff] }
  0x6a   : > { %v645_v10 = vadd.f32 %v1328_v11, %v2206_v12  ;;  %v763_v1 = vmax.f32 %v762_v18, %v648_v13  ;;  %v784_v53 = vmax.f32 %v783_v15, %v649_v54  ;;  %v721_v51 = vmax.f32 %v720_v25, %v646_v35  ;;  %v2208_v25 = vld [vmem:[#allocation14_spill] sm:$0xff]  ;;  %v2215_v13 = vld [vmem:[#allocation29_spill] sm:$0xff] }
  0x6b   : > { %v805_v2 = vmax.f32 %v804_v27, %v650_v16  ;;  %v826_v52 = vmax.f32 %v825_v63, %v651_v30  ;;  %v654_v22 = vadd.f32 %v1345_v4, %v1870_v24  ;;  %v497_v47 = vmul.f32 %v1253_v31, %v327_v55  ;;  %v2209_v27 = vld [vmem:[#allocation9_spill] sm:$0xff]  ;;  %v2216_v54 = vld [vmem:[#allocation54_spill] sm:$0xff]  ;;  %v2217_v55 = vld [vmem:[#allocation32_spill] sm:$0xff] }
  0x6c   : > { %v656_v57 = vadd.f32 %v1379_v6, %v1892_v37  ;;  %v657_v33 = vadd.f32 %v1396_v7, %v1895_v42  ;;  %v658_v46 = vadd.f32 %v1413_v8, %v1913_v44  ;;  %v493_v3 = vmul.f32 %v1229_v23, %v323_v19  ;;  %v272_v30 = vld [vmem:[%s1198_s19 + $0x240] sm:$0xff] }
  0x6d   : > { %v742_v48 = vmax.f32 %v741_v58, %v647_v43  ;;  %v655_v61 = vadd.f32 %v1362_v5, %v1873_v39  ;;  %v659_v24 = vadd.f32 %v1430_v9, %v1932_v45  ;;  %v491_v31 = vmul.f32 %v1221_v21, %v321_v62  ;;  %v2219_v43 = vld [vmem:[#allocation35_spill] sm:$0xff]  ;;  %v280_v19 = vld [vmem:[%s1198_s19 + $0x280] sm:$0xff]  ;;  %v2221_v62 = vld [vmem:[#allocation20_spill] sm:$0xff] }
  0x6e   : > { %v700_v34 = vmax.f32 %v699_v17, %v645_v10  ;;  %v764_v50 = vmax.f32 %v763_v1, %v656_v57  ;;  %v785_v37 = vmax.f32 %v784_v53, %v657_v33  ;;  %v653_v42 = vadd.f32 %v1328_v11, %v1849_v32  ;;  %v2207_v32 = vld [vmem:[#allocation38_spill] sm:$0xff]  ;;  %v2220_v53 = vld [vmem:[#allocation43_spill] sm:$0xff]  ;;  %v2224_v33 = vld [vmem:[#allocation24_spill] sm:$0xff] }
  0x6f   : > { %v722_v28 = vmax.f32 %v721_v51, %v654_v22  ;;  %v806_v49 = vmax.f32 %v805_v2, %v658_v46  ;;  %v827_v44 = vmax.f32 %v826_v52, %v659_v24  ;;  %v664_v23 = vadd.f32 %v1379_v6, %v494_v41  ;;  %v2210_v41 = vld [vmem:[#allocation15_spill] sm:$0xff]  ;;  %v2222_v2 = vld [vmem:[#allocation46_spill] sm:$0xff] }
  0x70   : > { %v665_v40 = vadd.f32 %v1396_v7, %v495_v14  ;;  %v666_v39 = vadd.f32 %v1413_v8, %v496_v38  ;;  %v667_v56 = vadd.f32 %v1430_v9, %v497_v47  ;;  %v743_v45 = vmax.f32 %v742_v48, %v655_v61  ;;  %v2223_v52 = vld [vmem:[#allocation23_spill] sm:$0xff] }
  0x71   : > { %v662_v21 = vadd.f32 %v1345_v4, %v1948_v0  ;;  %v663_v18 = vadd.f32 %v1362_v5, %v493_v3  ;;  %v668_v15 = vmax.f32 %v2208_v25, %v2207_v32  ;;  %v572_v6 = vadd.f32 %v1313_v59, %v2209_v27  ;;  %v2212_v4 = vld [vmem:[#allocation49_spill] sm:$0xff]  ;;  %v2213_v0 = vld [vmem:[#allocation26_spill] sm:$0xff]  ;;  %v2214_v5 = vld [vmem:[#allocation52_spill] sm:$0xff] }
  0x72   : > { %v580_v7 = vadd.f32 %v1313_v59, %v2210_v41  ;;  %v765_v8 = vmax.f32 %v764_v50, %v664_v23  ;;  %v786_v14 = vmax.f32 %v785_v37, %v665_v40  ;;  %v701_v9 = vmax.f32 %v700_v34, %v653_v42  ;;  %v2226_v34 = vld [vmem:[#allocation31_spill] sm:$0xff]  ;;  %v296_v23 = vld [vmem:[%s1198_s19 + $0x300] sm:$0xff] }
  0x73   : > { %v807_v63 = vmax.f32 %v806_v49, %v666_v39  ;;  %v828_v38 = vmax.f32 %v827_v44, %v667_v56  ;;  %v669_v35 = vmax.f32 %v668_v15, %v2211_v20  ;;  %v752_v60 = vmax.f32 %v2213_v0, %v2212_v4  ;;  %v2228_v49 = vld [vmem:[#allocation17_spill] sm:$0xff] }
  0x74   : > { %v773_v29 = vmax.f32 %v2215_v13, %v2214_v5  ;;  %v794_v58 = vmax.f32 %v2217_v55, %v2216_v54  ;;  %v815_v16 = vmax.f32 %v2219_v43, %v2218_v36  ;;  %v661_v17 = vadd.f32 %v1328_v11, %v491_v31  ;;  %v2225_v11 = vld [vmem:[#allocation3_spill] sm:$0xff]  ;;  %v320_v36 = vld [vmem:[%s1198_s19 + $0x3c0] sm:$0xff] }
  0x75   : > { %v723_v12 = vmax.f32 %v722_v28, %v662_v21  ;;  %v744_v10 = vmax.f32 %v743_v45, %v663_v18  ;;  %v670_v1 = vmax.f32 %v669_v35, %v1813_v26  ;;  %v710_v51 = vmax.f32 %v2221_v62, %v2220_v53  ;;  %v288_v26 = vld [vmem:[%s1198_s19 + $0x2c0] sm:$0xff]  ;;  %v2227_v28 = vld [vmem:[#allocation41_spill] sm:$0xff]  ;;  %v2229_v21 = vld [vmem:[#allocation39_spill] sm:$0xff] }
  0x76   : > { %v731_v22 = vmax.f32 %v2223_v52, %v2222_v2  ;;  %v766_v47 = vmax.f32 %v765_v8, %v752_v60  ;;  %v787_v57 = vmax.f32 %v786_v14, %v773_v29  ;;  %v588_v46 = vadd.f32 %v1313_v59, %v2224_v33 }
  0x77   : > { %v671_v3 = vmax.f32 %v670_v1, %v572_v6  ;;  %v808_v48 = vmax.f32 %v807_v63, %v794_v58  ;;  %v829_v61 = vmax.f32 %v828_v38, %v815_v16  ;;  %v442_v24 = vmul.f32 %v2225_v11, %v272_v30  ;;  %v304_v6 = vld [vmem:[%s1198_s19 + $0x340] sm:$0xff] }
  0x78   : > { %v450_v31 = vmul.f32 %v2225_v11, %v280_v19  ;;  %v596_v50 = vadd.f32 %v1313_v59, %v2226_v34  ;;  %v702_v37 = vmax.f32 %v701_v9, %v661_v17  ;;  %v689_v44 = vmax.f32 %v2228_v49, %v2227_v28  ;;  %v312_v9 = vld [vmem:[%s1198_s19 + $0x380] sm:$0xff] }
  0x79   : > { %v672_v42 = vmax.f32 %v671_v3, %v580_v7  ;;  %v724_v40 = vmax.f32 %v723_v12, %v710_v51  ;;  %v745_v39 = vmax.f32 %v744_v10, %v731_v22  ;;  %v767_v56 = vrot.slane %v766_v47, 4 }
  0x7a   : > { %v788_v45 = vrot.slane %v787_v57, 4  ;;  %v604_v18 = vadd.f32 %v1313_v59, %v2229_v21  ;;  %v809_v25 = vrot.slane %v808_v48, 4  ;;  %v830_v15 = vrot.slane %v829_v61, 4 }
  0x7b   : > { %v673_v32 = vmax.f32 %v672_v42, %v588_v46  ;;  %v458_v27 = vmul.f32 %v2225_v11, %v288_v26  ;;  %v466_v41 = vmul.f32 %v2225_v11, %v296_v23  ;;  %v612_v7 = vadd.f32 %v1313_v59, %v442_v24 }
  0x7c   : > { %v703_v14 = vmax.f32 %v702_v37, %v689_v44  ;;  %v725_v63 = vrot.slane %v724_v40, 4  ;;  %v746_v38 = vrot.slane %v745_v39, 4  ;;  %v768_v20 = vmax.f32 %v766_v47, %v767_v56 }
  0x7d   : > { %v674_v8 = vmax.f32 %v673_v32, %v596_v50  ;;  %v789_v35 = vmax.f32 %v787_v57, %v788_v45  ;;  %v620_v4 = vadd.f32 %v1313_v59, %v450_v31  ;;  %v810_v60 = vmax.f32 %v808_v48, %v809_v25 }
  0x7e   : > { %v831_v5 = vmax.f32 %v829_v61, %v830_v15  ;;  %v474_v13 = vmul.f32 %v2225_v11, %v304_v6  ;;  %v482_v29 = vmul.f32 %v2225_v11, %v312_v9  ;;  %v628_v54 = vadd.f32 %v1313_v59, %v458_v27  ;;  %v2230_v9 = vld [vmem:[#allocation2_spill] sm:$0xff] }
  0x7f   : > { %v675_v0 = vmax.f32 %v674_v8, %v604_v18  ;;  %v704_v58 = vrot.slane %v703_v14, 4  ;;  %v726_v43 = vmax.f32 %v724_v40, %v725_v63  ;;  %v747_v16 = vmax.f32 %v745_v39, %v746_v38 }
  0x80   : > { %v769_v30 = vrot.slane %v768_v20, 2  ;;  %v790_v19 = vrot.slane %v789_v35, 2  ;;  %v636_v17 = vadd.f32 %v1313_v59, %v466_v41  ;;  %v811_v10 = vrot.slane %v810_v60, 2 }
  0x81   : > { %v676_v55 = vmax.f32 %v675_v0, %v612_v7  ;;  %v832_v1 = vrot.slane %v831_v5, 2  ;;  %v490_v53 = vmul.f32 %v2225_v11, %v320_v36  ;;  %v644_v62 = vadd.f32 %v1313_v59, %v474_v13 }
  0x82   : > { %v705_v2 = vmax.f32 %v703_v14, %v704_v58  ;;  %v727_v52 = vrot.slane %v726_v43, 2  ;;  %v748_v22 = vrot.slane %v747_v16, 2  ;;  %v770_v47 = vmax.f32 %v768_v20, %v769_v30 }
  0x83   : > { %v677_v12 = vmax.f32 %v676_v55, %v620_v4  ;;  %v791_v57 = vmax.f32 %v789_v35, %v790_v19  ;;  %v652_v33 = vadd.f32 %v1313_v59, %v482_v29  ;;  %v812_v3 = vmax.f32 %v810_v60, %v811_v10 }
  0x84   : > { %v833_v48 = vmax.f32 %v831_v5, %v832_v1  ;;  %v660_v61 = vadd.f32 %v1313_v59, %v490_v53  ;;  %v706_v31 = vrot.slane %v705_v2, 2  ;;  %v728_v26 = vmax.f32 %v726_v43, %v727_v52 }
  0x85   : > { %v678_v51 = vmax.f32 %v677_v12, %v628_v54  ;;  %v749_v34 = vmax.f32 %v747_v16, %v748_v22  ;;  %v771_v11 = vrot.slane %v770_v47, 1  ;;  %v792_v50 = vrot.slane %v791_v57, 1 }
  0x86   : > { %v813_v42 = vrot.slane %v812_v3, 1  ;;  %v834_v28 = vrot.slane %v833_v48, 1  ;;  %v1150_v49 = vmov 1966171168   ;;  %v707_v40 = vmax.f32 %v705_v2, %v706_v31 }
  0x87   : > { %v679_v46 = vmax.f32 %v678_v51, %v636_v17  ;;  %v853_v44 = vunpack.c.l.s4 %v1150_v49  ;;  %v729_v39 = vrot.slane %v728_v26, 1  ;;  %v750_v56 = vrot.slane %v749_v34, 1 }
  0x88   : > { %v772_v45 = vmax.f32 %v770_v47, %v771_v11  ;;  %v793_v21 = vmax.f32 %v791_v57, %v792_v50  ;;  %v814_v32 = vmax.f32 %v812_v3, %v813_v42  ;;  %v835_v59 = vmax.f32 %v833_v48, %v834_v28 }
  0x89   : > { %v680_v24 = vmax.f32 %v679_v46, %v644_v62  ;;  %v854_v25 = vunpack.c.0.s8 %v853_v44  ;;  %v708_v27 = vrot.slane %v707_v40, 1  ;;  %v730_v6 = vmax.f32 %v728_v26, %v729_v39 }
  0x8a   : > { %v751_v41 = vmax.f32 %v749_v34, %v750_v56  ;;  %v850_v8 = vcombine.low %v772_v45, %v793_v21  ;;  %v851_v14 = vcombine.low %v814_v32, %v835_v59 }
  0x8b   : > { %v681_v37 = vmax.f32 %v680_v24, %v652_v33  ;;  %v857_v63 = vsub.s32 %v854_v25, %v2230_v9  ;;  %v709_v20 = vmax.f32 %v707_v40, %v708_v27 }
  0x8c   : > { %v849_v4 = vcombine.low %v730_v6, %v751_v41 }
  0x8d   : > { %v682_v23 = vmax.f32 %v681_v37, %v660_v61  ;;  %v872_v0 = vrot.slane %v850_v8, %v857_v63  ;;  %v879_v60 = vrot.slane %v851_v14, %v857_v63 }
  0x8e   : > { %v865_v29 = vrot.slane %v849_v4, %v857_v63 }
  0x8f   : > { %v683_v18 = vrot.slane %v682_v23, 4  ;;  %v881_v54 = vcombine.low %v872_v0, %v879_v60 }
  0x91   : > { %v684_v15 = vmax.f32 %v682_v23, %v683_v18  ;;  %v895_v36 = vrot.slane %v881_v54, %v857_v63 }
  0x93   : > { %v685_v7 = vrot.slane %v684_v15, 2 }
  0x95   : > { %v686_v38 = vmax.f32 %v684_v15, %v685_v7 }
  0x97   : > { %v687_v35 = vrot.slane %v686_v38, 1 }
  0x99   : > { %v688_v5 = vmax.f32 %v686_v38, %v687_v35 }
  0x9b   : > { %v848_v13 = vcombine.low %v688_v5, %v709_v20 }
  0x9d   : > { %v858_v55 = vrot.slane %v848_v13, %v857_v63 }
  0x9f   : > { %v880_v58 = vcombine.low %v858_v55, %v865_v29 }
  0xa1   : > { %v888_v43 = vrot.slane %v880_v58, %v857_v63 }
  0xa3   : > { %v896_v16 = vcombine.low %v888_v43, %v895_v36 }
  0xa5   : > { %898 = vst [vmem:[%s199_s27] sm:$0xff] %v896_v16 }
  0xa6 PF: > { %s13_s14 = sadd.s32 1, %s1148_s14   ;;  %s2231_s12 = smov %s1144_s13 }
  0xa7   : > { %p10_p5 = scmp.ge.s32.totalorder %s13_s14, 4   ;;  %s2232_s13 = smov %s2234_s15 }
  0xa9   :  { %12 = sbr.rel (!%p10_p5) target bundleno = 2 (0x2), region = 70 }

// kernel: pointnet_backbone_forward.17
= control target key start
LH: loop header
LB: loop body
LE: loop exit
PB: predicated region body
PF: predicated region fallthrough
CT: control target
= control target key end

     0   :  { %v2821_v3 = vmov 0   ;;  %s5013_s1 = inlined_call_operand.vmem [shape: bf16[128,1024], index: 1, kind: input, shape index: {}]   ;;  %s5014_s0 = inlined_call_operand.vmem [shape: f32[256,128], index: 0, kind: input, shape index: {}]   ;;  %s5015_s2 = inlined_call_operand.vmem [shape: f32[1,1024], index: 2, kind: input, shape index: {}]   ;;  %s5016_s3 = inlined_call_operand.vmem [shape: f32[256,1024], index: 3, kind: output, shape index: {0}]   ;;  %s5017_s4 = inlined_call_operand.vmem [shape: f32[1,1,1024], index: 4, kind: output, shape index: {1}]   ;;  %s5018_s5 = inlined_call_operand.vmem [shape: f32[1,1,1024], index: 5, kind: output, shape index: {2}]  }
   0x1   :  { %v66_v0 = vld [vmem:[%s5013_s1] sm:$0xff]  ;;  %v67_v2 = vld [vmem:[%s5013_s1 + $0x8] sm:$0xff]  ;;  %524 = vmatprep.mubr.bf16.mxu0 %v2821_v3  ;;  %717 = vmatprep.mubr.bf16.mxu1 %v2821_v3  ;;  %v68_v63 = vld [vmem:[%s5013_s1 + $0x10] sm:$0xff] }
   0x2   :  { %v70_v1 = vld [vmem:[%s5013_s1 + $0x20] sm:$0xff]  ;;  %v71_v5 = vld [vmem:[%s5013_s1 + $0x28] sm:$0xff] }
   0x3   :  { %v2755_v4 = vcombine.high %v66_v0, %v70_v1  ;;  %v2754_v6 = vcombine.low %v66_v0, %v70_v1  ;;  %v74_v7 = vld [vmem:[%s5013_s1 + $0x40] sm:$0xff]  ;;  %v2757_v9 = vcombine.high %v67_v2, %v71_v5  ;;  %v2756_v10 = vcombine.low %v67_v2, %v71_v5  ;;  %v75_v12 = vld [vmem:[%s5013_s1 + $0x48] sm:$0xff]  ;;  %v72_v0 = vld [vmem:[%s5013_s1 + $0x30] sm:$0xff] }
   0x4   :  { %v78_v8 = vld [vmem:[%s5013_s1 + $0x60] sm:$0xff]  ;;  %v79_v13 = vld [vmem:[%s5013_s1 + $0x68] sm:$0xff]  ;;  %v69_v1 = vld [vmem:[%s5013_s1 + $0x18] sm:$0xff] }
   0x5   :  { %v2763_v11 = vcombine.high %v74_v7, %v78_v8  ;;  %v82_v14 = vld [vmem:[%s5013_s1 + $0x80] sm:$0xff]  ;;  %492 = vmatprep.subr.bf16.mxu0 %v2755_v4  ;;  %v2765_v15 = vcombine.high %v75_v12, %v79_v13  ;;  %v83_v17 = vld [vmem:[%s5013_s1 + $0x88] sm:$0xff]  ;;  %685 = vmatprep.subr.bf16.mxu1 %v2757_v9  ;;  %v2762_v19 = vcombine.low %v74_v7, %v78_v8  ;;  %v73_v2 = vld [vmem:[%s5013_s1 + $0x38] sm:$0xff] }
   0x6   :  { %v86_v16 = vld [vmem:[%s5013_s1 + $0xa0] sm:$0xff]  ;;  %v87_v18 = vld [vmem:[%s5013_s1 + $0xa8] sm:$0xff]  ;;  %493 = vmatpush1.bf16.msra.mxu0 %v2754_v6  ;;  %686 = vmatpush1.bf16.msra.mxu1 %v2756_v10  ;;  %v2764_v20 = vcombine.low %v75_v12, %v79_v13  ;;  %v2759_v8 = vcombine.high %v68_v63, %v72_v0  ;;  %v2761_v9 = vcombine.high %v69_v1, %v73_v2  ;;  %v80_v12 = vld [vmem:[%s5013_s1 + $0x70] sm:$0xff] }
   0x7   :  { %494 = vmatprep.subr.bf16.mxu0 %v2763_v11  ;;  %v2771_v21 = vcombine.high %v82_v14, %v86_v16  ;;  %687 = vmatprep.subr.bf16.mxu1 %v2765_v15  ;;  %v2773_v22 = vcombine.high %v83_v17, %v87_v18  ;;  %v90_v23 = vld [vmem:[%s5013_s1 + $0xc0] sm:$0xff]  ;;  %v91_v25 = vld [vmem:[%s5013_s1 + $0xc8] sm:$0xff]  ;;  %v2770_v27 = vcombine.low %v82_v14, %v86_v16  ;;  %v76_v11 = vld [vmem:[%s5013_s1 + $0x50] sm:$0xff] }
   0x8   :  { %v94_v24 = vld [vmem:[%s5013_s1 + $0xe0] sm:$0xff]  ;;  %v95_v26 = vld [vmem:[%s5013_s1 + $0xe8] sm:$0xff]  ;;  %v2772_v28 = vcombine.low %v83_v17, %v87_v18  ;;  %v2758_v13 = vcombine.low %v68_v63, %v72_v0  ;;  %v77_v14 = vld [vmem:[%s5013_s1 + $0x58] sm:$0xff]  ;;  %v2760_v16 = vcombine.low %v69_v1, %v73_v2  ;;  %v2767_v17 = vcombine.high %v76_v11, %v80_v12 }
   0x9   :  { %v2779_v29 = vcombine.high %v90_v23, %v94_v24  ;;  %v2781_v30 = vcombine.high %v91_v25, %v95_v26  ;;  %v98_v31 = vld [vmem:[%s5013_s1 + $0x100] sm:$0xff]  ;;  %v99_v33 = vld [vmem:[%s5013_s1 + $0x108] sm:$0xff]  ;;  %v2778_v35 = vcombine.low %v90_v23, %v94_v24  ;;  %v2780_v36 = vcombine.low %v91_v25, %v95_v26  ;;  %v81_v15 = vld [vmem:[%s5013_s1 + $0x78] sm:$0xff] }
   0xa   :  { %495 = vmatpush1.bf16.msra.mxu0 %v2762_v19  ;;  %688 = vmatpush1.bf16.msra.mxu1 %v2764_v20  ;;  %v102_v32 = vld [vmem:[%s5013_s1 + $0x120] sm:$0xff]  ;;  %v103_v34 = vld [vmem:[%s5013_s1 + $0x128] sm:$0xff]  ;;  %v84_v18 = vld [vmem:[%s5013_s1 + $0x90] sm:$0xff]  ;;  %v2769_v20 = vcombine.high %v77_v14, %v81_v15  ;;  %v2766_v25 = vcombine.low %v76_v11, %v80_v12  ;;  %v2768_v26 = vcombine.low %v77_v14, %v81_v15 }
   0xb   :  { %496 = vmatprep.subr.bf16.mxu0 %v2771_v21  ;;  %689 = vmatprep.subr.bf16.mxu1 %v2773_v22  ;;  %v2787_v37 = vcombine.high %v98_v31, %v102_v32  ;;  %v2789_v38 = vcombine.high %v99_v33, %v103_v34  ;;  %v106_v39 = vld [vmem:[%s5013_s1 + $0x140] sm:$0xff]  ;;  %v107_v41 = vld [vmem:[%s5013_s1 + $0x148] sm:$0xff]  ;;  %v2786_v43 = vcombine.low %v98_v31, %v102_v32  ;;  %v88_v19 = vld [vmem:[%s5013_s1 + $0xb0] sm:$0xff] }
   0xc   :  { %v110_v40 = vld [vmem:[%s5013_s1 + $0x160] sm:$0xff]  ;;  %v111_v42 = vld [vmem:[%s5013_s1 + $0x168] sm:$0xff]  ;;  %v2788_v44 = vcombine.low %v99_v33, %v103_v34  ;;  %v85_v21 = vld [vmem:[%s5013_s1 + $0x98] sm:$0xff]  ;;  %v2774_v34 = vcombine.low %v84_v18, %v88_v19 }
   0xd   :  { %v2795_v45 = vcombine.high %v106_v39, %v110_v40  ;;  %v2797_v46 = vcombine.high %v107_v41, %v111_v42  ;;  %v114_v47 = vld [vmem:[%s5013_s1 + $0x180] sm:$0xff]  ;;  %v115_v49 = vld [vmem:[%s5013_s1 + $0x188] sm:$0xff]  ;;  %v2794_v51 = vcombine.low %v106_v39, %v110_v40  ;;  %v2796_v52 = vcombine.low %v107_v41, %v111_v42  ;;  %v89_v22 = vld [vmem:[%s5013_s1 + $0xb8] sm:$0xff] }
   0xe   :  { %497 = vmatpush1.bf16.msra.mxu0 %v2770_v27  ;;  %690 = vmatpush1.bf16.msra.mxu1 %v2772_v28  ;;  %v118_v48 = vld [vmem:[%s5013_s1 + $0x1a0] sm:$0xff]  ;;  %v119_v50 = vld [vmem:[%s5013_s1 + $0x1a8] sm:$0xff]  ;;  %v20_v23 = vld [vmem:[%s5014_s0 + $0x10] sm:$0xff]  ;;  %v2775_v27 = vcombine.high %v84_v18, %v88_v19  ;;  %v2777_v28 = vcombine.high %v85_v21, %v89_v22 }
   0xf   :  { %498 = vmatprep.subr.bf16.mxu0 %v2779_v29  ;;  %691 = vmatprep.subr.bf16.mxu1 %v2781_v30  ;;  %v2803_v53 = vcombine.high %v114_v47, %v118_v48  ;;  %v2805_v54 = vcombine.high %v115_v49, %v119_v50  ;;  %v122_v55 = vld [vmem:[%s5013_s1 + $0x1c0] sm:$0xff]  ;;  %v123_v57 = vld [vmem:[%s5013_s1 + $0x1c8] sm:$0xff]  ;;  %v2802_v59 = vcombine.low %v114_v47, %v118_v48  ;;  %v21_v24 = vld [vmem:[%s5014_s0 + $0x18] sm:$0xff] }
  0x10   :  { %v126_v56 = vld [vmem:[%s5013_s1 + $0x1e0] sm:$0xff]  ;;  %v127_v58 = vld [vmem:[%s5013_s1 + $0x1e8] sm:$0xff]  ;;  %v2804_v60 = vcombine.low %v115_v49, %v119_v50  ;;  %v3005_v29 = vpack.c.bf16 %v21_v24, %v20_v23  ;;  %v92_v30 = vld [vmem:[%s5013_s1 + $0xd0] sm:$0xff] }
  0x11   :  { %v2811_v61 = vcombine.high %v122_v55, %v126_v56  ;;  %v2813_v62 = vcombine.high %v123_v57, %v127_v58  ;;  %v2810_v4 = vcombine.low %v122_v55, %v126_v56  ;;  %v18_v5 = vld [vmem:[%s5014_s0] sm:$0xff]  ;;  %v19_v6 = vld [vmem:[%s5014_s0 + $0x8] sm:$0xff]  ;;  %v2812_v7 = vcombine.low %v123_v57, %v127_v58  ;;  %v96_v31 = vld [vmem:[%s5013_s1 + $0xf0] sm:$0xff] }
  0x12   :  { %499 = vmatpush1.bf16.msra.mxu0 %v2778_v35  ;;  %692 = vmatpush1.bf16.msra.mxu1 %v2780_v36  ;;  %v2969_v10 = vpack.c.bf16 %v19_v6, %v18_v5  ;;  %v93_v32 = vld [vmem:[%s5013_s1 + $0xd8] sm:$0xff]  ;;  %v2776_v35 = vcombine.low %v85_v21, %v89_v22  ;;  %v2783_v36 = vcombine.high %v92_v30, %v96_v31  ;;  %v100_v39 = vld [vmem:[%s5013_s1 + $0x110] sm:$0xff]  ;;  %v23_v41 = vld [vmem:[%s5014_s0 + $0x28] sm:$0xff] }
  0x13   :  { %500 = vmatprep.subr.bf16.mxu0 %v2787_v37  ;;  %693 = vmatprep.subr.bf16.mxu1 %v2789_v38  ;;  %v97_v33 = vld [vmem:[%s5013_s1 + $0xf8] sm:$0xff]  ;;  %v22_v37 = vld [vmem:[%s5014_s0 + $0x20] sm:$0xff]  ;;  %v104_v40 = vld [vmem:[%s5013_s1 + $0x130] sm:$0xff] }
  0x14   :  { %v2785_v38 = vcombine.high %v93_v32, %v97_v33  ;;  %v101_v42 = vld [vmem:[%s5013_s1 + $0x118] sm:$0xff]  ;;  %v3041_v47 = vpack.c.bf16 %v23_v41, %v22_v37  ;;  %v108_v49 = vld [vmem:[%s5013_s1 + $0x150] sm:$0xff]  ;;  %v26_v14 = vld [vmem:[%s5014_s0 + $0x40] sm:$0xff] }
  0x15   :  { %v112_v50 = vld [vmem:[%s5013_s1 + $0x170] sm:$0xff]  ;;  %v27_v15 = vld [vmem:[%s5014_s0 + $0x48] sm:$0xff]  ;;  %v30_v22 = vld [vmem:[%s5014_s0 + $0x60] sm:$0xff] }
  0x16   :  { %501 = vmatpush1.bf16.msra.mxu0 %v2786_v43  ;;  %694 = vmatpush1.bf16.msra.mxu1 %v2788_v44  ;;  %v105_v43 = vld [vmem:[%s5013_s1 + $0x138] sm:$0xff]  ;;  %v2782_v44 = vcombine.low %v92_v30, %v96_v31  ;;  %v2799_v55 = vcombine.high %v108_v49, %v112_v50  ;;  %v24_v56 = vld [vmem:[%s5014_s0 + $0x30] sm:$0xff]  ;;  %v2798_v63 = vcombine.low %v108_v49, %v112_v50  ;;  %v31_v23 = vld [vmem:[%s5014_s0 + $0x68] sm:$0xff] }
  0x17   :  { %502 = vmatprep.subr.bf16.mxu0 %v2795_v45  ;;  %695 = vmatprep.subr.bf16.mxu1 %v2797_v46  ;;  %v2784_v45 = vcombine.low %v93_v32, %v97_v33  ;;  %v2791_v46 = vcombine.high %v100_v39, %v104_v40  ;;  %v2793_v48 = vcombine.high %v101_v42, %v105_v43  ;;  %v116_v58 = vld [vmem:[%s5013_s1 + $0x190] sm:$0xff]  ;;  %v35_v30 = vld [vmem:[%s5014_s0 + $0x88] sm:$0xff]  ;;  %v37_v33 = vld [vmem:[%s5014_s0 + $0x98] sm:$0xff] }
  0x18   :  { %v124_v5 = vld [vmem:[%s5013_s1 + $0x1d0] sm:$0xff]  ;;  %v3101_v18 = vpack.c.bf16 %v27_v15, %v26_v14  ;;  %v3125_v24 = vpack.c.bf16 %v31_v23, %v30_v22  ;;  %v42_v41 = vld [vmem:[%s5014_s0 + $0xc0] sm:$0xff]  ;;  %v47_v49 = vld [vmem:[%s5014_s0 + $0xe8] sm:$0xff] }
  0x19   :  { %v128_v6 = vld [vmem:[%s5013_s1 + $0x1f0] sm:$0xff] }
  0x1a   :  { %503 = vmatpush1.bf16.msra.mxu0 %v2794_v51  ;;  %696 = vmatpush1.bf16.msra.mxu1 %v2796_v52  ;;  %v109_v51 = vld [vmem:[%s5013_s1 + $0x158] sm:$0xff]  ;;  %v2815_v12 = vcombine.high %v124_v5, %v128_v6  ;;  %v28_v19 = vld [vmem:[%s5014_s0 + $0x50] sm:$0xff] }
  0x1b   :  { %504 = vmatprep.subr.bf16.mxu0 %v2803_v53  ;;  %697 = vmatprep.subr.bf16.mxu1 %v2805_v54  ;;  %v113_v52 = vld [vmem:[%s5013_s1 + $0x178] sm:$0xff]  ;;  %v2790_v53 = vcombine.low %v100_v39, %v104_v40  ;;  %v2792_v54 = vcombine.low %v101_v42, %v105_v43  ;;  %v36_v32 = vld [vmem:[%s5014_s0 + $0x90] sm:$0xff]  ;;  %v43_v42 = vld [vmem:[%s5014_s0 + $0xc8] sm:$0xff] }
  0x1c   :  { %v2801_v57 = vcombine.high %v109_v51, %v113_v52  ;;  %v2800_v0 = vcombine.low %v109_v51, %v113_v52  ;;  %v41_v39 = vld [vmem:[%s5014_s0 + $0xb8] sm:$0xff]  ;;  %v3197_v43 = vpack.c.bf16 %v43_v42, %v42_v41  ;;  %v48_v51 = vld [vmem:[%s5014_s0 + $0xf0] sm:$0xff] }
  0x1d   :  { %v49_v52 = vld [vmem:[%s5014_s0 + $0xf8] sm:$0xff] }
  0x1e   :  { %505 = vmatpush1.bf16.msra.mxu0 %v2802_v59  ;;  %698 = vmatpush1.bf16.msra.mxu1 %v2804_v60  ;;  %v120_v59 = vld [vmem:[%s5013_s1 + $0x1b0] sm:$0xff]  ;;  %v25_v60 = vld [vmem:[%s5014_s0 + $0x38] sm:$0xff] }
  0x1f   :  { %506 = vmatprep.subr.bf16.mxu0 %v2811_v61  ;;  %699 = vmatprep.subr.bf16.mxu1 %v2813_v62  ;;  %v117_v61 = vld [vmem:[%s5013_s1 + $0x198] sm:$0xff]  ;;  %v2807_v1 = vcombine.high %v116_v58, %v120_v59  ;;  %v3077_v2 = vpack.c.bf16 %v25_v60, %v24_v56 }
  0x20   :  { %v121_v62 = vld [vmem:[%s5013_s1 + $0x1b8] sm:$0xff] }
  0x21   :  { %v2808_v11 = vcombine.low %v117_v61, %v121_v62 }
  0x22   :  { %507 = vmatpush1.bf16.msra.mxu0 %v2810_v4  ;;  %700 = vmatpush1.bf16.msra.mxu1 %v2812_v7  ;;  %v2809_v4 = vcombine.high %v117_v61, %v121_v62  ;;  %v125_v7 = vld [vmem:[%s5013_s1 + $0x1d8] sm:$0xff] }
  0x23   :  { %878 = vmatprep.subr.bf16.mxu0 %v2759_v8  ;;  %1071 = vmatprep.subr.bf16.mxu1 %v2761_v9  ;;  %v129_v8 = vld [vmem:[%s5013_s1 + $0x1f8] sm:$0xff]  ;;  %v2806_v9 = vcombine.low %v116_v58, %v120_v59 }
  0x25   :  { %525 = vmatmul.mubr.bf16.vlgmr.msra.gmra.mrb[0].mxu0 %v2969_v10  ;;  %718 = vmatmul.mubr.bf16.vlgmr.msra.gmra.mrb[0].mxu1 %v2969_v10 }
  0x26   :  { %879 = vmatpush1.bf16.msra.mxu0 %v2758_v13  ;;  %1072 = vmatpush1.bf16.msra.mxu1 %v2760_v16  ;;  %v2817_v13 = vcombine.high %v125_v7, %v129_v8  ;;  %v2814_v16 = vcombine.low %v124_v5, %v128_v6 }
  0x27   :  { %534 = vmatprep.mubr.bf16.mxu0 %v2821_v3  ;;  %727 = vmatprep.mubr.bf16.mxu1 %v2821_v3 }
  0x28   :  { %880 = vmatprep.subr.bf16.mxu0 %v2767_v17  ;;  %1073 = vmatprep.subr.bf16.mxu1 %v2769_v20  ;;  %v2816_v17 = vcombine.low %v125_v7, %v129_v8  ;;  %v29_v20 = vld [vmem:[%s5014_s0 + $0x58] sm:$0xff] }
  0x29   :  { %v3113_v21 = vpack.c.bf16 %v29_v20, %v28_v19 }
  0x2a   :  { %881 = vmatpush1.bf16.msra.mxu0 %v2766_v25  ;;  %1074 = vmatpush1.bf16.msra.mxu1 %v2768_v26  ;;  %v32_v25 = vld [vmem:[%s5014_s0 + $0x70] sm:$0xff]  ;;  %v33_v26 = vld [vmem:[%s5014_s0 + $0x78] sm:$0xff] }
  0x2b   :  { %882 = vmatprep.subr.bf16.mxu0 %v2775_v27  ;;  %1075 = vmatprep.subr.bf16.mxu1 %v2777_v28  ;;  %v3137_v27 = vpack.c.bf16 %v33_v26, %v32_v25  ;;  %v34_v28 = vld [vmem:[%s5014_s0 + $0x80] sm:$0xff] }
  0x2c   :  { %v3149_v31 = vpack.c.bf16 %v35_v30, %v34_v28 }
  0x2d   :  { %535 = vmatmul.mubr.bf16.gmra.mrb[4].mxu0 %v3005_v29  ;;  %728 = vmatmul.mubr.bf16.gmra.mrb[4].mxu1 %v3005_v29 }
  0x2e   :  { %544 = vmatprep.mubr.bf16.mxu0 %v2821_v3  ;;  %737 = vmatprep.mubr.bf16.mxu1 %v2821_v3 }
  0x2f   :  { %883 = vmatpush1.bf16.msra.mxu0 %v2774_v34  ;;  %1076 = vmatpush1.bf16.msra.mxu1 %v2776_v35  ;;  %v3161_v34 = vpack.c.bf16 %v37_v33, %v36_v32  ;;  %v38_v35 = vld [vmem:[%s5014_s0 + $0xa0] sm:$0xff] }
  0x30   :  { %884 = vmatprep.subr.bf16.mxu0 %v2783_v36  ;;  %1077 = vmatprep.subr.bf16.mxu1 %v2785_v38  ;;  %v39_v36 = vld [vmem:[%s5014_s0 + $0xa8] sm:$0xff]  ;;  %v40_v38 = vld [vmem:[%s5014_s0 + $0xb0] sm:$0xff] }
  0x31   :  { %v3173_v37 = vpack.c.bf16 %v39_v36, %v38_v35  ;;  %v3185_v40 = vpack.c.bf16 %v41_v39, %v40_v38 }
  0x33   :  { %885 = vmatpush1.bf16.msra.mxu0 %v2782_v44  ;;  %1078 = vmatpush1.bf16.msra.mxu1 %v2784_v45  ;;  %v44_v44 = vld [vmem:[%s5014_s0 + $0xd0] sm:$0xff]  ;;  %v45_v45 = vld [vmem:[%s5014_s0 + $0xd8] sm:$0xff] }
  0x34   :  { %886 = vmatprep.subr.bf16.mxu0 %v2791_v46  ;;  %1079 = vmatprep.subr.bf16.mxu1 %v2793_v48  ;;  %v3209_v46 = vpack.c.bf16 %v45_v45, %v44_v44  ;;  %v46_v48 = vld [vmem:[%s5014_s0 + $0xe0] sm:$0xff] }
  0x35   :  { %545 = vmatmul.mubr.bf16.gmra.mrb[8].mxu0 %v3041_v47  ;;  %738 = vmatmul.mubr.bf16.gmra.mrb[8].mxu1 %v3041_v47  ;;  %v3221_v50 = vpack.c.bf16 %v47_v49, %v46_v48 }
  0x36   :  { %554 = vmatprep.mubr.bf16.mxu0 %v2821_v3  ;;  %747 = vmatprep.mubr.bf16.mxu1 %v2821_v3 }
  0x37   :  { %887 = vmatpush1.bf16.msra.mxu0 %v2790_v53  ;;  %1080 = vmatpush1.bf16.msra.mxu1 %v2792_v54  ;;  %v3233_v53 = vpack.c.bf16 %v49_v52, %v48_v51  ;;  %v130_v54 = vld [vmem:[%s5015_s2] sm:$0xff] }
  0x38   :  { %888 = vmatprep.subr.bf16.mxu0 %v2799_v55  ;;  %1081 = vmatprep.subr.bf16.mxu1 %v2801_v57 }
  0x3b   :  { %889 = vmatpush1.bf16.msra.mxu0 %v2798_v63  ;;  %1082 = vmatpush1.bf16.msra.mxu1 %v2800_v0 }
  0x3c   :  { %890 = vmatprep.subr.bf16.mxu0 %v2807_v1  ;;  %1083 = vmatprep.subr.bf16.mxu1 %v2809_v4 }
  0x3d   :  { %555 = vmatmul.mubr.bf16.gmra.mrb[12].mxu0 %v3077_v2  ;;  %748 = vmatmul.mubr.bf16.gmra.mrb[12].mxu1 %v3077_v2 }
  0x3e   :  { %564 = vmatprep.mubr.bf16.mxu0 %v2821_v3  ;;  %757 = vmatprep.mubr.bf16.mxu1 %v2821_v3 }
  0x3f   :  { %891 = vmatpush1.bf16.msra.mxu0 %v2806_v9  ;;  %1084 = vmatpush1.bf16.msra.mxu1 %v2808_v11 }
  0x40   :  { %892 = vmatprep.subr.bf16.mxu0 %v2815_v12  ;;  %1085 = vmatprep.subr.bf16.mxu1 %v2817_v13 }
  0x43   :  { %893 = vmatpush1.bf16.msra.mxu0 %v2814_v16  ;;  %1086 = vmatpush1.bf16.msra.mxu1 %v2816_v17 }
  0x45   :  { %565 = vmatmul.mubr.bf16.gmra.mrb[16].mxu0 %v3101_v18  ;;  %758 = vmatmul.mubr.bf16.gmra.mrb[16].mxu1 %v3101_v18 }
  0x46   :  { %574 = vmatprep.mubr.bf16.mxu0 %v2821_v3  ;;  %767 = vmatprep.mubr.bf16.mxu1 %v2821_v3 }
  0x4d   :  { %575 = vmatmul.mubr.bf16.gmra.mrb[20].mxu0 %v3113_v21  ;;  %768 = vmatmul.mubr.bf16.gmra.mrb[20].mxu1 %v3113_v21 }
  0x4e   :  { %584 = vmatprep.mubr.bf16.mxu0 %v2821_v3  ;;  %777 = vmatprep.mubr.bf16.mxu1 %v2821_v3 }
  0x55   :  { %585 = vmatmul.mubr.bf16.gmra.mrb[24].mxu0 %v3125_v24  ;;  %778 = vmatmul.mubr.bf16.gmra.mrb[24].mxu1 %v3125_v24 }
  0x56   :  { %594 = vmatprep.mubr.bf16.mxu0 %v2821_v3  ;;  %787 = vmatprep.mubr.bf16.mxu1 %v2821_v3 }
  0x5d   :  { %595 = vmatmul.mubr.bf16.gmra.mrb[28].mxu0 %v3137_v27  ;;  %788 = vmatmul.mubr.bf16.gmra.mrb[28].mxu1 %v3137_v27 }
  0x5e   :  { %604 = vmatprep.mubr.bf16.mxu0 %v2821_v3  ;;  %797 = vmatprep.mubr.bf16.mxu1 %v2821_v3 }
  0x65   :  { %605 = vmatmul.mubr.bf16.gmra.mrb[32].mxu0 %v3149_v31  ;;  %798 = vmatmul.mubr.bf16.gmra.mrb[32].mxu1 %v3149_v31 }
  0x66   :  { %614 = vmatprep.mubr.bf16.mxu0 %v2821_v3  ;;  %807 = vmatprep.mubr.bf16.mxu1 %v2821_v3 }
  0x6d   :  { %615 = vmatmul.mubr.bf16.gmra.mrb[36].mxu0 %v3161_v34  ;;  %808 = vmatmul.mubr.bf16.gmra.mrb[36].mxu1 %v3161_v34 }
  0x6e   :  { %624 = vmatprep.mubr.bf16.mxu0 %v2821_v3  ;;  %817 = vmatprep.mubr.bf16.mxu1 %v2821_v3 }
  0x75   :  { %625 = vmatmul.mubr.bf16.gmra.mrb[40].mxu0 %v3173_v37  ;;  %818 = vmatmul.mubr.bf16.gmra.mrb[40].mxu1 %v3173_v37 }
  0x76   :  { %634 = vmatprep.mubr.bf16.mxu0 %v2821_v3  ;;  %827 = vmatprep.mubr.bf16.mxu1 %v2821_v3 }
  0x7d   :  { %635 = vmatmul.mubr.bf16.gmra.mrb[44].mxu0 %v3185_v40  ;;  %828 = vmatmul.mubr.bf16.gmra.mrb[44].mxu1 %v3185_v40 }
  0x7e   :  { %644 = vmatprep.mubr.bf16.mxu0 %v2821_v3  ;;  %837 = vmatprep.mubr.bf16.mxu1 %v2821_v3 }
  0x85   :  { %645 = vmatmul.mubr.bf16.gmra.mrb[48].mxu0 %v3197_v43  ;;  %838 = vmatmul.mubr.bf16.gmra.mrb[48].mxu1 %v3197_v43 }
  0x86   :  { %654 = vmatprep.mubr.bf16.mxu0 %v2821_v3  ;;  %847 = vmatprep.mubr.bf16.mxu1 %v2821_v3 }
  0x8d   :  { %655 = vmatmul.mubr.bf16.gmra.mrb[52].mxu0 %v3209_v46  ;;  %848 = vmatmul.mubr.bf16.gmra.mrb[52].mxu1 %v3209_v46 }
  0x8e   :  { %664 = vmatprep.mubr.bf16.mxu0 %v2821_v3  ;;  %857 = vmatprep.mubr.bf16.mxu1 %v2821_v3 }
  0x95   :  { %665 = vmatmul.mubr.bf16.gmra.mrb[56].mxu0 %v3221_v50  ;;  %858 = vmatmul.mubr.bf16.gmra.mrb[56].mxu1 %v3221_v50 }
  0x96   :  { %674 = vmatprep.mubr.bf16.mxu0 %v2821_v3  ;;  %867 = vmatprep.mubr.bf16.mxu1 %v2821_v3 }
  0x9d   :  { %675 = vmatmul.mubr.bf16.gmra.mrb[60].mxu0 %v3233_v53  ;;  %868 = vmatmul.mubr.bf16.gmra.mrb[60].mxu1 %v3233_v53 }
  0x9e   :  { %910 = vmatprep.mubr.bf16.mxu0 %v2821_v3  ;;  %1103 = vmatprep.mubr.bf16.mxu1 %v2821_v3 }
  0xa5   :  { %911 = vmatmul.mubr.bf16.vlgmr.msra.gmra.mrb[64].mxu0 %v2969_v10  ;;  %1104 = vmatmul.mubr.bf16.vlgmr.msra.gmra.mrb[64].mxu1 %v2969_v10  ;;  %v132_v10 = vlaneseq }
  0xa6   :  { %920 = vmatprep.mubr.bf16.mxu0 %v2821_v3  ;;  %1113 = vmatprep.mubr.bf16.mxu1 %v2821_v3 }
  0xad   :  { %921 = vmatmul.mubr.bf16.gmra.mrb[68].mxu0 %v3005_v29  ;;  %1114 = vmatmul.mubr.bf16.gmra.mrb[68].mxu1 %v3005_v29  ;;  %v3276_v29 = vshrl.u32 %v132_v10, 7 }
  0xae   :  { %930 = vmatprep.mubr.bf16.mxu0 %v2821_v3  ;;  %1123 = vmatprep.mubr.bf16.mxu1 %v2821_v3 }
  0xaf   :  { %v142_v55 = vsub.s32 2, %v3276_v29  ;;  %v138_v56 = vsub.s32 1, %v3276_v29  ;;  %v146_v57 = vsub.s32 3, %v3276_v29 }
  0xb1   :  { %v3292_v59 = vrot.slane %v130_v54, %v142_v55  ;;  %v3294_v60 = vrot.slane %v130_v54, %v138_v56  ;;  %v3297_v61 = vrot.slane %v130_v54, %v146_v57 }
  0xb5   :  { %931 = vmatmul.mubr.bf16.gmra.mrb[72].mxu0 %v3041_v47  ;;  %1124 = vmatmul.mubr.bf16.gmra.mrb[72].mxu1 %v3041_v47  ;;  %v134_v47 = vsub.s32 0, %v3276_v29 }
  0xb6   :  { %940 = vmatprep.mubr.bf16.mxu0 %v2821_v3  ;;  %1133 = vmatprep.mubr.bf16.mxu1 %v2821_v3 }
  0xb7   :  { %v3289_v58 = vrot.slane %v130_v54, %v134_v47 }
  0xbd   :  { %941 = vmatmul.mubr.bf16.gmra.mrb[76].mxu0 %v3077_v2  ;;  %1134 = vmatmul.mubr.bf16.gmra.mrb[76].mxu1 %v3077_v2 }
  0xbe   :  { %950 = vmatprep.mubr.bf16.mxu0 %v2821_v3  ;;  %1143 = vmatprep.mubr.bf16.mxu1 %v2821_v3 }
  0xc5   :  { %951 = vmatmul.mubr.bf16.gmra.mrb[80].mxu0 %v3101_v18  ;;  %1144 = vmatmul.mubr.bf16.gmra.mrb[80].mxu1 %v3101_v18 }
  0xc6   :  { %960 = vmatprep.mubr.bf16.mxu0 %v2821_v3  ;;  %1153 = vmatprep.mubr.bf16.mxu1 %v2821_v3 }
  0xcd   :  { %961 = vmatmul.mubr.bf16.gmra.mrb[84].mxu0 %v3113_v21  ;;  %1154 = vmatmul.mubr.bf16.gmra.mrb[84].mxu1 %v3113_v21 }
  0xce   :  { %970 = vmatprep.mubr.bf16.mxu0 %v2821_v3  ;;  %1163 = vmatprep.mubr.bf16.mxu1 %v2821_v3 }
  0xd5   :  { %971 = vmatmul.mubr.bf16.gmra.mrb[88].mxu0 %v3125_v24  ;;  %1164 = vmatmul.mubr.bf16.gmra.mrb[88].mxu1 %v3125_v24 }
  0xd6   :  { %980 = vmatprep.mubr.bf16.mxu0 %v2821_v3  ;;  %1173 = vmatprep.mubr.bf16.mxu1 %v2821_v3 }
  0xdd   :  { %981 = vmatmul.mubr.bf16.gmra.mrb[92].mxu0 %v3137_v27  ;;  %1174 = vmatmul.mubr.bf16.gmra.mrb[92].mxu1 %v3137_v27 }
  0xde   :  { %990 = vmatprep.mubr.bf16.mxu0 %v2821_v3  ;;  %1183 = vmatprep.mubr.bf16.mxu1 %v2821_v3 }
  0xe5   :  { %991 = vmatmul.mubr.bf16.gmra.mrb[96].mxu0 %v3149_v31  ;;  %1184 = vmatmul.mubr.bf16.gmra.mrb[96].mxu1 %v3149_v31 }
  0xe6   :  { %1000 = vmatprep.mubr.bf16.mxu0 %v2821_v3  ;;  %1193 = vmatprep.mubr.bf16.mxu1 %v2821_v3 }
  0xed   :  { %1001 = vmatmul.mubr.bf16.gmra.mrb[100].mxu0 %v3161_v34  ;;  %1194 = vmatmul.mubr.bf16.gmra.mrb[100].mxu1 %v3161_v34 }
  0xee   :  { %1010 = vmatprep.mubr.bf16.mxu0 %v2821_v3  ;;  %1203 = vmatprep.mubr.bf16.mxu1 %v2821_v3 }
  0xf5   :  { %1011 = vmatmul.mubr.bf16.gmra.mrb[104].mxu0 %v3173_v37  ;;  %1204 = vmatmul.mubr.bf16.gmra.mrb[104].mxu1 %v3173_v37 }
  0xf6   :  { %1020 = vmatprep.mubr.bf16.mxu0 %v2821_v3  ;;  %1213 = vmatprep.mubr.bf16.mxu1 %v2821_v3 }
  0xf8   :  { %v526_v62 = vpop.f32.mrb[0].mxu0  ;;  %v719_v0 = vpop.f32.mrb[0].mxu1 }
  0xf9   :  { %v527_v63 = vadd.f32 %v526_v62, %v3289_v58  ;;  %v528_v1 = vpop.f32.mrb[1].mxu0  ;;  %v720_v2 = vadd.f32 %v719_v0, %v3292_v59  ;;  %v721_v5 = vpop.f32.mrb[1].mxu1 }
  0xfa   :  { %v529_v4 = vadd.f32 %v528_v1, %v3294_v60  ;;  %v530_v6 = vpop.f32.mrb[2].mxu0  ;;  %v722_v8 = vadd.f32 %v721_v5, %v3297_v61  ;;  %v723_v11 = vpop.f32.mrb[2].mxu1 }
  0xfb   :  { %v1264_v7 = vmax.f32 %v527_v63, 0.0  ;;  %v531_v9 = vadd.f32 %v530_v6, %v3289_v58  ;;  %v532_v12 = vpop.f32.mrb[3].mxu0  ;;  %v1266_v13 = vmax.f32 %v720_v2, 0.0  ;;  %v724_v15 = vadd.f32 %v723_v11, %v3292_v59  ;;  %v725_v17 = vpop.f32.mrb[3].mxu1 }
  0xfc   :  { %v1265_v14 = vmax.f32 %v529_v4, 0.0  ;;  %v533_v16 = vadd.f32 %v532_v12, %v3294_v60  ;;  %v1267_v19 = vmax.f32 %v722_v8, 0.0  ;;  %v726_v21 = vadd.f32 %v725_v17, %v3297_v61 }
  0xfd   :  { %1520 = vst [vmem:[%s5016_s3] sm:$0xff] %v1264_v7  ;;  %v2131_v18 = vmul.f32 %v1264_v7, %v1264_v7  ;;  %v1272_v20 = vmax.f32 %v531_v9, 0.0  ;;  %1021 = vmatmul.mubr.bf16.gmra.mrb[108].mxu0 %v3185_v40  ;;  %1522 = vst [vmem:[%s5016_s3 + $0x10] sm:$0xff] %v1266_v13  ;;  %v2133_v22 = vmul.f32 %v1266_v13, %v1266_v13  ;;  %v1274_v24 = vmax.f32 %v724_v15, 0.0 }
  0xfe   :  { %1521 = vst [vmem:[%s5016_s3 + $0x8] sm:$0xff] %v1265_v14  ;;  %v2132_v23 = vmul.f32 %v1265_v14, %v1265_v14  ;;  %v1273_v25 = vmax.f32 %v533_v16, 0.0  ;;  %1214 = vmatmul.mubr.bf16.gmra.mrb[108].mxu1 %v3185_v40  ;;  %1030 = vmatprep.mubr.bf16.mxu0 %v2821_v3  ;;  %1523 = vst [vmem:[%s5016_s3 + $0x18] sm:$0xff] %v1267_v19  ;;  %v2134_v26 = vmul.f32 %v1267_v19, %v1267_v19 }
  0xff   :  { %1528 = vst [vmem:[%s5016_s3 + $0x40] sm:$0xff] %v1272_v20  ;;  %v1776_v27 = vadd.f32 %v1272_v20, %v1264_v7  ;;  %v2139_v28 = vmul.f32 %v1272_v20, %v1272_v20  ;;  %v1275_v30 = vmax.f32 %v726_v21, 0.0  ;;  %1223 = vmatprep.mubr.bf16.mxu1 %v2821_v3  ;;  %1530 = vst [vmem:[%s5016_s3 + $0x50] sm:$0xff] %v1274_v24 }
 0x100   :  { %v1850_v31 = vadd.f32 %v1274_v24, %v1266_v13  ;;  %v2141_v32 = vmul.f32 %v1274_v24, %v1274_v24  ;;  %1529 = vst [vmem:[%s5016_s3 + $0x48] sm:$0xff] %v1273_v25  ;;  %v1813_v33 = vadd.f32 %v1273_v25, %v1265_v14  ;;  %v2140_v34 = vmul.f32 %v1273_v25, %v1273_v25  ;;  %v536_v35 = vpop.f32.mrb[4].mxu0  ;;  %v729_v40 = vpop.f32.mrb[4].mxu1 }
 0x101   :  { %v2387_v36 = vadd.f32 %v2139_v28, %v2131_v18  ;;  %1531 = vst [vmem:[%s5016_s3 + $0x58] sm:$0xff] %v1275_v30  ;;  %v1887_v37 = vadd.f32 %v1275_v30, %v1267_v19  ;;  %v2142_v38 = vmul.f32 %v1275_v30, %v1275_v30  ;;  %v537_v39 = vadd.f32 %v536_v35, %v3289_v58  ;;  %v538_v41 = vpop.f32.mrb[5].mxu0  ;;  %v731_v49 = vpop.f32.mrb[5].mxu1 }
 0x102   :  { %v2461_v42 = vadd.f32 %v2141_v32, %v2133_v22  ;;  %v2424_v44 = vadd.f32 %v2140_v34, %v2132_v23  ;;  %v730_v45 = vadd.f32 %v729_v40, %v3292_v59  ;;  %v539_v48 = vadd.f32 %v538_v41, %v3294_v60  ;;  %v540_v51 = vpop.f32.mrb[6].mxu0  ;;  %v733_v55 = vpop.f32.mrb[6].mxu1 }
 0x103   :  { %v2498_v52 = vadd.f32 %v2142_v38, %v2134_v26  ;;  %v1280_v10 = vmax.f32 %v537_v39, 0.0  ;;  %v732_v47 = vadd.f32 %v731_v49, %v3297_v61  ;;  %v541_v54 = vadd.f32 %v540_v51, %v3289_v58  ;;  %v542_v56 = vpop.f32.mrb[7].mxu0  ;;  %v735_v1 = vpop.f32.mrb[7].mxu1 }
 0x104   :  { %v1282_v57 = vmax.f32 %v730_v45, 0.0  ;;  %v1281_v62 = vmax.f32 %v539_v48, 0.0  ;;  %v734_v63 = vadd.f32 %v733_v55, %v3292_v59  ;;  %v543_v0 = vadd.f32 %v542_v56, %v3294_v60 }
 0x105   :  { %1536 = vst [vmem:[%s5016_s3 + $0x80] sm:$0xff] %v1280_v10  ;;  %v1777_v2 = vadd.f32 %v1776_v27, %v1280_v10  ;;  %v2147_v4 = vmul.f32 %v1280_v10, %v1280_v10  ;;  %v1283_v5 = vmax.f32 %v732_v47, 0.0  ;;  %v1288_v6 = vmax.f32 %v541_v54, 0.0  ;;  %1031 = vmatmul.mubr.bf16.gmra.mrb[112].mxu0 %v3197_v43 }
 0x106   :  { %1538 = vst [vmem:[%s5016_s3 + $0x90] sm:$0xff] %v1282_v57  ;;  %v1851_v7 = vadd.f32 %v1850_v31, %v1282_v57  ;;  %v2149_v8 = vmul.f32 %v1282_v57, %v1282_v57  ;;  %1537 = vst [vmem:[%s5016_s3 + $0x88] sm:$0xff] %v1281_v62  ;;  %v1814_v9 = vadd.f32 %v1813_v33, %v1281_v62  ;;  %1224 = vmatmul.mubr.bf16.gmra.mrb[112].mxu1 %v3197_v43 }
 0x107   :  { %v2148_v11 = vmul.f32 %v1281_v62, %v1281_v62  ;;  %v2388_v12 = vadd.f32 %v2387_v36, %v2147_v4  ;;  %1539 = vst [vmem:[%s5016_s3 + $0x98] sm:$0xff] %v1283_v5  ;;  %v1888_v13 = vadd.f32 %v1887_v37, %v1283_v5  ;;  %v2150_v14 = vmul.f32 %v1283_v5, %v1283_v5 }
 0x108   :  { %1544 = vst [vmem:[%s5016_s3 + $0xc0] sm:$0xff] %v1288_v6  ;;  %v1778_v15 = vadd.f32 %v1777_v2, %v1288_v6  ;;  %1040 = vmatprep.mubr.bf16.mxu0 %v2821_v3  ;;  %v2462_v16 = vadd.f32 %v2461_v42, %v2149_v8  ;;  %v2155_v18 = vmul.f32 %v1288_v6, %v1288_v6  ;;  %v1290_v19 = vmax.f32 %v734_v63, 0.0  ;;  %v546_v20 = vpop.f32.mrb[8].mxu0  ;;  %v739_v24 = vpop.f32.mrb[8].mxu1 }
 0x109   :  { %v2425_v17 = vadd.f32 %v2424_v44, %v2148_v11  ;;  %1233 = vmatprep.mubr.bf16.mxu1 %v2821_v3  ;;  %v2499_v43 = vadd.f32 %v2498_v52, %v2150_v14  ;;  %v1289_v21 = vmax.f32 %v543_v0, 0.0  ;;  %v736_v22 = vadd.f32 %v735_v1, %v3297_v61  ;;  %v548_v25 = vpop.f32.mrb[9].mxu0  ;;  %v741_v31 = vpop.f32.mrb[9].mxu1 }
 0x10a   :  { %v547_v23 = vadd.f32 %v546_v20, %v3289_v58  ;;  %v2389_v26 = vadd.f32 %v2388_v12, %v2155_v18  ;;  %1546 = vst [vmem:[%s5016_s3 + $0xd0] sm:$0xff] %v1290_v19  ;;  %v1852_v27 = vadd.f32 %v1851_v7, %v1290_v19  ;;  %v2157_v28 = vmul.f32 %v1290_v19, %v1290_v19  ;;  %v550_v32 = vpop.f32.mrb[10].mxu0  ;;  %v743_v37 = vpop.f32.mrb[10].mxu1 }
 0x10b   :  { %v740_v30 = vadd.f32 %v739_v24, %v3292_v59  ;;  %1545 = vst [vmem:[%s5016_s3 + $0xc8] sm:$0xff] %v1289_v21  ;;  %v1815_v33 = vadd.f32 %v1814_v9, %v1289_v21  ;;  %v2156_v34 = vmul.f32 %v1289_v21, %v1289_v21  ;;  %v1291_v35 = vmax.f32 %v736_v22, 0.0  ;;  %v552_v38 = vpop.f32.mrb[11].mxu0  ;;  %v745_v44 = vpop.f32.mrb[11].mxu1 }
 0x10c   :  { %v1296_v36 = vmax.f32 %v547_v23, 0.0  ;;  %v2463_v39 = vadd.f32 %v2462_v16, %v2157_v28  ;;  %v549_v41 = vadd.f32 %v548_v25, %v3294_v60  ;;  %v742_v42 = vadd.f32 %v741_v31, %v3297_v61 }
 0x10d   :  { %v1298_v40 = vmax.f32 %v740_v30, 0.0  ;;  %v2426_v45 = vadd.f32 %v2425_v17, %v2156_v34  ;;  %1547 = vst [vmem:[%s5016_s3 + $0xd8] sm:$0xff] %v1291_v35  ;;  %v1889_v48 = vadd.f32 %v1888_v13, %v1291_v35  ;;  %v2158_v49 = vmul.f32 %v1291_v35, %v1291_v35  ;;  %1041 = vmatmul.mubr.bf16.gmra.mrb[116].mxu0 %v3209_v46 }
 0x10e   :  { %1552 = vst [vmem:[%s5016_s3 + $0x100] sm:$0xff] %v1296_v36  ;;  %v1779_v51 = vadd.f32 %v1778_v15, %v1296_v36  ;;  %v2163_v52 = vmul.f32 %v1296_v36, %v1296_v36  ;;  %v1297_v54 = vmax.f32 %v549_v41, 0.0  ;;  %1234 = vmatmul.mubr.bf16.gmra.mrb[116].mxu1 %v3209_v46  ;;  %1050 = vmatprep.mubr.bf16.mxu0 %v2821_v3  ;;  %v1299_v56 = vmax.f32 %v742_v42, 0.0 }
 0x10f   :  { %1554 = vst [vmem:[%s5016_s3 + $0x110] sm:$0xff] %v1298_v40  ;;  %v1853_v10 = vadd.f32 %v1852_v27, %v1298_v40  ;;  %v2165_v47 = vmul.f32 %v1298_v40, %v1298_v40  ;;  %v2500_v55 = vadd.f32 %v2499_v43, %v2158_v49  ;;  %v551_v57 = vadd.f32 %v550_v32, %v3289_v58 }
 0x110   :  { %v744_v62 = vadd.f32 %v743_v37, %v3292_v59  ;;  %1243 = vmatprep.mubr.bf16.mxu1 %v2821_v3  ;;  %v2390_v63 = vadd.f32 %v2389_v26, %v2163_v52  ;;  %1553 = vst [vmem:[%s5016_s3 + $0x108] sm:$0xff] %v1297_v54  ;;  %v1816_v1 = vadd.f32 %v1815_v33, %v1297_v54  ;;  %v556_v4 = vpop.f32.mrb[12].mxu0  ;;  %1555 = vst [vmem:[%s5016_s3 + $0x118] sm:$0xff] %v1299_v56  ;;  %v749_v8 = vpop.f32.mrb[12].mxu1 }
 0x111   :  { %v2464_v0 = vadd.f32 %v2463_v39, %v2165_v47  ;;  %v2164_v2 = vmul.f32 %v1297_v54, %v1297_v54  ;;  %v1890_v46 = vadd.f32 %v1889_v48, %v1299_v56  ;;  %v2166_v5 = vmul.f32 %v1299_v56, %v1299_v56  ;;  %v558_v9 = vpop.f32.mrb[13].mxu0  ;;  %v751_v15 = vpop.f32.mrb[13].mxu1 }
 0x112   :  { %v1304_v6 = vmax.f32 %v551_v57, 0.0  ;;  %v1306_v7 = vmax.f32 %v744_v62, 0.0  ;;  %v553_v12 = vadd.f32 %v552_v38, %v3294_v60  ;;  %v746_v13 = vadd.f32 %v745_v44, %v3297_v61  ;;  %v560_v16 = vpop.f32.mrb[14].mxu0  ;;  %v753_v43 = vpop.f32.mrb[14].mxu1 }
 0x113   :  { %v2427_v11 = vadd.f32 %v2426_v45, %v2164_v2  ;;  %v557_v14 = vadd.f32 %v556_v4, %v3289_v58  ;;  %v2501_v17 = vadd.f32 %v2500_v55, %v2166_v5  ;;  %v562_v21 = vpop.f32.mrb[15].mxu0  ;;  %v755_v26 = vpop.f32.mrb[15].mxu1  ;;  %v750_v28 = vadd.f32 %v749_v8, %v3292_v59 }
 0x114   :  { %1560 = vst [vmem:[%s5016_s3 + $0x140] sm:$0xff] %v1304_v6  ;;  %v1780_v18 = vadd.f32 %v1779_v51, %v1304_v6  ;;  %v2171_v19 = vmul.f32 %v1304_v6, %v1304_v6  ;;  %1562 = vst [vmem:[%s5016_s3 + $0x150] sm:$0xff] %v1306_v7  ;;  %v1854_v20 = vadd.f32 %v1853_v10, %v1306_v7  ;;  %v1305_v23 = vmax.f32 %v553_v12, 0.0 }
 0x115   :  { %v2173_v22 = vmul.f32 %v1306_v7, %v1306_v7  ;;  %v1307_v24 = vmax.f32 %v746_v13, 0.0  ;;  %v1312_v25 = vmax.f32 %v557_v14, 0.0  ;;  %v559_v30 = vadd.f32 %v558_v9, %v3294_v60  ;;  %1051 = vmatmul.mubr.bf16.gmra.mrb[120].mxu0 %v3221_v50 }
 0x116   :  { %v2391_v27 = vadd.f32 %v2390_v63, %v2171_v19  ;;  %v752_v31 = vadd.f32 %v751_v15, %v3297_v61  ;;  %1561 = vst [vmem:[%s5016_s3 + $0x148] sm:$0xff] %v1305_v23  ;;  %v1817_v33 = vadd.f32 %v1816_v1, %v1305_v23  ;;  %v2172_v34 = vmul.f32 %v1305_v23, %v1305_v23 }
 0x117   :  { %v2465_v32 = vadd.f32 %v2464_v0, %v2173_v22  ;;  %1563 = vst [vmem:[%s5016_s3 + $0x158] sm:$0xff] %v1307_v24  ;;  %v1891_v35 = vadd.f32 %v1890_v46, %v1307_v24  ;;  %1568 = vst [vmem:[%s5016_s3 + $0x180] sm:$0xff] %v1312_v25  ;;  %1244 = vmatmul.mubr.bf16.gmra.mrb[120].mxu1 %v3221_v50  ;;  %v2174_v36 = vmul.f32 %v1307_v24, %v1307_v24 }
 0x118   :  { %v1781_v37 = vadd.f32 %v1780_v18, %v1312_v25  ;;  %v2179_v38 = vmul.f32 %v1312_v25, %v1312_v25  ;;  %v1314_v39 = vmax.f32 %v750_v28, 0.0  ;;  %1060 = vmatprep.mubr.bf16.mxu0 %v2821_v3  ;;  %1253 = vmatprep.mubr.bf16.mxu1 %v2821_v3  ;;  %v2428_v40 = vadd.f32 %v2427_v11, %v2172_v34  ;;  %v566_v45 = vpop.f32.mrb[16].mxu0  ;;  %v759_v52 = vpop.f32.mrb[16].mxu1 }
 0x119   :  { %v1313_v41 = vmax.f32 %v559_v30, 0.0  ;;  %v1315_v42 = vmax.f32 %v752_v31, 0.0  ;;  %v561_v44 = vadd.f32 %v560_v16, %v3289_v58  ;;  %v2502_v48 = vadd.f32 %v2501_v17, %v2174_v36  ;;  %v568_v10 = vpop.f32.mrb[17].mxu0  ;;  %v761_v56 = vpop.f32.mrb[17].mxu1 }
 0x11a   :  { %v2392_v49 = vadd.f32 %v2391_v27, %v2179_v38  ;;  %1570 = vst [vmem:[%s5016_s3 + $0x190] sm:$0xff] %v1314_v39  ;;  %v1855_v50 = vadd.f32 %v1854_v20, %v1314_v39  ;;  %v2181_v51 = vmul.f32 %v1314_v39, %v1314_v39  ;;  %v570_v57 = vpop.f32.mrb[18].mxu0  ;;  %v754_v0 = vadd.f32 %v753_v43, %v3292_v59  ;;  %v763_v2 = vpop.f32.mrb[18].mxu1 }
 0x11b   :  { %1569 = vst [vmem:[%s5016_s3 + $0x188] sm:$0xff] %v1313_v41  ;;  %v1818_v3 = vadd.f32 %v1817_v33, %v1313_v41  ;;  %v2180_v47 = vmul.f32 %v1313_v41, %v1313_v41  ;;  %1571 = vst [vmem:[%s5016_s3 + $0x198] sm:$0xff] %v1315_v42  ;;  %v1892_v54 = vadd.f32 %v1891_v35, %v1315_v42  ;;  %v1320_v63 = vmax.f32 %v561_v44, 0.0  ;;  %v572_v4 = vpop.f32.mrb[19].mxu0  ;;  %v765_v8 = vpop.f32.mrb[19].mxu1 }
 0x11c   :  { %v2182_v55 = vmul.f32 %v1315_v42, %v1315_v42  ;;  %v2466_v62 = vadd.f32 %v2465_v32, %v2181_v51  ;;  %v563_v1 = vadd.f32 %v562_v21, %v3294_v60  ;;  %v756_v6 = vadd.f32 %v755_v26, %v3297_v61 }
 0x11d   :  { %v2429_v46 = vadd.f32 %v2428_v40, %v2180_v47  ;;  %v567_v7 = vadd.f32 %v566_v45, %v3289_v58  ;;  %1576 = vst [vmem:[%s5016_s3 + $0x1c0] sm:$0xff] %v1320_v63  ;;  %v1782_v9 = vadd.f32 %v1781_v37, %v1320_v63  ;;  %v2187_v11 = vmul.f32 %v1320_v63, %v1320_v63 }
 0x11e   :  { %v2503_v5 = vadd.f32 %v2502_v48, %v2182_v55  ;;  %v1322_v12 = vmax.f32 %v754_v0, 0.0  ;;  %v1321_v13 = vmax.f32 %v563_v1, 0.0  ;;  %1061 = vmatmul.mubr.bf16.gmra.mrb[124].mxu0 %v3233_v53  ;;  %v1323_v14 = vmax.f32 %v756_v6, 0.0 }
 0x11f   :  { %v1328_v15 = vmax.f32 %v567_v7, 0.0  ;;  %v760_v16 = vadd.f32 %v759_v52, %v3292_v59  ;;  %v569_v17 = vadd.f32 %v568_v10, %v3294_v60  ;;  %1254 = vmatmul.mubr.bf16.gmra.mrb[124].mxu1 %v3233_v53  ;;  %v2393_v18 = vadd.f32 %v2392_v49, %v2187_v11 }
 0x120   :  { %1578 = vst [vmem:[%s5016_s3 + $0x1d0] sm:$0xff] %v1322_v12  ;;  %v1856_v19 = vadd.f32 %v1855_v50, %v1322_v12  ;;  %v2189_v20 = vmul.f32 %v1322_v12, %v1322_v12  ;;  %1577 = vst [vmem:[%s5016_s3 + $0x1c8] sm:$0xff] %v1321_v13  ;;  %v1819_v43 = vadd.f32 %v1818_v3, %v1321_v13  ;;  %v576_v24 = vpop.f32.mrb[20].mxu0  ;;  %v769_v30 = vpop.f32.mrb[20].mxu1 }
 0x121   :  { %v2188_v21 = vmul.f32 %v1321_v13, %v1321_v13  ;;  %1579 = vst [vmem:[%s5016_s3 + $0x1d8] sm:$0xff] %v1323_v14  ;;  %v1893_v22 = vadd.f32 %v1892_v54, %v1323_v14  ;;  %v2190_v23 = vmul.f32 %v1323_v14, %v1323_v14  ;;  %1584 = vst [vmem:[%s5016_s3 + $0x200] sm:$0xff] %v1328_v15  ;;  %v1330_v27 = vmax.f32 %v760_v16, 0.0  ;;  %v578_v31 = vpop.f32.mrb[21].mxu0  ;;  %v771_v36 = vpop.f32.mrb[21].mxu1 }
 0x122   :  { %v1783_v53 = vadd.f32 %v1782_v9, %v1328_v15  ;;  %v2467_v25 = vadd.f32 %v2466_v62, %v2189_v20  ;;  %v2195_v26 = vmul.f32 %v1328_v15, %v1328_v15  ;;  %v1329_v28 = vmax.f32 %v569_v17, 0.0  ;;  %v580_v37 = vpop.f32.mrb[22].mxu0  ;;  %v773_v42 = vpop.f32.mrb[22].mxu1 }
 0x123   :  { %v2430_v32 = vadd.f32 %v2429_v46, %v2188_v21  ;;  %v2504_v33 = vadd.f32 %v2503_v5, %v2190_v23  ;;  %v762_v34 = vadd.f32 %v761_v56, %v3297_v61  ;;  %v571_v35 = vadd.f32 %v570_v57, %v3289_v58  ;;  %1586 = vst [vmem:[%s5016_s3 + $0x210] sm:$0xff] %v1330_v27  ;;  %v3460_v44 = vpop.f32.mrb[23].mxu0  ;;  %v775_v51 = vpop.f32.mrb[23].mxu1 }
 0x124   :  { %v2394_v38 = vadd.f32 %v2393_v18, %v2195_v26  ;;  %v1857_v39 = vadd.f32 %v1856_v19, %v1330_v27  ;;  %v2197_v40 = vmul.f32 %v1330_v27, %v1330_v27  ;;  %1585 = vst [vmem:[%s5016_s3 + $0x208] sm:$0xff] %v1329_v28  ;;  %v1820_v41 = vadd.f32 %v1819_v43, %v1329_v28 }
 0x125   :  { %v2196_v45 = vmul.f32 %v1329_v28, %v1329_v28  ;;  %v1331_v48 = vmax.f32 %v762_v34, 0.0  ;;  %v1336_v49 = vmax.f32 %v571_v35, 0.0  ;;  %v764_v50 = vadd.f32 %v763_v2, %v3292_v59 }
 0x126   :  { %v2468_v52 = vadd.f32 %v2467_v25, %v2197_v40  ;;  %v573_v10 = vadd.f32 %v572_v4, %v3294_v60  ;;  %v766_v3 = vadd.f32 %v765_v8, %v3297_v61  ;;  %v577_v47 = vadd.f32 %v576_v24, %v3289_v58 }
 0x127   :  { %v2431_v54 = vadd.f32 %v2430_v32, %v2196_v45  ;;  %1587 = vst [vmem:[%s5016_s3 + $0x218] sm:$0xff] %v1331_v48  ;;  %v1894_v55 = vadd.f32 %v1893_v22, %v1331_v48  ;;  %v2198_v56 = vmul.f32 %v1331_v48, %v1331_v48  ;;  %1592 = vst [vmem:[%s5016_s3 + $0x240] sm:$0xff] %v1336_v49  ;;  %v1338_v63 = vmax.f32 %v764_v50, 0.0 }
 0x128   :  { %v1784_v57 = vadd.f32 %v1783_v53, %v1336_v49  ;;  %v2203_v62 = vmul.f32 %v1336_v49, %v1336_v49  ;;  %v1337_v0 = vmax.f32 %v573_v10, 0.0  ;;  %v1339_v1 = vmax.f32 %v766_v3, 0.0  ;;  %v586_v6 = vpop.f32.mrb[24].mxu0  ;;  %v779_v12 = vpop.f32.mrb[24].mxu1 }
 0x129   :  { %v2505_v2 = vadd.f32 %v2504_v33, %v2198_v56  ;;  %v1344_v4 = vmax.f32 %v577_v47, 0.0  ;;  %v770_v46 = vadd.f32 %v769_v30, %v3292_v59  ;;  %v579_v5 = vadd.f32 %v578_v31, %v3294_v60  ;;  %1594 = vst [vmem:[%s5016_s3 + $0x250] sm:$0xff] %v1338_v63  ;;  %v588_v13 = vpop.f32.mrb[25].mxu0  ;;  %v3486_v18 = vpop.f32.mrb[25].mxu1 }
 0x12a   :  { %v2395_v7 = vadd.f32 %v2394_v38, %v2203_v62  ;;  %v1858_v8 = vadd.f32 %v1857_v39, %v1338_v63  ;;  %v2205_v9 = vmul.f32 %v1338_v63, %v1338_v63  ;;  %1593 = vst [vmem:[%s5016_s3 + $0x248] sm:$0xff] %v1337_v0  ;;  %v1821_v11 = vadd.f32 %v1820_v41, %v1337_v0  ;;  %v3488_v19 = vpop.f32.mrb[26].mxu0  ;;  %v3490_v23 = vpop.f32.mrb[26].mxu1 }
 0x12b   :  { %1595 = vst [vmem:[%s5016_s3 + $0x258] sm:$0xff] %v1339_v1  ;;  %v2204_v14 = vmul.f32 %v1337_v0, %v1337_v0  ;;  %v1895_v15 = vadd.f32 %v1894_v55, %v1339_v1  ;;  %v2206_v16 = vmul.f32 %v1339_v1, %v1339_v1  ;;  %1600 = vst [vmem:[%s5016_s3 + $0x280] sm:$0xff] %v1344_v4  ;;  %v1346_v21 = vmax.f32 %v770_v46, 0.0  ;;  %v3492_v53 = vpop.f32.mrb[27].mxu0  ;;  %v3496_v28 = vpop.f32.mrb[27].mxu1 }
 0x12c   :  { %v1785_v17 = vadd.f32 %v1784_v57, %v1344_v4  ;;  %v2469_v20 = vadd.f32 %v2468_v52, %v2205_v9  ;;  %v2211_v43 = vmul.f32 %v1344_v4, %v1344_v4  ;;  %v1345_v22 = vmax.f32 %v579_v5, 0.0 }
 0x12d   :  { %v2432_v24 = vadd.f32 %v2431_v54, %v2204_v14  ;;  %v2506_v25 = vadd.f32 %v2505_v2, %v2206_v16  ;;  %v772_v26 = vadd.f32 %v771_v36, %v3297_v61  ;;  %v581_v27 = vadd.f32 %v580_v37, %v3289_v58  ;;  %1602 = vst [vmem:[%s5016_s3 + $0x290] sm:$0xff] %v1346_v21 }
 0x12e   :  { %v2396_v30 = vadd.f32 %v2395_v7, %v2211_v43  ;;  %v1859_v31 = vadd.f32 %v1858_v8, %v1346_v21  ;;  %v2213_v32 = vmul.f32 %v1346_v21, %v1346_v21  ;;  %1601 = vst [vmem:[%s5016_s3 + $0x288] sm:$0xff] %v1345_v22  ;;  %v1822_v33 = vadd.f32 %v1821_v11, %v1345_v22 }
 0x12f   :  { %v2212_v34 = vmul.f32 %v1345_v22, %v1345_v22  ;;  %v1347_v35 = vmax.f32 %v772_v26, 0.0  ;;  %v1352_v38 = vmax.f32 %v581_v27, 0.0  ;;  %v774_v36 = vadd.f32 %v773_v42, %v3292_v59 }
 0x130   :  { %v2470_v37 = vadd.f32 %v2469_v20, %v2213_v32  ;;  %v583_v39 = vadd.f32 %v3460_v44, %v3294_v60  ;;  %v776_v40 = vadd.f32 %v775_v51, %v3297_v61  ;;  %v587_v41 = vadd.f32 %v586_v6, %v3289_v58  ;;  %v596_v50 = vpop.f32.mrb[28].mxu0  ;;  %v3515_v51 = vpop.f32.mrb[28].mxu1 }
 0x131   :  { %v2433_v45 = vadd.f32 %v2432_v24, %v2212_v34  ;;  %1603 = vst [vmem:[%s5016_s3 + $0x298] sm:$0xff] %v1347_v35  ;;  %v1896_v48 = vadd.f32 %v1895_v15, %v1347_v35  ;;  %v2214_v49 = vmul.f32 %v1347_v35, %v1347_v35  ;;  %1608 = vst [vmem:[%s5016_s3 + $0x2c0] sm:$0xff] %v1352_v38  ;;  %v1354_v10 = vmax.f32 %v774_v36, 0.0  ;;  %v3517_v47 = vpop.f32.mrb[29].mxu0  ;;  %v3521_v62 = vpop.f32.mrb[29].mxu1 }
 0x132   :  { %v1786_v42 = vadd.f32 %v1785_v17, %v1352_v38  ;;  %v2219_v52 = vmul.f32 %v1352_v38, %v1352_v38  ;;  %v1353_v44 = vmax.f32 %v583_v39, 0.0  ;;  %v1355_v3 = vmax.f32 %v776_v40, 0.0  ;;  %v3523_v63 = vpop.f32.mrb[30].mxu0  ;;  %v3534_v46 = vpop.f32.mrb[30].mxu1 }
 0x133   :  { %v2507_v54 = vadd.f32 %v2506_v25, %v2214_v49  ;;  %v1360_v55 = vmax.f32 %v587_v41, 0.0  ;;  %v780_v56 = vadd.f32 %v779_v12, %v3292_v59  ;;  %v589_v57 = vadd.f32 %v588_v13, %v3294_v60  ;;  %1610 = vst [vmem:[%s5016_s3 + $0x2d0] sm:$0xff] %v1354_v10  ;;  %v3536_v5 = vpop.f32.mrb[31].mxu0  ;;  %v3541_v11 = vpop.f32.mrb[31].mxu1 }
 0x134   :  { %v2397_v0 = vadd.f32 %v2396_v30, %v2219_v52  ;;  %v1860_v1 = vadd.f32 %v1859_v31, %v1354_v10  ;;  %v2221_v2 = vmul.f32 %v1354_v10, %v1354_v10  ;;  %1609 = vst [vmem:[%s5016_s3 + $0x2c8] sm:$0xff] %v1353_v44  ;;  %v1823_v4 = vadd.f32 %v1822_v33, %v1353_v44 }
 0x135   :  { %1611 = vst [vmem:[%s5016_s3 + $0x2d8] sm:$0xff] %v1355_v3  ;;  %v2220_v6 = vmul.f32 %v1353_v44, %v1353_v44  ;;  %v1897_v7 = vadd.f32 %v1896_v48, %v1355_v3  ;;  %v2222_v8 = vmul.f32 %v1355_v3, %v1355_v3  ;;  %1616 = vst [vmem:[%s5016_s3 + $0x300] sm:$0xff] %v1360_v55  ;;  %v1362_v14 = vmax.f32 %v780_v56, 0.0 }
 0x136   :  { %v1787_v9 = vadd.f32 %v1786_v42, %v1360_v55  ;;  %v2471_v12 = vadd.f32 %v2470_v37, %v2221_v2  ;;  %v2227_v13 = vmul.f32 %v1360_v55, %v1360_v55  ;;  %v1361_v15 = vmax.f32 %v589_v57, 0.0 }
 0x137   :  { %v2434_v16 = vadd.f32 %v2433_v45, %v2220_v6  ;;  %v2508_v17 = vadd.f32 %v2507_v54, %v2222_v8  ;;  %v782_v20 = vadd.f32 %v3486_v18, %v3297_v61  ;;  %v591_v43 = vadd.f32 %v3488_v19, %v3289_v58  ;;  %1618 = vst [vmem:[%s5016_s3 + $0x310] sm:$0xff] %v1362_v14 }
 0x138   :  { %v2398_v21 = vadd.f32 %v2397_v0, %v2227_v13  ;;  %v1861_v22 = vadd.f32 %v1860_v1, %v1362_v14  ;;  %v2229_v24 = vmul.f32 %v1362_v14, %v1362_v14  ;;  %1617 = vst [vmem:[%s5016_s3 + $0x308] sm:$0xff] %v1361_v15  ;;  %v1824_v25 = vadd.f32 %v1823_v4, %v1361_v15  ;;  %v3555_v31 = vpop.f32.mrb[32].mxu0  ;;  %v3562_v35 = vpop.f32.mrb[32].mxu1 }
 0x139   :  { %v2228_v26 = vmul.f32 %v1361_v15, %v1361_v15  ;;  %v1363_v27 = vmax.f32 %v782_v20, 0.0  ;;  %v1368_v30 = vmax.f32 %v591_v43, 0.0  ;;  %v784_v18 = vadd.f32 %v3490_v23, %v3292_v59  ;;  %v3564_v38 = vpop.f32.mrb[33].mxu0  ;;  %v3572_v39 = vpop.f32.mrb[33].mxu1 }
 0x13a   :  { %v2472_v19 = vadd.f32 %v2471_v12, %v2229_v24  ;;  %v593_v32 = vadd.f32 %v3492_v53, %v3294_v60  ;;  %v786_v33 = vadd.f32 %v3496_v28, %v3297_v61  ;;  %v597_v34 = vadd.f32 %v596_v50, %v3289_v58  ;;  %v3574_v28 = vpop.f32.mrb[34].mxu0  ;;  %v3576_v49 = vpop.f32.mrb[34].mxu1 }
 0x13b   :  { %v2435_v36 = vadd.f32 %v2434_v16, %v2228_v26  ;;  %1619 = vst [vmem:[%s5016_s3 + $0x318] sm:$0xff] %v1363_v27  ;;  %v1898_v23 = vadd.f32 %v1897_v7, %v1363_v27  ;;  %v2230_v37 = vmul.f32 %v1363_v27, %v1363_v27  ;;  %1624 = vst [vmem:[%s5016_s3 + $0x340] sm:$0xff] %v1368_v30  ;;  %v1370_v41 = vmax.f32 %v784_v18, 0.0  ;;  %v3578_v42 = vpop.f32.mrb[35].mxu0  ;;  %v3584_v3 = vpop.f32.mrb[35].mxu1 }
 0x13c   :  { %v1788_v53 = vadd.f32 %v1787_v9, %v1368_v30  ;;  %v2235_v40 = vmul.f32 %v1368_v30, %v1368_v30  ;;  %v1369_v45 = vmax.f32 %v593_v32, 0.0  ;;  %v1371_v48 = vmax.f32 %v786_v33, 0.0 }
 0x13d   :  { %v2509_v50 = vadd.f32 %v2508_v17, %v2230_v37  ;;  %v1376_v52 = vmax.f32 %v597_v34, 0.0  ;;  %v790_v10 = vadd.f32 %v3515_v51, %v3292_v59  ;;  %v599_v44 = vadd.f32 %v3517_v47, %v3294_v60  ;;  %1626 = vst [vmem:[%s5016_s3 + $0x350] sm:$0xff] %v1370_v41 }
 0x13e   :  { %v2399_v54 = vadd.f32 %v2398_v21, %v2235_v40  ;;  %v1862_v55 = vadd.f32 %v1861_v22, %v1370_v41  ;;  %v2237_v56 = vmul.f32 %v1370_v41, %v1370_v41  ;;  %1625 = vst [vmem:[%s5016_s3 + $0x348] sm:$0xff] %v1369_v45  ;;  %v1825_v57 = vadd.f32 %v1824_v25, %v1369_v45 }
 0x13f   :  { %1627 = vst [vmem:[%s5016_s3 + $0x358] sm:$0xff] %v1371_v48  ;;  %v2236_v51 = vmul.f32 %v1369_v45, %v1369_v45  ;;  %v1899_v47 = vadd.f32 %v1898_v23, %v1371_v48  ;;  %v2238_v0 = vmul.f32 %v1371_v48, %v1371_v48  ;;  %1632 = vst [vmem:[%s5016_s3 + $0x380] sm:$0xff] %v1376_v52  ;;  %v1378_v6 = vmax.f32 %v790_v10, 0.0 }
 0x140   :  { %v1789_v1 = vadd.f32 %v1788_v53, %v1376_v52  ;;  %v2473_v2 = vadd.f32 %v2472_v19, %v2237_v56  ;;  %v2243_v4 = vmul.f32 %v1376_v52, %v1376_v52  ;;  %v1377_v7 = vmax.f32 %v599_v44, 0.0  ;;  %v3602_v14 = vpop.f32.mrb[36].mxu0  ;;  %v3610_v43 = vpop.f32.mrb[36].mxu1 }
 0x141   :  { %v2436_v8 = vadd.f32 %v2435_v36, %v2236_v51  ;;  %v2510_v9 = vadd.f32 %v2509_v50, %v2238_v0  ;;  %v792_v12 = vadd.f32 %v3521_v62, %v3297_v61  ;;  %v601_v13 = vadd.f32 %v3523_v63, %v3289_v58  ;;  %1634 = vst [vmem:[%s5016_s3 + $0x390] sm:$0xff] %v1378_v6  ;;  %v3612_v62 = vpop.f32.mrb[37].mxu0  ;;  %v3616_v25 = vpop.f32.mrb[37].mxu1 }
 0x142   :  { %v2400_v15 = vadd.f32 %v2399_v54, %v2243_v4  ;;  %v1863_v16 = vadd.f32 %v1862_v55, %v1378_v6  ;;  %v2245_v17 = vmul.f32 %v1378_v6, %v1378_v6  ;;  %1633 = vst [vmem:[%s5016_s3 + $0x388] sm:$0xff] %v1377_v7  ;;  %v1826_v20 = vadd.f32 %v1825_v57, %v1377_v7  ;;  %v3618_v26 = vpop.f32.mrb[38].mxu0  ;;  %v3626_v32 = vpop.f32.mrb[38].mxu1 }
 0x143   :  { %v2244_v21 = vmul.f32 %v1377_v7, %v1377_v7  ;;  %v1379_v63 = vmax.f32 %v792_v12, 0.0  ;;  %v1384_v22 = vmax.f32 %v601_v13, 0.0  ;;  %v794_v24 = vadd.f32 %v3534_v46, %v3292_v59  ;;  %v3628_v33 = vpop.f32.mrb[39].mxu0 }
 0x144   :  { %v2474_v27 = vadd.f32 %v2473_v2, %v2245_v17  ;;  %v603_v30 = vadd.f32 %v3536_v5, %v3294_v60  ;;  %v796_v18 = vadd.f32 %v3541_v11, %v3297_v61  ;;  %v607_v19 = vadd.f32 %v3555_v31, %v3289_v58  ;;  %v3636_v11 = vpop.f32.mrb[39].mxu1 }
 0x145   :  { %v2437_v34 = vadd.f32 %v2436_v8, %v2244_v21  ;;  %1635 = vst [vmem:[%s5016_s3 + $0x398] sm:$0xff] %v1379_v63  ;;  %v1900_v46 = vadd.f32 %v1899_v47, %v1379_v63  ;;  %v2246_v36 = vmul.f32 %v1379_v63, %v1379_v63  ;;  %1640 = vst [vmem:[%s5016_s3 + $0x3c0] sm:$0xff] %v1384_v22  ;;  %v1386_v31 = vmax.f32 %v794_v24, 0.0 }
 0x146   :  { %v1790_v5 = vadd.f32 %v1789_v1, %v1384_v22  ;;  %v2251_v23 = vmul.f32 %v1384_v22, %v1384_v22  ;;  %v1385_v37 = vmax.f32 %v603_v30, 0.0  ;;  %v1387_v53 = vmax.f32 %v796_v18, 0.0 }
 0x147   :  { %v2511_v40 = vadd.f32 %v2510_v9, %v2246_v36  ;;  %v1392_v41 = vmax.f32 %v607_v19, 0.0  ;;  %v800_v45 = vadd.f32 %v3562_v35, %v3292_v59  ;;  %v609_v48 = vadd.f32 %v3564_v38, %v3294_v60  ;;  %1642 = vst [vmem:[%s5016_s3 + $0x3d0] sm:$0xff] %v1386_v31 }
 0x148   :  { %v2401_v50 = vadd.f32 %v2400_v15, %v2251_v23  ;;  %v1864_v52 = vadd.f32 %v1863_v16, %v1386_v31  ;;  %v2253_v10 = vmul.f32 %v1386_v31, %v1386_v31  ;;  %1641 = vst [vmem:[%s5016_s3 + $0x3c8] sm:$0xff] %v1385_v37  ;;  %v1827_v44 = vadd.f32 %v1826_v20, %v1385_v37  ;;  %v3654_v56 = vpop.f32.mrb[40].mxu0  ;;  %v3656_v1 = vpop.f32.mrb[40].mxu1 }
 0x149   :  { %1643 = vst [vmem:[%s5016_s3 + $0x3d8] sm:$0xff] %v1387_v53  ;;  %v2252_v35 = vmul.f32 %v1385_v37, %v1385_v37  ;;  %v1901_v54 = vadd.f32 %v1900_v46, %v1387_v53  ;;  %v2254_v55 = vmul.f32 %v1387_v53, %v1387_v53  ;;  %1648 = vst [vmem:[%s5016_s3 + $0x400] sm:$0xff] %v1392_v41  ;;  %v1394_v47 = vmax.f32 %v800_v45, 0.0  ;;  %v3658_v2 = vpop.f32.mrb[41].mxu0  ;;  %v3664_v9 = vpop.f32.mrb[41].mxu1 }
 0x14a   :  { %v1791_v38 = vadd.f32 %v1790_v5, %v1392_v41  ;;  %v2475_v57 = vadd.f32 %v2474_v27, %v2253_v10  ;;  %v2259_v51 = vmul.f32 %v1392_v41, %v1392_v41  ;;  %v1393_v0 = vmax.f32 %v609_v48, 0.0  ;;  %v3666_v12 = vpop.f32.mrb[42].mxu0 }
 0x14b   :  { %v2438_v4 = vadd.f32 %v2437_v34, %v2252_v35  ;;  %v2512_v6 = vadd.f32 %v2511_v40, %v2254_v55  ;;  %v802_v7 = vadd.f32 %v3572_v39, %v3297_v61  ;;  %v611_v8 = vadd.f32 %v3574_v28, %v3289_v58  ;;  %1650 = vst [vmem:[%s5016_s3 + $0x410] sm:$0xff] %v1394_v47  ;;  %v3674_v39 = vpop.f32.mrb[42].mxu1  ;;  %v3676_v20 = vpop.f32.mrb[43].mxu0 }
 0x14c   :  { %v2402_v13 = vadd.f32 %v2401_v50, %v2259_v51  ;;  %v1865_v15 = vadd.f32 %v1864_v52, %v1394_v47  ;;  %v2261_v16 = vmul.f32 %v1394_v47, %v1394_v47  ;;  %1649 = vst [vmem:[%s5016_s3 + $0x408] sm:$0xff] %v1393_v0  ;;  %v1828_v17 = vadd.f32 %v1827_v44, %v1393_v0  ;;  %v3680_v24 = vpop.f32.mrb[43].mxu1 }
 0x14d   :  { %v2260_v28 = vmul.f32 %v1393_v0, %v1393_v0  ;;  %v1395_v21 = vmax.f32 %v802_v7, 0.0  ;;  %v1400_v63 = vmax.f32 %v611_v8, 0.0  ;;  %v804_v22 = vadd.f32 %v3576_v49, %v3292_v59 }
 0x14e   :  { %v2476_v27 = vadd.f32 %v2475_v57, %v2261_v16  ;;  %v613_v30 = vadd.f32 %v3578_v42, %v3294_v60  ;;  %v806_v18 = vadd.f32 %v3584_v3, %v3297_v61  ;;  %v617_v19 = vadd.f32 %v3602_v14, %v3289_v58 }
 0x14f   :  { %v2439_v34 = vadd.f32 %v2438_v4, %v2260_v28  ;;  %1651 = vst [vmem:[%s5016_s3 + $0x418] sm:$0xff] %v1395_v21  ;;  %v1902_v46 = vadd.f32 %v1901_v54, %v1395_v21  ;;  %v2262_v36 = vmul.f32 %v1395_v21, %v1395_v21  ;;  %1656 = vst [vmem:[%s5016_s3 + $0x440] sm:$0xff] %v1400_v63  ;;  %v1402_v42 = vmax.f32 %v804_v22, 0.0 }
 0x150   :  { %v1792_v49 = vadd.f32 %v1791_v38, %v1400_v63  ;;  %v2267_v5 = vmul.f32 %v1400_v63, %v1400_v63  ;;  %v1401_v23 = vmax.f32 %v613_v30, 0.0  ;;  %v1403_v31 = vmax.f32 %v806_v18, 0.0  ;;  %v3698_v40 = vpop.f32.mrb[44].mxu0 }
 0x151   :  { %v2513_v3 = vadd.f32 %v2512_v6, %v2262_v36  ;;  %v1408_v37 = vmax.f32 %v617_v19, 0.0  ;;  %v810_v14 = vadd.f32 %v3610_v43, %v3292_v59  ;;  %v619_v53 = vadd.f32 %v3612_v62, %v3294_v60  ;;  %1658 = vst [vmem:[%s5016_s3 + $0x450] sm:$0xff] %v1402_v42  ;;  %v3709_v43 = vpop.f32.mrb[44].mxu1  ;;  %v3711_v62 = vpop.f32.mrb[45].mxu0 }
 0x152   :  { %v2403_v41 = vadd.f32 %v2402_v13, %v2267_v5  ;;  %v1866_v45 = vadd.f32 %v1865_v15, %v1402_v42  ;;  %v2269_v48 = vmul.f32 %v1402_v42, %v1402_v42  ;;  %1657 = vst [vmem:[%s5016_s3 + $0x448] sm:$0xff] %v1401_v23  ;;  %v1829_v50 = vadd.f32 %v1828_v17, %v1401_v23  ;;  %v3716_v54 = vpop.f32.mrb[45].mxu1  ;;  %v3718_v55 = vpop.f32.mrb[46].mxu0 }
 0x153   :  { %1659 = vst [vmem:[%s5016_s3 + $0x458] sm:$0xff] %v1403_v31  ;;  %v2268_v52 = vmul.f32 %v1401_v23, %v1401_v23  ;;  %v1903_v10 = vadd.f32 %v1902_v46, %v1403_v31  ;;  %v2270_v44 = vmul.f32 %v1403_v31, %v1403_v31  ;;  %1664 = vst [vmem:[%s5016_s3 + $0x480] sm:$0xff] %v1408_v37  ;;  %v1410_v51 = vmax.f32 %v810_v14, 0.0  ;;  %v3720_v0 = vpop.f32.mrb[46].mxu1  ;;  %v3722_v4 = vpop.f32.mrb[47].mxu0 }
 0x154   :  { %v1793_v35 = vadd.f32 %v1792_v49, %v1408_v37  ;;  %v2477_v38 = vadd.f32 %v2476_v27, %v2269_v48  ;;  %v2275_v57 = vmul.f32 %v1408_v37, %v1408_v37  ;;  %v1409_v47 = vmax.f32 %v619_v53, 0.0  ;;  %v3728_v15 = vpop.f32.mrb[47].mxu1 }
 0x155   :  { %v2440_v6 = vadd.f32 %v2439_v34, %v2268_v52  ;;  %v2514_v7 = vadd.f32 %v2513_v3, %v2270_v44  ;;  %v812_v8 = vadd.f32 %v3616_v25, %v3297_v61  ;;  %v621_v13 = vadd.f32 %v3618_v26, %v3289_v58  ;;  %1666 = vst [vmem:[%s5016_s3 + $0x490] sm:$0xff] %v1410_v51 }
 0x156   :  { %v2404_v16 = vadd.f32 %v2403_v41, %v2275_v57  ;;  %v1867_v17 = vadd.f32 %v1866_v45, %v1410_v51  ;;  %v2277_v28 = vmul.f32 %v1410_v51, %v1410_v51  ;;  %1665 = vst [vmem:[%s5016_s3 + $0x488] sm:$0xff] %v1409_v47  ;;  %v1830_v21 = vadd.f32 %v1829_v50, %v1409_v47 }
 0x157   :  { %v2276_v63 = vmul.f32 %v1409_v47, %v1409_v47  ;;  %v1411_v22 = vmax.f32 %v812_v8, 0.0  ;;  %v1416_v25 = vmax.f32 %v621_v13, 0.0  ;;  %v814_v26 = vadd.f32 %v3626_v32, %v3292_v59 }
 0x158   :  { %v2478_v27 = vadd.f32 %v2477_v38, %v2277_v28  ;;  %v623_v30 = vadd.f32 %v3628_v33, %v3294_v60  ;;  %v816_v18 = vadd.f32 %v3636_v11, %v3297_v61  ;;  %v627_v19 = vadd.f32 %v3654_v56, %v3289_v58  ;;  %v3750_v49 = vpop.f32.mrb[48].mxu0  ;;  %v3752_v23 = vpop.f32.mrb[48].mxu1 }
 0x159   :  { %v2441_v34 = vadd.f32 %v2440_v6, %v2276_v63  ;;  %1667 = vst [vmem:[%s5016_s3 + $0x498] sm:$0xff] %v1411_v22  ;;  %v1904_v46 = vadd.f32 %v1903_v10, %v1411_v22  ;;  %v2278_v36 = vmul.f32 %v1411_v22, %v1411_v22  ;;  %1672 = vst [vmem:[%s5016_s3 + $0x4c0] sm:$0xff] %v1416_v25  ;;  %v1418_v5 = vmax.f32 %v814_v26, 0.0  ;;  %v3754_v56 = vpop.f32.mrb[49].mxu0  ;;  %v3760_v53 = vpop.f32.mrb[49].mxu1 }
 0x15a   :  { %v1794_v32 = vadd.f32 %v1793_v35, %v1416_v25  ;;  %v2283_v33 = vmul.f32 %v1416_v25, %v1416_v25  ;;  %v1417_v11 = vmax.f32 %v623_v30, 0.0  ;;  %v1419_v42 = vmax.f32 %v816_v18, 0.0  ;;  %v3762_v41 = vpop.f32.mrb[50].mxu0 }
 0x15b   :  { %v2515_v31 = vadd.f32 %v2514_v7, %v2278_v36  ;;  %v1424_v3 = vmax.f32 %v627_v19, 0.0  ;;  %v820_v37 = vadd.f32 %v3656_v1, %v3292_v59  ;;  %v629_v14 = vadd.f32 %v3658_v2, %v3294_v60  ;;  %1674 = vst [vmem:[%s5016_s3 + $0x4d0] sm:$0xff] %v1418_v5  ;;  %v3773_v1 = vpop.f32.mrb[50].mxu1  ;;  %v3775_v2 = vpop.f32.mrb[51].mxu0 }
 0x15c   :  { %v2405_v45 = vadd.f32 %v2404_v16, %v2283_v33  ;;  %v1868_v48 = vadd.f32 %v1867_v17, %v1418_v5  ;;  %v2285_v50 = vmul.f32 %v1418_v5, %v1418_v5  ;;  %1673 = vst [vmem:[%s5016_s3 + $0x4c8] sm:$0xff] %v1417_v11  ;;  %v1831_v52 = vadd.f32 %v1830_v21, %v1417_v11  ;;  %v3780_v57 = vpop.f32.mrb[51].mxu1 }
 0x15d   :  { %1675 = vst [vmem:[%s5016_s3 + $0x4d8] sm:$0xff] %v1419_v42  ;;  %v2284_v10 = vmul.f32 %v1417_v11, %v1417_v11  ;;  %v1905_v44 = vadd.f32 %v1904_v46, %v1419_v42  ;;  %v2286_v35 = vmul.f32 %v1419_v42, %v1419_v42  ;;  %1680 = vst [vmem:[%s5016_s3 + $0x500] sm:$0xff] %v1424_v3  ;;  %v1426_v6 = vmax.f32 %v820_v37, 0.0 }
 0x15e   :  { %v1795_v38 = vadd.f32 %v1794_v32, %v1424_v3  ;;  %v2479_v51 = vadd.f32 %v2478_v27, %v2285_v50  ;;  %v2291_v47 = vmul.f32 %v1424_v3, %v1424_v3  ;;  %v1425_v7 = vmax.f32 %v629_v14, 0.0 }
 0x15f   :  { %v2442_v8 = vadd.f32 %v2441_v34, %v2284_v10  ;;  %v2516_v13 = vadd.f32 %v2515_v31, %v2286_v35  ;;  %v822_v16 = vadd.f32 %v3664_v9, %v3297_v61  ;;  %v631_v17 = vadd.f32 %v3666_v12, %v3289_v58  ;;  %1682 = vst [vmem:[%s5016_s3 + $0x510] sm:$0xff] %v1426_v6 }
 0x160   :  { %v2406_v28 = vadd.f32 %v2405_v45, %v2291_v47  ;;  %v1869_v21 = vadd.f32 %v1868_v48, %v1426_v6  ;;  %v2293_v63 = vmul.f32 %v1426_v6, %v1426_v6  ;;  %1681 = vst [vmem:[%s5016_s3 + $0x508] sm:$0xff] %v1425_v7  ;;  %v1832_v22 = vadd.f32 %v1831_v52, %v1425_v7  ;;  %v3794_v30 = vpop.f32.mrb[52].mxu0  ;;  %v3802_v46 = vpop.f32.mrb[52].mxu1 }
 0x161   :  { %v2292_v25 = vmul.f32 %v1425_v7, %v1425_v7  ;;  %v1427_v26 = vmax.f32 %v822_v16, 0.0  ;;  %v1432_v27 = vmax.f32 %v631_v17, 0.0  ;;  %v824_v9 = vadd.f32 %v3674_v39, %v3292_v59  ;;  %v3804_v36 = vpop.f32.mrb[53].mxu0 }
 0x162   :  { %v2480_v12 = vadd.f32 %v2479_v51, %v2293_v63  ;;  %v633_v18 = vadd.f32 %v3676_v20, %v3294_v60  ;;  %v826_v19 = vadd.f32 %v3680_v24, %v3297_v61  ;;  %v637_v34 = vadd.f32 %v3698_v40, %v3289_v58  ;;  %v3812_v24 = vpop.f32.mrb[53].mxu1  ;;  %v3814_v5 = vpop.f32.mrb[54].mxu0 }
 0x163   :  { %v2443_v32 = vadd.f32 %v2442_v8, %v2292_v25  ;;  %1683 = vst [vmem:[%s5016_s3 + $0x518] sm:$0xff] %v1427_v26  ;;  %v1906_v39 = vadd.f32 %v1905_v44, %v1427_v26  ;;  %v2294_v33 = vmul.f32 %v1427_v26, %v1427_v26  ;;  %1688 = vst [vmem:[%s5016_s3 + $0x540] sm:$0xff] %v1432_v27  ;;  %v1434_v11 = vmax.f32 %v824_v9, 0.0  ;;  %v3816_v3 = vpop.f32.mrb[54].mxu1  ;;  %v3818_v37 = vpop.f32.mrb[55].mxu0 }
 0x164   :  { %v1796_v20 = vadd.f32 %v1795_v38, %v1432_v27  ;;  %v2299_v40 = vmul.f32 %v1432_v27, %v1432_v27  ;;  %v1433_v42 = vmax.f32 %v633_v18, 0.0  ;;  %v1435_v31 = vmax.f32 %v826_v19, 0.0  ;;  %v3824_v52 = vpop.f32.mrb[55].mxu1 }
 0x165   :  { %v2517_v14 = vadd.f32 %v2516_v13, %v2294_v33  ;;  %v1440_v45 = vmax.f32 %v637_v34, 0.0  ;;  %v830_v48 = vadd.f32 %v3709_v43, %v3292_v59  ;;  %v639_v50 = vadd.f32 %v3711_v62, %v3294_v60  ;;  %1690 = vst [vmem:[%s5016_s3 + $0x550] sm:$0xff] %v1434_v11 }
 0x166   :  { %v2407_v10 = vadd.f32 %v2406_v28, %v2299_v40  ;;  %v1870_v44 = vadd.f32 %v1869_v21, %v1434_v11  ;;  %v2301_v35 = vmul.f32 %v1434_v11, %v1434_v11  ;;  %1689 = vst [vmem:[%s5016_s3 + $0x548] sm:$0xff] %v1433_v42  ;;  %v1833_v38 = vadd.f32 %v1832_v22, %v1433_v42 }
 0x167   :  { %1691 = vst [vmem:[%s5016_s3 + $0x558] sm:$0xff] %v1435_v31  ;;  %v2300_v43 = vmul.f32 %v1433_v42, %v1433_v42  ;;  %v1907_v62 = vadd.f32 %v1906_v39, %v1435_v31  ;;  %v2302_v51 = vmul.f32 %v1435_v31, %v1435_v31  ;;  %1696 = vst [vmem:[%s5016_s3 + $0x580] sm:$0xff] %v1440_v45  ;;  %v1442_v8 = vmax.f32 %v830_v48, 0.0 }
 0x168   :  { %v1797_v47 = vadd.f32 %v1796_v20, %v1440_v45  ;;  %v2481_v6 = vadd.f32 %v2480_v12, %v2301_v35  ;;  %v2307_v7 = vmul.f32 %v1440_v45, %v1440_v45  ;;  %v1441_v13 = vmax.f32 %v639_v50, 0.0  ;;  %v3842_v63 = vpop.f32.mrb[56].mxu0  ;;  %v3850_v9 = vpop.f32.mrb[56].mxu1 }
 0x169   :  { %v2444_v16 = vadd.f32 %v2443_v32, %v2300_v43  ;;  %v2518_v17 = vadd.f32 %v2517_v14, %v2302_v51  ;;  %v832_v28 = vadd.f32 %v3716_v54, %v3297_v61  ;;  %v641_v21 = vadd.f32 %v3718_v55, %v3289_v58  ;;  %1698 = vst [vmem:[%s5016_s3 + $0x590] sm:$0xff] %v1442_v8  ;;  %v3852_v54 = vpop.f32.mrb[57].mxu0  ;;  %v3856_v34 = vpop.f32.mrb[57].mxu1 }
 0x16a   :  { %v2408_v22 = vadd.f32 %v2407_v10, %v2307_v7  ;;  %v1871_v25 = vadd.f32 %v1870_v44, %v1442_v8  ;;  %v2309_v26 = vmul.f32 %v1442_v8, %v1442_v8  ;;  %1697 = vst [vmem:[%s5016_s3 + $0x588] sm:$0xff] %v1441_v13  ;;  %v1834_v27 = vadd.f32 %v1833_v38, %v1441_v13  ;;  %v3858_v32 = vpop.f32.mrb[58].mxu0  ;;  %v3866_v11 = vpop.f32.mrb[58].mxu1 }
 0x16b   :  { %v2308_v12 = vmul.f32 %v1441_v13, %v1441_v13  ;;  %v1443_v55 = vmax.f32 %v832_v28, 0.0  ;;  %v1448_v18 = vmax.f32 %v641_v21, 0.0  ;;  %v834_v19 = vadd.f32 %v3720_v0, %v3292_v59  ;;  %v3868_v42 = vpop.f32.mrb[59].mxu0 }
 0x16c   :  { %v2482_v39 = vadd.f32 %v2481_v6, %v2309_v26  ;;  %v643_v33 = vadd.f32 %v3722_v4, %v3294_v60  ;;  %v836_v20 = vadd.f32 %v3728_v15, %v3297_v61  ;;  %v647_v40 = vadd.f32 %v3750_v49, %v3289_v58  ;;  %v3876_v15 = vpop.f32.mrb[59].mxu1 }
 0x16d   :  { %v2445_v31 = vadd.f32 %v2444_v16, %v2308_v12  ;;  %1699 = vst [vmem:[%s5016_s3 + $0x598] sm:$0xff] %v1443_v55  ;;  %v1908_v0 = vadd.f32 %v1907_v62, %v1443_v55  ;;  %v2310_v14 = vmul.f32 %v1443_v55, %v1443_v55  ;;  %1704 = vst [vmem:[%s5016_s3 + $0x5c0] sm:$0xff] %v1448_v18  ;;  %v1450_v49 = vmax.f32 %v834_v19, 0.0 }
 0x16e   :  { %v1798_v4 = vadd.f32 %v1797_v47, %v1448_v18  ;;  %v2315_v45 = vmul.f32 %v1448_v18, %v1448_v18  ;;  %v1449_v48 = vmax.f32 %v643_v33, 0.0  ;;  %v1451_v50 = vmax.f32 %v836_v20, 0.0 }
 0x16f   :  { %v2519_v10 = vadd.f32 %v2518_v17, %v2310_v14  ;;  %v1456_v44 = vmax.f32 %v647_v40, 0.0  ;;  %v840_v35 = vadd.f32 %v3752_v23, %v3292_v59  ;;  %v649_v38 = vadd.f32 %v3754_v56, %v3294_v60  ;;  %1706 = vst [vmem:[%s5016_s3 + $0x5d0] sm:$0xff] %v1450_v49 }
 0x170   :  { %v2409_v43 = vadd.f32 %v2408_v22, %v2315_v45  ;;  %v1872_v62 = vadd.f32 %v1871_v25, %v1450_v49  ;;  %v2317_v51 = vmul.f32 %v1450_v49, %v1450_v49  ;;  %1705 = vst [vmem:[%s5016_s3 + $0x5c8] sm:$0xff] %v1449_v48  ;;  %v1835_v47 = vadd.f32 %v1834_v27, %v1449_v48  ;;  %v3894_v8 = vpop.f32.mrb[60].mxu0  ;;  %v3896_v21 = vpop.f32.mrb[60].mxu1 }
 0x171   :  { %1707 = vst [vmem:[%s5016_s3 + $0x5d8] sm:$0xff] %v1451_v50  ;;  %v2316_v23 = vmul.f32 %v1449_v48, %v1449_v48  ;;  %v1909_v6 = vadd.f32 %v1908_v0, %v1451_v50  ;;  %v2318_v7 = vmul.f32 %v1451_v50, %v1451_v50  ;;  %1712 = vst [vmem:[%s5016_s3 + $0x600] sm:$0xff] %v1456_v44  ;;  %v1458_v17 = vmax.f32 %v840_v35, 0.0  ;;  %v3898_v22 = vpop.f32.mrb[61].mxu0  ;;  %v3904_v55 = vpop.f32.mrb[61].mxu1 }
 0x172   :  { %v1799_v56 = vadd.f32 %v1798_v4, %v1456_v44  ;;  %v2483_v13 = vadd.f32 %v2482_v39, %v2317_v51  ;;  %v2323_v16 = vmul.f32 %v1456_v44, %v1456_v44  ;;  %v1457_v28 = vmax.f32 %v649_v38, 0.0  ;;  %v3906_v18 = vpop.f32.mrb[62].mxu0 }
 0x173   :  { %v2446_v25 = vadd.f32 %v2445_v31, %v2316_v23  ;;  %v2520_v26 = vadd.f32 %v2519_v10, %v2318_v7  ;;  %v842_v27 = vadd.f32 %v3760_v53, %v3297_v61  ;;  %v651_v12 = vadd.f32 %v3762_v41, %v3289_v58  ;;  %1714 = vst [vmem:[%s5016_s3 + $0x610] sm:$0xff] %v1458_v17  ;;  %v3914_v53 = vpop.f32.mrb[62].mxu1  ;;  %v3916_v40 = vpop.f32.mrb[63].mxu0 }
 0x174   :  { %v2410_v19 = vadd.f32 %v2409_v43, %v2323_v16  ;;  %v1873_v39 = vadd.f32 %v1872_v62, %v1458_v17  ;;  %v2325_v33 = vmul.f32 %v1458_v17, %v1458_v17  ;;  %1713 = vst [vmem:[%s5016_s3 + $0x608] sm:$0xff] %v1457_v28  ;;  %v1836_v20 = vadd.f32 %v1835_v47, %v1457_v28  ;;  %v3920_v4 = vpop.f32.mrb[63].mxu1 }
 0x175   :  { %v2324_v41 = vmul.f32 %v1457_v28, %v1457_v28  ;;  %v1459_v31 = vmax.f32 %v842_v27, 0.0  ;;  %v1464_v0 = vmax.f32 %v651_v12, 0.0  ;;  %v844_v14 = vadd.f32 %v3773_v1, %v3292_v59 }
 0x176   :  { %v2484_v45 = vadd.f32 %v2483_v13, %v2325_v33  ;;  %v653_v49 = vadd.f32 %v3775_v2, %v3294_v60  ;;  %v846_v48 = vadd.f32 %v3780_v57, %v3297_v61  ;;  %v657_v50 = vadd.f32 %v3794_v30, %v3289_v58 }
 0x177   :  { %v2447_v10 = vadd.f32 %v2446_v25, %v2324_v41  ;;  %1715 = vst [vmem:[%s5016_s3 + $0x618] sm:$0xff] %v1459_v31  ;;  %v1910_v44 = vadd.f32 %v1909_v6, %v1459_v31  ;;  %v2326_v35 = vmul.f32 %v1459_v31, %v1459_v31  ;;  %1720 = vst [vmem:[%s5016_s3 + $0x640] sm:$0xff] %v1464_v0  ;;  %v1466_v2 = vmax.f32 %v844_v14, 0.0 }
 0x178   :  { %v1800_v1 = vadd.f32 %v1799_v56, %v1464_v0  ;;  %v2331_v38 = vmul.f32 %v1464_v0, %v1464_v0  ;;  %v1465_v43 = vmax.f32 %v653_v49, 0.0  ;;  %v1467_v62 = vmax.f32 %v846_v48, 0.0  ;;  %v3938_v23 = vpop.f32.mrb[64].mxu0 }
 0x179   :  { %v2521_v57 = vadd.f32 %v2520_v26, %v2326_v35  ;;  %v1472_v51 = vmax.f32 %v657_v50, 0.0  ;;  %v850_v30 = vadd.f32 %v3802_v46, %v3292_v59  ;;  %v659_v47 = vadd.f32 %v3804_v36, %v3294_v60  ;;  %1722 = vst [vmem:[%s5016_s3 + $0x650] sm:$0xff] %v1466_v2  ;;  %v3949_v46 = vpop.f32.mrb[64].mxu1  ;;  %v3951_v36 = vpop.f32.mrb[65].mxu0 }
 0x17a   :  { %v2411_v6 = vadd.f32 %v2410_v19, %v2331_v38  ;;  %v1874_v7 = vadd.f32 %v1873_v39, %v1466_v2  ;;  %v2333_v56 = vmul.f32 %v1466_v2, %v1466_v2  ;;  %1721 = vst [vmem:[%s5016_s3 + $0x648] sm:$0xff] %v1465_v43  ;;  %v1837_v13 = vadd.f32 %v1836_v20, %v1465_v43  ;;  %v3956_v26 = vpop.f32.mrb[65].mxu1  ;;  %v3958_v27 = vpop.f32.mrb[66].mxu0 }
 0x17b   :  { %1723 = vst [vmem:[%s5016_s3 + $0x658] sm:$0xff] %v1467_v62  ;;  %v2332_v16 = vmul.f32 %v1465_v43, %v1465_v43  ;;  %v1911_v17 = vadd.f32 %v1910_v44, %v1467_v62  ;;  %v2334_v28 = vmul.f32 %v1467_v62, %v1467_v62  ;;  %1728 = vst [vmem:[%s5016_s3 + $0x680] sm:$0xff] %v1472_v51  ;;  %v1474_v39 = vmax.f32 %v850_v30, 0.0  ;;  %v3960_v20 = vpop.f32.mrb[66].mxu1  ;;  %v3962_v41 = vpop.f32.mrb[67].mxu0 }
 0x17c   :  { %v1801_v25 = vadd.f32 %v1800_v1, %v1472_v51  ;;  %v2485_v12 = vadd.f32 %v2484_v45, %v2333_v56  ;;  %v2339_v19 = vmul.f32 %v1472_v51, %v1472_v51  ;;  %v1473_v33 = vmax.f32 %v659_v47, 0.0  ;;  %v3968_v48 = vpop.f32.mrb[67].mxu1 }
 0x17d   :  { %v2448_v31 = vadd.f32 %v2447_v10, %v2332_v16  ;;  %v2522_v0 = vadd.f32 %v2521_v57, %v2334_v28  ;;  %v852_v14 = vadd.f32 %v3812_v24, %v3297_v61  ;;  %v661_v49 = vadd.f32 %v3814_v5, %v3289_v58  ;;  %1730 = vst [vmem:[%s5016_s3 + $0x690] sm:$0xff] %v1474_v39 }
 0x17e   :  { %v2412_v50 = vadd.f32 %v2411_v6, %v2339_v19  ;;  %v1875_v45 = vadd.f32 %v1874_v7, %v1474_v39  ;;  %v2341_v44 = vmul.f32 %v1474_v39, %v1474_v39  ;;  %1729 = vst [vmem:[%s5016_s3 + $0x688] sm:$0xff] %v1473_v33  ;;  %v1838_v10 = vadd.f32 %v1837_v13, %v1473_v33 }
 0x17f   :  { %v2340_v35 = vmul.f32 %v1473_v33, %v1473_v33  ;;  %v1475_v1 = vmax.f32 %v852_v14, 0.0  ;;  %v1480_v24 = vmax.f32 %v661_v49, 0.0  ;;  %v854_v5 = vadd.f32 %v3816_v3, %v3292_v59 }
 0x180   :  { %v2486_v38 = vadd.f32 %v2485_v12, %v2341_v44  ;;  %v663_v2 = vadd.f32 %v3818_v37, %v3294_v60  ;;  %v856_v43 = vadd.f32 %v3824_v52, %v3297_v61  ;;  %v667_v62 = vadd.f32 %v3842_v63, %v3289_v58  ;;  %v3990_v47 = vpop.f32.mrb[68].mxu0  ;;  %v3992_v56 = vpop.f32.mrb[68].mxu1 }
 0x181   :  { %v2449_v57 = vadd.f32 %v2448_v31, %v2340_v35  ;;  %1731 = vst [vmem:[%s5016_s3 + $0x698] sm:$0xff] %v1475_v1  ;;  %v1912_v51 = vadd.f32 %v1911_v17, %v1475_v1  ;;  %v2342_v30 = vmul.f32 %v1475_v1, %v1475_v1  ;;  %1736 = vst [vmem:[%s5016_s3 + $0x6c0] sm:$0xff] %v1480_v24  ;;  %v1482_v6 = vmax.f32 %v854_v5, 0.0  ;;  %v3994_v63 = vpop.f32.mrb[69].mxu0  ;;  %v4000_v12 = vpop.f32.mrb[69].mxu1 }
 0x182   :  { %v1802_v3 = vadd.f32 %v1801_v25, %v1480_v24  ;;  %v2347_v37 = vmul.f32 %v1480_v24, %v1480_v24  ;;  %v1481_v52 = vmax.f32 %v663_v2, 0.0  ;;  %v1483_v7 = vmax.f32 %v856_v43, 0.0  ;;  %v4002_v25 = vpop.f32.mrb[70].mxu0 }
 0x183   :  { %v2523_v13 = vadd.f32 %v2522_v0, %v2342_v30  ;;  %v1488_v16 = vmax.f32 %v667_v62, 0.0  ;;  %v860_v17 = vadd.f32 %v3850_v9, %v3292_v59  ;;  %v669_v28 = vadd.f32 %v3852_v54, %v3294_v60  ;;  %1738 = vst [vmem:[%s5016_s3 + $0x6d0] sm:$0xff] %v1482_v6  ;;  %v4013_v9 = vpop.f32.mrb[70].mxu1  ;;  %v4015_v54 = vpop.f32.mrb[71].mxu0 }
 0x184   :  { %v2413_v19 = vadd.f32 %v2412_v50, %v2347_v37  ;;  %v1876_v39 = vadd.f32 %v1875_v45, %v1482_v6  ;;  %v2349_v33 = vmul.f32 %v1482_v6, %v1482_v6  ;;  %1737 = vst [vmem:[%s5016_s3 + $0x6c8] sm:$0xff] %v1481_v52  ;;  %v1839_v31 = vadd.f32 %v1838_v10, %v1481_v52  ;;  %v4020_v45 = vpop.f32.mrb[71].mxu1 }
 0x185   :  { %1739 = vst [vmem:[%s5016_s3 + $0x6d8] sm:$0xff] %v1483_v7  ;;  %v2348_v0 = vmul.f32 %v1481_v52, %v1481_v52  ;;  %v1913_v14 = vadd.f32 %v1912_v51, %v1483_v7  ;;  %v2350_v49 = vmul.f32 %v1483_v7, %v1483_v7  ;;  %1744 = vst [vmem:[%s5016_s3 + $0x700] sm:$0xff] %v1488_v16  ;;  %v1490_v35 = vmax.f32 %v860_v17, 0.0 }
 0x186   :  { %v1803_v50 = vadd.f32 %v1802_v3, %v1488_v16  ;;  %v2487_v44 = vadd.f32 %v2486_v38, %v2349_v33  ;;  %v2355_v10 = vmul.f32 %v1488_v16, %v1488_v16  ;;  %v1489_v1 = vmax.f32 %v669_v28, 0.0 }
 0x187   :  { %v2450_v24 = vadd.f32 %v2449_v57, %v2348_v0  ;;  %v2524_v5 = vadd.f32 %v2523_v13, %v2350_v49  ;;  %v862_v2 = vadd.f32 %v3856_v34, %v3297_v61  ;;  %v671_v43 = vadd.f32 %v3858_v32, %v3289_v58  ;;  %1746 = vst [vmem:[%s5016_s3 + $0x710] sm:$0xff] %v1490_v35 }
 0x188   :  { %v2414_v62 = vadd.f32 %v2413_v19, %v2355_v10  ;;  %v1877_v51 = vadd.f32 %v1876_v39, %v1490_v35  ;;  %v2357_v30 = vmul.f32 %v1490_v35, %v1490_v35  ;;  %1745 = vst [vmem:[%s5016_s3 + $0x708] sm:$0xff] %v1489_v1  ;;  %v1840_v38 = vadd.f32 %v1839_v31, %v1489_v1  ;;  %v4034_v6 = vpop.f32.mrb[72].mxu0  ;;  %v4042_v16 = vpop.f32.mrb[72].mxu1 }
 0x189   :  { %v2356_v57 = vmul.f32 %v1489_v1, %v1489_v1  ;;  %v1491_v3 = vmax.f32 %v862_v2, 0.0  ;;  %v1496_v37 = vmax.f32 %v671_v43, 0.0  ;;  %v864_v34 = vadd.f32 %v3866_v11, %v3292_v59  ;;  %v4044_v17 = vpop.f32.mrb[73].mxu0 }
 0x18a   :  { %v2488_v32 = vadd.f32 %v2487_v44, %v2357_v30  ;;  %v673_v52 = vadd.f32 %v3868_v42, %v3294_v60  ;;  %v866_v7 = vadd.f32 %v3876_v15, %v3297_v61  ;;  %v677_v13 = vadd.f32 %v3894_v8, %v3289_v58  ;;  %v4052_v15 = vpop.f32.mrb[73].mxu1  ;;  %v4054_v39 = vpop.f32.mrb[74].mxu0 }
 0x18b   :  { %v2451_v28 = vadd.f32 %v2450_v24, %v2356_v57  ;;  %1747 = vst [vmem:[%s5016_s3 + $0x718] sm:$0xff] %v1491_v3  ;;  %v1914_v11 = vadd.f32 %v1913_v14, %v1491_v3  ;;  %v2358_v19 = vmul.f32 %v1491_v3, %v1491_v3  ;;  %1752 = vst [vmem:[%s5016_s3 + $0x740] sm:$0xff] %v1496_v37  ;;  %v1498_v33 = vmax.f32 %v864_v34, 0.0  ;;  %v4056_v49 = vpop.f32.mrb[74].mxu1  ;;  %v4058_v44 = vpop.f32.mrb[75].mxu0 }
 0x18c   :  { %v1804_v42 = vadd.f32 %v1803_v50, %v1496_v37  ;;  %v2363_v8 = vmul.f32 %v1496_v37, %v1496_v37  ;;  %v1497_v31 = vmax.f32 %v673_v52, 0.0  ;;  %v1499_v0 = vmax.f32 %v866_v7, 0.0  ;;  %v4064_v1 = vpop.f32.mrb[75].mxu1 }
 0x18d   :  { %v2525_v10 = vadd.f32 %v2524_v5, %v2358_v19  ;;  %v1504_v14 = vmax.f32 %v677_v13, 0.0  ;;  %v870_v35 = vadd.f32 %v3896_v21, %v3292_v59  ;;  %v679_v50 = vadd.f32 %v3898_v22, %v3294_v60  ;;  %1754 = vst [vmem:[%s5016_s3 + $0x750] sm:$0xff] %v1498_v33 }
 0x18e   :  { %v2415_v24 = vadd.f32 %v2414_v62, %v2363_v8  ;;  %v1878_v2 = vadd.f32 %v1877_v51, %v1498_v33  ;;  %v2365_v43 = vmul.f32 %v1498_v33, %v1498_v33  ;;  %1753 = vst [vmem:[%s5016_s3 + $0x748] sm:$0xff] %v1497_v31  ;;  %v1841_v5 = vadd.f32 %v1840_v38, %v1497_v31 }
 0x18f   :  { %1755 = vst [vmem:[%s5016_s3 + $0x758] sm:$0xff] %v1499_v0  ;;  %v2364_v21 = vmul.f32 %v1497_v31, %v1497_v31  ;;  %v1915_v22 = vadd.f32 %v1914_v11, %v1499_v0  ;;  %v2366_v30 = vmul.f32 %v1499_v0, %v1499_v0  ;;  %1760 = vst [vmem:[%s5016_s3 + $0x780] sm:$0xff] %v1504_v14  ;;  %v1506_v3 = vmax.f32 %v870_v35, 0.0 }
 0x190   :  { %v1805_v62 = vadd.f32 %v1804_v42, %v1504_v14  ;;  %v2489_v57 = vadd.f32 %v2488_v32, %v2365_v43  ;;  %v2371_v51 = vmul.f32 %v1504_v14, %v1504_v14  ;;  %v1505_v37 = vmax.f32 %v679_v50, 0.0  ;;  %v4082_v13 = vpop.f32.mrb[76].mxu0  ;;  %v4090_v42 = vpop.f32.mrb[76].mxu1 }
 0x191   :  { %v2452_v34 = vadd.f32 %v2451_v28, %v2364_v21  ;;  %v2526_v52 = vadd.f32 %v2525_v10, %v2366_v30  ;;  %v872_v38 = vadd.f32 %v3904_v55, %v3297_v61  ;;  %v681_v7 = vadd.f32 %v3906_v18, %v3289_v58  ;;  %1762 = vst [vmem:[%s5016_s3 + $0x790] sm:$0xff] %v1506_v3  ;;  %v4092_v55 = vpop.f32.mrb[77].mxu0  ;;  %v4096_v31 = vpop.f32.mrb[77].mxu1 }
 0x192   :  { %v2416_v11 = vadd.f32 %v2415_v24, %v2371_v51  ;;  %v1879_v19 = vadd.f32 %v1878_v2, %v1506_v3  ;;  %v2373_v32 = vmul.f32 %v1506_v3, %v1506_v3  ;;  %1761 = vst [vmem:[%s5016_s3 + $0x788] sm:$0xff] %v1505_v37  ;;  %v1842_v28 = vadd.f32 %v1841_v5, %v1505_v37  ;;  %v4098_v0 = vpop.f32.mrb[78].mxu0  ;;  %v4104_v50 = vpop.f32.mrb[78].mxu1 }
 0x193   :  { %v2372_v8 = vmul.f32 %v1505_v37, %v1505_v37  ;;  %v1507_v58 = vmax.f32 %v872_v38, 0.0  ;;  %v1512_v18 = vmax.f32 %v681_v7, 0.0  ;;  %v874_v33 = vadd.f32 %v3914_v53, %v3292_v59  ;;  %v4106_v24 = vpop.f32.mrb[79].mxu0 }
 0x194   :  { %v2490_v10 = vadd.f32 %v2489_v57, %v2373_v32  ;;  %v683_v14 = vadd.f32 %v3916_v40, %v3294_v60  ;;  %v876_v35 = vadd.f32 %v3920_v4, %v3297_v61  ;;  %5025 = vst [vmem:[#allocation2_spill] sm:$0xff] %v4106_v24  ;;  %v4114_v60 = vpop.f32.mrb[79].mxu1  ;;  %v2822_v5 = vmov 1966171168  }
 0x195   :  { %v2453_v2 = vadd.f32 %v2452_v34, %v2372_v8  ;;  %1763 = vst [vmem:[%s5016_s3 + $0x798] sm:$0xff] %v1507_v58  ;;  %v1916_v59 = vadd.f32 %v1915_v22, %v1507_v58  ;;  %v2374_v53 = vmul.f32 %v1507_v58, %v1507_v58  ;;  %1768 = vst [vmem:[%s5016_s3 + $0x7c0] sm:$0xff] %v1512_v18  ;;  %v1514_v61 = vmax.f32 %v874_v33, 0.0 }
 0x196   :  { %v1806_v43 = vadd.f32 %v1805_v62, %v1512_v18  ;;  %5026 = vst [vmem:[#allocation3_spill] sm:$0xff] %v4114_v60  ;;  %v2379_v40 = vmul.f32 %v1512_v18, %v1512_v18  ;;  %v1513_v4 = vmax.f32 %v683_v14, 0.0  ;;  %v2085_v21 = vunpack.c.l.s4 %v2822_v5 }
 0x197   :  { %v2527_v30 = vadd.f32 %v2526_v52, %v2374_v53  ;;  %v1515_v51 = vmax.f32 %v876_v35, 0.0  ;;  %1770 = vst [vmem:[%s5016_s3 + $0x7d0] sm:$0xff] %v1514_v61  ;;  %v1880_v22 = vadd.f32 %v1879_v19, %v1514_v61  ;;  %v2381_v34 = vmul.f32 %v1514_v61, %v1514_v61 }
 0x198   :  { %v1807_v57 = vrot.slane %v1806_v43, 4  ;;  %v2417_v37 = vadd.f32 %v2416_v11, %v2379_v40  ;;  %1769 = vst [vmem:[%s5016_s3 + $0x7c8] sm:$0xff] %v1513_v4  ;;  %v1843_v62 = vadd.f32 %v1842_v28, %v1513_v4  ;;  %v2086_v7 = vunpack.c.0.s8 %v2085_v21  ;;  %v4126_v11 = vpop.f32.mrb[80].mxu0  ;;  %v4128_v33 = vpop.f32.mrb[80].mxu1 }
 0x199   :  { %v2380_v32 = vmul.f32 %v1513_v4, %v1513_v4  ;;  %1771 = vst [vmem:[%s5016_s3 + $0x7d8] sm:$0xff] %v1515_v51  ;;  %v1917_v52 = vadd.f32 %v1916_v59, %v1515_v51  ;;  %5027 = vst [vmem:[#allocation4_spill] sm:$0xff] %v4126_v11  ;;  %v1881_v58 = vrot.slane %v1880_v22, 4  ;;  %v2491_v18 = vadd.f32 %v2490_v10, %v2381_v34  ;;  %v4130_v14 = vpop.f32.mrb[81].mxu0  ;;  %v4135_v40 = vpop.f32.mrb[81].mxu1 }
 0x19a   :  { %v1808_v38 = vadd.f32 %v1807_v57, %v1806_v43  ;;  %v2418_v8 = vrot.slane %v2417_v37, 4  ;;  %v1844_v19 = vrot.slane %v1843_v62, 4  ;;  %5028 = vst [vmem:[#allocation5_spill] sm:$0xff] %v4128_v33  ;;  %5029 = vst [vmem:[#allocation6_spill] sm:$0xff] %v4130_v14  ;;  %v4133_v28 = vsub.s32 %v2086_v7, %v3276_v29  ;;  %v4137_v61 = vpop.f32.mrb[82].mxu0  ;;  %v4139_v10 = vpop.f32.mrb[82].mxu1 }
 0x19b   :  { %v2454_v53 = vadd.f32 %v2453_v2, %v2380_v32  ;;  %v1918_v43 = vrot.slane %v1917_v52, 4  ;;  %5031 = vst [vmem:[#allocation8_spill] sm:$0xff] %v4135_v40  ;;  %5032 = vst [vmem:[#allocation9_spill] sm:$0xff] %v4137_v61  ;;  %v1882_v4 = vadd.f32 %v1881_v58, %v1880_v22  ;;  %v2492_v5 = vrot.slane %v2491_v18, 4  ;;  %v4141_v57 = vpop.f32.mrb[83].mxu0  ;;  %v4143_v7 = vpop.f32.mrb[83].mxu1 }
 0x19c   :  { %v1809_v35 = vrot.slane %v1808_v38, 2  ;;  %5030 = vst [vmem:[#allocation7_spill] sm:$0xff] %v4133_v28  ;;  %v2419_v59 = vadd.f32 %v2418_v8, %v2417_v37  ;;  %v1845_v21 = vadd.f32 %v1844_v19, %v1843_v62  ;;  %5033 = vst [vmem:[#allocation10_spill] sm:$0xff] %v4139_v10  ;;  %v2382_v33 = vmul.f32 %v1515_v51, %v1515_v51 }
 0x19d   :  { %5034 = vst [vmem:[#allocation11_spill] sm:$0xff] %v4141_v57  ;;  %v2455_v3 = vrot.slane %v2454_v53, 4  ;;  %v1919_v14 = vadd.f32 %v1918_v43, %v1917_v52  ;;  %5035 = vst [vmem:[#allocation12_spill] sm:$0xff] %v4143_v7  ;;  %v1883_v32 = vrot.slane %v1882_v4, 2  ;;  %v2493_v11 = vadd.f32 %v2492_v5, %v2491_v18 }
 0x19e   :  { %v1810_v34 = vadd.f32 %v1809_v35, %v1808_v38  ;;  %v2420_v2 = vrot.slane %v2419_v59, 2  ;;  %v1846_v40 = vrot.slane %v1845_v21, 2  ;;  %v2528_v22 = vadd.f32 %v2527_v30, %v2382_v33 }
 0x19f   :  { %v2456_v61 = vadd.f32 %v2455_v3, %v2454_v53  ;;  %v1920_v37 = vrot.slane %v1919_v14, 2  ;;  %v1884_v62 = vadd.f32 %v1883_v32, %v1882_v4  ;;  %v2494_v58 = vrot.slane %v2493_v11, 2 }
 0x1a0   :  { %v1811_v60 = vrot.slane %v1810_v34, 1  ;;  %v2421_v8 = vadd.f32 %v2420_v2, %v2419_v59  ;;  %v1847_v19 = vadd.f32 %v1846_v40, %v1845_v21  ;;  %v2529_v35 = vrot.slane %v2528_v22, 4  ;;  %v4145_v52 = vpop.f32.mrb[84].mxu0  ;;  %v4147_v18 = vpop.f32.mrb[84].mxu1 }
 0x1a1   :  { %v2457_v57 = vrot.slane %v2456_v61, 2  ;;  %v1921_v38 = vadd.f32 %v1920_v37, %v1919_v14  ;;  %v1885_v43 = vrot.slane %v1884_v62, 1  ;;  %v2495_v7 = vadd.f32 %v2494_v58, %v2493_v11  ;;  %v4149_v5 = vpop.f32.mrb[85].mxu0  ;;  %v4158_v40 = vpop.f32.mrb[85].mxu1 }
 0x1a2   :  { %v1812_v10 = vadd.f32 %v1811_v60, %v1810_v34  ;;  %v2422_v51 = vrot.slane %v2421_v8, 1  ;;  %v1848_v24 = vrot.slane %v1847_v19, 1  ;;  %v2530_v33 = vadd.f32 %v2529_v35, %v2528_v22  ;;  %v2820_v60 = vld [vmem:[%s5015_s2] sm:$0xff]  ;;  %v4160_v59 = vpop.f32.mrb[86].mxu0  ;;  %v4162_v2 = vpop.f32.mrb[86].mxu1 }
 0x1a3   :  { %v2458_v3 = vadd.f32 %v2457_v57, %v2456_v61  ;;  %v1922_v30 = vrot.slane %v1921_v38, 1  ;;  %v5036_v14 = vsub.s32 4, %v3276_v29  ;;  %v1886_v4 = vadd.f32 %v1885_v43, %v1884_v62  ;;  %v4164_v61 = vpop.f32.mrb[87].mxu0  ;;  %v4168_v58 = vpop.f32.mrb[87].mxu1 }
 0x1a4   :  { %v2423_v11 = vadd.f32 %v2422_v51, %v2421_v8  ;;  %v2496_v21 = vrot.slane %v2495_v7, 1  ;;  %v1849_v34 = vadd.f32 %v1848_v24, %v1847_v19  ;;  %5037 = vst [vmem:[#allocation13_spill] sm:$0xff] %v4164_v61  ;;  %v2531_v37 = vrot.slane %v2530_v33, 2  ;;  %5038 = vst [vmem:[#allocation14_spill] sm:$0xff] %v4168_v58 }
 0x1a5   :  { %v4156_v53 = vrot.slane %v2820_v60, %v5036_v14  ;;  %v2459_v57 = vrot.slane %v2458_v3, 1  ;;  %v1923_v32 = vadd.f32 %v1922_v30, %v1921_v38  ;;  %v158_v14 = vsub.s32 6, %v3276_v29 }
 0x1a6   :  { %v2080_v35 = vcombine.low %v1812_v10, %v1849_v34  ;;  %v154_v8 = vsub.s32 5, %v3276_v29  ;;  %v2532_v24 = vadd.f32 %v2531_v37, %v2530_v33  ;;  %v2497_v30 = vadd.f32 %v2496_v21, %v2495_v7 }
 0x1a7   :  { %v913_v22 = vadd.f32 %v3938_v23, %v4156_v53  ;;  %v2460_v62 = vadd.f32 %v2459_v57, %v2458_v3  ;;  %v2081_v51 = vcombine.low %v1886_v4, %v1923_v32  ;;  %v4175_v61 = vrot.slane %v2820_v60, %v158_v14 }
 0x1a8   :  { %v4173_v43 = vrot.slane %v2080_v35, %v4133_v28  ;;  %v4177_v38 = vrot.slane %v2820_v60, %v154_v8  ;;  %v162_v23 = vsub.s32 7, %v3276_v29  ;;  %v2533_v34 = vrot.slane %v2532_v24, 1  ;;  %v4186_v3 = vpop.f32.mrb[88].mxu0  ;;  %v4196_v7 = vpop.f32.mrb[88].mxu1 }
 0x1a9   :  { %v1268_v19 = vmax.f32 %v913_v22, 0.0  ;;  %v2691_v58 = vcombine.low %v2423_v11, %v2460_v62  ;;  %v4181_v10 = vrot.slane %v2081_v51, %v4133_v28  ;;  %v1106_v33 = vadd.f32 %v3949_v46, %v4175_v61  ;;  %v4198_v11 = vpop.f32.mrb[89].mxu0  ;;  %v4204_v46 = vpop.f32.mrb[89].mxu1 }
 0x1aa   :  { %5039 = vst [vmem:[#allocation15_spill] sm:$0xff] %v4173_v43  ;;  %v915_v4 = vadd.f32 %v3951_v36, %v4177_v38  ;;  %v4192_v57 = vrot.slane %v2820_v60, %v162_v23  ;;  %v917_v29 = vadd.f32 %v3958_v27, %v4156_v53  ;;  %v2534_v32 = vadd.f32 %v2533_v34, %v2532_v24  ;;  %v4206_v22 = vpop.f32.mrb[90].mxu0  ;;  %v4210_v14 = vpop.f32.mrb[90].mxu1 }
 0x1ab   :  { %5040 = vst [vmem:[#allocation16_spill] sm:$0xff] %v4181_v10  ;;  %1524 = vst [vmem:[%s5016_s3 + $0x20] sm:$0xff] %v1268_v19  ;;  %v1110_v37 = vadd.f32 %v3960_v20, %v4175_v61  ;;  %v1270_v36 = vmax.f32 %v1106_v33, 0.0  ;;  %v4212_v8 = vpop.f32.mrb[91].mxu0  ;;  %v4215_v62 = vrot.slane %v2691_v58, %v4133_v28  ;;  %v919_v20 = vadd.f32 %v3962_v41, %v4177_v38  ;;  %v4219_v23 = vpop.f32.mrb[91].mxu1 }
 0x1ac   :  { %v1269_v60 = vmax.f32 %v915_v4, 0.0  ;;  %v1108_v27 = vadd.f32 %v3956_v26, %v4192_v57  ;;  %v1276_v35 = vmax.f32 %v917_v29, 0.0  ;;  %v2692_v51 = vcombine.low %v2497_v30, %v2534_v32 }
 0x1ad   :  { %5041 = vst [vmem:[#allocation17_spill] sm:$0xff] %v4215_v62  ;;  %v1278_v24 = vmax.f32 %v1110_v37, 0.0  ;;  %v2135_v34 = vmul.f32 %v1268_v19, %v1268_v19  ;;  %1526 = vst [vmem:[%s5016_s3 + $0x30] sm:$0xff] %v1270_v36  ;;  %v2137_v26 = vmul.f32 %v1270_v36, %v1270_v36  ;;  %v1277_v37 = vmax.f32 %v919_v20, 0.0 }
 0x1ae   :  { %1525 = vst [vmem:[%s5016_s3 + $0x28] sm:$0xff] %v1269_v60  ;;  %v1271_v33 = vmax.f32 %v1108_v27, 0.0  ;;  %1532 = vst [vmem:[%s5016_s3 + $0x60] sm:$0xff] %v1276_v35  ;;  %v1924_v58 = vadd.f32 %v1276_v35, %v1268_v19  ;;  %v4231_v41 = vrot.slane %v2692_v51, %v4133_v28  ;;  %v2143_v30 = vmul.f32 %v1276_v35, %v1276_v35 }
 0x1af   :  { %1534 = vst [vmem:[%s5016_s3 + $0x70] sm:$0xff] %v1278_v24  ;;  %v1998_v4 = vadd.f32 %v1278_v24, %v1270_v36  ;;  %v2145_v29 = vmul.f32 %v1278_v24, %v1278_v24  ;;  %v2136_v32 = vmul.f32 %v1269_v60, %v1269_v60  ;;  %v1112_v27 = vadd.f32 %v3968_v48, %v4192_v57 }
 0x1b0   :  { %5042 = vst [vmem:[#allocation18_spill] sm:$0xff] %v4231_v41  ;;  %1527 = vst [vmem:[%s5016_s3 + $0x38] sm:$0xff] %v1271_v33  ;;  %v923_v19 = vadd.f32 %v3990_v47, %v4156_v53  ;;  %v2535_v51 = vadd.f32 %v2143_v30, %v2135_v34  ;;  %v1116_v36 = vadd.f32 %v3992_v56, %v4175_v61  ;;  %v4247_v24 = vpop.f32.mrb[92].mxu0  ;;  %v4252_v28 = vpop.f32.mrb[92].mxu1 }
 0x1b1   :  { %v2609_v21 = vadd.f32 %v2145_v29, %v2137_v26  ;;  %1533 = vst [vmem:[%s5016_s3 + $0x68] sm:$0xff] %v1277_v37  ;;  %v1961_v20 = vadd.f32 %v1277_v37, %v1269_v60  ;;  %v2144_v10 = vmul.f32 %v1277_v37, %v1277_v37  ;;  %v1279_v48 = vmax.f32 %v1112_v27, 0.0  ;;  %v4254_v47 = vpop.f32.mrb[93].mxu0  ;;  %v4260_v30 = vpop.f32.mrb[93].mxu1 }
 0x1b2   :  { %v1284_v43 = vmax.f32 %v923_v19, 0.0  ;;  %v2138_v35 = vmul.f32 %v1271_v33, %v1271_v33  ;;  %v1286_v34 = vmax.f32 %v1116_v36, 0.0  ;;  %v925_v26 = vadd.f32 %v3994_v63, %v4177_v38  ;;  %v4262_v29 = vpop.f32.mrb[94].mxu0  ;;  %v4270_v63 = vpop.f32.mrb[94].mxu1 }
 0x1b3   :  { %v1118_v56 = vadd.f32 %v4000_v12, %v4192_v57  ;;  %5043 = vst [vmem:[#allocation19_spill] sm:$0xff] %v4262_v29  ;;  %v2572_v60 = vadd.f32 %v2144_v10, %v2136_v32  ;;  %1535 = vst [vmem:[%s5016_s3 + $0x78] sm:$0xff] %v1279_v48  ;;  %v2035_v37 = vadd.f32 %v1279_v48, %v1271_v33  ;;  %v4272_v36 = vpop.f32.mrb[95].mxu0  ;;  %v4277_v62 = vpop.f32.mrb[95].mxu1 }
 0x1b4   :  { %v2146_v27 = vmul.f32 %v1279_v48, %v1279_v48  ;;  %1540 = vst [vmem:[%s5016_s3 + $0xa0] sm:$0xff] %v1284_v43  ;;  %v1925_v19 = vadd.f32 %v1924_v58, %v1284_v43  ;;  %5044 = vst [vmem:[#allocation20_spill] sm:$0xff] %v4270_v63  ;;  %v2151_v12 = vmul.f32 %v1284_v43, %v1284_v43  ;;  %v1285_v41 = vmax.f32 %v925_v26, 0.0 }
 0x1b5   :  { %5045 = vst [vmem:[#allocation21_spill] sm:$0xff] %v4272_v36  ;;  %1542 = vst [vmem:[%s5016_s3 + $0xb0] sm:$0xff] %v1286_v34  ;;  %v1999_v10 = vadd.f32 %v1998_v4, %v1286_v34  ;;  %v2153_v32 = vmul.f32 %v1286_v34, %v1286_v34  ;;  %v1287_v48 = vmax.f32 %v1118_v56, 0.0  ;;  %v927_v29 = vadd.f32 %v4002_v25, %v4156_v53 }
 0x1b6   :  { %v2646_v33 = vadd.f32 %v2146_v27, %v2138_v35  ;;  %v1120_v58 = vadd.f32 %v4013_v9, %v4175_v61  ;;  %v2536_v63 = vadd.f32 %v2535_v51, %v2151_v12  ;;  %1541 = vst [vmem:[%s5016_s3 + $0xa8] sm:$0xff] %v1285_v41  ;;  %v1962_v43 = vadd.f32 %v1961_v20, %v1285_v41 }
 0x1b7   :  { %v2610_v36 = vadd.f32 %v2609_v21, %v2153_v32  ;;  %v2152_v4 = vmul.f32 %v1285_v41, %v1285_v41  ;;  %1543 = vst [vmem:[%s5016_s3 + $0xb8] sm:$0xff] %v1287_v48  ;;  %v2036_v35 = vadd.f32 %v2035_v37, %v1287_v48  ;;  %v2154_v34 = vmul.f32 %v1287_v48, %v1287_v48 }
 0x1b8   :  { %v1292_v26 = vmax.f32 %v927_v29, 0.0  ;;  %v1294_v56 = vmax.f32 %v1120_v58, 0.0  ;;  %v929_v9 = vadd.f32 %v4015_v54, %v4177_v38  ;;  %v1122_v21 = vadd.f32 %v4020_v45, %v4192_v57  ;;  %v4295_v20 = vpop.f32.mrb[96].mxu0 }
 0x1b9   :  { %v2573_v25 = vadd.f32 %v2572_v60, %v2152_v4  ;;  %v933_v51 = vadd.f32 %v4034_v6, %v4156_v53  ;;  %v2647_v41 = vadd.f32 %v2646_v33, %v2154_v34  ;;  %v4303_v60 = vpop.f32.mrb[96].mxu1  ;;  %v4305_v45 = vpop.f32.mrb[97].mxu0  ;;  %v935_v4 = vadd.f32 %v4044_v17, %v4177_v38 }
 0x1ba   :  { %1548 = vst [vmem:[%s5016_s3 + $0xe0] sm:$0xff] %v1292_v26  ;;  %v1926_v37 = vadd.f32 %v1925_v19, %v1292_v26  ;;  %v2159_v29 = vmul.f32 %v1292_v26, %v1292_v26  ;;  %1550 = vst [vmem:[%s5016_s3 + $0xf0] sm:$0xff] %v1294_v56  ;;  %v2000_v54 = vadd.f32 %v1999_v10, %v1294_v56  ;;  %v1293_v6 = vmax.f32 %v929_v9, 0.0  ;;  %v4307_v33 = vpop.f32.mrb[97].mxu1  ;;  %v4309_v48 = vpop.f32.mrb[98].mxu0 }
 0x1bb   :  { %v2161_v27 = vmul.f32 %v1294_v56, %v1294_v56  ;;  %v1295_v12 = vmax.f32 %v1122_v21, 0.0  ;;  %v1300_v32 = vmax.f32 %v933_v51, 0.0  ;;  %5046 = vst [vmem:[#allocation22_spill] sm:$0xff] %v4309_v48  ;;  %v1126_v19 = vadd.f32 %v4042_v16, %v4175_v61  ;;  %v4317_v34 = vpop.f32.mrb[98].mxu1  ;;  %v4319_v26 = vpop.f32.mrb[99].mxu0 }
 0x1bc   :  { %v2537_v58 = vadd.f32 %v2536_v63, %v2159_v29  ;;  %v1128_v10 = vadd.f32 %v4052_v15, %v4192_v57  ;;  %5047 = vst [vmem:[#allocation23_spill] sm:$0xff] %v4317_v34  ;;  %5048 = vst [vmem:[#allocation24_spill] sm:$0xff] %v4319_v26  ;;  %v1963_v9 = vadd.f32 %v1962_v43, %v1293_v6  ;;  %v4330_v17 = vpop.f32.mrb[99].mxu1 }
 0x1bd   :  { %v2611_v56 = vadd.f32 %v2610_v36, %v2161_v27  ;;  %1549 = vst [vmem:[%s5016_s3 + $0xe8] sm:$0xff] %v1293_v6  ;;  %v2160_v63 = vmul.f32 %v1293_v6, %v1293_v6  ;;  %1551 = vst [vmem:[%s5016_s3 + $0xf8] sm:$0xff] %v1295_v12  ;;  %v2037_v16 = vadd.f32 %v2036_v35, %v1295_v12  ;;  %v1302_v51 = vmax.f32 %v1126_v19, 0.0 }
 0x1be   :  { %1556 = vst [vmem:[%s5016_s3 + $0x120] sm:$0xff] %v1300_v32  ;;  %v2162_v15 = vmul.f32 %v1295_v12, %v1295_v12  ;;  %v1927_v21 = vadd.f32 %v1926_v37, %v1300_v32  ;;  %v2167_v36 = vmul.f32 %v1300_v32, %v1300_v32  ;;  %v1301_v27 = vmax.f32 %v935_v4, 0.0 }
 0x1bf   :  { %v2574_v29 = vadd.f32 %v2573_v25, %v2160_v63  ;;  %v1303_v26 = vmax.f32 %v1128_v10, 0.0  ;;  %v937_v43 = vadd.f32 %v4054_v39, %v4156_v53  ;;  %1558 = vst [vmem:[%s5016_s3 + $0x130] sm:$0xff] %v1302_v51  ;;  %v2001_v35 = vadd.f32 %v2000_v54, %v1302_v51 }
 0x1c0   :  { %v2648_v6 = vadd.f32 %v2647_v41, %v2162_v15  ;;  %v2538_v34 = vadd.f32 %v2537_v58, %v2167_v36  ;;  %v2169_v48 = vmul.f32 %v1302_v51, %v1302_v51  ;;  %1557 = vst [vmem:[%s5016_s3 + $0x128] sm:$0xff] %v1301_v27  ;;  %v1964_v37 = vadd.f32 %v1963_v9, %v1301_v27  ;;  %v4343_v41 = vpop.f32.mrb[100].mxu0  ;;  %v4349_v4 = vpop.f32.mrb[100].mxu1 }
 0x1c1   :  { %v2168_v12 = vmul.f32 %v1301_v27, %v1301_v27  ;;  %1559 = vst [vmem:[%s5016_s3 + $0x138] sm:$0xff] %v1303_v26  ;;  %v2038_v25 = vadd.f32 %v2037_v16, %v1303_v26  ;;  %v2170_v39 = vmul.f32 %v1303_v26, %v1303_v26  ;;  %v1308_v58 = vmax.f32 %v937_v43, 0.0  ;;  %v4351_v10 = vpop.f32.mrb[101].mxu0 }
 0x1c2   :  { %v2612_v32 = vadd.f32 %v2611_v56, %v2169_v48  ;;  %v1130_v54 = vadd.f32 %v4056_v49, %v4175_v61  ;;  %v939_v19 = vadd.f32 %v4058_v44, %v4177_v38  ;;  %v1132_v16 = vadd.f32 %v4064_v1, %v4192_v57  ;;  %v4357_v48 = vpop.f32.mrb[101].mxu1  ;;  %v4359_v56 = vpop.f32.mrb[102].mxu0 }
 0x1c3   :  { %v2575_v9 = vadd.f32 %v2574_v29, %v2168_v12  ;;  %v2649_v63 = vadd.f32 %v2648_v6, %v2170_v39  ;;  %v943_v26 = vadd.f32 %v4082_v13, %v4156_v53  ;;  %1564 = vst [vmem:[%s5016_s3 + $0x160] sm:$0xff] %v1308_v58  ;;  %v1928_v49 = vadd.f32 %v1927_v21, %v1308_v58  ;;  %v4364_v51 = vpop.f32.mrb[102].mxu1  ;;  %v4366_v29 = vpop.f32.mrb[103].mxu0 }
 0x1c4   :  { %v2175_v44 = vmul.f32 %v1308_v58, %v1308_v58  ;;  %v1310_v15 = vmax.f32 %v1130_v54, 0.0  ;;  %v1309_v36 = vmax.f32 %v939_v19, 0.0  ;;  %v1311_v1 = vmax.f32 %v1132_v16, 0.0  ;;  %v4372_v6 = vpop.f32.mrb[103].mxu1 }
 0x1c5   :  { %v1316_v27 = vmax.f32 %v943_v26, 0.0  ;;  %v1136_v13 = vadd.f32 %v4090_v42, %v4175_v61  ;;  %v945_v43 = vadd.f32 %v4092_v55, %v4177_v38  ;;  %5049 = vst [vmem:[#allocation25_spill] sm:$0xff] %v4372_v6 }
 0x1c6   :  { %v2539_v12 = vadd.f32 %v2538_v34, %v2175_v44  ;;  %1566 = vst [vmem:[%s5016_s3 + $0x170] sm:$0xff] %v1310_v15  ;;  %v2002_v21 = vadd.f32 %v2001_v35, %v1310_v15  ;;  %v2177_v39 = vmul.f32 %v1310_v15, %v1310_v15  ;;  %1565 = vst [vmem:[%s5016_s3 + $0x168] sm:$0xff] %v1309_v36 }
 0x1c7   :  { %v1965_v58 = vadd.f32 %v1964_v37, %v1309_v36  ;;  %v2176_v54 = vmul.f32 %v1309_v36, %v1309_v36  ;;  %1567 = vst [vmem:[%s5016_s3 + $0x178] sm:$0xff] %v1311_v1  ;;  %v2039_v42 = vadd.f32 %v2038_v25, %v1311_v1  ;;  %v2178_v55 = vmul.f32 %v1311_v1, %v1311_v1 }
 0x1c8   :  { %1572 = vst [vmem:[%s5016_s3 + $0x1a0] sm:$0xff] %v1316_v27  ;;  %v1929_v34 = vadd.f32 %v1928_v49, %v1316_v27  ;;  %v2613_v19 = vadd.f32 %v2612_v32, %v2177_v39  ;;  %v2183_v35 = vmul.f32 %v1316_v27, %v1316_v27  ;;  %v1318_v16 = vmax.f32 %v1136_v13, 0.0  ;;  %v4390_v6 = vpop.f32.mrb[104].mxu0  ;;  %v5055_v39 = vld [vmem:[#allocation2_spill] sm:$0xff] }
 0x1c9   :  { %v1317_v26 = vmax.f32 %v945_v43, 0.0  ;;  %v2576_v44 = vadd.f32 %v2575_v9, %v2176_v54  ;;  %v2650_v15 = vadd.f32 %v2649_v63, %v2178_v55  ;;  %v1138_v37 = vadd.f32 %v4096_v31, %v4192_v57  ;;  %5050 = vst [vmem:[#allocation26_spill] sm:$0xff] %v4390_v6  ;;  %v4398_v63 = vpop.f32.mrb[104].mxu1  ;;  %v4400_v31 = vpop.f32.mrb[105].mxu0 }
 0x1ca   :  { %v947_v36 = vadd.f32 %v4098_v0, %v4156_v53  ;;  %v2540_v25 = vadd.f32 %v2539_v12, %v2183_v35  ;;  %1574 = vst [vmem:[%s5016_s3 + $0x1b0] sm:$0xff] %v1318_v16  ;;  %v2003_v49 = vadd.f32 %v2002_v21, %v1318_v16  ;;  %v2185_v32 = vmul.f32 %v1318_v16, %v1318_v16  ;;  %v4404_v43 = vpop.f32.mrb[105].mxu1  ;;  %v4406_v12 = vpop.f32.mrb[106].mxu0  ;;  %v5057_v35 = vld [vmem:[#allocation4_spill] sm:$0xff] }
 0x1cb   :  { %1573 = vst [vmem:[%s5016_s3 + $0x1a8] sm:$0xff] %v1317_v26  ;;  %v1966_v9 = vadd.f32 %v1965_v58, %v1317_v26  ;;  %5051 = vst [vmem:[#allocation27_spill] sm:$0xff] %v4398_v63  ;;  %v2184_v1 = vmul.f32 %v1317_v26, %v1317_v26  ;;  %v1319_v0 = vmax.f32 %v1138_v37, 0.0  ;;  %v1140_v13 = vadd.f32 %v4104_v50, %v4175_v61  ;;  %v5056_v58 = vld [vmem:[#allocation3_spill] sm:$0xff]  ;;  %v4414_v26 = vpop.f32.mrb[106].mxu1  ;;  %v4416_v37 = vpop.f32.mrb[107].mxu0 }
 0x1cc   :  { %5052 = vst [vmem:[#allocation28_spill] sm:$0xff] %v4400_v31  ;;  %v1324_v27 = vmax.f32 %v947_v36, 0.0  ;;  %5053 = vst [vmem:[#allocation29_spill] sm:$0xff] %v4404_v43  ;;  %v2614_v21 = vadd.f32 %v2613_v19, %v2185_v32  ;;  %v949_v54 = vadd.f32 %v5055_v39, %v4177_v38  ;;  %v1142_v55 = vadd.f32 %v5056_v58, %v4192_v57  ;;  %v4424_v39 = vpop.f32.mrb[107].mxu1  ;;  %v5062_v31 = vld [vmem:[#allocation6_spill] sm:$0xff] }
 0x1cd   :  { %5054 = vst [vmem:[#allocation30_spill] sm:$0xff] %v4406_v12  ;;  %v953_v16 = vadd.f32 %v5057_v35, %v4156_v53  ;;  %5058 = vst [vmem:[#allocation2_spill] sm:$0xff] %v4414_v26  ;;  %v2577_v36 = vadd.f32 %v2576_v44, %v2184_v1  ;;  %v2040_v50 = vadd.f32 %v2039_v42, %v1319_v0  ;;  %v1326_v35 = vmax.f32 %v1140_v13, 0.0  ;;  %v5061_v44 = vld [vmem:[#allocation5_spill] sm:$0xff] }
 0x1ce   :  { %5059 = vst [vmem:[#allocation3_spill] sm:$0xff] %v4416_v37  ;;  %1575 = vst [vmem:[%s5016_s3 + $0x1b8] sm:$0xff] %v1319_v0  ;;  %v2186_v19 = vmul.f32 %v1319_v0, %v1319_v0  ;;  %v1930_v32 = vadd.f32 %v1929_v34, %v1324_v27  ;;  %v2191_v58 = vmul.f32 %v1324_v27, %v1324_v27  ;;  %v1325_v12 = vmax.f32 %v949_v54, 0.0 }
 0x1cf   :  { %1580 = vst [vmem:[%s5016_s3 + $0x1e0] sm:$0xff] %v1324_v27  ;;  %5060 = vst [vmem:[#allocation4_spill] sm:$0xff] %v4424_v39  ;;  %v1327_v26 = vmax.f32 %v1142_v55, 0.0  ;;  %v1332_v37 = vmax.f32 %v953_v16, 0.0  ;;  %v1146_v1 = vadd.f32 %v5061_v44, %v4175_v61  ;;  %v955_v42 = vadd.f32 %v5062_v31, %v4177_v38 }
 0x1d0   :  { %v2651_v43 = vadd.f32 %v2650_v15, %v2186_v19  ;;  %v2541_v0 = vadd.f32 %v2540_v25, %v2191_v58  ;;  %1582 = vst [vmem:[%s5016_s3 + $0x1f0] sm:$0xff] %v1326_v35  ;;  %v2004_v34 = vadd.f32 %v2003_v49, %v1326_v35  ;;  %v2193_v63 = vmul.f32 %v1326_v35, %v1326_v35  ;;  %v4442_v31 = vpop.f32.mrb[108].mxu0 }
 0x1d1   :  { %1581 = vst [vmem:[%s5016_s3 + $0x1e8] sm:$0xff] %v1325_v12  ;;  %v1967_v27 = vadd.f32 %v1966_v9, %v1325_v12  ;;  %1583 = vst [vmem:[%s5016_s3 + $0x1f8] sm:$0xff] %v1327_v26  ;;  %v2192_v15 = vmul.f32 %v1325_v12, %v1325_v12  ;;  %v2041_v13 = vadd.f32 %v2040_v50, %v1327_v26  ;;  %v1334_v16 = vmax.f32 %v1146_v1, 0.0  ;;  %v4444_v58 = vpop.f32.mrb[108].mxu1  ;;  %v4446_v9 = vpop.f32.mrb[109].mxu0  ;;  %v5063_v12 = vld [vmem:[#allocation8_spill] sm:$0xff] }
 0x1d2   :  { %v2194_v54 = vmul.f32 %v1327_v26, %v1327_v26  ;;  %1588 = vst [vmem:[%s5016_s3 + $0x220] sm:$0xff] %v1332_v37  ;;  %v1931_v25 = vadd.f32 %v1930_v32, %v1332_v37  ;;  %v2615_v49 = vadd.f32 %v2614_v21, %v2193_v63  ;;  %v2199_v55 = vmul.f32 %v1332_v37, %v1332_v37  ;;  %v5064_v50 = vld [vmem:[#allocation9_spill] sm:$0xff]  ;;  %v4452_v6 = vpop.f32.mrb[109].mxu1  ;;  %v4454_v32 = vpop.f32.mrb[110].mxu0 }
 0x1d3   :  { %v1333_v19 = vmax.f32 %v955_v42, 0.0  ;;  %v2578_v35 = vadd.f32 %v2577_v36, %v2192_v15  ;;  %v1148_v26 = vadd.f32 %v5063_v12, %v4192_v57  ;;  %v957_v39 = vadd.f32 %v5064_v50, %v4156_v53  ;;  %5065 = vst [vmem:[#allocation5_spill] sm:$0xff] %v4452_v6  ;;  %5066 = vst [vmem:[#allocation6_spill] sm:$0xff] %v4454_v32  ;;  %v4462_v36 = vpop.f32.mrb[110].mxu1  ;;  %v4464_v1 = vpop.f32.mrb[111].mxu0  ;;  %v5071_v32 = vld [vmem:[#allocation12_spill] sm:$0xff] }
 0x1d4   :  { %v2652_v44 = vadd.f32 %v2651_v43, %v2194_v54  ;;  %v2542_v63 = vadd.f32 %v2541_v0, %v2199_v55  ;;  %1590 = vst [vmem:[%s5016_s3 + $0x230] sm:$0xff] %v1334_v16  ;;  %v2005_v21 = vadd.f32 %v2004_v34, %v1334_v16  ;;  %v2201_v37 = vmul.f32 %v1334_v16, %v1334_v16  ;;  %v5068_v0 = vld [vmem:[#allocation10_spill] sm:$0xff]  ;;  %v4468_v12 = vpop.f32.mrb[111].mxu1  ;;  %v5070_v34 = vld [vmem:[#allocation11_spill] sm:$0xff] }
 0x1d5   :  { %1589 = vst [vmem:[%s5016_s3 + $0x228] sm:$0xff] %v1333_v19  ;;  %v1968_v43 = vadd.f32 %v1967_v27, %v1333_v19  ;;  %5067 = vst [vmem:[#allocation8_spill] sm:$0xff] %v4462_v36  ;;  %v2200_v42 = vmul.f32 %v1333_v19, %v1333_v19  ;;  %v1335_v15 = vmax.f32 %v1148_v26, 0.0  ;;  %v1340_v54 = vmax.f32 %v957_v39, 0.0 }
 0x1d6   :  { %v1150_v55 = vadd.f32 %v5068_v0, %v4175_v61  ;;  %5069 = vst [vmem:[#allocation9_spill] sm:$0xff] %v4468_v12  ;;  %v2616_v50 = vadd.f32 %v2615_v49, %v2201_v37  ;;  %v959_v16 = vadd.f32 %v5070_v34, %v4177_v38  ;;  %v1152_v6 = vadd.f32 %v5071_v32, %v4192_v57 }
 0x1d7   :  { %v963_v27 = vadd.f32 %v4145_v52, %v4156_v53  ;;  %v2579_v36 = vadd.f32 %v2578_v35, %v2200_v42  ;;  %1591 = vst [vmem:[%s5016_s3 + $0x238] sm:$0xff] %v1335_v15  ;;  %v2042_v39 = vadd.f32 %v2041_v13, %v1335_v15  ;;  %v2202_v19 = vmul.f32 %v1335_v15, %v1335_v15 }
 0x1d8   :  { %1596 = vst [vmem:[%s5016_s3 + $0x260] sm:$0xff] %v1340_v54  ;;  %v1932_v49 = vadd.f32 %v1931_v25, %v1340_v54  ;;  %v2207_v26 = vmul.f32 %v1340_v54, %v1340_v54  ;;  %v1342_v37 = vmax.f32 %v1150_v55, 0.0  ;;  %v1341_v0 = vmax.f32 %v959_v16, 0.0  ;;  %v4486_v42 = vpop.f32.mrb[112].mxu0 }
 0x1d9   :  { %v1343_v34 = vmax.f32 %v1152_v6, 0.0  ;;  %v2653_v32 = vadd.f32 %v2652_v44, %v2202_v19  ;;  %v1348_v12 = vmax.f32 %v963_v27, 0.0  ;;  %v1156_v52 = vadd.f32 %v4147_v18, %v4175_v61  ;;  %v4497_v18 = vpop.f32.mrb[112].mxu1 }
 0x1da   :  { %v965_v35 = vadd.f32 %v4149_v5, %v4177_v38  ;;  %v2543_v13 = vadd.f32 %v2542_v63, %v2207_v26  ;;  %1598 = vst [vmem:[%s5016_s3 + $0x270] sm:$0xff] %v1342_v37  ;;  %v2006_v25 = vadd.f32 %v2005_v21, %v1342_v37  ;;  %v2209_v15 = vmul.f32 %v1342_v37, %v1342_v37  ;;  %v4499_v5 = vpop.f32.mrb[113].mxu0  ;;  %v4504_v55 = vpop.f32.mrb[113].mxu1 }
 0x1db   :  { %1597 = vst [vmem:[%s5016_s3 + $0x268] sm:$0xff] %v1341_v0  ;;  %v1969_v6 = vadd.f32 %v1968_v43, %v1341_v0  ;;  %1599 = vst [vmem:[%s5016_s3 + $0x278] sm:$0xff] %v1343_v34  ;;  %v2208_v44 = vmul.f32 %v1341_v0, %v1341_v0  ;;  %v2043_v63 = vadd.f32 %v2042_v39, %v1343_v34  ;;  %v4506_v16 = vpop.f32.mrb[114].mxu0  ;;  %v1350_v19 = vmax.f32 %v1156_v52, 0.0  ;;  %v4508_v37 = vpop.f32.mrb[114].mxu1 }
 0x1dc   :  { %5072 = vst [vmem:[#allocation10_spill] sm:$0xff] %v4497_v18  ;;  %5073 = vst [vmem:[#allocation11_spill] sm:$0xff] %v4499_v5  ;;  %v2210_v54 = vmul.f32 %v1343_v34, %v1343_v34  ;;  %v1933_v21 = vadd.f32 %v1932_v49, %v1348_v12  ;;  %v2617_v43 = vadd.f32 %v2616_v50, %v2209_v15  ;;  %v1349_v26 = vmax.f32 %v965_v35, 0.0  ;;  %v4510_v18 = vpop.f32.mrb[115].mxu0  ;;  %v4516_v5 = vpop.f32.mrb[115].mxu1 }
 0x1dd   :  { %1604 = vst [vmem:[%s5016_s3 + $0x2a0] sm:$0xff] %v1348_v12  ;;  %5074 = vst [vmem:[#allocation12_spill] sm:$0xff] %v4504_v55  ;;  %v2215_v27 = vmul.f32 %v1348_v12, %v1348_v12  ;;  %v2580_v0 = vadd.f32 %v2579_v36, %v2208_v44  ;;  %v1158_v34 = vadd.f32 %v4158_v40, %v4192_v57  ;;  %v5076_v44 = vld [vmem:[#allocation14_spill] sm:$0xff] }
 0x1de   :  { %v2654_v39 = vadd.f32 %v2653_v32, %v2210_v54  ;;  %v967_v49 = vadd.f32 %v4160_v59, %v4156_v53  ;;  %1606 = vst [vmem:[%s5016_s3 + $0x2b0] sm:$0xff] %v1350_v19  ;;  %v2007_v12 = vadd.f32 %v2006_v25, %v1350_v19  ;;  %v2217_v50 = vmul.f32 %v1350_v19, %v1350_v19 }
 0x1df   :  { %v2544_v55 = vadd.f32 %v2543_v13, %v2215_v27  ;;  %1605 = vst [vmem:[%s5016_s3 + $0x2a8] sm:$0xff] %v1349_v26  ;;  %v1970_v36 = vadd.f32 %v1969_v6, %v1349_v26  ;;  %v2216_v32 = vmul.f32 %v1349_v26, %v1349_v26  ;;  %v1351_v52 = vmax.f32 %v1158_v34, 0.0  ;;  %v5075_v13 = vld [vmem:[#allocation13_spill] sm:$0xff] }
 0x1e0   :  { %v1356_v40 = vmax.f32 %v967_v49, 0.0  ;;  %v1160_v59 = vadd.f32 %v4162_v2, %v4175_v61  ;;  %v2618_v35 = vadd.f32 %v2617_v43, %v2217_v50  ;;  %v969_v15 = vadd.f32 %v5075_v13, %v4177_v38  ;;  %v4538_v43 = vpop.f32.mrb[116].mxu0 }
 0x1e1   :  { %v1162_v54 = vadd.f32 %v5076_v44, %v4192_v57  ;;  %v973_v25 = vadd.f32 %v4186_v3, %v4156_v53  ;;  %v2581_v27 = vadd.f32 %v2580_v0, %v2216_v32  ;;  %1607 = vst [vmem:[%s5016_s3 + $0x2b8] sm:$0xff] %v1351_v52  ;;  %v2044_v6 = vadd.f32 %v2043_v63, %v1351_v52  ;;  %v4540_v13 = vpop.f32.mrb[116].mxu1  ;;  %v4542_v3 = vpop.f32.mrb[117].mxu0 }
 0x1e2   :  { %v2218_v19 = vmul.f32 %v1351_v52, %v1351_v52  ;;  %1612 = vst [vmem:[%s5016_s3 + $0x2e0] sm:$0xff] %v1356_v40  ;;  %v1934_v2 = vadd.f32 %v1933_v21, %v1356_v40  ;;  %v2223_v26 = vmul.f32 %v1356_v40, %v1356_v40  ;;  %v1358_v34 = vmax.f32 %v1160_v59, 0.0  ;;  %5077 = vst [vmem:[#allocation13_spill] sm:$0xff] %v4542_v3  ;;  %v4548_v44 = vpop.f32.mrb[117].mxu1  ;;  %v4550_v21 = vpop.f32.mrb[118].mxu0 }
 0x1e3   :  { %v1357_v49 = vmax.f32 %v969_v15, 0.0  ;;  %v1359_v50 = vmax.f32 %v1162_v54, 0.0  ;;  %v1364_v32 = vmax.f32 %v973_v25, 0.0  ;;  %v1166_v63 = vadd.f32 %v4196_v7, %v4175_v61  ;;  %5078 = vst [vmem:[#allocation14_spill] sm:$0xff] %v4548_v44  ;;  %5079 = vst [vmem:[#allocation31_spill] sm:$0xff] %v4550_v21  ;;  %v4561_v7 = vpop.f32.mrb[118].mxu1 }
 0x1e4   :  { %v2655_v0 = vadd.f32 %v2654_v39, %v2218_v19  ;;  %v975_v52 = vadd.f32 %v4198_v11, %v4177_v38  ;;  %v2545_v40 = vadd.f32 %v2544_v55, %v2223_v26  ;;  %1614 = vst [vmem:[%s5016_s3 + $0x2f0] sm:$0xff] %v1358_v34  ;;  %v2008_v59 = vadd.f32 %v2007_v12, %v1358_v34  ;;  %v4563_v11 = vpop.f32.mrb[119].mxu0  ;;  %v4568_v19 = vpop.f32.mrb[119].mxu1 }
 0x1e5   :  { %v2225_v15 = vmul.f32 %v1358_v34, %v1358_v34  ;;  %1613 = vst [vmem:[%s5016_s3 + $0x2e8] sm:$0xff] %v1357_v49  ;;  %v1971_v39 = vadd.f32 %v1970_v36, %v1357_v49  ;;  %1615 = vst [vmem:[%s5016_s3 + $0x2f8] sm:$0xff] %v1359_v50  ;;  %v2224_v55 = vmul.f32 %v1357_v49, %v1357_v49  ;;  %v1366_v34 = vmax.f32 %v1166_v63, 0.0 }
 0x1e6   :  { %5080 = vst [vmem:[#allocation32_spill] sm:$0xff] %v4561_v7  ;;  %v2045_v54 = vadd.f32 %v2044_v6, %v1359_v50  ;;  %v2226_v25 = vmul.f32 %v1359_v50, %v1359_v50  ;;  %1620 = vst [vmem:[%s5016_s3 + $0x320] sm:$0xff] %v1364_v32  ;;  %v1935_v12 = vadd.f32 %v1934_v2, %v1364_v32  ;;  %v1365_v21 = vmax.f32 %v975_v52, 0.0 }
 0x1e7   :  { %v2619_v26 = vadd.f32 %v2618_v35, %v2225_v15  ;;  %v2231_v36 = vmul.f32 %v1364_v32, %v1364_v32  ;;  %v2582_v44 = vadd.f32 %v2581_v27, %v2224_v55  ;;  %v1168_v7 = vadd.f32 %v4204_v46, %v4192_v57  ;;  %1622 = vst [vmem:[%s5016_s3 + $0x330] sm:$0xff] %v1366_v34 }
 0x1e8   :  { %v2656_v3 = vadd.f32 %v2655_v0, %v2226_v25  ;;  %v977_v6 = vadd.f32 %v4206_v22, %v4156_v53  ;;  %v2009_v2 = vadd.f32 %v2008_v59, %v1366_v34  ;;  %v2233_v50 = vmul.f32 %v1366_v34, %v1366_v34  ;;  %1621 = vst [vmem:[%s5016_s3 + $0x328] sm:$0xff] %v1365_v21  ;;  %v4582_v63 = vpop.f32.mrb[120].mxu0 }
 0x1e9   :  { %v2546_v49 = vadd.f32 %v2545_v40, %v2231_v36  ;;  %v1972_v35 = vadd.f32 %v1971_v39, %v1365_v21  ;;  %v2232_v27 = vmul.f32 %v1365_v21, %v1365_v21  ;;  %v1367_v0 = vmax.f32 %v1168_v7, 0.0  ;;  %v4592_v21 = vpop.f32.mrb[121].mxu0 }
 0x1ea   :  { %v1372_v32 = vmax.f32 %v977_v6, 0.0  ;;  %v1170_v46 = vadd.f32 %v4210_v14, %v4175_v61  ;;  %v2620_v22 = vadd.f32 %v2619_v26, %v2233_v50  ;;  %v979_v52 = vadd.f32 %v4212_v8, %v4177_v38  ;;  %v4590_v15 = vpop.f32.mrb[120].mxu1  ;;  %v4602_v55 = vpop.f32.mrb[122].mxu0 }
 0x1eb   :  { %v1172_v40 = vadd.f32 %v4219_v23, %v4192_v57  ;;  %v983_v59 = vadd.f32 %v4247_v24, %v4156_v53  ;;  %v2583_v39 = vadd.f32 %v2582_v44, %v2232_v27  ;;  %1623 = vst [vmem:[%s5016_s3 + $0x338] sm:$0xff] %v1367_v0  ;;  %v2046_v14 = vadd.f32 %v2045_v54, %v1367_v0  ;;  %v4600_v23 = vpop.f32.mrb[121].mxu1  ;;  %v4606_v34 = vpop.f32.mrb[123].mxu0 }
 0x1ec   :  { %v2234_v7 = vmul.f32 %v1367_v0, %v1367_v0  ;;  %1628 = vst [vmem:[%s5016_s3 + $0x360] sm:$0xff] %v1372_v32  ;;  %v1936_v8 = vadd.f32 %v1935_v12, %v1372_v32  ;;  %v2239_v24 = vmul.f32 %v1372_v32, %v1372_v32  ;;  %v1374_v25 = vmax.f32 %v1170_v46, 0.0  ;;  %v4604_v44 = vpop.f32.mrb[122].mxu1  ;;  %5081 = vst [vmem:[#allocation33_spill] sm:$0xff] %v4606_v34 }
 0x1ed   :  { %v1373_v26 = vmax.f32 %v979_v52, 0.0  ;;  %v1375_v36 = vmax.f32 %v1172_v40, 0.0  ;;  %v1380_v54 = vmax.f32 %v983_v59, 0.0  ;;  %v1176_v50 = vadd.f32 %v4252_v28, %v4175_v61  ;;  %v4612_v27 = vpop.f32.mrb[123].mxu1 }
 0x1ee   :  { %v2657_v6 = vadd.f32 %v2656_v3, %v2234_v7  ;;  %v985_v12 = vadd.f32 %v4254_v47, %v4177_v38  ;;  %5082 = vst [vmem:[#allocation34_spill] sm:$0xff] %v4612_v27  ;;  %v2547_v0 = vadd.f32 %v2546_v49, %v2239_v24  ;;  %1630 = vst [vmem:[%s5016_s3 + $0x370] sm:$0xff] %v1374_v25  ;;  %v5083_v27 = vld [vmem:[#allocation19_spill] sm:$0xff] }
 0x1ef   :  { %v2010_v32 = vadd.f32 %v2009_v2, %v1374_v25  ;;  %v2241_v46 = vmul.f32 %v1374_v25, %v1374_v25  ;;  %1629 = vst [vmem:[%s5016_s3 + $0x368] sm:$0xff] %v1373_v26  ;;  %v1973_v3 = vadd.f32 %v1972_v35, %v1373_v26  ;;  %1631 = vst [vmem:[%s5016_s3 + $0x378] sm:$0xff] %v1375_v36  ;;  %v1382_v59 = vmax.f32 %v1176_v50, 0.0 }
 0x1f0   :  { %v2240_v28 = vmul.f32 %v1373_v26, %v1373_v26  ;;  %v2047_v47 = vadd.f32 %v2046_v14, %v1375_v36  ;;  %v2242_v52 = vmul.f32 %v1375_v36, %v1375_v36  ;;  %1636 = vst [vmem:[%s5016_s3 + $0x3a0] sm:$0xff] %v1380_v54  ;;  %v1937_v49 = vadd.f32 %v1936_v8, %v1380_v54 }
 0x1f1   :  { %v2621_v40 = vadd.f32 %v2620_v22, %v2241_v46  ;;  %v2247_v2 = vmul.f32 %v1380_v54, %v1380_v54  ;;  %v1381_v7 = vmax.f32 %v985_v12, 0.0  ;;  %v1178_v35 = vadd.f32 %v4260_v30, %v4192_v57  ;;  %v4630_v26 = vpop.f32.mrb[124].mxu0  ;;  %1638 = vst [vmem:[%s5016_s3 + $0x3b0] sm:$0xff] %v1382_v59  ;;  %v5084_v12 = vld [vmem:[#allocation20_spill] sm:$0xff] }
 0x1f2   :  { %v2584_v24 = vadd.f32 %v2583_v39, %v2240_v28  ;;  %v2658_v25 = vadd.f32 %v2657_v6, %v2242_v52  ;;  %v987_v34 = vadd.f32 %v5083_v27, %v4156_v53  ;;  %v2011_v8 = vadd.f32 %v2010_v32, %v1382_v59  ;;  %v4638_v36 = vpop.f32.mrb[124].mxu1  ;;  %v4640_v30 = vpop.f32.mrb[125].mxu0  ;;  %v5086_v28 = vld [vmem:[#allocation21_spill] sm:$0xff] }
 0x1f3   :  { %v2548_v14 = vadd.f32 %v2547_v0, %v2247_v2  ;;  %v2249_v22 = vmul.f32 %v1382_v59, %v1382_v59  ;;  %1637 = vst [vmem:[%s5016_s3 + $0x3a8] sm:$0xff] %v1381_v7  ;;  %v1974_v39 = vadd.f32 %v1973_v3, %v1381_v7  ;;  %v2248_v6 = vmul.f32 %v1381_v7, %v1381_v7  ;;  %v4644_v0 = vpop.f32.mrb[125].mxu1  ;;  %v4646_v46 = vpop.f32.mrb[126].mxu0 }
 0x1f4   :  { %v1383_v54 = vmax.f32 %v1178_v35, 0.0  ;;  %v1388_v50 = vmax.f32 %v987_v34, 0.0  ;;  %v1180_v27 = vadd.f32 %v5084_v12, %v4175_v61  ;;  %5085 = vst [vmem:[#allocation19_spill] sm:$0xff] %v4646_v46  ;;  %v989_v52 = vadd.f32 %v5086_v28, %v4177_v38  ;;  %v4654_v59 = vpop.f32.mrb[126].mxu1  ;;  %v4656_v34 = vpop.f32.mrb[127].mxu0 }
 0x1f5   :  { %v2622_v32 = vadd.f32 %v2621_v40, %v2249_v22  ;;  %v1182_v3 = vadd.f32 %v4277_v62, %v4192_v57  ;;  %v993_v2 = vadd.f32 %v4295_v20, %v4156_v53  ;;  %5087 = vst [vmem:[#allocation20_spill] sm:$0xff] %v4654_v59  ;;  %5088 = vst [vmem:[#allocation21_spill] sm:$0xff] %v4656_v34  ;;  %v4664_v62 = vpop.f32.mrb[127].mxu1 }
 0x1f6   :  { %v2585_v7 = vadd.f32 %v2584_v24, %v2248_v6  ;;  %1639 = vst [vmem:[%s5016_s3 + $0x3b8] sm:$0xff] %v1383_v54  ;;  %v2048_v35 = vadd.f32 %v2047_v47, %v1383_v54  ;;  %v2250_v40 = vmul.f32 %v1383_v54, %v1383_v54  ;;  %1644 = vst [vmem:[%s5016_s3 + $0x3e0] sm:$0xff] %v1388_v50  ;;  %v1390_v20 = vmax.f32 %v1180_v27, 0.0 }
 0x1f7   :  { %v1938_v22 = vadd.f32 %v1937_v49, %v1388_v50  ;;  %v2255_v12 = vmul.f32 %v1388_v50, %v1388_v50  ;;  %v1389_v28 = vmax.f32 %v989_v52, 0.0  ;;  %v1391_v59 = vmax.f32 %v1182_v3, 0.0 }
 0x1f8   :  { %v2659_v46 = vadd.f32 %v2658_v25, %v2250_v40  ;;  %v1396_v34 = vmax.f32 %v993_v2, 0.0  ;;  %v1186_v24 = vadd.f32 %v4303_v60, %v4175_v61  ;;  %v995_v47 = vadd.f32 %v4305_v45, %v4177_v38  ;;  %1646 = vst [vmem:[%s5016_s3 + $0x3f0] sm:$0xff] %v1390_v20 }
 0x1f9   :  { %v2549_v6 = vadd.f32 %v2548_v14, %v2255_v12  ;;  %v2012_v49 = vadd.f32 %v2011_v8, %v1390_v20  ;;  %v2257_v54 = vmul.f32 %v1390_v20, %v1390_v20  ;;  %1645 = vst [vmem:[%s5016_s3 + $0x3e8] sm:$0xff] %v1389_v28  ;;  %v1975_v50 = vadd.f32 %v1974_v39, %v1389_v28  ;;  %v5089_v12 = vld [vmem:[#allocation22_spill] sm:$0xff] }
 0x1fa   :  { %1647 = vst [vmem:[%s5016_s3 + $0x3f8] sm:$0xff] %v1391_v59  ;;  %v2256_v60 = vmul.f32 %v1389_v28, %v1389_v28  ;;  %v2049_v25 = vadd.f32 %v2048_v35, %v1391_v59  ;;  %v2258_v27 = vmul.f32 %v1391_v59, %v1391_v59  ;;  %1652 = vst [vmem:[%s5016_s3 + $0x420] sm:$0xff] %v1396_v34  ;;  %v1398_v52 = vmax.f32 %v1186_v24, 0.0 }
 0x1fb   :  { %v1939_v45 = vadd.f32 %v1938_v22, %v1396_v34  ;;  %v2623_v14 = vadd.f32 %v2622_v32, %v2257_v54  ;;  %v2263_v8 = vmul.f32 %v1396_v34, %v1396_v34  ;;  %v1397_v3 = vmax.f32 %v995_v47, 0.0  ;;  %v5091_v47 = vld [vmem:[#allocation24_spill] sm:$0xff] }
 0x1fc   :  { %v2586_v2 = vadd.f32 %v2585_v7, %v2256_v60  ;;  %v2660_v40 = vadd.f32 %v2659_v46, %v2258_v27  ;;  %v1188_v39 = vadd.f32 %v4307_v33, %v4192_v57  ;;  %v997_v20 = vadd.f32 %v5089_v12, %v4156_v53  ;;  %1654 = vst [vmem:[%s5016_s3 + $0x430] sm:$0xff] %v1398_v52  ;;  %v5090_v33 = vld [vmem:[#allocation23_spill] sm:$0xff] }
 0x1fd   :  { %v2550_v28 = vadd.f32 %v2549_v6, %v2263_v8  ;;  %v2013_v59 = vadd.f32 %v2012_v49, %v1398_v52  ;;  %v2265_v35 = vmul.f32 %v1398_v52, %v1398_v52  ;;  %1653 = vst [vmem:[%s5016_s3 + $0x428] sm:$0xff] %v1397_v3  ;;  %v1976_v32 = vadd.f32 %v1975_v50, %v1397_v3 }
 0x1fe   :  { %v2264_v34 = vmul.f32 %v1397_v3, %v1397_v3  ;;  %v1399_v46 = vmax.f32 %v1188_v39, 0.0  ;;  %v1404_v7 = vmax.f32 %v997_v20, 0.0  ;;  %v1190_v22 = vadd.f32 %v5090_v33, %v4175_v61 }
 0x1ff   :  { %v2624_v24 = vadd.f32 %v2623_v14, %v2265_v35  ;;  %v999_v6 = vadd.f32 %v5091_v47, %v4177_v38  ;;  %v1192_v54 = vadd.f32 %v4330_v17, %v4192_v57  ;;  %v1003_v49 = vadd.f32 %v4343_v41, %v4156_v53 }
 0x200   :  { %v2587_v60 = vadd.f32 %v2586_v2, %v2264_v34  ;;  %1655 = vst [vmem:[%s5016_s3 + $0x438] sm:$0xff] %v1399_v46  ;;  %v2050_v50 = vadd.f32 %v2049_v25, %v1399_v46  ;;  %v2266_v27 = vmul.f32 %v1399_v46, %v1399_v46  ;;  %1660 = vst [vmem:[%s5016_s3 + $0x460] sm:$0xff] %v1404_v7  ;;  %v1406_v52 = vmax.f32 %v1190_v22, 0.0 }
 0x201   :  { %v1940_v14 = vadd.f32 %v1939_v45, %v1404_v7  ;;  %v2271_v8 = vmul.f32 %v1404_v7, %v1404_v7  ;;  %v1405_v3 = vmax.f32 %v999_v6, 0.0  ;;  %v1407_v39 = vmax.f32 %v1192_v54, 0.0 }
 0x202   :  { %v2661_v17 = vadd.f32 %v2660_v40, %v2266_v27  ;;  %v1412_v12 = vmax.f32 %v1003_v49, 0.0  ;;  %v1196_v41 = vadd.f32 %v4349_v4, %v4175_v61  ;;  %v1005_v2 = vadd.f32 %v4351_v10, %v4177_v38  ;;  %1662 = vst [vmem:[%s5016_s3 + $0x470] sm:$0xff] %v1406_v52 }
 0x203   :  { %v2551_v20 = vadd.f32 %v2550_v28, %v2271_v8  ;;  %v2014_v25 = vadd.f32 %v2013_v59, %v1406_v52  ;;  %v2273_v35 = vmul.f32 %v1406_v52, %v1406_v52  ;;  %1661 = vst [vmem:[%s5016_s3 + $0x468] sm:$0xff] %v1405_v3  ;;  %v1977_v45 = vadd.f32 %v1976_v32, %v1405_v3  ;;  %v5092_v8 = vld [vmem:[#allocation25_spill] sm:$0xff] }
 0x204   :  { %1663 = vst [vmem:[%s5016_s3 + $0x478] sm:$0xff] %v1407_v39  ;;  %v2272_v4 = vmul.f32 %v1405_v3, %v1405_v3  ;;  %v2051_v40 = vadd.f32 %v2050_v50, %v1407_v39  ;;  %v2274_v34 = vmul.f32 %v1407_v39, %v1407_v39  ;;  %1668 = vst [vmem:[%s5016_s3 + $0x4a0] sm:$0xff] %v1412_v12  ;;  %v1414_v46 = vmax.f32 %v1196_v41, 0.0  ;;  %v5093_v3 = vld [vmem:[#allocation26_spill] sm:$0xff] }
 0x205   :  { %v1941_v10 = vadd.f32 %v1940_v14, %v1412_v12  ;;  %v2625_v28 = vadd.f32 %v2624_v24, %v2273_v35  ;;  %v2279_v59 = vmul.f32 %v1412_v12, %v1412_v12  ;;  %v1413_v7 = vmax.f32 %v1005_v2, 0.0 }
 0x206   :  { %v2588_v33 = vadd.f32 %v2587_v60, %v2272_v4  ;;  %v2662_v22 = vadd.f32 %v2661_v17, %v2274_v34  ;;  %v1198_v32 = vadd.f32 %v4357_v48, %v4192_v57  ;;  %v1007_v47 = vadd.f32 %v4359_v56, %v4156_v53  ;;  %1670 = vst [vmem:[%s5016_s3 + $0x4b0] sm:$0xff] %v1414_v46  ;;  %v5094_v4 = vld [vmem:[#allocation27_spill] sm:$0xff] }
 0x207   :  { %v2552_v6 = vadd.f32 %v2551_v20, %v2279_v59  ;;  %v2015_v54 = vadd.f32 %v2014_v25, %v1414_v46  ;;  %v2281_v49 = vmul.f32 %v1414_v46, %v1414_v46  ;;  %1669 = vst [vmem:[%s5016_s3 + $0x4a8] sm:$0xff] %v1413_v7  ;;  %v1978_v24 = vadd.f32 %v1977_v45, %v1413_v7 }
 0x208   :  { %v2280_v60 = vmul.f32 %v1413_v7, %v1413_v7  ;;  %v1415_v50 = vmax.f32 %v1198_v32, 0.0  ;;  %v1420_v27 = vmax.f32 %v1007_v47, 0.0  ;;  %v1200_v48 = vadd.f32 %v4364_v51, %v4175_v61 }
 0x209   :  { %v2626_v14 = vadd.f32 %v2625_v28, %v2281_v49  ;;  %v1009_v56 = vadd.f32 %v4366_v29, %v4177_v38  ;;  %v1202_v52 = vadd.f32 %v5092_v8, %v4192_v57  ;;  %v1013_v39 = vadd.f32 %v5093_v3, %v4156_v53  ;;  %v5095_v28 = vld [vmem:[#allocation28_spill] sm:$0xff] }
 0x20a   :  { %v2589_v17 = vadd.f32 %v2588_v33, %v2280_v60  ;;  %1671 = vst [vmem:[%s5016_s3 + $0x4b8] sm:$0xff] %v1415_v50  ;;  %v2052_v12 = vadd.f32 %v2051_v40, %v1415_v50  ;;  %v2282_v41 = vmul.f32 %v1415_v50, %v1415_v50  ;;  %1676 = vst [vmem:[%s5016_s3 + $0x4e0] sm:$0xff] %v1420_v27  ;;  %v1422_v29 = vmax.f32 %v1200_v48, 0.0 }
 0x20b   :  { %v1942_v51 = vadd.f32 %v1941_v10, %v1420_v27  ;;  %v2287_v2 = vmul.f32 %v1420_v27, %v1420_v27  ;;  %v1421_v20 = vmax.f32 %v1009_v56, 0.0  ;;  %v1423_v25 = vmax.f32 %v1202_v52, 0.0  ;;  %v5097_v56 = vld [vmem:[#allocation30_spill] sm:$0xff] }
 0x20c   :  { %v2663_v35 = vadd.f32 %v2662_v22, %v2282_v41  ;;  %v1428_v45 = vmax.f32 %v1013_v39, 0.0  ;;  %v1206_v34 = vadd.f32 %v5094_v4, %v4175_v61  ;;  %v1015_v59 = vadd.f32 %v5095_v28, %v4177_v38  ;;  %1678 = vst [vmem:[%s5016_s3 + $0x4f0] sm:$0xff] %v1422_v29 }
 0x20d   :  { %v2553_v46 = vadd.f32 %v2552_v6, %v2287_v2  ;;  %v2016_v40 = vadd.f32 %v2015_v54, %v1422_v29  ;;  %v2289_v7 = vmul.f32 %v1422_v29, %v1422_v29  ;;  %1677 = vst [vmem:[%s5016_s3 + $0x4e8] sm:$0xff] %v1421_v20  ;;  %v1979_v10 = vadd.f32 %v1978_v24, %v1421_v20  ;;  %v5096_v24 = vld [vmem:[#allocation29_spill] sm:$0xff] }
 0x20e   :  { %1679 = vst [vmem:[%s5016_s3 + $0x4f8] sm:$0xff] %v1423_v25  ;;  %v2288_v33 = vmul.f32 %v1421_v20, %v1421_v20  ;;  %v2053_v22 = vadd.f32 %v2052_v12, %v1423_v25  ;;  %v2290_v32 = vmul.f32 %v1423_v25, %v1423_v25  ;;  %1684 = vst [vmem:[%s5016_s3 + $0x520] sm:$0xff] %v1428_v45  ;;  %v1430_v49 = vmax.f32 %v1206_v34, 0.0  ;;  %v5099_v20 = vld [vmem:[#allocation3_spill] sm:$0xff] }
 0x20f   :  { %v1943_v47 = vadd.f32 %v1942_v51, %v1428_v45  ;;  %v2627_v6 = vadd.f32 %v2626_v14, %v2289_v7  ;;  %v2295_v54 = vmul.f32 %v1428_v45, %v1428_v45  ;;  %v1429_v60 = vmax.f32 %v1015_v59, 0.0  ;;  %v5098_v51 = vld [vmem:[#allocation2_spill] sm:$0xff] }
 0x210   :  { %v2590_v50 = vadd.f32 %v2589_v17, %v2288_v33  ;;  %v2664_v27 = vadd.f32 %v2663_v35, %v2290_v32  ;;  %v1208_v48 = vadd.f32 %v5096_v24, %v4192_v57  ;;  %v1017_v8 = vadd.f32 %v5097_v56, %v4156_v53  ;;  %1686 = vst [vmem:[%s5016_s3 + $0x530] sm:$0xff] %v1430_v49  ;;  %v5100_v35 = vld [vmem:[#allocation4_spill] sm:$0xff] }
 0x211   :  { %v2554_v52 = vadd.f32 %v2553_v46, %v2295_v54  ;;  %v2017_v3 = vadd.f32 %v2016_v40, %v1430_v49  ;;  %v2297_v39 = vmul.f32 %v1430_v49, %v1430_v49  ;;  %1685 = vst [vmem:[%s5016_s3 + $0x528] sm:$0xff] %v1429_v60  ;;  %v1980_v14 = vadd.f32 %v1979_v10, %v1429_v60 }
 0x212   :  { %v2296_v17 = vmul.f32 %v1429_v60, %v1429_v60  ;;  %v1431_v12 = vmax.f32 %v1208_v48, 0.0  ;;  %v1436_v41 = vmax.f32 %v1017_v8, 0.0  ;;  %v1210_v2 = vadd.f32 %v5098_v51, %v4175_v61 }
 0x213   :  { %v2628_v29 = vadd.f32 %v2627_v6, %v2297_v39  ;;  %v1019_v25 = vadd.f32 %v5099_v20, %v4177_v38  ;;  %v1212_v45 = vadd.f32 %v5100_v35, %v4192_v57  ;;  %v1023_v4 = vadd.f32 %v4442_v31, %v4156_v53  ;;  %v5101_v39 = vld [vmem:[#allocation5_spill] sm:$0xff] }
 0x214   :  { %v2591_v34 = vadd.f32 %v2590_v50, %v2296_v17  ;;  %1687 = vst [vmem:[%s5016_s3 + $0x538] sm:$0xff] %v1431_v12  ;;  %v2054_v28 = vadd.f32 %v2053_v22, %v1431_v12  ;;  %v2298_v59 = vmul.f32 %v1431_v12, %v1431_v12  ;;  %1692 = vst [vmem:[%s5016_s3 + $0x560] sm:$0xff] %v1436_v41  ;;  %v1438_v7 = vmax.f32 %v1210_v2, 0.0  ;;  %v5102_v17 = vld [vmem:[#allocation6_spill] sm:$0xff] }
 0x215   :  { %v1944_v46 = vadd.f32 %v1943_v47, %v1436_v41  ;;  %v2303_v40 = vmul.f32 %v1436_v41, %v1436_v41  ;;  %v1437_v10 = vmax.f32 %v1019_v25, 0.0  ;;  %v1439_v33 = vmax.f32 %v1212_v45, 0.0  ;;  %v5103_v45 = vld [vmem:[#allocation8_spill] sm:$0xff] }
 0x216   :  { %v2665_v32 = vadd.f32 %v2664_v27, %v2298_v59  ;;  %v1444_v6 = vmax.f32 %v1023_v4, 0.0  ;;  %v1216_v31 = vadd.f32 %v4444_v58, %v4175_v61  ;;  %v1025_v54 = vadd.f32 %v4446_v9, %v4177_v38  ;;  %1694 = vst [vmem:[%s5016_s3 + $0x570] sm:$0xff] %v1438_v7  ;;  %v5104_v59 = vld [vmem:[#allocation9_spill] sm:$0xff] }
 0x217   :  { %v2555_v49 = vadd.f32 %v2554_v52, %v2303_v40  ;;  %v2018_v22 = vadd.f32 %v2017_v3, %v1438_v7  ;;  %v2305_v60 = vmul.f32 %v1438_v7, %v1438_v7  ;;  %1693 = vst [vmem:[%s5016_s3 + $0x568] sm:$0xff] %v1437_v10  ;;  %v1981_v47 = vadd.f32 %v1980_v14, %v1437_v10 }
 0x218   :  { %1695 = vst [vmem:[%s5016_s3 + $0x578] sm:$0xff] %v1439_v33  ;;  %v2304_v58 = vmul.f32 %v1437_v10, %v1437_v10  ;;  %v2055_v50 = vadd.f32 %v2054_v28, %v1439_v33  ;;  %v2306_v27 = vmul.f32 %v1439_v33, %v1439_v33  ;;  %1700 = vst [vmem:[%s5016_s3 + $0x5a0] sm:$0xff] %v1444_v6  ;;  %v1446_v56 = vmax.f32 %v1216_v31, 0.0 }
 0x219   :  { %v1945_v9 = vadd.f32 %v1944_v46, %v1444_v6  ;;  %v2629_v24 = vadd.f32 %v2628_v29, %v2305_v60  ;;  %v2311_v48 = vmul.f32 %v1444_v6, %v1444_v6  ;;  %v1445_v8 = vmax.f32 %v1025_v54, 0.0 }
 0x21a   :  { %v2592_v52 = vadd.f32 %v2591_v34, %v2304_v58  ;;  %v2666_v3 = vadd.f32 %v2665_v32, %v2306_v27  ;;  %v1218_v14 = vadd.f32 %v5101_v39, %v4192_v57  ;;  %v1027_v12 = vadd.f32 %v5102_v17, %v4156_v53  ;;  %1702 = vst [vmem:[%s5016_s3 + $0x5b0] sm:$0xff] %v1446_v56 }
 0x21b   :  { %v2556_v41 = vadd.f32 %v2555_v49, %v2311_v48  ;;  %v2019_v51 = vadd.f32 %v2018_v22, %v1446_v56  ;;  %v2313_v2 = vmul.f32 %v1446_v56, %v1446_v56  ;;  %1701 = vst [vmem:[%s5016_s3 + $0x5a8] sm:$0xff] %v1445_v8  ;;  %v1982_v29 = vadd.f32 %v1981_v47, %v1445_v8  ;;  %v5106_v47 = vld [vmem:[#allocation11_spill] sm:$0xff] }
 0x21c   :  { %v2312_v20 = vmul.f32 %v1445_v8, %v1445_v8  ;;  %v1447_v25 = vmax.f32 %v1218_v14, 0.0  ;;  %v1452_v35 = vmax.f32 %v1027_v12, 0.0  ;;  %v1220_v4 = vadd.f32 %v5103_v45, %v4175_v61 }
 0x21d   :  { %v2630_v34 = vadd.f32 %v2629_v24, %v2313_v2  ;;  %v1029_v28 = vadd.f32 %v4464_v1, %v4177_v38  ;;  %v1222_v46 = vadd.f32 %v5104_v59, %v4192_v57  ;;  %v1033_v40 = vadd.f32 %v4486_v42, %v4156_v53  ;;  %v5105_v42 = vld [vmem:[#allocation10_spill] sm:$0xff] }
 0x21e   :  { %v2593_v7 = vadd.f32 %v2592_v52, %v2312_v20  ;;  %1703 = vst [vmem:[%s5016_s3 + $0x5b8] sm:$0xff] %v1447_v25  ;;  %v2056_v10 = vadd.f32 %v2055_v50, %v1447_v25  ;;  %v2314_v33 = vmul.f32 %v1447_v25, %v1447_v25  ;;  %1708 = vst [vmem:[%s5016_s3 + $0x5e0] sm:$0xff] %v1452_v35  ;;  %v1454_v1 = vmax.f32 %v1220_v4, 0.0 }
 0x21f   :  { %v1946_v32 = vadd.f32 %v1945_v9, %v1452_v35  ;;  %v2319_v6 = vmul.f32 %v1452_v35, %v1452_v35  ;;  %v1453_v31 = vmax.f32 %v1029_v28, 0.0  ;;  %v1455_v54 = vmax.f32 %v1222_v46, 0.0 }
 0x220   :  { %v2667_v49 = vadd.f32 %v2666_v3, %v2314_v33  ;;  %v1460_v22 = vmax.f32 %v1033_v40, 0.0  ;;  %v1226_v60 = vadd.f32 %v5105_v42, %v4175_v61  ;;  %v1035_v58 = vadd.f32 %v5106_v47, %v4177_v38  ;;  %1710 = vst [vmem:[%s5016_s3 + $0x5f0] sm:$0xff] %v1454_v1 }
 0x221   :  { %v2557_v27 = vadd.f32 %v2556_v41, %v2319_v6  ;;  %v2020_v50 = vadd.f32 %v2019_v51, %v1454_v1  ;;  %v2321_v24 = vmul.f32 %v1454_v1, %v1454_v1  ;;  %1709 = vst [vmem:[%s5016_s3 + $0x5e8] sm:$0xff] %v1453_v31  ;;  %v1983_v9 = vadd.f32 %v1982_v29, %v1453_v31  ;;  %v5107_v51 = vld [vmem:[#allocation12_spill] sm:$0xff] }
 0x222   :  { %1711 = vst [vmem:[%s5016_s3 + $0x5f8] sm:$0xff] %v1455_v54  ;;  %v2320_v48 = vmul.f32 %v1453_v31, %v1453_v31  ;;  %v2057_v56 = vadd.f32 %v2056_v10, %v1455_v54  ;;  %v2322_v8 = vmul.f32 %v1455_v54, %v1455_v54  ;;  %1716 = vst [vmem:[%s5016_s3 + $0x620] sm:$0xff] %v1460_v22  ;;  %v1462_v14 = vmax.f32 %v1226_v60, 0.0 }
 0x223   :  { %v1947_v52 = vadd.f32 %v1946_v32, %v1460_v22  ;;  %v2631_v3 = vadd.f32 %v2630_v34, %v2321_v24  ;;  %v2327_v39 = vmul.f32 %v1460_v22, %v1460_v22  ;;  %v1461_v17 = vmax.f32 %v1035_v58, 0.0 }
 0x224   :  { %v2594_v12 = vadd.f32 %v2593_v7, %v2320_v48  ;;  %v2668_v41 = vadd.f32 %v2667_v49, %v2322_v8  ;;  %v1228_v2 = vadd.f32 %v5107_v51, %v4192_v57  ;;  %v1037_v29 = vadd.f32 %v4506_v16, %v4156_v53  ;;  %1718 = vst [vmem:[%s5016_s3 + $0x630] sm:$0xff] %v1462_v14  ;;  %v5108_v49 = vld [vmem:[#allocation13_spill] sm:$0xff] }
 0x225   :  { %v2558_v20 = vadd.f32 %v2557_v27, %v2327_v39  ;;  %v2021_v25 = vadd.f32 %v2020_v50, %v1462_v14  ;;  %v2329_v35 = vmul.f32 %v1462_v14, %v1462_v14  ;;  %1717 = vst [vmem:[%s5016_s3 + $0x628] sm:$0xff] %v1461_v17  ;;  %v1984_v45 = vadd.f32 %v1983_v9, %v1461_v17  ;;  %v5109_v39 = vld [vmem:[#allocation14_spill] sm:$0xff] }
 0x226   :  { %v2328_v4 = vmul.f32 %v1461_v17, %v1461_v17  ;;  %v1463_v34 = vmax.f32 %v1228_v2, 0.0  ;;  %v1468_v28 = vmax.f32 %v1037_v29, 0.0  ;;  %v1230_v59 = vadd.f32 %v4508_v37, %v4175_v61  ;;  %v5110_v17 = vld [vmem:[#allocation31_spill] sm:$0xff] }
 0x227   :  { %v2632_v46 = vadd.f32 %v2631_v3, %v2329_v35  ;;  %v1039_v16 = vadd.f32 %v4510_v18, %v4177_v38  ;;  %v1232_v40 = vadd.f32 %v4516_v5, %v4192_v57  ;;  %v1043_v7 = vadd.f32 %v4538_v43, %v4156_v53 }
 0x228   :  { %v2595_v10 = vadd.f32 %v2594_v12, %v2328_v4  ;;  %1719 = vst [vmem:[%s5016_s3 + $0x638] sm:$0xff] %v1463_v34  ;;  %v2058_v33 = vadd.f32 %v2057_v56, %v1463_v34  ;;  %v2330_v32 = vmul.f32 %v1463_v34, %v1463_v34  ;;  %1724 = vst [vmem:[%s5016_s3 + $0x660] sm:$0xff] %v1468_v28  ;;  %v1470_v18 = vmax.f32 %v1230_v59, 0.0 }
 0x229   :  { %v1948_v37 = vadd.f32 %v1947_v52, %v1468_v28  ;;  %v2335_v6 = vmul.f32 %v1468_v28, %v1468_v28  ;;  %v1469_v1 = vmax.f32 %v1039_v16, 0.0  ;;  %v1471_v31 = vmax.f32 %v1232_v40, 0.0 }
 0x22a   :  { %v2669_v5 = vadd.f32 %v2668_v41, %v2330_v32  ;;  %v1476_v54 = vmax.f32 %v1043_v7, 0.0  ;;  %v1236_v43 = vadd.f32 %v4540_v13, %v4175_v61  ;;  %v1045_v22 = vadd.f32 %v5108_v49, %v4177_v38  ;;  %1726 = vst [vmem:[%s5016_s3 + $0x670] sm:$0xff] %v1470_v18 }
 0x22b   :  { %v2559_v42 = vadd.f32 %v2558_v20, %v2335_v6  ;;  %v2022_v60 = vadd.f32 %v2021_v25, %v1470_v18  ;;  %v2337_v47 = vmul.f32 %v1470_v18, %v1470_v18  ;;  %1725 = vst [vmem:[%s5016_s3 + $0x668] sm:$0xff] %v1469_v1  ;;  %v1985_v58 = vadd.f32 %v1984_v45, %v1469_v1  ;;  %v5111_v45 = vld [vmem:[#allocation32_spill] sm:$0xff] }
 0x22c   :  { %1727 = vst [vmem:[%s5016_s3 + $0x678] sm:$0xff] %v1471_v31  ;;  %v2336_v13 = vmul.f32 %v1469_v1, %v1469_v1  ;;  %v2059_v27 = vadd.f32 %v2058_v33, %v1471_v31  ;;  %v2338_v50 = vmul.f32 %v1471_v31, %v1471_v31  ;;  %1732 = vst [vmem:[%s5016_s3 + $0x6a0] sm:$0xff] %v1476_v54  ;;  %v1478_v56 = vmax.f32 %v1236_v43, 0.0 }
 0x22d   :  { %v1949_v24 = vadd.f32 %v1948_v37, %v1476_v54  ;;  %v2633_v9 = vadd.f32 %v2632_v46, %v2337_v47  ;;  %v2343_v48 = vmul.f32 %v1476_v54, %v1476_v54  ;;  %v1477_v8 = vmax.f32 %v1045_v22, 0.0 }
 0x22e   :  { %v2596_v52 = vadd.f32 %v2595_v10, %v2336_v13  ;;  %v2670_v3 = vadd.f32 %v2669_v5, %v2338_v50  ;;  %v1238_v14 = vadd.f32 %v5109_v39, %v4192_v57  ;;  %v1047_v12 = vadd.f32 %v5110_v17, %v4156_v53  ;;  %1734 = vst [vmem:[%s5016_s3 + $0x6b0] sm:$0xff] %v1478_v56  ;;  %v5113_v17 = vld [vmem:[#allocation34_spill] sm:$0xff] }
 0x22f   :  { %v2560_v41 = vadd.f32 %v2559_v42, %v2343_v48  ;;  %v2023_v51 = vadd.f32 %v2022_v60, %v1478_v56  ;;  %v2345_v2 = vmul.f32 %v1478_v56, %v1478_v56  ;;  %1733 = vst [vmem:[%s5016_s3 + $0x6a8] sm:$0xff] %v1477_v8  ;;  %v1986_v29 = vadd.f32 %v1985_v58, %v1477_v8 }
 0x230   :  { %v2344_v20 = vmul.f32 %v1477_v8, %v1477_v8  ;;  %v1479_v25 = vmax.f32 %v1238_v14, 0.0  ;;  %v1484_v35 = vmax.f32 %v1047_v12, 0.0  ;;  %v1240_v4 = vadd.f32 %v5111_v45, %v4175_v61 }
 0x231   :  { %v2634_v34 = vadd.f32 %v2633_v9, %v2345_v2  ;;  %v1049_v28 = vadd.f32 %v4563_v11, %v4177_v38  ;;  %v1242_v59 = vadd.f32 %v4568_v19, %v4192_v57  ;;  %v1053_v46 = vadd.f32 %v4582_v63, %v4156_v53 }
 0x232   :  { %v2597_v16 = vadd.f32 %v2596_v52, %v2344_v20  ;;  %1735 = vst [vmem:[%s5016_s3 + $0x6b8] sm:$0xff] %v1479_v25  ;;  %v2060_v40 = vadd.f32 %v2059_v27, %v1479_v25  ;;  %v2346_v7 = vmul.f32 %v1479_v25, %v1479_v25  ;;  %1740 = vst [vmem:[%s5016_s3 + $0x6e0] sm:$0xff] %v1484_v35  ;;  %v1486_v11 = vmax.f32 %v1240_v4, 0.0 }
 0x233   :  { %v1950_v10 = vadd.f32 %v1949_v24, %v1484_v35  ;;  %v2351_v33 = vmul.f32 %v1484_v35, %v1484_v35  ;;  %v1485_v32 = vmax.f32 %v1049_v28, 0.0  ;;  %v1487_v37 = vmax.f32 %v1242_v59, 0.0 }
 0x234   :  { %v2671_v19 = vadd.f32 %v2670_v3, %v2346_v7  ;;  %v1492_v6 = vmax.f32 %v1053_v46, 0.0  ;;  %v1246_v63 = vadd.f32 %v4590_v15, %v4175_v61  ;;  %v1055_v18 = vadd.f32 %v4592_v21, %v4177_v38  ;;  %1742 = vst [vmem:[%s5016_s3 + $0x6f0] sm:$0xff] %v1486_v11 }
 0x235   :  { %v2561_v1 = vadd.f32 %v2560_v41, %v2351_v33  ;;  %v2024_v31 = vadd.f32 %v2023_v51, %v1486_v11  ;;  %v2353_v5 = vmul.f32 %v1486_v11, %v1486_v11  ;;  %1741 = vst [vmem:[%s5016_s3 + $0x6e8] sm:$0xff] %v1485_v32  ;;  %v1987_v54 = vadd.f32 %v1986_v29, %v1485_v32 }
 0x236   :  { %1743 = vst [vmem:[%s5016_s3 + $0x6f8] sm:$0xff] %v1487_v37  ;;  %v2352_v15 = vmul.f32 %v1485_v32, %v1485_v32  ;;  %v2061_v43 = vadd.f32 %v2060_v40, %v1487_v37  ;;  %v2354_v49 = vmul.f32 %v1487_v37, %v1487_v37  ;;  %1748 = vst [vmem:[%s5016_s3 + $0x720] sm:$0xff] %v1492_v6  ;;  %v1494_v60 = vmax.f32 %v1246_v63, 0.0 }
 0x237   :  { %v1951_v21 = vadd.f32 %v1950_v10, %v1492_v6  ;;  %v2635_v22 = vadd.f32 %v2634_v34, %v2353_v5  ;;  %v2359_v42 = vmul.f32 %v1492_v6, %v1492_v6  ;;  %v1493_v47 = vmax.f32 %v1055_v18, 0.0  ;;  %v5114_v18 = vld [vmem:[#allocation19_spill] sm:$0xff] }
 0x238   :  { %v2598_v58 = vadd.f32 %v2597_v16, %v2352_v15  ;;  %v2672_v13 = vadd.f32 %v2671_v19, %v2354_v49  ;;  %v1248_v27 = vadd.f32 %v4600_v23, %v4192_v57  ;;  %v1057_v50 = vadd.f32 %v4602_v55, %v4156_v53  ;;  %1750 = vst [vmem:[%s5016_s3 + $0x730] sm:$0xff] %v1494_v60  ;;  %v5112_v55 = vld [vmem:[#allocation33_spill] sm:$0xff] }
 0x239   :  { %v2562_v24 = vadd.f32 %v2561_v1, %v2359_v42  ;;  %v2025_v9 = vadd.f32 %v2024_v31, %v1494_v60  ;;  %v2361_v48 = vmul.f32 %v1494_v60, %v1494_v60  ;;  %1749 = vst [vmem:[%s5016_s3 + $0x728] sm:$0xff] %v1493_v47  ;;  %v1988_v56 = vadd.f32 %v1987_v54, %v1493_v47 }
 0x23a   :  { %v2360_v8 = vmul.f32 %v1493_v47, %v1493_v47  ;;  %v1495_v52 = vmax.f32 %v1248_v27, 0.0  ;;  %v1500_v3 = vmax.f32 %v1057_v50, 0.0  ;;  %v1250_v23 = vadd.f32 %v4604_v44, %v4175_v61 }
 0x23b   :  { %v2636_v39 = vadd.f32 %v2635_v22, %v2361_v48  ;;  %v1059_v14 = vadd.f32 %v5112_v55, %v4177_v38  ;;  %v1252_v12 = vadd.f32 %v5113_v17, %v4192_v57  ;;  %v1063_v41 = vadd.f32 %v4630_v26, %v4156_v53 }
 0x23c   :  { %v2599_v51 = vadd.f32 %v2598_v58, %v2360_v8  ;;  %1751 = vst [vmem:[%s5016_s3 + $0x738] sm:$0xff] %v1495_v52  ;;  %v2062_v2 = vadd.f32 %v2061_v43, %v1495_v52  ;;  %v2362_v29 = vmul.f32 %v1495_v52, %v1495_v52  ;;  %1756 = vst [vmem:[%s5016_s3 + $0x760] sm:$0xff] %v1500_v3  ;;  %v1502_v25 = vmax.f32 %v1250_v23, 0.0 }
 0x23d   :  { %v1952_v44 = vadd.f32 %v1951_v21, %v1500_v3  ;;  %v2367_v20 = vmul.f32 %v1500_v3, %v1500_v3  ;;  %v1501_v35 = vmax.f32 %v1059_v14, 0.0  ;;  %v1503_v45 = vmax.f32 %v1252_v12, 0.0 }
 0x23e   :  { %v2673_v4 = vadd.f32 %v2672_v13, %v2362_v29  ;;  %v1508_v34 = vmax.f32 %v1063_v41, 0.0  ;;  %v1256_v26 = vadd.f32 %v4638_v36, %v4175_v61  ;;  %v1065_v28 = vadd.f32 %v4640_v30, %v4177_v38  ;;  %1758 = vst [vmem:[%s5016_s3 + $0x770] sm:$0xff] %v1502_v25 }
 0x23f   :  { %v2563_v59 = vadd.f32 %v2562_v24, %v2367_v20  ;;  %v2026_v46 = vadd.f32 %v2025_v9, %v1502_v25  ;;  %v2369_v16 = vmul.f32 %v1502_v25, %v1502_v25  ;;  %1757 = vst [vmem:[%s5016_s3 + $0x768] sm:$0xff] %v1501_v35  ;;  %v1989_v40 = vadd.f32 %v1988_v56, %v1501_v35 }
 0x240   :  { %1759 = vst [vmem:[%s5016_s3 + $0x778] sm:$0xff] %v1503_v45  ;;  %v2368_v36 = vmul.f32 %v1501_v35, %v1501_v35  ;;  %v2063_v7 = vadd.f32 %v2062_v2, %v1503_v45  ;;  %v2370_v10 = vmul.f32 %v1503_v45, %v1503_v45  ;;  %1764 = vst [vmem:[%s5016_s3 + $0x7a0] sm:$0xff] %v1508_v34  ;;  %v1510_v32 = vmax.f32 %v1256_v26, 0.0 }
 0x241   :  { %v1953_v30 = vadd.f32 %v1952_v44, %v1508_v34  ;;  %v2637_v33 = vadd.f32 %v2636_v39, %v2369_v16  ;;  %v2375_v11 = vmul.f32 %v1508_v34, %v1508_v34  ;;  %v1509_v37 = vmax.f32 %v1065_v28, 0.0 }
 0x242   :  { %v2600_v19 = vadd.f32 %v2599_v51, %v2368_v36  ;;  %v2674_v6 = vadd.f32 %v2673_v4, %v2370_v10  ;;  %v1258_v63 = vadd.f32 %v4644_v0, %v4192_v57  ;;  %v1067_v1 = vadd.f32 %v5114_v18, %v4156_v53  ;;  %1766 = vst [vmem:[%s5016_s3 + $0x7b0] sm:$0xff] %v1510_v32  ;;  %v5115_v0 = vld [vmem:[#allocation20_spill] sm:$0xff]  ;;  %v5116_v53 = vld [vmem:[#allocation21_spill] sm:$0xff] }
 0x243   :  { %v2564_v31 = vadd.f32 %v2563_v59, %v2375_v11  ;;  %v2027_v5 = vadd.f32 %v2026_v46, %v1510_v32  ;;  %v2377_v54 = vmul.f32 %v1510_v32, %v1510_v32  ;;  %1765 = vst [vmem:[%s5016_s3 + $0x7a8] sm:$0xff] %v1509_v37  ;;  %v1990_v15 = vadd.f32 %v1989_v40, %v1509_v37 }
 0x244   :  { %v2376_v43 = vmul.f32 %v1509_v37, %v1509_v37  ;;  %v1511_v49 = vmax.f32 %v1258_v63, 0.0  ;;  %v1516_v21 = vmax.f32 %v1067_v1, 0.0  ;;  %v1260_v22 = vadd.f32 %v5115_v0, %v4175_v61 }
 0x245   :  { %v2638_v42 = vadd.f32 %v2637_v33, %v2377_v54  ;;  %v1069_v60 = vadd.f32 %v5116_v53, %v4177_v38  ;;  %v1262_v47 = vadd.f32 %v4664_v62, %v4192_v57 }
 0x246   :  { %v2601_v58 = vadd.f32 %v2600_v19, %v2376_v43  ;;  %1767 = vst [vmem:[%s5016_s3 + $0x7b8] sm:$0xff] %v1511_v49  ;;  %v2064_v13 = vadd.f32 %v2063_v7, %v1511_v49  ;;  %v2378_v27 = vmul.f32 %v1511_v49, %v1511_v49  ;;  %1772 = vst [vmem:[%s5016_s3 + $0x7e0] sm:$0xff] %v1516_v21  ;;  %v1518_v24 = vmax.f32 %v1260_v22, 0.0 }
 0x247   :  { %v1954_v50 = vadd.f32 %v1953_v30, %v1516_v21  ;;  %v2383_v61 = vmul.f32 %v1516_v21, %v1516_v21  ;;  %v1517_v9 = vmax.f32 %v1069_v60, 0.0  ;;  %v1519_v48 = vmax.f32 %v1262_v47, 0.0 }
 0x248   :  { %v2675_v38 = vadd.f32 %v2674_v6, %v2378_v27  ;;  %1774 = vst [vmem:[%s5016_s3 + $0x7f0] sm:$0xff] %v1518_v24  ;;  %v2028_v57 = vadd.f32 %v2027_v5, %v1518_v24  ;;  %v2385_v62 = vmul.f32 %v1518_v24, %v1518_v24  ;;  %v5117_v24 = vld [vmem:[#allocation7_spill] sm:$0xff] }
 0x249   :  { %v1955_v56 = vrot.slane %v1954_v50, 4  ;;  %v2565_v8 = vadd.f32 %v2564_v31, %v2383_v61  ;;  %1773 = vst [vmem:[%s5016_s3 + $0x7e8] sm:$0xff] %v1517_v9  ;;  %v1991_v52 = vadd.f32 %v1990_v15, %v1517_v9  ;;  %1775 = vst [vmem:[%s5016_s3 + $0x7f8] sm:$0xff] %v1519_v48  ;;  %v2384_v23 = vmul.f32 %v1517_v9, %v1517_v9 }
 0x24a   :  { %v2065_v39 = vadd.f32 %v2064_v13, %v1519_v48  ;;  %v2386_v55 = vmul.f32 %v1519_v48, %v1519_v48  ;;  %v2029_v17 = vrot.slane %v2028_v57, 4  ;;  %v2639_v12 = vadd.f32 %v2638_v42, %v2385_v62 }
 0x24b   :  { %v1956_v3 = vadd.f32 %v1955_v56, %v1954_v50  ;;  %v2566_v14 = vrot.slane %v2565_v8, 4  ;;  %v1992_v41 = vrot.slane %v1991_v52, 4  ;;  %v2602_v2 = vadd.f32 %v2601_v58, %v2384_v23 }
 0x24c   :  { %v2066_v29 = vrot.slane %v2065_v39, 4  ;;  %v2676_v44 = vadd.f32 %v2675_v38, %v2386_v55  ;;  %v2030_v25 = vadd.f32 %v2029_v17, %v2028_v57  ;;  %v2640_v35 = vrot.slane %v2639_v12, 4  ;;  %v5121_v17 = vld [vmem:[#allocation17_spill] sm:$0xff] }
 0x24d   :  { %v1957_v51 = vrot.slane %v1956_v3, 2  ;;  %v2567_v20 = vadd.f32 %v2566_v14, %v2565_v8  ;;  %v1993_v45 = vadd.f32 %v1992_v41, %v1991_v52  ;;  %v2603_v34 = vrot.slane %v2602_v2, 4  ;;  %v5118_v52 = vld [vmem:[#allocation15_spill] sm:$0xff] }
 0x24e   :  { %v2067_v26 = vadd.f32 %v2066_v29, %v2065_v39  ;;  %v2677_v28 = vrot.slane %v2676_v44, 4  ;;  %v2031_v46 = vrot.slane %v2030_v25, 2  ;;  %v2641_v16 = vadd.f32 %v2640_v35, %v2639_v12  ;;  %v5122_v12 = vld [vmem:[#allocation18_spill] sm:$0xff] }
 0x24f   :  { %v1958_v4 = vadd.f32 %v1957_v51, %v1956_v3  ;;  %v2568_v59 = vrot.slane %v2567_v20, 2  ;;  %v1994_v40 = vrot.slane %v1993_v45, 2  ;;  %v2604_v7 = vadd.f32 %v2603_v34, %v2602_v2  ;;  %v5119_v3 = vld [vmem:[#allocation16_spill] sm:$0xff] }
 0x250   :  { %v2068_v10 = vrot.slane %v2067_v26, 2  ;;  %v2678_v30 = vadd.f32 %v2677_v28, %v2676_v44  ;;  %v2032_v11 = vadd.f32 %v2031_v46, %v2030_v25  ;;  %v2642_v32 = vrot.slane %v2641_v16, 2 }
 0x251   :  { %v1959_v36 = vrot.slane %v1958_v4, 1  ;;  %v2569_v33 = vadd.f32 %v2568_v59, %v2567_v20  ;;  %v1995_v37 = vadd.f32 %v1994_v40, %v1993_v45  ;;  %v2605_v6 = vrot.slane %v2604_v7, 2 }
 0x252   :  { %v2069_v63 = vadd.f32 %v2068_v10, %v2067_v26  ;;  %v2679_v18 = vrot.slane %v2678_v30, 2  ;;  %v2033_v31 = vrot.slane %v2032_v11, 1  ;;  %v2643_v5 = vadd.f32 %v2642_v32, %v2641_v16 }
 0x253   :  { %v1960_v19 = vadd.f32 %v1959_v36, %v1958_v4  ;;  %v2570_v1 = vrot.slane %v2569_v33, 1  ;;  %v1996_v54 = vrot.slane %v1995_v37, 1  ;;  %v2606_v15 = vadd.f32 %v2605_v6, %v2604_v7 }
 0x254   :  { %v2070_v43 = vrot.slane %v2069_v63, 1  ;;  %v2680_v49 = vadd.f32 %v2679_v18, %v2678_v30  ;;  %v2034_v21 = vadd.f32 %v2033_v31, %v2032_v11  ;;  %v2644_v0 = vrot.slane %v2643_v5, 1 }
 0x255   :  { %v1997_v22 = vadd.f32 %v1996_v54, %v1995_v37  ;;  %v2571_v42 = vadd.f32 %v2570_v1, %v2569_v33  ;;  %v2607_v53 = vrot.slane %v2606_v15, 1  ;;  %v5120_v23 = vcombine.low %v5118_v52, %v5119_v3 }
 0x256   :  { %v2071_v60 = vadd.f32 %v2070_v43, %v2069_v63  ;;  %v2681_v47 = vrot.slane %v2680_v49, 1  ;;  %v2645_v58 = vadd.f32 %v2644_v0, %v2643_v5  ;;  %v5123_v41 = vcombine.low %v5121_v17, %v5122_v12 }
 0x257   :  { %v2082_v13 = vcombine.low %v1960_v19, %v1997_v22  ;;  %v2608_v27 = vadd.f32 %v2607_v53, %v2606_v15  ;;  %v2120_v39 = vrot.slane %v5120_v23, %v5117_v24 }
 0x258   :  { %v2083_v50 = vcombine.low %v2034_v21, %v2071_v60  ;;  %v2682_v61 = vadd.f32 %v2681_v47, %v2680_v49  ;;  %v2731_v51 = vrot.slane %v5123_v41, %v5117_v24 }
 0x259   :  { %v2104_v9 = vrot.slane %v2082_v13, %v5117_v24  ;;  %v2693_v48 = vcombine.low %v2571_v42, %v2608_v27 }
 0x25a   :  { %v2111_v38 = vrot.slane %v2083_v50, %v5117_v24  ;;  %v2694_v56 = vcombine.low %v2645_v58, %v2682_v61 }
 0x25b   :  { %v2715_v8 = vrot.slane %v2693_v48, %v5117_v24 }
 0x25c   :  { %v2113_v57 = vcombine.low %v2104_v9, %v2111_v38  ;;  %v2722_v62 = vrot.slane %v2694_v56, %v5117_v24 }
 0x25e   :  { %v2127_v55 = vrot.slane %v2113_v57, %v5117_v24  ;;  %v2724_v14 = vcombine.low %v2715_v8, %v2722_v62 }
 0x260   :  { %v2128_v2 = vcombine.low %v2120_v39, %v2127_v55  ;;  %v2738_v29 = vrot.slane %v2724_v14, %v5117_v24 }
 0x262   :  { %2130 = vst [vmem:[%s5017_s4] sm:$0xff] %v2128_v2  ;;  %v2739_v44 = vcombine.low %v2731_v51, %v2738_v29 }
 0x264   :  { %2741 = vst [vmem:[%s5018_s5] sm:$0xff] %v2739_v44 }

// kernel: pointnet_backbone_forward.19
= control target key start
LH: loop header
LB: loop body
LE: loop exit
PB: predicated region body
PF: predicated region fallthrough
CT: control target
= control target key end

     0   :  { %s1009_s18 = smov 0   ;;  %s1011_s19 = smov 0   ;;  %s1195_s0 = inlined_call_operand.vmem [shape: f32[2,128,3], index: 0, kind: input, shape index: {}]   ;;  %s1196_s1 = inlined_call_operand.vmem [shape: f32[2,3,64], index: 1, kind: input, shape index: {}]   ;;  %s1197_s2 = inlined_call_operand.vmem [shape: f32[2,1,64], index: 2, kind: input, shape index: {}]   ;;  %s1198_s3 = inlined_call_operand.vmem [shape: f32[2,128,64], index: 3, kind: output, shape index: {0}]   ;;  %s1199_s4 = inlined_call_operand.vmem [shape: f32[2,1,1,64], index: 4, kind: output, shape index: {1}]   ;;  %s1200_s5 = inlined_call_operand.vmem [shape: f32[2,1,1,64], index: 5, kind: output, shape index: {2}]  }
   0x1   :  { %s1013_s20 = smov 0  }
   0x2 LB: > { %s28_s21 = sadd.s32 1, %s973_s19  ;;  %p858_p0 = scmp.ge.s32.totalorder %s977_s20, 1  ;;  %s977_s20 = sphi %s1013_s20, %s16_s20   ;;  %s973_s19 = sphi %s1011_s19, %s1202_s19   ;;  %s969_s18 = sphi %s1009_s18, %s1201_s18  }
   0x3   : > { %p30_p1 = scmp.ge.s32.totalorder %s28_s21, 2  ;;  %p234_p2 = scmp.lt.s32.totalorder %s977_s20, 3 }
   0x5   : > { %s1204_s21 = smov (%p30_p1, %s28_s21), 0  ;;  %p235_p3 = pnand %p858_p0, %p234_p2 }
   0x6   : > { %p290_p4 = scmp.lt.s32.totalorder (!%p235_p3), %s969_s18, 1  ;;  %vm401_vm0 = vcmask (!%p235_p3), 1042432   ;;  %vm352_vm1 = vcmask (!%p235_p3), 23552   ;;  %vm566_vm2 = vcmask (!%p235_p3), 523264   ;;  %vm620_vm3 = vcmask (!%p235_p3), 516096  }
   0x7   : > { %238 = sbr.rel (%p235_p3) target bundleno = 285 (0x11d), region = 32 }
   0xe   : > { %s1206_s18 = smov (!%p290_p4, %s969_s18), 1 }
   0xf   : > { %s884_s22 = sshll.u32 %s1206_s18, 7  ;;  %s861_s23 = sshll.u32 %s1206_s18, 2 }
  0x10   : > { %s1036_s26 = scalar_lea.vmem %s1195_s0, %s884_s22  ;;  %s302_s29 = scalar_lea.vmem %s1196_s1, %s861_s23 }
  0x11   : > { %v344_v0 = vld [vmem:[%s302_s29] sm:$0x7]  ;;  %v329_v2 = vld [vmem:[%s1036_s26 + $0x8] sm:$0xff]  ;;  %v330_v3 = vld [vmem:[%s1036_s26 + $0x10] sm:$0xff]  ;;  %s305_s7 = scalar_lea.vmem %s1197_s2, %s1206_s18  ;;  %s1085_s10 = scalar_lea.vmem %s1198_s3, %s884_s22 }
  0x12   : > { %v328_v1 = vld [vmem:[%s1036_s26] sm:$0xff]  ;;  %903 = vmatprep.subr.msk.mxu0 %vm401_vm0, %v344_v0  ;;  %929 = vmatprep.subr.msk.mxu1 %vm401_vm0, %v344_v0  ;;  %v337_v5 = vld [vmem:[%s1036_s26 + $0x48] sm:$0xff]  ;;  %v331_v6 = vld [vmem:[%s1036_s26 + $0x18] sm:$0xff]  ;;  %s321_s13 = scalar_lea.vmem %s1199_s4, %s1206_s18  ;;  %s327_s16 = scalar_lea.vmem %s1200_s5, %s1206_s18 }
  0x13   : > { %905 = vmatprep.mubr.msk.f32.mxu0 %vm352_vm1, %v328_v1  ;;  %904 = vmatpush3.msk.msra.mxu0 %vm401_vm0, %v344_v0  ;;  %v336_v4 = vld [vmem:[%s1036_s26 + $0x40] sm:$0xff]  ;;  %v338_v7 = vld [vmem:[%s1036_s26 + $0x50] sm:$0xff]  ;;  %v339_v9 = vld [vmem:[%s1036_s26 + $0x58] sm:$0xff] }
  0x14   : > { %906 = vmatmul.mubr.msk.f32.vlgmr.msra.gmra.mrb[0].mxu0 %vm352_vm1, %v329_v2  ;;  %930 = vmatpush3.msk.msra.mxu1 %vm401_vm0, %v344_v0  ;;  %v332_v8 = vld [vmem:[%s1036_s26 + $0x20] sm:$0xff]  ;;  %v333_v11 = vld [vmem:[%s1036_s26 + $0x28] sm:$0xff]  ;;  %v334_v12 = vld [vmem:[%s1036_s26 + $0x30] sm:$0xff] }
  0x15   : > { %908 = vmatprep.mubr.msk.f32.mxu0 %vm352_vm1, %v330_v3  ;;  %917 = vmatprep.mubr.msk.f32.mxu1 %vm352_vm1, %v336_v4  ;;  %v340_v10 = vld [vmem:[%s1036_s26 + $0x60] sm:$0xff]  ;;  %v341_v13 = vld [vmem:[%s1036_s26 + $0x68] sm:$0xff]  ;;  %v342_v14 = vld [vmem:[%s1036_s26 + $0x70] sm:$0xff] }
  0x16   : > { %918 = vmatmul.mubr.msk.f32.vlgmr.msra.gmra.mrb[0].mxu1 %vm352_vm1, %v337_v5  ;;  %v335_v15 = vld [vmem:[%s1036_s26 + $0x38] sm:$0xff]  ;;  %v1077_v17 = vld [vmem:[%s305_s7] ss:$0 sm:$0xff] }
  0x17   : > { %920 = vmatprep.mubr.msk.f32.mxu1 %vm352_vm1, %v338_v7  ;;  %v343_v16 = vld [vmem:[%s1036_s26 + $0x78] sm:$0xff] }
  0x18   : > { %909 = vmatmul.mubr.msk.f32.gmra.mrb[2].mxu0 %vm352_vm1, %v331_v6 }
  0x19   : > { %911 = vmatprep.mubr.msk.f32.mxu0 %vm352_vm1, %v332_v8 }
  0x1a   : > { %921 = vmatmul.mubr.msk.f32.gmra.mrb[2].mxu1 %vm352_vm1, %v339_v9 }
  0x1b   : > { %923 = vmatprep.mubr.msk.f32.mxu1 %vm352_vm1, %v340_v10 }
  0x1c   : > { %912 = vmatmul.mubr.msk.f32.gmra.mrb[4].mxu0 %vm352_vm1, %v333_v11 }
  0x1d   : > { %914 = vmatprep.mubr.msk.f32.mxu0 %vm352_vm1, %v334_v12 }
  0x1e   : > { %924 = vmatmul.mubr.msk.f32.gmra.mrb[4].mxu1 %vm352_vm1, %v341_v13 }
  0x1f   : > { %926 = vmatprep.mubr.msk.f32.mxu1 %vm352_vm1, %v342_v14 }
  0x20   : > { %915 = vmatmul.mubr.msk.f32.gmra.mrb[6].mxu0 %vm352_vm1, %v335_v15 }
  0x22   : > { %927 = vmatmul.mubr.msk.f32.gmra.mrb[6].mxu1 %vm352_vm1, %v343_v16 }
  0xe7   : > { %v907_v18 = vpop.f32.mrb[0].mxu0 }
  0xe8   : > { %v477_v19 = vadd.f32 %v907_v18, %v1077_v17  ;;  %v471_v20 = vpop.f32.mrb[1].mxu0 }
  0xe9   : > { %v472_v21 = vadd.f32 %v1077_v17, %v471_v20  ;;  %v919_v22 = vpop.f32.mrb[0].mxu1 }
  0xea   : > { %v551_v23 = vmax.f32 %v477_v19, 0.0  ;;  %v517_v24 = vadd.f32 %v919_v22, %v1077_v17  ;;  %v511_v25 = vpop.f32.mrb[1].mxu1 }
  0xeb   : > { %v550_v26 = vmax.f32 %v472_v21, 0.0  ;;  %v910_v27 = vpop.f32.mrb[2].mxu0  ;;  %v512_v28 = vadd.f32 %v1077_v17, %v511_v25 }
  0xec   : > { %568 = vst.msk [vmem:[%s1085_s10 + $0x8] sm:$0xff] %vm566_vm2, %v551_v23  ;;  %v584_v29 = vsel %vm566_vm2, %v551_v23, 0.0  ;;  %v623_v30 = vmul.f32 %v551_v23, %v551_v23  ;;  %v487_v31 = vadd.f32 %v910_v27, %v1077_v17  ;;  %v481_v32 = vpop.f32.mrb[3].mxu0  ;;  %v1094_v33 = vmax.f32 %v517_v24, 0.0 }
  0xed   : > { %567 = vst.msk [vmem:[%s1085_s10] sm:$0xff] %vm566_vm2, %v550_v26  ;;  %v583_v34 = vsel %vm566_vm2, %v550_v26, 0.0  ;;  %v622_v35 = vmul.f32 %v550_v26, %v550_v26  ;;  %v482_v36 = vadd.f32 %v1077_v17, %v481_v32  ;;  %v1100_v37 = vmax.f32 %v512_v28, 0.0  ;;  %v922_v38 = vpop.f32.mrb[2].mxu1 }
  0xee   : > { %v639_v39 = vsel %vm566_vm2, %v623_v30, 0.0  ;;  %v585_v40 = vadd.f32 %v584_v29, %v583_v34  ;;  %v553_v41 = vmax.f32 %v487_v31, 0.0  ;;  %576 = vst.msk [vmem:[%s1085_s10 + $0x48] sm:$0xff] %vm566_vm2, %v1094_v33  ;;  %v521_v42 = vpop.f32.mrb[3].mxu1  ;;  %v527_v62 = vadd.f32 %v922_v38, %v1077_v17 }
  0xef   : > { %v638_v43 = vsel %vm566_vm2, %v622_v35, 0.0  ;;  %v552_v44 = vmax.f32 %v482_v36, 0.0  ;;  %v913_v45 = vpop.f32.mrb[4].mxu0  ;;  %575 = vst.msk [vmem:[%s1085_s10 + $0x40] sm:$0xff] %vm566_vm2, %v1100_v37  ;;  %v522_v3 = vadd.f32 %v1077_v17, %v521_v42  ;;  %v630_v12 = vmul.f32 %v1100_v37, %v1100_v37 }
  0xf0   : > { %v640_v46 = vadd.f32 %v639_v39, %v638_v43  ;;  %570 = vst.msk [vmem:[%s1085_s10 + $0x18] sm:$0xff] %vm566_vm2, %v553_v41  ;;  %v625_v47 = vmul.f32 %v553_v41, %v553_v41  ;;  %v497_v48 = vadd.f32 %v913_v45, %v1077_v17  ;;  %v491_v49 = vpop.f32.mrb[5].mxu0  ;;  %v588_v54 = vsel %vm566_vm2, %v553_v41, 0.0 }
  0xf1   : > { %569 = vst.msk [vmem:[%s1085_s10 + $0x10] sm:$0xff] %vm566_vm2, %v552_v44  ;;  %v586_v50 = vsel %vm566_vm2, %v552_v44, 0.0  ;;  %v624_v51 = vmul.f32 %v552_v44, %v552_v44  ;;  %v492_v52 = vadd.f32 %v1077_v17, %v491_v49  ;;  %v925_v53 = vpop.f32.mrb[4].mxu1  ;;  %v561_v18 = vmax.f32 %v527_v62, 0.0 }
  0xf2   : > { %v587_v55 = vadd.f32 %v586_v50, %v585_v40  ;;  %v555_v56 = vmax.f32 %v497_v48, 0.0  ;;  %v531_v57 = vpop.f32.mrb[5].mxu1  ;;  %v643_v58 = vsel %vm566_vm2, %v625_v47, 0.0  ;;  %v560_v21 = vmax.f32 %v522_v3, 0.0 }
  0xf3   : > { %v641_v59 = vsel %vm566_vm2, %v624_v51, 0.0  ;;  %v554_v60 = vmax.f32 %v492_v52, 0.0  ;;  %v916_v61 = vpop.f32.mrb[6].mxu0  ;;  %v537_v22 = vadd.f32 %v925_v53, %v1077_v17  ;;  %578 = vst.msk [vmem:[%s1085_s10 + $0x58] sm:$0xff] %vm566_vm2, %v561_v18  ;;  %v631_v29 = vmul.f32 %v1094_v33, %v1094_v33 }
  0xf4   : > { %v642_v63 = vadd.f32 %v641_v59, %v640_v46  ;;  %572 = vst.msk [vmem:[%s1085_s10 + $0x28] sm:$0xff] %vm566_vm2, %v555_v56  ;;  %v627_v0 = vmul.f32 %v555_v56, %v555_v56  ;;  %v589_v1 = vadd.f32 %v588_v54, %v587_v55  ;;  %v501_v2 = vpop.f32.mrb[7].mxu0  ;;  %v507_v6 = vadd.f32 %v916_v61, %v1077_v17 }
  0xf5   : > { %571 = vst.msk [vmem:[%s1085_s10 + $0x20] sm:$0xff] %vm566_vm2, %v554_v60  ;;  %v590_v4 = vsel %vm566_vm2, %v554_v60, 0.0  ;;  %v626_v5 = vmul.f32 %v554_v60, %v554_v60  ;;  %v502_v7 = vadd.f32 %v1077_v17, %v501_v2  ;;  %v928_v8 = vpop.f32.mrb[6].mxu1  ;;  %v592_v9 = vsel %vm566_vm2, %v555_v56, 0.0  ;;  %577 = vst.msk [vmem:[%s1085_s10 + $0x50] sm:$0xff] %vm566_vm2, %v560_v21 }
  0xf6   : > { %v591_v10 = vadd.f32 %v590_v4, %v589_v1  ;;  %v644_v11 = vadd.f32 %v643_v58, %v642_v63  ;;  %v541_v13 = vpop.f32.mrb[7].mxu1  ;;  %v557_v15 = vmax.f32 %v507_v6, 0.0  ;;  %v647_v23 = vsel %vm566_vm2, %v627_v0, 0.0 }
  0xf7   : > { %v645_v14 = vsel %vm566_vm2, %v626_v5, 0.0  ;;  %v556_v16 = vmax.f32 %v502_v7, 0.0  ;;  %v598_v32 = vsel %vm566_vm2, %v1100_v37, 0.0  ;;  %v653_v34 = vsel %vm566_vm2, %v630_v12, 0.0 }
  0xf8   : > { %v646_v19 = vadd.f32 %v645_v14, %v644_v11  ;;  %v593_v20 = vadd.f32 %v592_v9, %v591_v10  ;;  %574 = vst.msk [vmem:[%s1085_s10 + $0x38] sm:$0xff] %vm566_vm2, %v557_v15  ;;  %v629_v24 = vmul.f32 %v557_v15, %v557_v15  ;;  %v596_v30 = vsel %vm566_vm2, %v557_v15, 0.0 }
  0xf9   : > { %573 = vst.msk [vmem:[%s1085_s10 + $0x30] sm:$0xff] %vm566_vm2, %v556_v16  ;;  %v594_v25 = vsel %vm566_vm2, %v556_v16, 0.0  ;;  %v628_v26 = vmul.f32 %v556_v16, %v556_v16  ;;  %v563_v39 = vmax.f32 %v537_v22, 0.0  ;;  %v632_v40 = vmul.f32 %v560_v21, %v560_v21 }
  0xfa   : > { %v595_v27 = vadd.f32 %v594_v25, %v593_v20  ;;  %v648_v28 = vadd.f32 %v647_v23, %v646_v19  ;;  %v651_v35 = vsel %vm566_vm2, %v629_v24, 0.0  ;;  %v532_v41 = vadd.f32 %v1077_v17, %v531_v57 }
  0xfb   : > { %v649_v31 = vsel %vm566_vm2, %v628_v26, 0.0  ;;  %v547_v42 = vadd.f32 %v928_v8, %v1077_v17  ;;  %v542_v43 = vadd.f32 %v1077_v17, %v541_v13  ;;  %v600_v44 = vsel %vm566_vm2, %v1094_v33, 0.0  ;;  %580 = vst.msk [vmem:[%s1085_s10 + $0x68] sm:$0xff] %vm566_vm2, %v563_v39 }
  0xfc   : > { %v650_v36 = vadd.f32 %v649_v31, %v648_v28  ;;  %v597_v38 = vadd.f32 %v596_v30, %v595_v27  ;;  %v602_v46 = vsel %vm566_vm2, %v560_v21, 0.0  ;;  %v562_v47 = vmax.f32 %v532_v41, 0.0 }
  0xfd   : > { %v565_v48 = vmax.f32 %v547_v42, 0.0  ;;  %v564_v49 = vmax.f32 %v542_v43, 0.0  ;;  %v655_v52 = vsel %vm566_vm2, %v631_v29, 0.0  ;;  %v633_v53 = vmul.f32 %v561_v18, %v561_v18 }
  0xfe   : > { %v599_v37 = vadd.f32 %v598_v32, %v597_v38  ;;  %v652_v45 = vadd.f32 %v651_v35, %v650_v36  ;;  %v657_v17 = vsel %vm566_vm2, %v632_v40, 0.0  ;;  %579 = vst.msk [vmem:[%s1085_s10 + $0x60] sm:$0xff] %vm566_vm2, %v562_v47  ;;  %v634_v33 = vmul.f32 %v562_v47, %v562_v47 }
  0xff   : > { %582 = vst.msk [vmem:[%s1085_s10 + $0x78] sm:$0xff] %vm566_vm2, %v565_v48  ;;  %581 = vst.msk [vmem:[%s1085_s10 + $0x70] sm:$0xff] %vm566_vm2, %v564_v49  ;;  %v604_v56 = vsel %vm566_vm2, %v561_v18, 0.0  ;;  %v606_v57 = vsel %vm566_vm2, %v562_v47, 0.0  ;;  %v659_v60 = vsel %vm566_vm2, %v633_v53, 0.0  ;;  %v635_v61 = vmul.f32 %v563_v39, %v563_v39 }
 0x100   : > { %v654_v50 = vadd.f32 %v653_v34, %v652_v45  ;;  %v601_v51 = vadd.f32 %v600_v44, %v599_v37  ;;  %v661_v62 = vsel %vm566_vm2, %v634_v33, 0.0  ;;  %v636_v63 = vmul.f32 %v564_v49, %v564_v49 }
 0x101   : > { %v608_v2 = vsel %vm566_vm2, %v563_v39, 0.0  ;;  %v610_v3 = vsel %vm566_vm2, %v564_v49, 0.0  ;;  %v663_v6 = vsel %vm566_vm2, %v635_v61, 0.0  ;;  %v637_v7 = vmul.f32 %v565_v48, %v565_v48 }
 0x102   : > { %v603_v54 = vadd.f32 %v602_v46, %v601_v51  ;;  %v656_v55 = vadd.f32 %v655_v52, %v654_v50  ;;  %v665_v8 = vsel %vm566_vm2, %v636_v63, 0.0  ;;  %v612_v11 = vsel %vm566_vm2, %v565_v48, 0.0 }
 0x103   : > { %v667_v14 = vsel %vm566_vm2, %v637_v7, 0.0 }
 0x104   : > { %v658_v58 = vadd.f32 %v657_v17, %v656_v55  ;;  %v605_v59 = vadd.f32 %v604_v56, %v603_v54 }
 0x106   : > { %v607_v0 = vadd.f32 %v606_v57, %v605_v59  ;;  %v660_v1 = vadd.f32 %v659_v60, %v658_v58 }
 0x108   : > { %v662_v4 = vadd.f32 %v661_v62, %v660_v1  ;;  %v609_v5 = vadd.f32 %v608_v2, %v607_v0 }
 0x10a   : > { %v611_v9 = vadd.f32 %v610_v3, %v609_v5  ;;  %v664_v10 = vadd.f32 %v663_v6, %v662_v4 }
 0x10c   : > { %v613_v12 = vadd.f32 %v612_v11, %v611_v9  ;;  %v666_v13 = vadd.f32 %v665_v8, %v664_v10 }
 0x10e   : > { %v614_v15 = vrot.slane %v613_v12, 4  ;;  %v668_v16 = vadd.f32 %v667_v14, %v666_v13 }
 0x110   : > { %v615_v18 = vadd.f32 %v614_v15, %v613_v12  ;;  %v669_v19 = vrot.slane %v668_v16, 4 }
 0x112   : > { %v616_v20 = vrot.slane %v615_v18, 2  ;;  %v670_v21 = vadd.f32 %v669_v19, %v668_v16 }
 0x114   : > { %v617_v22 = vadd.f32 %v616_v20, %v615_v18  ;;  %v671_v23 = vrot.slane %v670_v21, 2 }
 0x116   : > { %v618_v24 = vrot.slane %v617_v22, 1  ;;  %v672_v25 = vadd.f32 %v671_v23, %v670_v21 }
 0x118   : > { %v619_v26 = vadd.f32 %v618_v24, %v617_v22  ;;  %v673_v27 = vrot.slane %v672_v25, 1 }
 0x11a   : > { %621 = vst.msk [vmem:[%s321_s13] sm:$0x1] %vm620_vm3, %v619_v26  ;;  %v674_v28 = vadd.f32 %v673_v27, %v672_v25 }
 0x11c   : > { %675 = vst.msk [vmem:[%s327_s16] sm:$0x1] %vm620_vm3, %v674_v28 }
 0x11d PF: > { %s16_s20 = sadd.s32 1, %s977_s20   ;;  %s1201_s18 = smov %s973_s19 }
 0x11e   : > { %p13_p5 = scmp.ge.s32.totalorder %s16_s20, 4   ;;  %s1202_s19 = smov %s1204_s21 }
 0x120   :  { %15 = sbr.rel (!%p13_p5) target bundleno = 2 (0x2), region = 92 }

// kernel: pointnet_backbone_forward.20
= control target key start
LH: loop header
LB: loop body
LE: loop exit
PB: predicated region body
PF: predicated region fallthrough
CT: control target
= control target key end

     0   :  { %vm105_vm0 = vcmask 523264   ;;  %vm448_vm1 = vcmask 516096   ;;  %s1130_s1 = inlined_call_operand.vmem [shape: bf16[64,64], index: 1, kind: input, shape index: {}]   ;;  %s1131_s0 = inlined_call_operand.vmem [shape: f32[256,64], index: 0, kind: input, shape index: {}]   ;;  %s1132_s2 = inlined_call_operand.vmem [shape: f32[1,64], index: 2, kind: input, shape index: {}]   ;;  %s1133_s3 = inlined_call_operand.vmem [shape: f32[256,64], index: 3, kind: output, shape index: {0}]   ;;  %s1134_s4 = inlined_call_operand.vmem [shape: f32[1,1,64], index: 4, kind: output, shape index: {1}]   ;;  %s1135_s5 = inlined_call_operand.vmem [shape: f32[1,1,64], index: 5, kind: output, shape index: {2}]  }
   0x1   :  { %v653_v0 = vld [vmem:[%s1130_s1] sm:$0xff]   ;;  %v654_v1 = vld [vmem:[%s1130_s1 + $0x8] sm:$0xff]   ;;  %v655_v2 = vld [vmem:[%s1130_s1 + $0x10] sm:$0xff]  }
   0x2   :  { %605 = vmatprep.subr.bf16.mxu0 %v653_v0  ;;  %645 = vmatprep.subr.bf16.mxu1 %v653_v0  ;;  %v18_v3 = vld [vmem:[%s1131_s0] sm:$0xff]  ;;  %v19_v4 = vld [vmem:[%s1131_s0 + $0x8] sm:$0xff]  ;;  %v656_v6 = vld [vmem:[%s1130_s1 + $0x18] sm:$0xff]  }
   0x3   :  { %606 = vmatpush3.bf16.msra.mxu0 %v653_v0  ;;  %649 = vmatpush3.bf16.msra.mxu1 %v653_v0  ;;  %v50_v5 = vpack.c.bf16 %v19_v4, %v18_v3  ;;  %v34_v7 = vld [vmem:[%s1131_s0 + $0x80] sm:$0xff]  ;;  %v35_v8 = vld [vmem:[%s1131_s0 + $0x88] sm:$0xff]  ;;  %v20_v10 = vld [vmem:[%s1131_s0 + $0x10] sm:$0xff] }
   0x4   :  { %607 = vmatprep.subr.bf16.mxu0 %v654_v1  ;;  %646 = vmatprep.subr.bf16.mxu1 %v654_v1  ;;  %v58_v9 = vpack.c.bf16 %v35_v8, %v34_v7  ;;  %v21_v11 = vld [vmem:[%s1131_s0 + $0x18] sm:$0xff]  ;;  %v22_v12 = vld [vmem:[%s1131_s0 + $0x20] sm:$0xff]  ;;  %v23_v13 = vld [vmem:[%s1131_s0 + $0x28] sm:$0xff] }
   0x5   :  { %613 = vmatprep.mubr.msk.bf16.mxu0 %vm105_vm0, %v50_v5  ;;  %v36_v14 = vld [vmem:[%s1131_s0 + $0x90] sm:$0xff]  ;;  %v37_v15 = vld [vmem:[%s1131_s0 + $0x98] sm:$0xff]  ;;  %v38_v16 = vld [vmem:[%s1131_s0 + $0xa0] sm:$0xff]  ;;  %v51_v18 = vpack.c.bf16 %v21_v11, %v20_v10  ;;  %v52_v19 = vpack.c.bf16 %v23_v13, %v22_v12 }
   0x6   :  { %629 = vmatprep.mubr.msk.bf16.mxu1 %vm105_vm0, %v58_v9  ;;  %v39_v17 = vld [vmem:[%s1131_s0 + $0xa8] sm:$0xff]  ;;  %v59_v20 = vpack.c.bf16 %v37_v15, %v36_v14  ;;  %v24_v22 = vld [vmem:[%s1131_s0 + $0x30] sm:$0xff]  ;;  %v25_v23 = vld [vmem:[%s1131_s0 + $0x38] sm:$0xff] }
   0x7   :  { %608 = vmatpush3.bf16.msra.mxu0 %v654_v1  ;;  %650 = vmatpush3.bf16.msra.mxu1 %v654_v1  ;;  %v60_v21 = vpack.c.bf16 %v39_v17, %v38_v16  ;;  %v26_v24 = vld [vmem:[%s1131_s0 + $0x40] sm:$0xff]  ;;  %v27_v25 = vld [vmem:[%s1131_s0 + $0x48] sm:$0xff]  ;;  %v40_v26 = vld [vmem:[%s1131_s0 + $0xb0] sm:$0xff]  ;;  %v53_v30 = vpack.c.bf16 %v25_v23, %v24_v22 }
   0x8   :  { %609 = vmatprep.subr.bf16.mxu0 %v655_v2  ;;  %647 = vmatprep.subr.bf16.mxu1 %v655_v2  ;;  %v41_v27 = vld [vmem:[%s1131_s0 + $0xb8] sm:$0xff]  ;;  %v42_v28 = vld [vmem:[%s1131_s0 + $0xc0] sm:$0xff]  ;;  %v43_v29 = vld [vmem:[%s1131_s0 + $0xc8] sm:$0xff]  ;;  %v54_v31 = vpack.c.bf16 %v27_v25, %v26_v24 }
   0x9   :  { %v61_v32 = vpack.c.bf16 %v41_v27, %v40_v26  ;;  %v62_v33 = vpack.c.bf16 %v43_v29, %v42_v28  ;;  %v28_v34 = vld [vmem:[%s1131_s0 + $0x50] sm:$0xff]  ;;  %v29_v35 = vld [vmem:[%s1131_s0 + $0x58] sm:$0xff]  ;;  %v30_v36 = vld [vmem:[%s1131_s0 + $0x60] sm:$0xff] }
   0xa   :  { %v31_v37 = vld [vmem:[%s1131_s0 + $0x68] sm:$0xff]  ;;  %v44_v38 = vld [vmem:[%s1131_s0 + $0xd0] sm:$0xff]  ;;  %v45_v39 = vld [vmem:[%s1131_s0 + $0xd8] sm:$0xff]  ;;  %v55_v42 = vpack.c.bf16 %v29_v35, %v28_v34 }
   0xb   :  { %610 = vmatpush3.bf16.msra.mxu0 %v655_v2  ;;  %651 = vmatpush3.bf16.msra.mxu1 %v655_v2  ;;  %v46_v40 = vld [vmem:[%s1131_s0 + $0xe0] sm:$0xff]  ;;  %v47_v41 = vld [vmem:[%s1131_s0 + $0xe8] sm:$0xff]  ;;  %v56_v43 = vpack.c.bf16 %v31_v37, %v30_v36  ;;  %v63_v44 = vpack.c.bf16 %v45_v39, %v44_v38  ;;  %v32_v46 = vld [vmem:[%s1131_s0 + $0x70] sm:$0xff] }
   0xc   :  { %611 = vmatprep.subr.bf16.mxu0 %v656_v6  ;;  %648 = vmatprep.subr.bf16.mxu1 %v656_v6  ;;  %v64_v45 = vpack.c.bf16 %v47_v41, %v46_v40  ;;  %v33_v47 = vld [vmem:[%s1131_s0 + $0x78] sm:$0xff]  ;;  %v48_v48 = vld [vmem:[%s1131_s0 + $0xf0] sm:$0xff]  ;;  %v814_v52 = vld [vmem:[%s1132_s2] ss:$0 sm:$0xff] }
   0xd   :  { %v49_v49 = vld [vmem:[%s1131_s0 + $0xf8] sm:$0xff]  ;;  %v57_v50 = vpack.c.bf16 %v33_v47, %v32_v46 }
   0xe   :  { %v65_v51 = vpack.c.bf16 %v49_v49, %v48_v48 }
   0xf   :  { %612 = vmatpush3.bf16.msra.mxu0 %v656_v6  ;;  %652 = vmatpush3.bf16.msra.mxu1 %v656_v6 }
  0x12   :  { %614 = vmatmul.mubr.msk.bf16.vlgmr.msra.gmra.mrb[0].mxu0 %vm105_vm0, %v51_v18  ;;  %630 = vmatmul.mubr.msk.bf16.vlgmr.msra.gmra.mrb[0].mxu1 %vm105_vm0, %v59_v20 }
  0x13   :  { %617 = vmatprep.mubr.msk.bf16.mxu0 %vm105_vm0, %v52_v19  ;;  %633 = vmatprep.mubr.msk.bf16.mxu1 %vm105_vm0, %v60_v21 }
  0x1a   :  { %618 = vmatmul.mubr.msk.bf16.gmra.mrb[4].mxu0 %vm105_vm0, %v53_v30  ;;  %634 = vmatmul.mubr.msk.bf16.gmra.mrb[4].mxu1 %vm105_vm0, %v61_v32 }
  0x1b   :  { %621 = vmatprep.mubr.msk.bf16.mxu0 %vm105_vm0, %v54_v31  ;;  %637 = vmatprep.mubr.msk.bf16.mxu1 %vm105_vm0, %v62_v33 }
  0x22   :  { %622 = vmatmul.mubr.msk.bf16.gmra.mrb[8].mxu0 %vm105_vm0, %v55_v42  ;;  %638 = vmatmul.mubr.msk.bf16.gmra.mrb[8].mxu1 %vm105_vm0, %v63_v44 }
  0x23   :  { %625 = vmatprep.mubr.msk.bf16.mxu0 %vm105_vm0, %v56_v43  ;;  %641 = vmatprep.mubr.msk.bf16.mxu1 %vm105_vm0, %v64_v45 }
  0x2a   :  { %626 = vmatmul.mubr.msk.bf16.gmra.mrb[12].mxu0 %vm105_vm0, %v57_v50  ;;  %642 = vmatmul.mubr.msk.bf16.gmra.mrb[12].mxu1 %vm105_vm0, %v65_v51 }
  0xe5   :  { %v615_v53 = vpop.f32.mrb[0].mxu0  ;;  %v631_v56 = vpop.f32.mrb[0].mxu1 }
  0xe6   :  { %v197_v54 = vadd.f32 %v615_v53, %v814_v52  ;;  %v188_v55 = vpop.f32.mrb[1].mxu0  ;;  %v261_v59 = vadd.f32 %v631_v56, %v814_v52  ;;  %v252_v60 = vpop.f32.mrb[1].mxu1 }
  0xe7   :  { %v189_v57 = vadd.f32 %v814_v52, %v188_v55  ;;  %v616_v58 = vpop.f32.mrb[2].mxu0  ;;  %v253_v0 = vadd.f32 %v814_v52, %v252_v60  ;;  %v632_v1 = vpop.f32.mrb[2].mxu1 }
  0xe8   :  { %v317_v61 = vmax.f32 %v197_v54, 0.0  ;;  %v200_v62 = vadd.f32 %v616_v58, %v814_v52  ;;  %v191_v63 = vpop.f32.mrb[3].mxu0  ;;  %v822_v4 = vmax.f32 %v261_v59, 0.0  ;;  %v824_v5 = vpop.f32.mrb[3].mxu1  ;;  %v264_v10 = vadd.f32 %v632_v1, %v814_v52 }
  0xe9   :  { %v315_v2 = vmax.f32 %v189_v57, 0.0  ;;  %v192_v3 = vadd.f32 %v814_v52, %v191_v63  ;;  %v830_v7 = vmax.f32 %v253_v0, 0.0  ;;  %v256_v0 = vadd.f32 %v814_v52, %v824_v5 }
  0xea   :  { %349 = vst.msk [vmem:[%s1133_s3 + $0x10] sm:$0xff] %vm105_vm0, %v317_v61  ;;  %v318_v6 = vmax.f32 %v200_v62, 0.0  ;;  %365 = vst.msk [vmem:[%s1133_s3 + $0x90] sm:$0xff] %vm105_vm0, %v822_v4  ;;  %v452_v11 = vmul.f32 %v317_v61, %v317_v61  ;;  %v382_v16 = vsel %vm105_vm0, %v317_v61, 0.0  ;;  %v864_v26 = vmax.f32 %v264_v10, 0.0 }
  0xeb   :  { %347 = vst.msk [vmem:[%s1133_s3] sm:$0xff] %vm105_vm0, %v315_v2  ;;  %v450_v8 = vmul.f32 %v315_v2, %v315_v2  ;;  %v316_v9 = vmax.f32 %v192_v3, 0.0  ;;  %363 = vst.msk [vmem:[%s1133_s3 + $0x80] sm:$0xff] %vm105_vm0, %v830_v7  ;;  %v379_v12 = vsel %vm105_vm0, %v315_v2, 0.0 }
  0xec   :  { %350 = vst.msk [vmem:[%s1133_s3 + $0x18] sm:$0xff] %vm105_vm0, %v318_v6  ;;  %v453_v17 = vmul.f32 %v318_v6, %v318_v6  ;;  %v485_v34 = vsel %vm105_vm0, %v452_v11, 0.0  ;;  %v384_v35 = vsel %vm105_vm0, %v318_v6, 0.0  ;;  %366 = vst.msk [vmem:[%s1133_s3 + $0x98] sm:$0xff] %vm105_vm0, %v864_v26 }
  0xed   :  { %348 = vst.msk [vmem:[%s1133_s3 + $0x8] sm:$0xff] %vm105_vm0, %v316_v9  ;;  %v380_v13 = vsel %vm105_vm0, %v316_v9, 0.0  ;;  %v451_v14 = vmul.f32 %v316_v9, %v316_v9  ;;  %v619_v15 = vpop.f32.mrb[4].mxu0  ;;  %v859_v21 = vpop.f32.mrb[4].mxu1  ;;  %v482_v22 = vsel %vm105_vm0, %v450_v8, 0.0 }
  0xee   :  { %v381_v18 = vadd.f32 %v380_v13, %v379_v12  ;;  %v213_v19 = vadd.f32 %v619_v15, %v814_v52  ;;  %v204_v20 = vpop.f32.mrb[5].mxu0  ;;  %v866_v27 = vpop.f32.mrb[5].mxu1  ;;  %v487_v39 = vsel %vm105_vm0, %v453_v17, 0.0 }
  0xef   :  { %v483_v23 = vsel %vm105_vm0, %v451_v14, 0.0  ;;  %v205_v24 = vadd.f32 %v814_v52, %v204_v20  ;;  %v620_v25 = vpop.f32.mrb[6].mxu0  ;;  %v869_v33 = vpop.f32.mrb[6].mxu1  ;;  %v916_v14 = vmax.f32 %v256_v0, 0.0 }
  0xf0   :  { %v383_v28 = vadd.f32 %v382_v16, %v381_v18  ;;  %v484_v29 = vadd.f32 %v483_v23, %v482_v22  ;;  %v321_v30 = vmax.f32 %v213_v19, 0.0  ;;  %v216_v31 = vadd.f32 %v620_v25, %v814_v52  ;;  %v207_v32 = vpop.f32.mrb[7].mxu0  ;;  %v879_v38 = vpop.f32.mrb[7].mxu1 }
  0xf1   :  { %v319_v36 = vmax.f32 %v205_v24, 0.0  ;;  %v208_v37 = vadd.f32 %v814_v52, %v207_v32  ;;  %364 = vst.msk [vmem:[%s1133_s3 + $0x88] sm:$0xff] %vm105_vm0, %v916_v14 }
  0xf2   :  { %v486_v40 = vadd.f32 %v485_v34, %v484_v29  ;;  %353 = vst.msk [vmem:[%s1133_s3 + $0x30] sm:$0xff] %vm105_vm0, %v321_v30  ;;  %v385_v41 = vadd.f32 %v384_v35, %v383_v28  ;;  %v322_v44 = vmax.f32 %v216_v31, 0.0  ;;  %v390_v48 = vsel %vm105_vm0, %v321_v30, 0.0 }
  0xf3   :  { %351 = vst.msk [vmem:[%s1133_s3 + $0x20] sm:$0xff] %vm105_vm0, %v319_v36  ;;  %v386_v42 = vsel %vm105_vm0, %v319_v36, 0.0  ;;  %v454_v43 = vmul.f32 %v319_v36, %v319_v36  ;;  %v320_v45 = vmax.f32 %v208_v37, 0.0  ;;  %v456_v49 = vmul.f32 %v321_v30, %v321_v30 }
  0xf4   :  { %v387_v46 = vadd.f32 %v386_v42, %v385_v41  ;;  %v488_v47 = vadd.f32 %v487_v39, %v486_v40  ;;  %354 = vst.msk [vmem:[%s1133_s3 + $0x38] sm:$0xff] %vm105_vm0, %v322_v44  ;;  %v392_v60 = vsel %vm105_vm0, %v322_v44, 0.0  ;;  %v457_v61 = vmul.f32 %v322_v44, %v322_v44 }
  0xf5   :  { %v489_v50 = vsel %vm105_vm0, %v454_v43, 0.0  ;;  %352 = vst.msk [vmem:[%s1133_s3 + $0x28] sm:$0xff] %vm105_vm0, %v320_v45  ;;  %v388_v51 = vsel %vm105_vm0, %v320_v45, 0.0  ;;  %v623_v53 = vpop.f32.mrb[8].mxu0  ;;  %v455_v56 = vmul.f32 %v320_v45, %v320_v45  ;;  %v903_v59 = vpop.f32.mrb[8].mxu1  ;;  %v493_v5 = vsel %vm105_vm0, %v456_v49, 0.0 }
  0xf6   :  { %v490_v54 = vadd.f32 %v489_v50, %v488_v47  ;;  %v389_v55 = vadd.f32 %v388_v51, %v387_v46  ;;  %v229_v57 = vadd.f32 %v623_v53, %v814_v52  ;;  %v220_v58 = vpop.f32.mrb[9].mxu0  ;;  %v909_v1 = vpop.f32.mrb[9].mxu1  ;;  %v495_v23 = vsel %vm105_vm0, %v457_v61, 0.0 }
  0xf7   :  { %v221_v62 = vadd.f32 %v814_v52, %v220_v58  ;;  %v624_v63 = vpop.f32.mrb[10].mxu0  ;;  %v491_v3 = vsel %vm105_vm0, %v455_v56, 0.0  ;;  %v913_v10 = vpop.f32.mrb[10].mxu1  ;;  %v949_v37 = vsel %vm105_vm0, %v830_v7, 0.0 }
  0xf8   :  { %v391_v2 = vadd.f32 %v390_v48, %v389_v55  ;;  %v325_v6 = vmax.f32 %v229_v57, 0.0  ;;  %v232_v8 = vadd.f32 %v624_v63, %v814_v52  ;;  %v223_v9 = vpop.f32.mrb[11].mxu0  ;;  %v492_v11 = vadd.f32 %v491_v3, %v490_v54  ;;  %v918_v15 = vpop.f32.mrb[11].mxu1 }
  0xf9   :  { %v323_v12 = vmax.f32 %v221_v62, 0.0  ;;  %v224_v13 = vadd.f32 %v814_v52, %v223_v9  ;;  %v277_v62 = vadd.f32 %v859_v21, %v814_v52  ;;  %v466_v21 = vmul.f32 %v830_v7, %v830_v7 }
  0xfa   :  { %357 = vst.msk [vmem:[%s1133_s3 + $0x50] sm:$0xff] %vm105_vm0, %v325_v6  ;;  %v393_v16 = vadd.f32 %v392_v60, %v391_v2  ;;  %v326_v17 = vmax.f32 %v232_v8, 0.0  ;;  %v494_v18 = vadd.f32 %v493_v5, %v492_v11  ;;  %v460_v32 = vmul.f32 %v325_v6, %v325_v6 }
  0xfb   :  { %355 = vst.msk [vmem:[%s1133_s3 + $0x40] sm:$0xff] %vm105_vm0, %v323_v12  ;;  %v394_v19 = vsel %vm105_vm0, %v323_v12, 0.0  ;;  %v458_v20 = vmul.f32 %v323_v12, %v323_v12  ;;  %v324_v22 = vmax.f32 %v224_v13, 0.0  ;;  %v398_v40 = vsel %vm105_vm0, %v325_v6, 0.0 }
  0xfc   :  { %v395_v24 = vadd.f32 %v394_v19, %v393_v16  ;;  %358 = vst.msk [vmem:[%s1133_s3 + $0x58] sm:$0xff] %vm105_vm0, %v326_v17  ;;  %v496_v25 = vadd.f32 %v495_v23, %v494_v18  ;;  %v461_v46 = vmul.f32 %v326_v17, %v326_v17  ;;  %v400_v53 = vsel %vm105_vm0, %v326_v17, 0.0 }
  0xfd   :  { %v497_v28 = vsel %vm105_vm0, %v458_v20, 0.0  ;;  %356 = vst.msk [vmem:[%s1133_s3 + $0x48] sm:$0xff] %vm105_vm0, %v324_v22  ;;  %v396_v29 = vsel %vm105_vm0, %v324_v22, 0.0  ;;  %v459_v30 = vmul.f32 %v324_v22, %v324_v22  ;;  %v627_v31 = vpop.f32.mrb[12].mxu0  ;;  %v951_v39 = vpop.f32.mrb[12].mxu1  ;;  %v501_v58 = vsel %vm105_vm0, %v460_v32, 0.0 }
  0xfe   :  { %v397_v34 = vadd.f32 %v396_v29, %v395_v24  ;;  %v245_v35 = vadd.f32 %v627_v31, %v814_v52  ;;  %v236_v36 = vpop.f32.mrb[13].mxu0  ;;  %v498_v41 = vadd.f32 %v497_v28, %v496_v25  ;;  %v956_v45 = vpop.f32.mrb[13].mxu1  ;;  %v503_v6 = vsel %vm105_vm0, %v461_v46, 0.0 }
  0xff   :  { %v499_v42 = vsel %vm105_vm0, %v459_v30, 0.0  ;;  %v237_v43 = vadd.f32 %v814_v52, %v236_v36  ;;  %v628_v44 = vpop.f32.mrb[14].mxu0  ;;  %v959_v51 = vpop.f32.mrb[14].mxu1  ;;  %v991_v18 = vmax.f32 %v277_v62, 0.0  ;;  %v269_v19 = vadd.f32 %v814_v52, %v866_v27 }
 0x100   :  { %v399_v47 = vadd.f32 %v398_v40, %v397_v34  ;;  %v329_v48 = vmax.f32 %v245_v35, 0.0  ;;  %v248_v49 = vadd.f32 %v628_v44, %v814_v52  ;;  %v239_v50 = vpop.f32.mrb[15].mxu0  ;;  %v500_v54 = vadd.f32 %v499_v42, %v498_v41  ;;  %v963_v57 = vpop.f32.mrb[15].mxu1 }
 0x101   :  { %v327_v55 = vmax.f32 %v237_v43, 0.0  ;;  %v240_v56 = vadd.f32 %v814_v52, %v239_v50  ;;  %v280_v22 = vadd.f32 %v869_v33, %v814_v52  ;;  %v272_v23 = vadd.f32 %v814_v52, %v879_v38  ;;  %369 = vst.msk [vmem:[%s1133_s3 + $0xb0] sm:$0xff] %vm105_vm0, %v991_v18 }
 0x102   :  { %361 = vst.msk [vmem:[%s1133_s3 + $0x70] sm:$0xff] %vm105_vm0, %v329_v48  ;;  %v401_v60 = vadd.f32 %v400_v53, %v399_v47  ;;  %v330_v61 = vmax.f32 %v248_v49, 0.0  ;;  %v502_v63 = vadd.f32 %v501_v58, %v500_v54  ;;  %v406_v8 = vsel %vm105_vm0, %v329_v48, 0.0 }
 0x103   :  { %359 = vst.msk [vmem:[%s1133_s3 + $0x60] sm:$0xff] %vm105_vm0, %v327_v55  ;;  %v402_v0 = vsel %vm105_vm0, %v327_v55, 0.0  ;;  %v462_v2 = vmul.f32 %v327_v55, %v327_v55  ;;  %v328_v3 = vmax.f32 %v240_v56, 0.0  ;;  %v464_v16 = vmul.f32 %v329_v48, %v329_v48 }
 0x104   :  { %v403_v9 = vadd.f32 %v402_v0, %v401_v60  ;;  %362 = vst.msk [vmem:[%s1133_s3 + $0x78] sm:$0xff] %vm105_vm0, %v330_v61  ;;  %v504_v11 = vadd.f32 %v503_v6, %v502_v63  ;;  %v408_v24 = vsel %vm105_vm0, %v330_v61, 0.0  ;;  %v465_v25 = vmul.f32 %v330_v61, %v330_v61 }
 0x105   :  { %v505_v12 = vsel %vm105_vm0, %v462_v2, 0.0  ;;  %360 = vst.msk [vmem:[%s1133_s3 + $0x68] sm:$0xff] %vm105_vm0, %v328_v3  ;;  %v404_v13 = vsel %vm105_vm0, %v328_v3, 0.0  ;;  %v463_v5 = vmul.f32 %v328_v3, %v328_v3  ;;  %v335_v27 = vmax.f32 %v269_v19, 0.0 }
 0x106   :  { %v405_v17 = vadd.f32 %v404_v13, %v403_v9  ;;  %v506_v20 = vadd.f32 %v505_v12, %v504_v11  ;;  %v1006_v30 = vmax.f32 %v280_v22, 0.0  ;;  %v336_v31 = vmax.f32 %v272_v23, 0.0 }
 0x107   :  { %v507_v7 = vsel %vm105_vm0, %v463_v5, 0.0  ;;  %v293_v33 = vadd.f32 %v903_v59, %v814_v52  ;;  %v509_v38 = vsel %vm105_vm0, %v464_v16, 0.0  ;;  %v467_v34 = vmul.f32 %v916_v14, %v916_v14  ;;  %367 = vst.msk [vmem:[%s1133_s3 + $0xa0] sm:$0xff] %vm105_vm0, %v335_v27 }
 0x108   :  { %v407_v28 = vadd.f32 %v406_v8, %v405_v17  ;;  %v508_v29 = vadd.f32 %v507_v7, %v506_v20  ;;  %v414_v36 = vsel %vm105_vm0, %v822_v4, 0.0  ;;  %370 = vst.msk [vmem:[%s1133_s3 + $0xb8] sm:$0xff] %vm105_vm0, %v1006_v30  ;;  %368 = vst.msk [vmem:[%s1133_s3 + $0xa8] sm:$0xff] %vm105_vm0, %v336_v31  ;;  %v511_v59 = vsel %vm105_vm0, %v465_v25, 0.0 }
 0x109   :  { %v513_v41 = vsel %vm105_vm0, %v466_v21, 0.0  ;;  %v1031_v42 = vmax.f32 %v293_v33, 0.0  ;;  %v412_v44 = vsel %vm105_vm0, %v916_v14, 0.0  ;;  %v285_v46 = vadd.f32 %v814_v52, %v909_v1 }
 0x10a   :  { %v409_v32 = vadd.f32 %v408_v24, %v407_v28  ;;  %v510_v35 = vadd.f32 %v509_v38, %v508_v29  ;;  %v296_v47 = vadd.f32 %v913_v10, %v814_v52  ;;  %v468_v48 = vmul.f32 %v822_v4, %v822_v4 }
 0x10b   :  { %v515_v50 = vsel %vm105_vm0, %v467_v34, 0.0  ;;  %373 = vst.msk [vmem:[%s1133_s3 + $0xd0] sm:$0xff] %vm105_vm0, %v1031_v42  ;;  %v339_v1 = vmax.f32 %v285_v46, 0.0  ;;  %v288_v10 = vadd.f32 %v814_v52, %v918_v15  ;;  %v470_v4 = vmul.f32 %v335_v27, %v335_v27 }
 0x10c   :  { %v411_v40 = vadd.f32 %v949_v37, %v409_v32  ;;  %v512_v43 = vadd.f32 %v511_v59, %v510_v35  ;;  %v469_v37 = vmul.f32 %v864_v26, %v864_v26  ;;  %v342_v53 = vmax.f32 %v296_v47, 0.0 }
 0x10d   :  { %v309_v55 = vadd.f32 %v951_v39, %v814_v52  ;;  %v301_v56 = vadd.f32 %v814_v52, %v956_v45  ;;  %v416_v58 = vsel %vm105_vm0, %v864_v26, 0.0  ;;  %v418_v61 = vsel %vm105_vm0, %v335_v27, 0.0  ;;  %371 = vst.msk [vmem:[%s1133_s3 + $0xc0] sm:$0xff] %vm105_vm0, %v339_v1 }
 0x10e   :  { %v413_v49 = vadd.f32 %v412_v44, %v411_v40  ;;  %v514_v14 = vadd.f32 %v513_v41, %v512_v43  ;;  %374 = vst.msk [vmem:[%s1133_s3 + $0xd8] sm:$0xff] %vm105_vm0, %v342_v53  ;;  %v517_v15 = vsel %vm105_vm0, %v468_v48, 0.0  ;;  %v340_v45 = vmax.f32 %v288_v10, 0.0 }
 0x10f   :  { %v345_v62 = vmax.f32 %v309_v55, 0.0  ;;  %v343_v26 = vmax.f32 %v301_v56, 0.0  ;;  %v312_v0 = vadd.f32 %v959_v51, %v814_v52  ;;  %v519_v2 = vsel %vm105_vm0, %v469_v37, 0.0 }
 0x110   :  { %v415_v54 = vadd.f32 %v414_v36, %v413_v49  ;;  %v516_v60 = vadd.f32 %v515_v50, %v514_v14  ;;  %v521_v6 = vsel %vm105_vm0, %v470_v4, 0.0  ;;  %v471_v8 = vmul.f32 %v336_v31, %v336_v31  ;;  %372 = vst.msk [vmem:[%s1133_s3 + $0xc8] sm:$0xff] %vm105_vm0, %v340_v45 }
 0x111   :  { %377 = vst.msk [vmem:[%s1133_s3 + $0xf0] sm:$0xff] %vm105_vm0, %v345_v62  ;;  %v420_v21 = vsel %vm105_vm0, %v336_v31, 0.0  ;;  %375 = vst.msk [vmem:[%s1133_s3 + $0xe0] sm:$0xff] %vm105_vm0, %v343_v26  ;;  %v472_v51 = vmul.f32 %v991_v18, %v991_v18  ;;  %v346_v12 = vmax.f32 %v312_v0, 0.0  ;;  %v422_v13 = vsel %vm105_vm0, %v991_v18, 0.0 }
 0x112   :  { %v417_v39 = vadd.f32 %v416_v58, %v415_v54  ;;  %v518_v63 = vadd.f32 %v517_v15, %v516_v60  ;;  %v304_v16 = vadd.f32 %v814_v52, %v963_v57  ;;  %v473_v17 = vmul.f32 %v1006_v30, %v1006_v30 }
 0x113   :  { %v523_v20 = vsel %vm105_vm0, %v471_v8, 0.0  ;;  %v474_v7 = vmul.f32 %v339_v1, %v339_v1  ;;  %378 = vst.msk [vmem:[%s1133_s3 + $0xf8] sm:$0xff] %vm105_vm0, %v346_v12  ;;  %v424_v22 = vsel %vm105_vm0, %v1006_v30, 0.0  ;;  %v426_v23 = vsel %vm105_vm0, %v339_v1, 0.0 }
 0x114   :  { %v419_v3 = vadd.f32 %v418_v61, %v417_v39  ;;  %v520_v9 = vadd.f32 %v519_v2, %v518_v63  ;;  %v344_v24 = vmax.f32 %v304_v16, 0.0  ;;  %v525_v52 = vsel %vm105_vm0, %v472_v51, 0.0 }
 0x115   :  { %v527_v28 = vsel %vm105_vm0, %v473_v17, 0.0  ;;  %v529_v29 = vsel %vm105_vm0, %v474_v7, 0.0  ;;  %v475_v31 = vmul.f32 %v340_v45, %v340_v45  ;;  %v428_v33 = vsel %vm105_vm0, %v340_v45, 0.0 }
 0x116   :  { %v421_v11 = vadd.f32 %v420_v21, %v419_v3  ;;  %v522_v5 = vadd.f32 %v521_v6, %v520_v9  ;;  %376 = vst.msk [vmem:[%s1133_s3 + $0xe8] sm:$0xff] %vm105_vm0, %v344_v24  ;;  %v476_v38 = vmul.f32 %v1031_v42, %v1031_v42  ;;  %v430_v34 = vsel %vm105_vm0, %v1031_v42, 0.0 }
 0x117   :  { %v477_v36 = vmul.f32 %v342_v53, %v342_v53  ;;  %v531_v40 = vsel %vm105_vm0, %v475_v31, 0.0  ;;  %v478_v41 = vmul.f32 %v343_v26, %v343_v26  ;;  %v432_v43 = vsel %vm105_vm0, %v342_v53, 0.0 }
 0x118   :  { %v423_v19 = vadd.f32 %v422_v13, %v421_v11  ;;  %v524_v18 = vadd.f32 %v523_v20, %v522_v5  ;;  %v434_v46 = vsel %vm105_vm0, %v343_v26, 0.0  ;;  %v533_v47 = vsel %vm105_vm0, %v476_v38, 0.0 }
 0x119   :  { %v535_v49 = vsel %vm105_vm0, %v477_v36, 0.0  ;;  %v537_v42 = vsel %vm105_vm0, %v478_v41, 0.0  ;;  %v479_v14 = vmul.f32 %v344_v24, %v344_v24  ;;  %v436_v10 = vsel %vm105_vm0, %v344_v24, 0.0 }
 0x11a   :  { %v425_v57 = vadd.f32 %v424_v22, %v423_v19  ;;  %v526_v25 = vadd.f32 %v525_v52, %v524_v18  ;;  %v480_v54 = vmul.f32 %v345_v62, %v345_v62  ;;  %v438_v53 = vsel %vm105_vm0, %v345_v62, 0.0 }
 0x11b   :  { %v481_v56 = vmul.f32 %v346_v12, %v346_v12  ;;  %v539_v60 = vsel %vm105_vm0, %v479_v14, 0.0  ;;  %v440_v61 = vsel %vm105_vm0, %v346_v12, 0.0 }
 0x11c   :  { %v427_v27 = vadd.f32 %v426_v23, %v425_v57  ;;  %v528_v30 = vadd.f32 %v527_v28, %v526_v25  ;;  %v541_v39 = vsel %vm105_vm0, %v480_v54, 0.0 }
 0x11d   :  { %v543_v26 = vsel %vm105_vm0, %v481_v56, 0.0 }
 0x11e   :  { %v429_v32 = vadd.f32 %v428_v33, %v427_v27  ;;  %v530_v35 = vadd.f32 %v529_v29, %v528_v30 }
 0x120   :  { %v431_v59 = vadd.f32 %v430_v34, %v429_v32  ;;  %v532_v44 = vadd.f32 %v531_v40, %v530_v35 }
 0x122   :  { %v433_v48 = vadd.f32 %v432_v43, %v431_v59  ;;  %v534_v37 = vadd.f32 %v533_v47, %v532_v44 }
 0x124   :  { %v435_v50 = vadd.f32 %v434_v46, %v433_v48  ;;  %v536_v1 = vadd.f32 %v535_v49, %v534_v37 }
 0x126   :  { %v437_v4 = vadd.f32 %v436_v10, %v435_v50  ;;  %v538_v55 = vadd.f32 %v537_v42, %v536_v1 }
 0x128   :  { %v439_v58 = vadd.f32 %v438_v53, %v437_v4  ;;  %v540_v15 = vadd.f32 %v539_v60, %v538_v55 }
 0x12a   :  { %v441_v45 = vadd.f32 %v440_v61, %v439_v58  ;;  %v542_v63 = vadd.f32 %v541_v39, %v540_v15 }
 0x12c   :  { %v442_v0 = vrot.slane %v441_v45, 4  ;;  %v544_v2 = vadd.f32 %v543_v26, %v542_v63 }
 0x12e   :  { %v443_v3 = vadd.f32 %v442_v0, %v441_v45  ;;  %v545_v6 = vrot.slane %v544_v2, 4 }
 0x130   :  { %v444_v8 = vrot.slane %v443_v3, 2  ;;  %v546_v62 = vadd.f32 %v545_v6, %v544_v2 }
 0x132   :  { %v445_v9 = vadd.f32 %v444_v8, %v443_v3  ;;  %v547_v21 = vrot.slane %v546_v62, 2 }
 0x134   :  { %v446_v51 = vrot.slane %v445_v9, 1  ;;  %v548_v11 = vadd.f32 %v547_v21, %v546_v62 }
 0x136   :  { %v447_v13 = vadd.f32 %v446_v51, %v445_v9  ;;  %v549_v12 = vrot.slane %v548_v11, 1 }
 0x138   :  { %449 = vst.msk [vmem:[%s1134_s4] sm:$0x1] %vm448_vm1, %v447_v13  ;;  %v550_v5 = vadd.f32 %v549_v12, %v548_v11 }
 0x13a   :  { %551 = vst.msk [vmem:[%s1135_s5] sm:$0x1] %vm448_vm1, %v550_v5 }

// kernel: pointnet_backbone_forward.25
= control target key start
LH: loop header
LB: loop body
LE: loop exit
PB: predicated region body
PF: predicated region fallthrough
CT: control target
= control target key end

     0   :  { %s1324_s0 = inlined_call_operand.vmem [shape: f32[2,128,64], index: 0, kind: input, shape index: {}]   ;;  %s1325_s1 = inlined_call_operand.vmem [shape: f32[2,64,64], index: 1, kind: input, shape index: {}]   ;;  %s1326_s2 = inlined_call_operand.vmem [shape: f32[2,1,64], index: 2, kind: input, shape index: {}]   ;;  %s1327_s3 = inlined_call_operand.vmem [shape: f32[2,128,64], index: 3, kind: output, shape index: {0}]   ;;  %s1328_s4 = inlined_call_operand.hbm [shape: f32[2,1,1,64], index: 4, kind: output, shape index: {1}]   ;;  %s1329_s5 = inlined_call_operand.hbm [shape: f32[2,1,1,64], index: 5, kind: output, shape index: {2}]  }
   0x1   :  { %1331 = sst [smem:[#allocation8_spill]] %s1324_s0 }
   0x2   :  { %11 = vsyncpa [#allocation3], 0 }
   0x3   :  { %13 = vsyncpa [#allocation3 + $0x1], 0 }
   0x4   :  { %14 = vsyncpa [#allocation5], 0 }
   0x5   :  { %16 = vsyncpa [#allocation5 + $0x1], 0  ;;  %s1096_s18 = smov 0   ;;  %s1098_s19 = smov 0  }
   0x6   :  { %s1100_s20 = smov 0   ;;  %s1102_s21 = smov 0  }
   0x7   :  { %s1104_s22 = smov 0   ;;  %s1106_s23 = smov 0  }
   0x8 LB: > { %s767_s24 = sadd.s32 4294967295, %s1061_s23   ;;  %s768_s25 = sadd.s32 4294967294, %s1061_s23   ;;  %s1061_s23 = sphi %s1106_s23, %s22_s23   ;;  %s1057_s22 = sphi %s1104_s22, %s1340_s22   ;;  %s1053_s21 = sphi %s1102_s21, %s1339_s21   ;;  %s1049_s20 = sphi %s1100_s20, %s1338_s20   ;;  %s1045_s19 = sphi %s1098_s19, %s1337_s19   ;;  %s1041_s18 = sphi %s1096_s18, %s1336_s18  }
   0x9   : > { %s34_s26 = sadd.s32 1, %s1057_s22  ;;  %s151_s27 = sadd.s32 1, %s1049_s20 }
   0xa   : > { %p36_p0 = scmp.ge.s32.totalorder %s34_s26, 2  ;;  %p161_p1 = scmp.ne.s32.totalorder %s1049_s20, %s1045_s19 }
   0xb   : > { %p162_p2 = scmp.eq.s32.totalorder %s767_s24, 1  ;;  %p167_p3 = scmp.ne.s32.totalorder %s1045_s19, %s1041_s18 }
   0xc   : > { %s1342_s26 = smov (%p36_p0, %s34_s26), 0  ;;  %p168_p5 = scmp.eq.s32.totalorder %s768_s25, 1 }
   0xd   : > { %p1136_p4 = por %p162_p2, %p161_p1  ;;  %s146_s29 = ssub.s32 %s1057_s22, %s1342_s26 }
   0xe   : > { %p771_p6 = scmp.ge.s32.totalorder %s1061_s23, 1  ;;  %p149_p7 = scmp.eq.s32.totalorder %s146_s29, 0 }
   0xf   : > { %p1143_p8 = por %p168_p5, %p167_p3  ;;  %p241_p9 = scmp.lt.s32.totalorder %s1061_s23, 3 }
  0x10   : > { %s1149_s6 = scalar_select %p149_p7, %s1049_s20, %s151_s27  }
  0x11   : > { %p242_p10 = pnand %p771_p6, %p241_p9 }
  0x12   : > { %p294_p11 = scmp.lt.s32.totalorder (!%p242_p10), %s1053_s21, 1  ;;  %s1334_s0 = sld [smem:[#allocation8_spill]] (!%p242_p10)  ;;  %vm352_vm0 = vcmask (!%p242_p10), 523264   ;;  %vm562_vm1 = vcmask (!%p242_p10), 516096   ;;  %v1063_v28 = vmov (!%p242_p10), 0.0  }
  0x13   : > { %245 = sbr.rel (%p242_p10) target bundleno = 277 (0x115), region = 32  ;;  %s1200_s16 = sand.u32 (!%p242_p10), 1, %s1045_s19  }
  0x14   : > { %s795_s17 = sshll.u32 (!%p242_p10), %s1053_s21, 4  ;;  %s286_s24 = scalar_lea.vmem (!%p242_p10), [#allocation2], %s1200_s16 }
  0x15   : > { %s596_s25 = sshll.u32 (!%p242_p10), %s286_s24, 4  ;;  %563 = vst.msk [vmem:[%s286_s24] sm:$0x1] (!%p242_p10), %vm562_vm1, %v1063_v28  ;;  %s292_s10 = scalar_lea.vmem (!%p242_p10), [#allocation4], %s1200_s16  ;;  %s597_s25 = int_to_ptr.vmem [resolvable:$true] %s596_s25 }
  0x16   : > { %564 = vst.msk [vmem:[%s292_s10] sm:$0x1] (!%p242_p10), %vm562_vm1, %v1063_v28  ;;  %s575_s11 = scalar_lea.sflag (!%p242_p10), [#allocation3], %s1200_s16  ;;  %s1064_s13 = smov (!%p242_p10), [#allocation2]  }
  0x17   : > { %s955_s14 = sshll.u32 (!%p242_p10), %s1064_s13, 4  ;;  %s956_s14 = int_to_ptr.vmem [resolvable:$false] %s955_s14 }
  0x18   : > { %p958_p1 = scmp.lt.s32.totalorder (!%p242_p10), %s597_s25, %s956_s14 }
  0x1a   : > { %s1153_s7 = scalar_select %p294_p11, %s1053_s21, 1 }
  0x1c   : > { %s1330_s8 = sshll.u32 %s1153_s7, 7  ;;  %s800_s9 = sshll.u32 %s1153_s7, 6 }
  0x1d   : > { %s307_s12 = scalar_lea.vmem %s1325_s1, %s800_s9  ;;  %s1165_s15 = scalar_lea.vmem %s1334_s0, %s1330_s8 }
  0x1e   : > { %v337_v0 = vld [vmem:[%s307_s12] sm:$0xff]  ;;  %v338_v1 = vld [vmem:[%s307_s12 + $0x8] sm:$0xff]  ;;  %v339_v2 = vld [vmem:[%s307_s12 + $0x10] sm:$0xff]  ;;  %s1209_s9 = scalar_lea.hbm %s1328_s4, %s795_s17 }
  0x1f   : > { %v866_v3 = vpack.c.bf16 %v338_v1, %v337_v0  ;;  %v340_v4 = vld [vmem:[%s307_s12 + $0x18] sm:$0xff]  ;;  %v341_v6 = vld [vmem:[%s307_s12 + $0x20] sm:$0xff]  ;;  %v342_v7 = vld [vmem:[%s307_s12 + $0x28] sm:$0xff] }
  0x20   : > { %v870_v5 = vpack.c.bf16 %v340_v4, %v339_v2  ;;  %v321_v8 = vld [vmem:[%s1165_s15] sm:$0xff]  ;;  %v874_v10 = vpack.c.bf16 %v342_v7, %v341_v6  ;;  %v343_v11 = vld [vmem:[%s307_s12 + $0x30] sm:$0xff]  ;;  %v344_v12 = vld [vmem:[%s307_s12 + $0x38] sm:$0xff]  ;;  %s951_s12 = scalar_lea.vmem %s597_s25, 16 }
  0x21   : > { %867 = vmatprep.subr.bf16.mxu0 %v866_v3  ;;  %882 = vmatprep.subr.bf16.mxu1 %v866_v3  ;;  %v329_v9 = vld [vmem:[%s1165_s15 + $0x40] sm:$0xff]  ;;  %v878_v13 = vpack.c.bf16 %v344_v12, %v343_v11  ;;  %v322_v14 = vld [vmem:[%s1165_s15 + $0x8] sm:$0xff]  ;;  %v323_v16 = vld [vmem:[%s1165_s15 + $0x10] sm:$0xff]  ;;  %p952_p12 = scmp.ne.s32.totalorder %s597_s25, %s951_s12 }
  0x22   : > { %869 = vmatpush3.bf16.msra.mxu0 %v866_v3  ;;  %886 = vmatpush3.bf16.msra.mxu1 %v866_v3  ;;  %v330_v15 = vld [vmem:[%s1165_s15 + $0x48] sm:$0xff]  ;;  %v331_v17 = vld [vmem:[%s1165_s15 + $0x50] sm:$0xff]  ;;  %v324_v18 = vld [vmem:[%s1165_s15 + $0x18] sm:$0xff] }
  0x23   : > { %871 = vmatprep.subr.bf16.mxu0 %v870_v5  ;;  %883 = vmatprep.subr.bf16.mxu1 %v870_v5  ;;  %v332_v19 = vld [vmem:[%s1165_s15 + $0x58] sm:$0xff]  ;;  %v325_v20 = vld [vmem:[%s1165_s15 + $0x20] sm:$0xff]  ;;  %v326_v22 = vld [vmem:[%s1165_s15 + $0x28] sm:$0xff]  ;;  %p953_p13 = pnand %p952_p12, %p1136_p4 }
  0x24   : > { %842 = vmatprep.mubr.msk.f32.mxu0 %vm352_vm0, %v321_v8  ;;  %854 = vmatprep.mubr.msk.f32.mxu1 %vm352_vm0, %v329_v9  ;;  %v333_v21 = vld [vmem:[%s1165_s15 + $0x60] sm:$0xff]  ;;  %v334_v23 = vld [vmem:[%s1165_s15 + $0x68] sm:$0xff]  ;;  %v327_v24 = vld [vmem:[%s1165_s15 + $0x30] sm:$0xff] }
  0x25   : > { %v335_v25 = vld [vmem:[%s1165_s15 + $0x70] sm:$0xff]  ;;  %v328_v26 = vld [vmem:[%s1165_s15 + $0x38] sm:$0xff]  ;;  %p954_p0 = pneg %p953_p13 }
  0x26   : > { %873 = vmatpush3.bf16.msra.mxu0 %v870_v5  ;;  %887 = vmatpush3.bf16.msra.mxu1 %v870_v5  ;;  %v336_v27 = vld [vmem:[%s1165_s15 + $0x78] sm:$0xff]  ;;  %s957_s15 = scalar_lea.vmem %s956_s14, 32 }
  0x27   : > { %875 = vmatprep.subr.bf16.mxu0 %v874_v10  ;;  %884 = vmatprep.subr.bf16.mxu1 %v874_v10  ;;  %p959_p2 = scmp.lt.s32.totalorder %s957_s15, %s951_s12 }
  0x29   : > { %p960_p3 = por %p959_p2, %p958_p1 }
  0x2a   : > { %877 = vmatpush3.bf16.msra.mxu0 %v874_v10  ;;  %888 = vmatpush3.bf16.msra.mxu1 %v874_v10 }
  0x2b   : > { %879 = vmatprep.subr.bf16.mxu0 %v878_v13  ;;  %885 = vmatprep.subr.bf16.mxu1 %v878_v13  ;;  %p961_p5 = pnand %p960_p3, %p954_p0 }
  0x2e   : > { %881 = vmatpush3.bf16.msra.mxu0 %v878_v13  ;;  %889 = vmatpush3.bf16.msra.mxu1 %v878_v13 }
  0x31   : > { %843 = vmatmul.mubr.msk.f32.vlgmr.msra.gmra.mrb[0].mxu0 %vm352_vm0, %v322_v14  ;;  %855 = vmatmul.mubr.msk.f32.vlgmr.msra.gmra.mrb[0].mxu1 %vm352_vm0, %v330_v15 }
  0x32   : > { %845 = vmatprep.mubr.msk.f32.mxu0 %vm352_vm0, %v323_v16  ;;  %857 = vmatprep.mubr.msk.f32.mxu1 %vm352_vm0, %v331_v17 }
  0x35   : > { %846 = vmatmul.mubr.msk.f32.gmra.mrb[2].mxu0 %vm352_vm0, %v324_v18  ;;  %858 = vmatmul.mubr.msk.f32.gmra.mrb[2].mxu1 %vm352_vm0, %v332_v19 }
  0x36   : > { %848 = vmatprep.mubr.msk.f32.mxu0 %vm352_vm0, %v325_v20  ;;  %860 = vmatprep.mubr.msk.f32.mxu1 %vm352_vm0, %v333_v21 }
  0x39   : > { %849 = vmatmul.mubr.msk.f32.gmra.mrb[4].mxu0 %vm352_vm0, %v326_v22  ;;  %861 = vmatmul.mubr.msk.f32.gmra.mrb[4].mxu1 %vm352_vm0, %v334_v23 }
  0x3a   : > { %851 = vmatprep.mubr.msk.f32.mxu0 %vm352_vm0, %v327_v24  ;;  %863 = vmatprep.mubr.msk.f32.mxu1 %vm352_vm0, %v335_v25 }
  0x3d   : > { %852 = vmatmul.mubr.msk.f32.gmra.mrb[6].mxu0 %vm352_vm0, %v328_v26  ;;  %864 = vmatmul.mubr.msk.f32.gmra.mrb[6].mxu1 %vm352_vm0, %v336_v27 }
  0x3e   : > { %964 = shalt.err (!%p961_p5)
}
  0x3f   : > { %s965_s24 = scalar_lea.hbm %s1209_s9, 16  ;;  %s969_s13 = scalar_lea.hbm %s1328_s4, 32 }
  0x40   : > { %p966_p6 = scmp.ne.s32.totalorder %s1209_s9, %s965_s24  ;;  %p970_p10 = scmp.lt.u32.totalorder %s1209_s9, %s1328_s4 }
  0x41   : > { %p971_p11 = scmp.lt.u32.totalorder %s969_s13, %s965_s24  ;;  %p973_p13 = scmp.lt.u32.totalorder %s965_s24, %s1209_s9 }
  0x42   : > { %p967_p7 = pnand %p966_p6, %p1136_p4 }
  0x43   : > { %p972_p12 = por %p971_p11, %p970_p10 }
  0x44   : > { %p968_p9 = pneg %p967_p7 }
  0x45   : > { %p974_p0 = por %p973_p13, %p972_p12 }
  0x47   : > { %p975_p1 = pnand %p974_p0, %p968_p9 }
  0x49   : > { %978 = shalt.err (!%p975_p1)
}
  0x4a   : > { %890 = dma.vmem_to_hbm [thread:$0]  (%p1136_p4), %s597_s25, 16, %s1209_s9, %s575_s11  }
  0x4b   : > { %s1237_s8 = scalar_lea.hbm %s1329_s5, %s795_s17  ;;  %s610_s27 = sshll.u32 %s292_s10, 4  ;;  %s611_s27 = int_to_ptr.vmem [resolvable:$true] %s610_s27 }
  0x4c   : > { %s579_s24 = scalar_lea.sflag [#allocation5], %s1200_s16  ;;  %s979_s29 = scalar_lea.vmem %s611_s27, 16 }
  0x4d   : > { %p980_p2 = scmp.ne.s32.totalorder %s611_s27, %s979_s29  ;;  %s1065_s13 = smov [#allocation4]  }
  0x4e   : > { %s983_s14 = sshll.u32 %s1065_s13, 4  ;;  %s984_s14 = int_to_ptr.vmem [resolvable:$false] %s983_s14 }
  0x4f   : > { %p981_p3 = pnand %p980_p2, %p1136_p4  ;;  %s985_s0 = scalar_lea.vmem %s984_s14, 32 }
  0x50   : > { %p986_p6 = scmp.lt.s32.totalorder %s611_s27, %s984_s14  ;;  %p987_p7 = scmp.lt.s32.totalorder %s985_s0, %s979_s29 }
  0x51   : > { %p982_p5 = pneg %p981_p3 }
  0x52   : > { %p988_p9 = por %p987_p7, %p986_p6 }
  0x54   : > { %p989_p10 = pnand %p988_p9, %p982_p5 }
  0x56   : > { %992 = shalt.err (!%p989_p10)
}
  0x57   : > { %s993_s21 = scalar_lea.hbm %s1237_s8, 16  ;;  %s997_s25 = scalar_lea.hbm %s1329_s5, 32 }
  0x58   : > { %p994_p11 = scmp.ne.s32.totalorder %s1237_s8, %s993_s21  ;;  %p998_p0 = scmp.lt.u32.totalorder %s1237_s8, %s1329_s5 }
  0x59   : > { %p999_p1 = scmp.lt.u32.totalorder %s997_s25, %s993_s21  ;;  %p1001_p3 = scmp.lt.u32.totalorder %s993_s21, %s1237_s8 }
  0x5a   : > { %p995_p12 = pnand %p994_p11, %p1136_p4 }
  0x5b   : > { %p1000_p2 = por %p999_p1, %p998_p0 }
  0x5c   : > { %p996_p13 = pneg %p995_p12 }
  0x5d   : > { %p1002_p5 = por %p1001_p3, %p1000_p2 }
  0x5f   : > { %p1003_p6 = pnand %p1002_p5, %p996_p13 }
  0x61   : > { %1006 = shalt.err (!%p1003_p6)
}
  0x62   : > { %891 = dma.vmem_to_hbm [thread:$0]  (%p1136_p4), %s611_s27, 16, %s1237_s8, %s579_s24  }
  0x63   : > { %s310_s12 = scalar_lea.vmem %s1326_s2, %s1153_s7  ;;  %s1335_s15 = sshll.u32 %s1153_s7, 7 }
  0x64   : > { %v778_v29 = vld [vmem:[%s310_s12] ss:$0 sm:$0xff]  ;;  %s1268_s14 = scalar_lea.vmem %s1327_s3, %s1335_s15 }
 0x104   : > { %v844_v30 = vpop.f32.mrb[0].mxu0  ;;  %v856_v31 = vpop.f32.mrb[0].mxu1 }
 0x105   : > { %v473_v32 = vadd.f32 %v844_v30, %v778_v29  ;;  %v513_v33 = vadd.f32 %v856_v31, %v778_v29  ;;  %v467_v34 = vpop.f32.mrb[1].mxu0  ;;  %v507_v35 = vpop.f32.mrb[1].mxu1 }
 0x106   : > { %v468_v36 = vadd.f32 %v778_v29, %v467_v34  ;;  %v508_v37 = vadd.f32 %v778_v29, %v507_v35 }
 0x107   : > { %547 = vst.msk [vmem:[%s1268_s14 + $0x8] sm:$0xff] %vm352_vm0, %v473_v32  ;;  %555 = vst.msk [vmem:[%s1268_s14 + $0x48] sm:$0xff] %vm352_vm0, %v513_v33 }
 0x108   : > { %546 = vst.msk [vmem:[%s1268_s14] sm:$0xff] %vm352_vm0, %v468_v36  ;;  %554 = vst.msk [vmem:[%s1268_s14 + $0x40] sm:$0xff] %vm352_vm0, %v508_v37  ;;  %v847_v38 = vpop.f32.mrb[2].mxu0  ;;  %v859_v39 = vpop.f32.mrb[2].mxu1 }
 0x109   : > { %v483_v40 = vadd.f32 %v847_v38, %v778_v29  ;;  %v523_v41 = vadd.f32 %v859_v39, %v778_v29  ;;  %v477_v42 = vpop.f32.mrb[3].mxu0  ;;  %v517_v43 = vpop.f32.mrb[3].mxu1 }
 0x10a   : > { %v478_v44 = vadd.f32 %v778_v29, %v477_v42  ;;  %v518_v45 = vadd.f32 %v778_v29, %v517_v43 }
 0x10b   : > { %549 = vst.msk [vmem:[%s1268_s14 + $0x18] sm:$0xff] %vm352_vm0, %v483_v40  ;;  %557 = vst.msk [vmem:[%s1268_s14 + $0x58] sm:$0xff] %vm352_vm0, %v523_v41 }
 0x10c   : > { %548 = vst.msk [vmem:[%s1268_s14 + $0x10] sm:$0xff] %vm352_vm0, %v478_v44  ;;  %556 = vst.msk [vmem:[%s1268_s14 + $0x50] sm:$0xff] %vm352_vm0, %v518_v45  ;;  %v850_v46 = vpop.f32.mrb[4].mxu0  ;;  %v862_v47 = vpop.f32.mrb[4].mxu1 }
 0x10d   : > { %v493_v48 = vadd.f32 %v850_v46, %v778_v29  ;;  %v533_v49 = vadd.f32 %v862_v47, %v778_v29  ;;  %v487_v50 = vpop.f32.mrb[5].mxu0  ;;  %v527_v51 = vpop.f32.mrb[5].mxu1 }
 0x10e   : > { %v488_v52 = vadd.f32 %v778_v29, %v487_v50  ;;  %v528_v53 = vadd.f32 %v778_v29, %v527_v51 }
 0x10f   : > { %551 = vst.msk [vmem:[%s1268_s14 + $0x28] sm:$0xff] %vm352_vm0, %v493_v48  ;;  %559 = vst.msk [vmem:[%s1268_s14 + $0x68] sm:$0xff] %vm352_vm0, %v533_v49 }
 0x110   : > { %550 = vst.msk [vmem:[%s1268_s14 + $0x20] sm:$0xff] %vm352_vm0, %v488_v52  ;;  %558 = vst.msk [vmem:[%s1268_s14 + $0x60] sm:$0xff] %vm352_vm0, %v528_v53  ;;  %v853_v54 = vpop.f32.mrb[6].mxu0  ;;  %v865_v55 = vpop.f32.mrb[6].mxu1 }
 0x111   : > { %v503_v56 = vadd.f32 %v853_v54, %v778_v29  ;;  %v543_v57 = vadd.f32 %v865_v55, %v778_v29  ;;  %v497_v58 = vpop.f32.mrb[7].mxu0  ;;  %v537_v59 = vpop.f32.mrb[7].mxu1 }
 0x112   : > { %v498_v60 = vadd.f32 %v778_v29, %v497_v58  ;;  %v538_v61 = vadd.f32 %v778_v29, %v537_v59 }
 0x113   : > { %553 = vst.msk [vmem:[%s1268_s14 + $0x38] sm:$0xff] %vm352_vm0, %v503_v56  ;;  %561 = vst.msk [vmem:[%s1268_s14 + $0x78] sm:$0xff] %vm352_vm0, %v543_v57 }
 0x114   : > { %552 = vst.msk [vmem:[%s1268_s14 + $0x30] sm:$0xff] %vm352_vm0, %v498_v60  ;;  %560 = vst.msk [vmem:[%s1268_s14 + $0x70] sm:$0xff] %vm352_vm0, %v538_v61 }
 0x115 PF: > { %p901_p4 = scmp.ge.s32.totalorder %s1061_s23, 2  ;;  %s634_s28 = sand.u32 1, %s1041_s18  }
 0x116   : > { %s635_s7 = scalar_lea.sflag [#allocation3], %s634_s28 }
 0x117   : > { %p895_p7 = pnand %p901_p4, %p1143_p8 }
 0x119   : > { %1032 = dma.done.wait (!%p895_p7), %s635_s7, 16  }
 0x11a   : > { %1034 = vsyncadd (!%p895_p7), %s635_s7, 4294967280  ;;  %s643_s8 = scalar_lea.sflag [#allocation5], %s634_s28 }
 0x11b   : > { %1036 = dma.done.wait (!%p895_p7), %s643_s8, 16  }
 0x11c   : > { %1038 = vsyncadd (!%p895_p7), %s643_s8, 4294967280  ;;  %s22_s23 = sadd.s32 1, %s1061_s23   ;;  %s1336_s18 = smov %s1045_s19 }
 0x11d   : > { %p19_p9 = scmp.ge.s32.totalorder %s22_s23, 4   ;;  %s1337_s19 = smov %s1049_s20 }
 0x11e   : > { %s1338_s20 = smov %s1149_s6  ;;  %s1339_s21 = smov %s1057_s22 }
 0x11f   : > { %s1340_s22 = smov %s1342_s26  ;;  %21 = sbr.rel (!%p19_p9) target bundleno = 8 (0x8), region = 102 }
 0x126   :  { %647 = vsyncpa [#allocation3], 1 }
 0x127   :  { %649 = vsyncpa [#allocation3 + $0x1], 1 }
 0x128   :  { %650 = vsyncpa [#allocation5], 1 }
 0x129   :  { %652 = vsyncpa [#allocation5 + $0x1], 1 }

// kernel: pointnet_backbone_forward.29
= control target key start
LH: loop header
LB: loop body
LE: loop exit
PB: predicated region body
PF: predicated region fallthrough
CT: control target
= control target key end

     0   :  { %s1242_s15 = smov 0   ;;  %s1244_s16 = smov 0   ;;  %s2434_s0 = inlined_call_operand.vmem [shape: f32[2,128,512], index: 0, kind: input, shape index: {}]   ;;  %s2435_s1 = inlined_call_operand.vmem [shape: f32[1,512], index: 1, kind: input, shape index: {}]   ;;  %s2436_s2 = inlined_call_operand.vmem [shape: f32[1,512], index: 2, kind: input, shape index: {}]   ;;  %s2437_s3 = inlined_call_operand.vmem [shape: f32[2,1,512], index: 3, kind: output, shape index: {0}]   ;;  %s2438_s4 = inlined_call_operand.vmem [shape: s32[2,1,512], index: 4, kind: output, shape index: {1}]  }
   0x1   :  { %s1246_s17 = smov 0  }
   0x2 LB: > { %s27_s18 = sadd.s32 1, %s1210_s16  ;;  %p1159_p0 = scmp.ge.s32.totalorder %s1214_s17, 1  ;;  %s1214_s17 = sphi %s1246_s17, %s15_s17   ;;  %s1210_s16 = sphi %s1244_s16, %s2666_s16   ;;  %s1206_s15 = sphi %s1242_s15, %s2665_s15  }
   0x3   : > { %p29_p1 = scmp.ge.s32.totalorder %s27_s18, 2  ;;  %p185_p2 = scmp.lt.s32.totalorder %s1214_s17, 3 }
   0x5   : > { %s2668_s18 = smov (%p29_p1, %s27_s18), 0  ;;  %p186_p3 = pnand %p1159_p0, %p185_p2 }
   0x7   : > { %189 = sbr.rel (%p186_p3) target bundleno = 164 (0xa4), region = 32 }
   0xe   : > { %p220_p4 = scmp.lt.s32.totalorder %s1206_s15, 1  ;;  %v2439_v0 = vlaneseq  ;;  %v302_v5 = vld [vmem:[%s2435_s1] sm:$0xf] }
   0xf   : > { %v388_v8 = vld [vmem:[%s2436_s2] sm:$0xf] }
  0x10   : > { %s2670_s15 = smov (!%p220_p4, %s1206_s15), 1  ;;  %v1263_v1 = vshrl.u32 %v2439_v0, 7 }
  0x11   : > { %s1166_s19 = sshll.u32 %s2670_s15, 9  ;;  %s1162_s27 = sshll.u32 %s2670_s15, 2 }
  0x12   : > { %s1269_s22 = scalar_lea.vmem %s2434_s0, %s1166_s19  ;;  %v306_v2 = vsub.s32 0, %v1263_v1  ;;  %v310_v3 = vsub.s32 1, %v1263_v1  ;;  %v314_v4 = vsub.s32 2, %v1263_v1  ;;  %v318_v6 = vsub.s32 3, %v1263_v1  ;;  %s233_s30 = scalar_lea.vmem %s2437_s3, %s1162_s27 }
  0x13   : > { %v238_v7 = vld [vmem:[%s1269_s22] sm:$0xff]  ;;  %v239_v9 = vld [vmem:[%s1269_s22 + $0x8] sm:$0xff]  ;;  %v240_v10 = vld [vmem:[%s1269_s22 + $0x10] sm:$0xff]  ;;  %v1300_v22 = vadd.s32 8, %v1263_v1  ;;  %v1303_v23 = vadd.s32 16, %v1263_v1  ;;  %s237_s7 = scalar_lea.vmem %s2438_s4, %s1162_s27 }
  0x14   : > { %v241_v11 = vld [vmem:[%s1269_s22 + $0x18] sm:$0xff]  ;;  %v1285_v12 = vrot.slane %v302_v5, %v306_v2  ;;  %v1287_v13 = vrot.slane %v302_v5, %v310_v3  ;;  %v1289_v14 = vrot.slane %v302_v5, %v314_v4  ;;  %v242_v15 = vld [vmem:[%s1269_s22 + $0x20] sm:$0xff]  ;;  %v243_v16 = vld [vmem:[%s1269_s22 + $0x28] sm:$0xff]  ;;  %v1294_v18 = vrot.slane %v302_v5, %v318_v6 }
  0x15   : > { %v248_v17 = vld [vmem:[%s1269_s22 + $0x50] sm:$0xff]  ;;  %v245_v20 = vld [vmem:[%s1269_s22 + $0x38] sm:$0xff]  ;;  %2521 = vst [vmem:[#allocation2_spill] sm:$0xff] %v1300_v22  ;;  %2522 = vst [vmem:[#allocation3_spill] sm:$0xff] %v1303_v23  ;;  %v1308_v27 = vrot.slane %v388_v8, %v306_v2  ;;  %v1310_v28 = vrot.slane %v388_v8, %v310_v3  ;;  %v1312_v29 = vrot.slane %v388_v8, %v314_v4 }
  0x16   : > { %v244_v19 = vld [vmem:[%s1269_s22 + $0x30] sm:$0xff]  ;;  %v249_v21 = vld [vmem:[%s1269_s22 + $0x58] sm:$0xff]  ;;  %v246_v24 = vld [vmem:[%s1269_s22 + $0x40] sm:$0xff]  ;;  %v1314_v30 = vrot.slane %v388_v8, %v318_v6  ;;  %v324_v34 = vmul.f32 %v1285_v12, %v238_v7  ;;  %v325_v35 = vmul.f32 %v1287_v13, %v239_v9  ;;  %v326_v36 = vmul.f32 %v1289_v14, %v240_v10 }
  0x17   : > { %v247_v25 = vld [vmem:[%s1269_s22 + $0x48] sm:$0xff]  ;;  %v252_v26 = vld [vmem:[%s1269_s22 + $0x70] sm:$0xff]  ;;  %v250_v31 = vld [vmem:[%s1269_s22 + $0x60] sm:$0xff]  ;;  %v334_v37 = vmul.f32 %v1289_v14, %v248_v17  ;;  %v327_v40 = vmul.f32 %v1294_v18, %v241_v11  ;;  %v328_v41 = vmul.f32 %v1285_v12, %v242_v15  ;;  %v1328_v42 = vmul.f32 %v1287_v13, %v243_v16 }
  0x18   : > { %v251_v32 = vld [vmem:[%s1269_s22 + $0x68] sm:$0xff]  ;;  %v253_v33 = vld [vmem:[%s1269_s22 + $0x78] sm:$0xff]  ;;  %v254_v38 = vld [vmem:[%s1269_s22 + $0x80] sm:$0xff]  ;;  %v335_v43 = vmul.f32 %v1294_v18, %v249_v21  ;;  %v1334_v46 = vmul.f32 %v1289_v14, %v244_v19  ;;  %v1337_v47 = vmul.f32 %v1294_v18, %v245_v20  ;;  %v1340_v48 = vmul.f32 %v1285_v12, %v246_v24 }
  0x19   : > { %v255_v39 = vld [vmem:[%s1269_s22 + $0x88] sm:$0xff]  ;;  %v256_v44 = vld [vmem:[%s1269_s22 + $0x90] sm:$0xff]  ;;  %v257_v45 = vld [vmem:[%s1269_s22 + $0x98] sm:$0xff]  ;;  %v338_v49 = vmul.f32 %v1289_v14, %v252_v26  ;;  %v1346_v52 = vmul.f32 %v1287_v13, %v247_v25  ;;  %v1349_v53 = vmul.f32 %v1285_v12, %v250_v31  ;;  %v1352_v54 = vmul.f32 %v1287_v13, %v251_v32 }
  0x1a   : > { %v258_v50 = vld [vmem:[%s1269_s22 + $0xa0] sm:$0xff]  ;;  %v259_v51 = vld [vmem:[%s1269_s22 + $0xa8] sm:$0xff]  ;;  %v339_v55 = vmul.f32 %v1294_v18, %v253_v33  ;;  %v260_v56 = vld [vmem:[%s1269_s22 + $0xb0] sm:$0xff]  ;;  %v1358_v58 = vmul.f32 %v1285_v12, %v254_v38  ;;  %v1361_v59 = vmul.f32 %v1287_v13, %v255_v39  ;;  %v1364_v60 = vadd.f32 %v1308_v27, %v324_v34 }
  0x1b   : > { %v261_v57 = vld [vmem:[%s1269_s22 + $0xb8] sm:$0xff]  ;;  %v1367_v61 = vadd.f32 %v1312_v29, %v334_v37  ;;  %v262_v62 = vld [vmem:[%s1269_s22 + $0xc0] sm:$0xff]  ;;  %v264_v63 = vld [vmem:[%s1269_s22 + $0xd0] sm:$0xff]  ;;  %v342_v3 = vmul.f32 %v1289_v14, %v256_v44  ;;  %v343_v4 = vmul.f32 %v1294_v18, %v257_v45  ;;  %v1375_v5 = vadd.f32 %v1310_v28, %v325_v35 }
  0x1c   : > { %v265_v2 = vld [vmem:[%s1269_s22 + $0xd8] sm:$0xff]  ;;  %v1378_v6 = vadd.f32 %v1314_v30, %v335_v43  ;;  %v263_v7 = vld [vmem:[%s1269_s22 + $0xc8] sm:$0xff]  ;;  %v266_v8 = vld [vmem:[%s1269_s22 + $0xe0] sm:$0xff]  ;;  %v1383_v9 = vmul.f32 %v1285_v12, %v258_v50  ;;  %v1386_v10 = vmul.f32 %v1287_v13, %v259_v51  ;;  %v1389_v11 = vadd.f32 %v1312_v29, %v326_v36 }
  0x1d   : > { %v1392_v15 = vadd.f32 %v1312_v29, %v338_v49  ;;  %v268_v16 = vld [vmem:[%s1269_s22 + $0xf0] sm:$0xff]  ;;  %v269_v17 = vld [vmem:[%s1269_s22 + $0xf8] sm:$0xff]  ;;  %v346_v19 = vmul.f32 %v1289_v14, %v260_v56  ;;  %v347_v20 = vmul.f32 %v1294_v18, %v261_v57  ;;  %v1399_v21 = vadd.f32 %v1314_v30, %v327_v40  ;;  %v267_v39 = vld [vmem:[%s1269_s22 + $0xe8] sm:$0xff] }
  0x1e   : > { %v1402_v24 = vadd.f32 %v1314_v30, %v339_v55  ;;  %v272_v25 = vld [vmem:[%s1269_s22 + $0x110] sm:$0xff]  ;;  %v273_v26 = vld [vmem:[%s1269_s22 + $0x118] sm:$0xff]  ;;  %v1407_v31 = vmul.f32 %v1285_v12, %v262_v62  ;;  %v350_v32 = vmul.f32 %v1289_v14, %v264_v63  ;;  %v351_v33 = vmul.f32 %v1294_v18, %v265_v2  ;;  %v270_v57 = vld [vmem:[%s1269_s22 + $0x100] sm:$0xff] }
  0x1f   : > { %v518_v34 = vmax.f32 %v1392_v15, %v1367_v61  ;;  %v1414_v35 = vmul.f32 %v1287_v13, %v263_v7  ;;  %v1417_v36 = vmul.f32 %v1285_v12, %v266_v8  ;;  %v1420_v37 = vadd.f32 %v1308_v27, %v328_v41  ;;  %v276_v40 = vld [vmem:[%s1269_s22 + $0x130] sm:$0xff]  ;;  %v277_v43 = vld [vmem:[%s1269_s22 + $0x138] sm:$0xff] }
  0x20   : > { %v539_v38 = vmax.f32 %v1402_v24, %v1378_v6  ;;  %v354_v44 = vmul.f32 %v1289_v14, %v268_v16  ;;  %v355_v45 = vmul.f32 %v1294_v18, %v269_v17  ;;  %v1430_v49 = vadd.f32 %v1312_v29, %v342_v3  ;;  %v280_v62 = vld [vmem:[%s1269_s22 + $0x150] sm:$0xff]  ;;  %v281_v63 = vld [vmem:[%s1269_s22 + $0x158] sm:$0xff] }
  0x21   : > { %v1433_v50 = vadd.f32 %v1314_v30, %v343_v4  ;;  %v358_v41 = vmul.f32 %v1289_v14, %v272_v25  ;;  %v359_v51 = vmul.f32 %v1294_v18, %v273_v26  ;;  %v1438_v55 = vadd.f32 %v1312_v29, %v346_v19  ;;  %v284_v25 = vld [vmem:[%s1269_s22 + $0x170] sm:$0xff]  ;;  %v285_v26 = vld [vmem:[%s1269_s22 + $0x178] sm:$0xff] }
  0x22   : > { %v1441_v56 = vadd.f32 %v1314_v30, %v347_v20  ;;  %v519_v2 = vmax.f32 %v518_v34, %v1430_v49  ;;  %v1449_v4 = vadd.f32 %v1312_v29, %v350_v32  ;;  %v1452_v7 = vadd.f32 %v1314_v30, %v351_v33  ;;  %v271_v20 = vld [vmem:[%s1269_s22 + $0x108] sm:$0xff]  ;;  %v289_v0 = vld [vmem:[%s1269_s22 + $0x198] sm:$0xff] }
  0x23   : > { %v540_v3 = vmax.f32 %v539_v38, %v1433_v50  ;;  %v1455_v8 = vmul.f32 %v1287_v13, %v267_v39  ;;  %v362_v16 = vmul.f32 %v1289_v14, %v276_v40  ;;  %v363_v17 = vmul.f32 %v1294_v18, %v277_v43  ;;  %v274_v39 = vld [vmem:[%s1269_s22 + $0x120] sm:$0xff] }
  0x24   : > { %2523 = vst [vmem:[#allocation4_spill] sm:$0xff] %v1441_v56  ;;  %2524 = vst [vmem:[#allocation5_spill] sm:$0xff] %v1449_v4  ;;  %v1461_v19 = vadd.f32 %v1310_v28, %v1328_v42  ;;  %v520_v32 = vmax.f32 %v519_v2, %v1438_v55  ;;  %v1469_v34 = vadd.f32 %v1312_v29, %v354_v44  ;;  %v288_v44 = vld [vmem:[%s1269_s22 + $0x190] sm:$0xff] }
  0x25   : > { %2525 = vst [vmem:[#allocation6_spill] sm:$0xff] %v1452_v7  ;;  %v541_v33 = vmax.f32 %v540_v3, %v1441_v56  ;;  %v1472_v38 = vadd.f32 %v1314_v30, %v355_v45  ;;  %v1476_v40 = vmul.f32 %v1285_v12, %v270_v57  ;;  %v366_v42 = vmul.f32 %v1289_v14, %v280_v62  ;;  %v275_v3 = vld [vmem:[%s1269_s22 + $0x128] sm:$0xff] }
  0x26   : > { %2526 = vst [vmem:[#allocation7_spill] sm:$0xff] %v1469_v34  ;;  %v367_v43 = vmul.f32 %v1294_v18, %v281_v63  ;;  %v1482_v2 = vadd.f32 %v1312_v29, %v1334_v46  ;;  %v521_v45 = vmax.f32 %v520_v32, %v1449_v4  ;;  %v1490_v22 = vadd.f32 %v1312_v29, %v358_v41 }
  0x27   : > { %2527 = vst [vmem:[#allocation8_spill] sm:$0xff] %v1472_v38  ;;  %v542_v23 = vmax.f32 %v541_v33, %v1452_v7  ;;  %v1493_v57 = vadd.f32 %v1314_v30, %v359_v51  ;;  %v1496_v62 = vmul.f32 %v1287_v13, %v271_v20  ;;  %v370_v46 = vmul.f32 %v1289_v14, %v284_v25  ;;  %v292_v33 = vld [vmem:[%s1269_s22 + $0x1b0] sm:$0xff]  ;;  %v293_v7 = vld [vmem:[%s1269_s22 + $0x1b8] sm:$0xff] }
  0x28   : > { %2528 = vst [vmem:[#allocation9_spill] sm:$0xff] %v1490_v22  ;;  %v371_v63 = vmul.f32 %v1294_v18, %v285_v26  ;;  %v1502_v32 = vadd.f32 %v1314_v30, %v1337_v47  ;;  %v522_v41 = vmax.f32 %v521_v45, %v1469_v34  ;;  %v1509_v51 = vadd.f32 %v1312_v29, %v362_v16  ;;  %v296_v34 = vld [vmem:[%s1269_s22 + $0x1d0] sm:$0xff] }
  0x29   : > { %2529 = vst [vmem:[#allocation10_spill] sm:$0xff] %v1493_v57  ;;  %v543_v4 = vmax.f32 %v542_v23, %v1472_v38  ;;  %v1512_v20 = vadd.f32 %v1314_v30, %v363_v17  ;;  %v1515_v25 = vmul.f32 %v1285_v12, %v274_v39  ;;  %v1518_v47 = vmul.f32 %v1287_v13, %v275_v3  ;;  %v297_v23 = vld [vmem:[%s1269_s22 + $0x1d8] sm:$0xff] }
  0x2a   : > { %v374_v26 = vmul.f32 %v1289_v14, %v288_v44  ;;  %v375_v45 = vmul.f32 %v1294_v18, %v289_v0  ;;  %v523_v16 = vmax.f32 %v522_v41, %v1490_v22  ;;  %v1527_v17 = vadd.f32 %v1312_v29, %v366_v42  ;;  %v300_v41 = vld [vmem:[%s1269_s22 + $0x1f0] sm:$0xff] }
  0x2b   : > { %v544_v38 = vmax.f32 %v543_v4, %v1493_v57  ;;  %v1530_v56 = vadd.f32 %v1314_v30, %v367_v43  ;;  %v378_v39 = vmul.f32 %v1289_v14, %v292_v33  ;;  %v379_v3 = vmul.f32 %v1294_v18, %v293_v7  ;;  %v301_v4 = vld [vmem:[%s1269_s22 + $0x1f8] sm:$0xff] }
  0x2c   : > { %v1536_v44 = vadd.f32 %v1308_v27, %v1340_v48  ;;  %v1540_v0 = vadd.f32 %v1310_v28, %v1346_v52  ;;  %v524_v42 = vmax.f32 %v523_v16, %v1509_v51  ;;  %v1547_v43 = vadd.f32 %v1312_v29, %v370_v46 }
  0x2d   : > { %v545_v57 = vmax.f32 %v544_v38, %v1512_v20  ;;  %v1550_v33 = vadd.f32 %v1314_v30, %v371_v63  ;;  %v382_v7 = vmul.f32 %v1289_v14, %v296_v34  ;;  %v383_v48 = vmul.f32 %v1294_v18, %v297_v23 }
  0x2e   : > { %2530 = vst [vmem:[#allocation11_spill] sm:$0xff] %v1547_v43  ;;  %v1556_v52 = vadd.f32 %v1308_v27, %v1349_v53  ;;  %v1560_v22 = vadd.f32 %v1310_v28, %v1352_v54  ;;  %v525_v38 = vmax.f32 %v524_v42, %v1527_v17  ;;  %v1565_v16 = vadd.f32 %v1312_v29, %v374_v26 }
  0x2f   : > { %2531 = vst [vmem:[#allocation12_spill] sm:$0xff] %v1550_v33  ;;  %v546_v46 = vmax.f32 %v545_v57, %v1530_v56  ;;  %v1568_v63 = vadd.f32 %v1314_v30, %v375_v45  ;;  %v386_v34 = vmul.f32 %v1289_v14, %v300_v41  ;;  %v387_v23 = vmul.f32 %v1294_v18, %v301_v4 }
  0x30   : > { %2532 = vst [vmem:[#allocation13_spill] sm:$0xff] %v1565_v16  ;;  %v475_v53 = vmax.f32 %v1364_v60, %v1420_v37  ;;  %v496_v54 = vmax.f32 %v1375_v5, %v1461_v19  ;;  %v526_v42 = vmax.f32 %v525_v38, %v1547_v43  ;;  %v1579_v26 = vadd.f32 %v1312_v29, %v378_v39 }
  0x31   : > { %2533 = vst [vmem:[#allocation14_spill] sm:$0xff] %v1568_v63  ;;  %v547_v57 = vmax.f32 %v546_v46, %v1550_v33  ;;  %v1582_v45 = vadd.f32 %v1314_v30, %v379_v3  ;;  %v1586_v14 = vadd.f32 %v1308_v27, %v1358_v58  ;;  %v1590_v18 = vadd.f32 %v1310_v28, %v1361_v59 }
  0x32   : > { %2534 = vst [vmem:[#allocation15_spill] sm:$0xff] %v1579_v26  ;;  %v476_v41 = vmax.f32 %v475_v53, %v1536_v44  ;;  %v497_v4 = vmax.f32 %v496_v54, %v1540_v0  ;;  %v527_v39 = vmax.f32 %v526_v42, %v1565_v16  ;;  %v1597_v3 = vadd.f32 %v1312_v29, %v382_v7  ;;  %v291_v16 = vld [vmem:[%s1269_s22 + $0x1a8] sm:$0xff] }
  0x33   : > { %2535 = vst [vmem:[#allocation16_spill] sm:$0xff] %v1582_v45  ;;  %v548_v38 = vmax.f32 %v547_v57, %v1568_v63  ;;  %v1600_v58 = vadd.f32 %v1314_v30, %v383_v48  ;;  %v1604_v46 = vadd.f32 %v1308_v27, %v1383_v9  ;;  %v1608_v59 = vadd.f32 %v1310_v28, %v1386_v10  ;;  %v278_v57 = vld [vmem:[%s1269_s22 + $0x140] sm:$0xff]  ;;  %v279_v63 = vld [vmem:[%s1269_s22 + $0x148] sm:$0xff] }
  0x34   : > { %2536 = vst [vmem:[#allocation17_spill] sm:$0xff] %v1597_v3  ;;  %v477_v53 = vmax.f32 %v476_v41, %v1556_v52  ;;  %v498_v54 = vmax.f32 %v497_v4, %v1560_v22  ;;  %v528_v7 = vmax.f32 %v527_v39, %v1579_v26  ;;  %v1615_v48 = vadd.f32 %v1312_v29, %v386_v34  ;;  %v287_v26 = vld [vmem:[%s1269_s22 + $0x188] sm:$0xff] }
  0x35   : > { %2537 = vst [vmem:[#allocation18_spill] sm:$0xff] %v1600_v58  ;;  %v549_v42 = vmax.f32 %v548_v38, %v1582_v45  ;;  %v1618_v9 = vadd.f32 %v1314_v30, %v387_v23  ;;  %v1624_v10 = vadd.f32 %v1308_v27, %v1407_v31  ;;  %v1628_v41 = vadd.f32 %v1310_v28, %v1414_v35  ;;  %v282_v23 = vld [vmem:[%s1269_s22 + $0x160] sm:$0xff]  ;;  %v283_v38 = vld [vmem:[%s1269_s22 + $0x168] sm:$0xff] }
  0x36   : > { %2538 = vst [vmem:[#allocation19_spill] sm:$0xff] %v1615_v48  ;;  %v478_v4 = vmax.f32 %v477_v53, %v1586_v14  ;;  %v499_v39 = vmax.f32 %v498_v54, %v1590_v18  ;;  %v529_v29 = vmax.f32 %v528_v7, %v1597_v3  ;;  %v517_v34 = vmax.f32 %v1389_v11, %v1482_v2 }
  0x37   : > { %2539 = vst [vmem:[#allocation20_spill] sm:$0xff] %v1618_v9  ;;  %2540 = vst [vmem:[#allocation21_spill] sm:$0xff] %v1628_v41  ;;  %v550_v30 = vmax.f32 %v549_v42, %v1600_v58  ;;  %v538_v31 = vmax.f32 %v1399_v21, %v1502_v32  ;;  %v1642_v35 = vadd.f32 %v1308_v27, %v1417_v36  ;;  %v286_v36 = vld [vmem:[%s1269_s22 + $0x180] sm:$0xff] }
  0x38   : > { %v1646_v53 = vadd.f32 %v1310_v28, %v1455_v8  ;;  %v479_v54 = vmax.f32 %v478_v4, %v1604_v46  ;;  %v500_v7 = vmax.f32 %v499_v39, %v1608_v59  ;;  %v364_v42 = vmul.f32 %v1285_v12, %v278_v57 }
  0x39   : > { %2541 = vst [vmem:[#allocation22_spill] sm:$0xff] %v1642_v35  ;;  %v365_v58 = vmul.f32 %v1287_v13, %v279_v63  ;;  %v530_v3 = vmax.f32 %v529_v29, %v1615_v48  ;;  %v551_v45 = vmax.f32 %v550_v30, %v1618_v9  ;;  %v1658_v8 = vadd.f32 %v1308_v27, %v1476_v40  ;;  %v290_v48 = vld [vmem:[%s1269_s22 + $0x1a0] sm:$0xff] }
  0x3a   : > { %2542 = vst [vmem:[#allocation23_spill] sm:$0xff] %v1646_v53  ;;  %v1662_v4 = vadd.f32 %v1310_v28, %v1496_v62  ;;  %v480_v39 = vmax.f32 %v479_v54, %v1624_v10  ;;  %v501_v57 = vmax.f32 %v500_v7, %v1628_v41  ;;  %v368_v63 = vmul.f32 %v1285_v12, %v282_v23 }
  0x3b   : > { %v369_v29 = vmul.f32 %v1287_v13, %v283_v38  ;;  %v531_v30 = vmax.f32 %v530_v3, %v517_v34  ;;  %v552_v9 = vmax.f32 %v551_v45, %v538_v31  ;;  %v1672_v40 = vadd.f32 %v1308_v27, %v1515_v25  ;;  %v294_v31 = vld [vmem:[%s1269_s22 + $0x1c0] sm:$0xff]  ;;  %v295_v38 = vld [vmem:[%s1269_s22 + $0x1c8] sm:$0xff] }
  0x3c   : > { %2543 = vst [vmem:[#allocation24_spill] sm:$0xff] %v1662_v4  ;;  %v1676_v62 = vadd.f32 %v1310_v28, %v1518_v47  ;;  %v481_v54 = vmax.f32 %v480_v39, %v1642_v35  ;;  %v502_v7 = vmax.f32 %v501_v57, %v1646_v53  ;;  %v372_v23 = vmul.f32 %v1285_v12, %v286_v36  ;;  %v298_v53 = vld [vmem:[%s1269_s22 + $0x1e0] sm:$0xff]  ;;  %v299_v35 = vld [vmem:[%s1269_s22 + $0x1e8] sm:$0xff] }
  0x3d   : > { %v373_v45 = vmul.f32 %v1287_v13, %v287_v26  ;;  %v532_v3 = vrot.slane %v531_v30, 4  ;;  %v553_v34 = vrot.slane %v552_v9, 4  ;;  %v1685_v25 = vadd.f32 %v1308_v27, %v364_v42 }
  0x3e   : > { %2544 = vst [vmem:[#allocation25_spill] sm:$0xff] %v1676_v62  ;;  %v1688_v47 = vadd.f32 %v1310_v28, %v365_v58  ;;  %v482_v39 = vmax.f32 %v481_v54, %v1658_v8  ;;  %v503_v33 = vmax.f32 %v502_v7, %v1662_v4  ;;  %v376_v57 = vmul.f32 %v1285_v12, %v290_v48 }
  0x3f   : > { %v377_v36 = vmul.f32 %v1287_v13, %v291_v16  ;;  %v533_v43 = vmax.f32 %v531_v30, %v532_v3  ;;  %v554_v26 = vmax.f32 %v552_v9, %v553_v34  ;;  %v1697_v41 = vadd.f32 %v1308_v27, %v368_v63 }
  0x40   : > { %v1700_v42 = vadd.f32 %v1310_v28, %v369_v29  ;;  %v483_v58 = vmax.f32 %v482_v39, %v1672_v40  ;;  %v504_v54 = vmax.f32 %v503_v33, %v1676_v62  ;;  %v380_v7 = vmul.f32 %v1285_v12, %v294_v31 }
  0x41   : > { %v381_v48 = vmul.f32 %v1287_v13, %v295_v38  ;;  %v534_v4 = vrot.slane %v533_v43, 2  ;;  %v555_v16 = vrot.slane %v554_v26, 2  ;;  %v1707_v9 = vadd.f32 %v1308_v27, %v372_v23 }
  0x42   : > { %v1710_v30 = vadd.f32 %v1310_v28, %v373_v45  ;;  %v484_v63 = vmax.f32 %v483_v58, %v1685_v25  ;;  %v505_v29 = vmax.f32 %v504_v54, %v1688_v47  ;;  %v384_v3 = vmul.f32 %v1285_v12, %v298_v53 }
  0x43   : > { %v385_v33 = vmul.f32 %v1287_v13, %v299_v35  ;;  %v535_v34 = vmax.f32 %v533_v43, %v534_v4  ;;  %v556_v31 = vmax.f32 %v554_v26, %v555_v16  ;;  %v1717_v38 = vadd.f32 %v1308_v27, %v376_v57 }
  0x44   : > { %v1720_v39 = vadd.f32 %v1310_v28, %v377_v36  ;;  %v485_v23 = vmax.f32 %v484_v63, %v1697_v41  ;;  %v506_v45 = vmax.f32 %v505_v29, %v1700_v42  ;;  %v1725_v54 = vadd.s32 24, %v1263_v1 }
  0x45   : > { %v536_v62 = vrot.slane %v535_v34, 1  ;;  %v557_v58 = vrot.slane %v556_v31, 1  ;;  %v1728_v12 = vadd.f32 %v1308_v27, %v380_v7  ;;  %v1731_v13 = vadd.f32 %v1310_v28, %v381_v48 }
  0x46   : > { %2545 = vst [vmem:[#allocation26_spill] sm:$0xff] %v1720_v39  ;;  %v486_v43 = vmax.f32 %v485_v23, %v1707_v9  ;;  %v507_v35 = vmax.f32 %v506_v45, %v1710_v30  ;;  %v1736_v53 = vadd.f32 %v1308_v27, %v384_v3  ;;  %v1739_v4 = vadd.f32 %v1310_v28, %v385_v33 }
  0x47   : > { %2546 = vst [vmem:[#allocation27_spill] sm:$0xff] %v1728_v12  ;;  %2547 = vst [vmem:[#allocation28_spill] sm:$0xff] %v1731_v13  ;;  %v1742_v57 = vadd.s32 32, %v1263_v1  ;;  %v1745_v36 = vadd.s32 40, %v1263_v1  ;;  %v1750_v48 = vadd.s32 48, %v1263_v1  ;;  %v1754_v27 = vmax.f32 %v535_v34, %v536_v62 }
  0x48   : > { %2548 = vst [vmem:[#allocation29_spill] sm:$0xff] %v1736_v53  ;;  %2549 = vst [vmem:[#allocation30_spill] sm:$0xff] %v1739_v4  ;;  %v487_v26 = vmax.f32 %v486_v43, %v1717_v38  ;;  %v508_v7 = vmax.f32 %v507_v35, %v1720_v39  ;;  %v1216_v16 = vmov 1966171168   ;;  %v1756_v28 = vmax.f32 %v556_v31, %v557_v58 }
  0x49   : > { %v1752_v63 = vunpack.c.l.s4 %v1216_v16  ;;  %v1759_v29 = vadd.s32 56, %v1263_v1  ;;  %v1762_v3 = vadd.s32 64, %v1263_v1  ;;  %v1767_v45 = vadd.s32 72, %v1263_v1 }
  0x4a   : > { %v488_v33 = vmax.f32 %v487_v26, %v1728_v12  ;;  %v509_v23 = vmax.f32 %v508_v7, %v1731_v13  ;;  %v1770_v43 = vadd.s32 80, %v1263_v1  ;;  %v1773_v62 = vadd.s32 88, %v1263_v1  ;;  %v2566_v12 = vld [vmem:[#allocation2_spill] sm:$0xff] }
  0x4b   : > { %2550 = vst [vmem:[#allocation31_spill] sm:$0xff] %v1752_v63  ;;  %v1776_v34 = vadd.s32 96, %v1263_v1  ;;  %v1779_v31 = vadd.s32 104, %v1263_v1  ;;  %v1782_v58 = vadd.s32 112, %v1263_v1  ;;  %v1787_v7 = vadd.s32 120, %v1263_v1  ;;  %v2557_v63 = vld [vmem:[#allocation4_spill] sm:$0xff] }
  0x4c   : > { %2551 = vst [vmem:[#allocation32_spill] sm:$0xff] %v1770_v43  ;;  %2552 = vst [vmem:[#allocation33_spill] sm:$0xff] %v1773_v62  ;;  %v489_v35 = vmax.f32 %v488_v33, %v1736_v53  ;;  %v510_v26 = vmax.f32 %v509_v23, %v1739_v4  ;;  %vm595_vm0 = vcmp.eq.f32.partialorder %v1389_v11, %v1754_v27  ;;  %v2561_v62 = vld [vmem:[#allocation8_spill] sm:$0xff] }
  0x4d   : > { %2553 = vst [vmem:[#allocation34_spill] sm:$0xff] %v1776_v34  ;;  %2554 = vst [vmem:[#allocation35_spill] sm:$0xff] %v1779_v31  ;;  %vm596_vm1 = vcmp.eq.f32.partialorder %v1399_v21, %v1756_v28  ;;  %vm599_vm2 = vcmp.eq.f32.partialorder %v1482_v2, %v1754_v27  ;;  %vm600_vm3 = vcmp.eq.f32.partialorder %v1502_v32, %v1756_v28  ;;  %v2559_v31 = vld [vmem:[#allocation6_spill] sm:$0xff]  ;;  %v2560_v34 = vld [vmem:[#allocation7_spill] sm:$0xff]  ;;  %v1834_v43 = vsel %vm595_vm0, %v1263_v1, 1073741824 }
  0x4e   : > { %2555 = vst [vmem:[#allocation36_spill] sm:$0xff] %v1782_v58  ;;  %2556 = vst [vmem:[#allocation37_spill] sm:$0xff] %v1787_v7  ;;  %v490_v33 = vrot.slane %v489_v35, 4  ;;  %v511_v58 = vrot.slane %v510_v26, 4  ;;  %vm603_vm4 = vcmp.eq.f32.partialorder %v1367_v61, %v1754_v27  ;;  %vm604_vm5 = vcmp.eq.f32.partialorder %v1378_v6, %v1756_v28  ;;  %v2558_v7 = vld [vmem:[#allocation5_spill] sm:$0xff] }
  0x4f   : > { %vm607_vm6 = vcmp.eq.f32.partialorder %v1392_v15, %v1754_v27  ;;  %vm608_vm7 = vcmp.eq.f32.partialorder %v1402_v24, %v1756_v28  ;;  %vm611_vm8 = vcmp.eq.f32.partialorder %v1430_v49, %v1754_v27  ;;  %vm612_vm9 = vcmp.eq.f32.partialorder %v1433_v50, %v1756_v28  ;;  %2564 = vst [vmem:[#allocation4_spill] sm:$0xff] %v1834_v43  ;;  %v2567_v43 = vld [vmem:[#allocation3_spill] sm:$0xff] }
  0x50   : > { %v491_v23 = vmax.f32 %v489_v35, %v490_v33  ;;  %v512_v16 = vmax.f32 %v510_v26, %v511_v58  ;;  %vm623_vm14 = vcmp.eq.f32.partialorder %v2560_v34, %v1754_v27  ;;  %vm624_vm15 = vcmp.eq.f32.partialorder %v2561_v62, %v1756_v28  ;;  %v2562_v26 = vld [vmem:[#allocation9_spill] sm:$0xff]  ;;  %v2563_v33 = vld [vmem:[#allocation10_spill] sm:$0xff] }
  0x51   : > { %vm627_vm10 = vcmp.eq.f32.partialorder %v2562_v26, %v1754_v27  ;;  %vm628_vm11 = vcmp.eq.f32.partialorder %v2563_v33, %v1756_v28  ;;  %vm631_vm12 = vcmp.eq.f32.partialorder %v1509_v51, %v1754_v27  ;;  %vm632_vm13 = vcmp.eq.f32.partialorder %v1512_v20, %v1756_v28  ;;  %v2588_v51 = vld [vmem:[#allocation21_spill] sm:$0xff]  ;;  %v2589_v20 = vld [vmem:[#allocation22_spill] sm:$0xff]  ;;  %v2591_v26 = vld [vmem:[#allocation11_spill] sm:$0xff] }
  0x52   : > { %v492_v35 = vrot.slane %v491_v23, 2  ;;  %v513_v58 = vrot.slane %v512_v16, 2  ;;  %v1840_v4 = vsel %vm596_vm1, %v1263_v1, 1073741824  ;;  %v1846_v39 = vsel %vm599_vm2, %v2566_v12, 1073741824  ;;  %v2592_v33 = vld [vmem:[#allocation12_spill] sm:$0xff] }
  0x53   : > { %2565 = vst [vmem:[#allocation5_spill] sm:$0xff] %v1840_v4  ;;  %v1852_v11 = vsel %vm600_vm3, %v2566_v12, 1073741824  ;;  %v1858_v21 = vsel %vm603_vm4, %v2567_v43, 1073741824  ;;  %v1870_v2 = vsel %vm607_vm6, %v1725_v54, 1073741824  ;;  %v1876_v32 = vsel %vm608_vm7, %v1725_v54, 1073741824 }
  0x54   : > { %v493_v53 = vmax.f32 %v491_v23, %v492_v35  ;;  %v514_v13 = vmax.f32 %v512_v16, %v513_v58  ;;  %2568 = vst [vmem:[#allocation6_spill] sm:$0xff] %v1858_v21  ;;  %v1864_v16 = vsel %vm604_vm5, %v2567_v43, 1073741824  ;;  %2570 = vst [vmem:[#allocation8_spill] sm:$0xff] %v1870_v2  ;;  %v1882_v6 = vsel %vm611_vm8, %v1742_v57, 1073741824 }
  0x55   : > { %2569 = vst [vmem:[#allocation7_spill] sm:$0xff] %v1864_v16  ;;  %2571 = vst [vmem:[#allocation9_spill] sm:$0xff] %v1876_v32  ;;  %v1888_v15 = vsel %vm612_vm9, %v1742_v57, 1073741824  ;;  %vm2574_vm0 = vcmp.eq.f32.partialorder %v1438_v55, %v1754_v27  ;;  %vm2576_vm1 = vcmp.eq.f32.partialorder %v2557_v63, %v1756_v28  ;;  %vm2578_vm2 = vcmp.eq.f32.partialorder %v2558_v7, %v1754_v27  ;;  %v2607_v32 = vld [vmem:[#allocation20_spill] sm:$0xff] }
  0x56   : > { %v494_v61 = vrot.slane %v493_v53, 1  ;;  %v515_v23 = vrot.slane %v514_v13, 1  ;;  %2572 = vst [vmem:[#allocation10_spill] sm:$0xff] %v1882_v6  ;;  %2573 = vst [vmem:[#allocation2_spill] sm:$0xff] %v1888_v15  ;;  %v1894_v24 = vsel %vm2574_vm0, %v1745_v36, 1073741824  ;;  %v1900_v35 = vsel %vm2576_vm1, %v1745_v36, 1073741824 }
  0x57   : > { %2575 = vst [vmem:[#allocation3_spill] sm:$0xff] %v1894_v24  ;;  %2577 = vst [vmem:[#allocation38_spill] sm:$0xff] %v1900_v35  ;;  %v1906_v49 = vsel %vm2578_vm2, %v1750_v48, 1073741824  ;;  %vm2580_vm3 = vcmp.eq.f32.partialorder %v2559_v31, %v1756_v28  ;;  %v1922_v63 = vsel %vm623_vm14, %v1759_v29, 1073741824  ;;  %v1928_v7 = vsel %vm624_vm15, %v1759_v29, 1073741824  ;;  %v2590_v31 = vld [vmem:[#allocation23_spill] sm:$0xff] }
  0x58   : > { %2579 = vst [vmem:[#allocation39_spill] sm:$0xff] %v1906_v49  ;;  %v1912_v50 = vsel %vm2580_vm3, %v1750_v48, 1073741824  ;;  %v1914_v55 = vmax.f32 %v493_v53, %v494_v61  ;;  %v1916_v58 = vmax.f32 %v514_v13, %v515_v23  ;;  %2582 = vst [vmem:[#allocation41_spill] sm:$0xff] %v1922_v63  ;;  %v1934_v53 = vsel %vm627_vm10, %v1762_v3, 1073741824  ;;  %v2593_v61 = vld [vmem:[#allocation24_spill] sm:$0xff]  ;;  %v2594_v23 = vld [vmem:[#allocation25_spill] sm:$0xff] }
  0x59   : > { %2581 = vst [vmem:[#allocation40_spill] sm:$0xff] %v1912_v50  ;;  %2583 = vst [vmem:[#allocation42_spill] sm:$0xff] %v1928_v7  ;;  %v1940_v13 = vsel %vm628_vm11, %v1762_v3, 1073741824  ;;  %v1946_v34 = vsel %vm631_vm12, %v1767_v45, 1073741824  ;;  %v1952_v62 = vsel %vm632_vm13, %v1767_v45, 1073741824  ;;  %v2599_v7 = vld [vmem:[#allocation26_spill] sm:$0xff]  ;;  %vm656_vm3 = vcmp.eq.f32.partialorder %v2607_v32, %v1756_v28 }
  0x5a   : > { %2584 = vst [vmem:[#allocation43_spill] sm:$0xff] %v1934_v53  ;;  %2585 = vst [vmem:[#allocation44_spill] sm:$0xff] %v1940_v13  ;;  %vm593_vm4 = vcmp.eq.f32.partialorder %v1364_v60, %v1914_v55  ;;  %vm594_vm5 = vcmp.eq.f32.partialorder %v1375_v5, %v1916_v58  ;;  %vm597_vm6 = vcmp.eq.f32.partialorder %v1420_v37, %v1914_v55  ;;  %v2597_v13 = vld [vmem:[#allocation15_spill] sm:$0xff]  ;;  %v2598_v53 = vld [vmem:[#allocation16_spill] sm:$0xff] }
  0x5b   : > { %2586 = vst [vmem:[#allocation45_spill] sm:$0xff] %v1946_v34  ;;  %2587 = vst [vmem:[#allocation46_spill] sm:$0xff] %v1952_v62  ;;  %vm598_vm7 = vcmp.eq.f32.partialorder %v1461_v19, %v1916_v58  ;;  %vm601_vm8 = vcmp.eq.f32.partialorder %v1536_v44, %v1914_v55  ;;  %vm602_vm9 = vcmp.eq.f32.partialorder %v1540_v0, %v1916_v58  ;;  %v2595_v62 = vld [vmem:[#allocation13_spill] sm:$0xff]  ;;  %v2596_v34 = vld [vmem:[#allocation14_spill] sm:$0xff]  ;;  %v657_v2 = vsel %vm593_vm4, %v1263_v1, 1073741824 }
  0x5c   : > { %vm605_vm10 = vcmp.eq.f32.partialorder %v1556_v52, %v1914_v55  ;;  %vm606_vm11 = vcmp.eq.f32.partialorder %v1560_v22, %v1916_v58  ;;  %vm609_vm12 = vcmp.eq.f32.partialorder %v1586_v14, %v1914_v55  ;;  %v2600_v63 = vld [vmem:[#allocation17_spill] sm:$0xff]  ;;  %v2601_v50 = vld [vmem:[#allocation18_spill] sm:$0xff]  ;;  %v2602_v49 = vld [vmem:[#allocation27_spill] sm:$0xff]  ;;  %v658_v16 = vsel %vm594_vm5, %v1263_v1, 1073741824 }
  0x5d   : > { %vm652_vm13 = vcmp.eq.f32.partialorder %v2601_v50, %v1756_v28  ;;  %vm649_vm14 = vcmp.eq.f32.partialorder %v2602_v49, %v1914_v55  ;;  %v2603_v35 = vld [vmem:[#allocation28_spill] sm:$0xff]  ;;  %v2604_v24 = vld [vmem:[#allocation29_spill] sm:$0xff]  ;;  %v2605_v15 = vld [vmem:[#allocation30_spill] sm:$0xff]  ;;  %v661_v21 = vsel %vm597_vm6, %v2566_v12, 1073741824  ;;  %v662_v4 = vsel %vm598_vm7, %v2566_v12, 1073741824 }
  0x5e   : > { %vm650_vm15 = vcmp.eq.f32.partialorder %v2603_v35, %v1916_v58  ;;  %vm653_vm0 = vcmp.eq.f32.partialorder %v2604_v24, %v1914_v55  ;;  %vm654_vm1 = vcmp.eq.f32.partialorder %v2605_v15, %v1916_v58  ;;  %v2606_v6 = vld [vmem:[#allocation19_spill] sm:$0xff]  ;;  %v665_v60 = vsel %vm601_vm8, %v2567_v43, 1073741824  ;;  %v2641_v49 = vld [vmem:[#allocation37_spill] sm:$0xff]  ;;  %v2642_v24 = vld [vmem:[#allocation4_spill] sm:$0xff] }
  0x5f   : > { %vm655_vm2 = vcmp.eq.f32.partialorder %v2606_v6, %v1754_v27  ;;  %v666_v5 = vsel %vm602_vm9, %v2567_v43, 1073741824  ;;  %v669_v37 = vsel %vm605_vm10, %v1725_v54, 1073741824  ;;  %v670_v19 = vsel %vm606_vm11, %v1725_v54, 1073741824  ;;  %v2643_v15 = vld [vmem:[#allocation5_spill] sm:$0xff]  ;;  %v2644_v32 = vld [vmem:[#allocation6_spill] sm:$0xff] }
  0x60   : > { %v2078_v44 = vsel %vm609_vm12, %v1742_v57, 1073741824  ;;  %vm2608_vm4 = vcmp.eq.f32.partialorder %v1590_v18, %v1916_v58  ;;  %vm2609_vm5 = vcmp.eq.f32.partialorder %v1604_v46, %v1914_v55  ;;  %vm2610_vm6 = vcmp.eq.f32.partialorder %v1608_v59, %v1916_v58 }
  0x61   : > { %v2084_v0 = vsel %vm2608_vm4, %v1742_v57, 1073741824  ;;  %v2090_v52 = vsel %vm2609_vm5, %v1745_v36, 1073741824  ;;  %v2096_v22 = vsel %vm2610_vm6, %v1745_v36, 1073741824  ;;  %vm2611_vm7 = vcmp.eq.f32.partialorder %v1624_v10, %v1914_v55 }
  0x62   : > { %v2102_v14 = vsel %vm2611_vm7, %v1750_v48, 1073741824  ;;  %vm2612_vm8 = vcmp.eq.f32.partialorder %v2588_v51, %v1916_v58  ;;  %vm2613_vm9 = vcmp.eq.f32.partialorder %v2589_v20, %v1914_v55  ;;  %vm2614_vm10 = vcmp.eq.f32.partialorder %v2590_v31, %v1916_v58 }
  0x63   : > { %v2108_v18 = vsel %vm2612_vm8, %v1750_v48, 1073741824  ;;  %v2114_v46 = vsel %vm2613_vm9, %v1759_v29, 1073741824  ;;  %v2120_v59 = vsel %vm2614_vm10, %v1759_v29, 1073741824  ;;  %vm2615_vm11 = vcmp.eq.f32.partialorder %v1658_v8, %v1914_v55  ;;  %v2619_v8 = vld [vmem:[#allocation32_spill] sm:$0xff] }
  0x64   : > { %v2126_v10 = vsel %vm2615_vm11, %v1762_v3, 1073741824  ;;  %vm2616_vm12 = vcmp.eq.f32.partialorder %v2593_v61, %v1916_v58  ;;  %vm2617_vm4 = vcmp.eq.f32.partialorder %v1672_v40, %v1914_v55  ;;  %vm2618_vm5 = vcmp.eq.f32.partialorder %v2594_v23, %v1916_v58 }
  0x65   : > { %v2132_v54 = vsel %vm2616_vm12, %v1762_v3, 1073741824  ;;  %v2138_v12 = vsel %vm2617_vm4, %v1767_v45, 1073741824  ;;  %v2144_v57 = vsel %vm2618_vm5, %v1767_v45, 1073741824  ;;  %vm2620_vm6 = vcmp.eq.f32.partialorder %v1685_v25, %v1914_v55  ;;  %v2624_v25 = vld [vmem:[#allocation33_spill] sm:$0xff] }
  0x66   : > { %v2150_v36 = vsel %vm2620_vm6, %v2619_v8, 1073741824  ;;  %vm2621_vm7 = vcmp.eq.f32.partialorder %v1688_v47, %v1916_v58  ;;  %vm2622_vm8 = vcmp.eq.f32.partialorder %v1527_v17, %v1754_v27  ;;  %vm2623_vm9 = vcmp.eq.f32.partialorder %v1530_v56, %v1756_v28 }
  0x67   : > { %v2156_v48 = vsel %vm2621_vm7, %v2619_v8, 1073741824  ;;  %v2162_v40 = vsel %vm2622_vm8, %v2619_v8, 1073741824  ;;  %v2168_v29 = vsel %vm2623_vm9, %v2619_v8, 1073741824  ;;  %vm2625_vm10 = vcmp.eq.f32.partialorder %v1697_v41, %v1914_v55  ;;  %v2629_v41 = vld [vmem:[#allocation34_spill] sm:$0xff]  ;;  %v2645_v8 = vld [vmem:[#allocation7_spill] sm:$0xff] }
  0x68   : > { %v2174_v3 = vsel %vm2625_vm10, %v2624_v25, 1073741824  ;;  %vm2626_vm11 = vcmp.eq.f32.partialorder %v1700_v42, %v1916_v58  ;;  %vm2627_vm12 = vcmp.eq.f32.partialorder %v2591_v26, %v1754_v27  ;;  %vm2628_vm4 = vcmp.eq.f32.partialorder %v2592_v33, %v1756_v28 }
  0x69   : > { %v2180_v47 = vsel %vm2626_vm11, %v2624_v25, 1073741824  ;;  %v2186_v17 = vsel %vm2627_vm12, %v2624_v25, 1073741824  ;;  %v2192_v56 = vsel %vm2628_vm4, %v2624_v25, 1073741824  ;;  %vm2630_vm5 = vcmp.eq.f32.partialorder %v1707_v9, %v1914_v55  ;;  %v2634_v9 = vld [vmem:[#allocation35_spill] sm:$0xff] }
  0x6a   : > { %v2198_v45 = vsel %vm2630_vm5, %v2629_v41, 1073741824  ;;  %vm2631_vm6 = vcmp.eq.f32.partialorder %v1710_v30, %v1916_v58  ;;  %vm2632_vm7 = vcmp.eq.f32.partialorder %v2595_v62, %v1754_v27  ;;  %vm2633_vm8 = vcmp.eq.f32.partialorder %v2596_v34, %v1756_v28 }
  0x6b   : > { %v2204_v42 = vsel %vm2631_vm6, %v2629_v41, 1073741824  ;;  %v2210_v43 = vsel %vm2632_vm7, %v2629_v41, 1073741824  ;;  %v2216_v51 = vsel %vm2633_vm8, %v2629_v41, 1073741824  ;;  %vm2635_vm9 = vcmp.eq.f32.partialorder %v1717_v38, %v1914_v55  ;;  %v2639_v38 = vld [vmem:[#allocation36_spill] sm:$0xff] }
  0x6c   : > { %v2222_v20 = vsel %vm2635_vm9, %v2634_v9, 1073741824  ;;  %vm2636_vm10 = vcmp.eq.f32.partialorder %v2599_v7, %v1916_v58  ;;  %vm2637_vm11 = vcmp.eq.f32.partialorder %v2597_v13, %v1754_v27  ;;  %vm2638_vm12 = vcmp.eq.f32.partialorder %v2598_v53, %v1756_v28 }
  0x6d   : > { %v2228_v30 = vsel %vm2636_vm10, %v2634_v9, 1073741824  ;;  %v2234_v62 = vsel %vm2637_vm11, %v2634_v9, 1073741824  ;;  %v2240_v34 = vsel %vm2638_vm12, %v2634_v9, 1073741824  ;;  %v2246_v31 = vsel %vm649_vm14, %v2639_v38, 1073741824 }
  0x6e   : > { %v2252_v7 = vsel %vm650_vm15, %v2639_v38, 1073741824  ;;  %vm2640_vm4 = vcmp.eq.f32.partialorder %v2600_v63, %v1754_v27  ;;  %v2264_v53 = vsel %vm652_vm13, %v2639_v38, 1073741824  ;;  %v2270_v26 = vsel %vm653_vm0, %v2641_v49, 1073741824 }
  0x6f   : > { %v2258_v13 = vsel %vm2640_vm4, %v2639_v38, 1073741824  ;;  %v2276_v35 = vsel %vm654_vm1, %v2641_v49, 1073741824  ;;  %v2282_v63 = vsel %vm655_vm2, %v2641_v49, 1073741824  ;;  %v2288_v50 = vsel %vm656_vm3, %v2641_v49, 1073741824 }
  0x70   : > { %vm721_vm13 = vcmp.lt.s32.totalorder %v657_v2, %v661_v21  ;;  %vm760_vm14 = vcmp.lt.s32.totalorder %v658_v16, %v662_v4  ;;  %vm799_vm15 = vcmp.lt.s32.totalorder %v2642_v24, %v1846_v39  ;;  %vm838_vm0 = vcmp.lt.s32.totalorder %v2643_v15, %v1852_v11 }
  0x71   : > { %v722_v33 = vsel %vm721_vm13, %v657_v2, %v661_v21  ;;  %v761_v61 = vsel %vm760_vm14, %v658_v16, %v662_v4  ;;  %v800_v6 = vsel %vm799_vm15, %v2642_v24, %v1846_v39  ;;  %v839_v23 = vsel %vm838_vm0, %v2643_v15, %v1852_v11  ;;  %v2646_v4 = vld [vmem:[#allocation8_spill] sm:$0xff]  ;;  %v2647_v39 = vld [vmem:[#allocation9_spill] sm:$0xff] }
  0x72   : > { %vm723_vm1 = vcmp.lt.s32.totalorder %v722_v33, %v665_v60  ;;  %vm762_vm2 = vcmp.lt.s32.totalorder %v761_v61, %v666_v5  ;;  %vm801_vm3 = vcmp.lt.s32.totalorder %v800_v6, %v2644_v32  ;;  %vm840_vm5 = vcmp.lt.s32.totalorder %v839_v23, %v2645_v8 }
  0x73   : > { %v724_v25 = vsel %vm723_vm1, %v722_v33, %v665_v60  ;;  %v763_v41 = vsel %vm762_vm2, %v761_v61, %v666_v5  ;;  %v802_v9 = vsel %vm801_vm3, %v800_v6, %v2644_v32  ;;  %v841_v38 = vsel %vm840_vm5, %v839_v23, %v2645_v8  ;;  %v2648_v60 = vld [vmem:[#allocation10_spill] sm:$0xff]  ;;  %v2652_v23 = vld [vmem:[#allocation39_spill] sm:$0xff]  ;;  %v2653_v32 = vld [vmem:[#allocation40_spill] sm:$0xff] }
  0x74   : > { %vm725_vm6 = vcmp.lt.s32.totalorder %v724_v25, %v669_v37  ;;  %vm764_vm7 = vcmp.lt.s32.totalorder %v763_v41, %v670_v19  ;;  %vm803_vm8 = vcmp.lt.s32.totalorder %v802_v9, %v2646_v4  ;;  %vm842_vm9 = vcmp.lt.s32.totalorder %v841_v38, %v2647_v39  ;;  %v2649_v5 = vld [vmem:[#allocation2_spill] sm:$0xff] }
  0x75   : > { %v726_v21 = vsel %vm725_vm6, %v724_v25, %v669_v37  ;;  %v765_v11 = vsel %vm764_vm7, %v763_v41, %v670_v19  ;;  %v804_v16 = vsel %vm803_vm8, %v802_v9, %v2646_v4  ;;  %v843_v2 = vsel %vm842_vm9, %v841_v38, %v2647_v39  ;;  %v2650_v19 = vld [vmem:[#allocation3_spill] sm:$0xff]  ;;  %v2651_v33 = vld [vmem:[#allocation38_spill] sm:$0xff]  ;;  %v2654_v41 = vld [vmem:[#allocation41_spill] sm:$0xff] }
  0x76   : > { %vm727_vm10 = vcmp.lt.s32.totalorder %v726_v21, %v2078_v44  ;;  %vm766_vm11 = vcmp.lt.s32.totalorder %v765_v11, %v2084_v0  ;;  %vm805_vm12 = vcmp.lt.s32.totalorder %v804_v16, %v2648_v60  ;;  %vm844_vm4 = vcmp.lt.s32.totalorder %v843_v2, %v2649_v5  ;;  %v2655_v9 = vld [vmem:[#allocation42_spill] sm:$0xff]  ;;  %v2656_v39 = vld [vmem:[#allocation43_spill] sm:$0xff] }
  0x77   : > { %v728_v49 = vsel %vm727_vm10, %v726_v21, %v2078_v44  ;;  %v767_v24 = vsel %vm766_vm11, %v765_v11, %v2084_v0  ;;  %v806_v15 = vsel %vm805_vm12, %v804_v16, %v2648_v60  ;;  %v845_v37 = vsel %vm844_vm4, %v843_v2, %v2649_v5  ;;  %v2657_v21 = vld [vmem:[#allocation44_spill] sm:$0xff]  ;;  %v2658_v2 = vld [vmem:[#allocation45_spill] sm:$0xff]  ;;  %v2659_v60 = vld [vmem:[#allocation46_spill] sm:$0xff] }
  0x78   : > { %vm729_vm13 = vcmp.lt.s32.totalorder %v728_v49, %v2090_v52  ;;  %vm768_vm14 = vcmp.lt.s32.totalorder %v767_v24, %v2096_v22  ;;  %vm807_vm15 = vcmp.lt.s32.totalorder %v806_v15, %v2650_v19  ;;  %vm846_vm0 = vcmp.lt.s32.totalorder %v845_v37, %v2651_v33 }
  0x79   : > { %v730_v61 = vsel %vm729_vm13, %v728_v49, %v2090_v52  ;;  %v769_v6 = vsel %vm768_vm14, %v767_v24, %v2096_v22  ;;  %v808_v44 = vsel %vm807_vm15, %v806_v15, %v2650_v19  ;;  %v847_v0 = vsel %vm846_vm0, %v845_v37, %v2651_v33 }
  0x7a   : > { %vm731_vm1 = vcmp.lt.s32.totalorder %v730_v61, %v2102_v14  ;;  %vm770_vm2 = vcmp.lt.s32.totalorder %v769_v6, %v2108_v18  ;;  %vm809_vm3 = vcmp.lt.s32.totalorder %v808_v44, %v2652_v23  ;;  %vm848_vm5 = vcmp.lt.s32.totalorder %v847_v0, %v2653_v32 }
  0x7b   : > { %v732_v8 = vsel %vm731_vm1, %v730_v61, %v2102_v14  ;;  %v771_v25 = vsel %vm770_vm2, %v769_v6, %v2108_v18  ;;  %v810_v52 = vsel %vm809_vm3, %v808_v44, %v2652_v23  ;;  %v849_v22 = vsel %vm848_vm5, %v847_v0, %v2653_v32  ;;  %v2660_v0 = vld [vmem:[#allocation31_spill] sm:$0xff] }
  0x7c   : > { %vm733_vm6 = vcmp.lt.s32.totalorder %v732_v8, %v2114_v46  ;;  %vm772_vm7 = vcmp.lt.s32.totalorder %v771_v25, %v2120_v59  ;;  %vm811_vm8 = vcmp.lt.s32.totalorder %v810_v52, %v2654_v41  ;;  %vm850_vm9 = vcmp.lt.s32.totalorder %v849_v22, %v2655_v9 }
  0x7d   : > { %v734_v38 = vsel %vm733_vm6, %v732_v8, %v2114_v46  ;;  %v773_v4 = vsel %vm772_vm7, %v771_v25, %v2120_v59  ;;  %v812_v14 = vsel %vm811_vm8, %v810_v52, %v2654_v41  ;;  %v851_v18 = vsel %vm850_vm9, %v849_v22, %v2655_v9 }
  0x7e   : > { %vm735_vm10 = vcmp.lt.s32.totalorder %v734_v38, %v2126_v10  ;;  %vm774_vm11 = vcmp.lt.s32.totalorder %v773_v4, %v2132_v54  ;;  %vm813_vm12 = vcmp.lt.s32.totalorder %v812_v14, %v2656_v39  ;;  %vm852_vm4 = vcmp.lt.s32.totalorder %v851_v18, %v2657_v21 }
  0x7f   : > { %v736_v11 = vsel %vm735_vm10, %v734_v38, %v2126_v10  ;;  %v775_v16 = vsel %vm774_vm11, %v773_v4, %v2132_v54  ;;  %v814_v46 = vsel %vm813_vm12, %v812_v14, %v2656_v39  ;;  %v853_v59 = vsel %vm852_vm4, %v851_v18, %v2657_v21 }
  0x80   : > { %vm737_vm13 = vcmp.lt.s32.totalorder %v736_v11, %v2138_v12  ;;  %vm776_vm14 = vcmp.lt.s32.totalorder %v775_v16, %v2144_v57  ;;  %vm815_vm15 = vcmp.lt.s32.totalorder %v814_v46, %v2658_v2  ;;  %vm854_vm0 = vcmp.lt.s32.totalorder %v853_v59, %v2659_v60 }
  0x81   : > { %v738_v5 = vsel %vm737_vm13, %v736_v11, %v2138_v12  ;;  %v777_v49 = vsel %vm776_vm14, %v775_v16, %v2144_v57  ;;  %v816_v10 = vsel %vm815_vm15, %v814_v46, %v2658_v2  ;;  %v855_v54 = vsel %vm854_vm0, %v853_v59, %v2659_v60 }
  0x82   : > { %vm739_vm1 = vcmp.lt.s32.totalorder %v738_v5, %v2150_v36  ;;  %vm778_vm2 = vcmp.lt.s32.totalorder %v777_v49, %v2156_v48  ;;  %vm817_vm3 = vcmp.lt.s32.totalorder %v816_v10, %v2162_v40  ;;  %vm856_vm5 = vcmp.lt.s32.totalorder %v855_v54, %v2168_v29 }
  0x83   : > { %v740_v24 = vsel %vm739_vm1, %v738_v5, %v2150_v36  ;;  %v779_v15 = vsel %vm778_vm2, %v777_v49, %v2156_v48  ;;  %v818_v12 = vsel %vm817_vm3, %v816_v10, %v2162_v40  ;;  %v857_v57 = vsel %vm856_vm5, %v855_v54, %v2168_v29 }
  0x84   : > { %vm741_vm6 = vcmp.lt.s32.totalorder %v740_v24, %v2174_v3  ;;  %vm780_vm7 = vcmp.lt.s32.totalorder %v779_v15, %v2180_v47  ;;  %vm819_vm8 = vcmp.lt.s32.totalorder %v818_v12, %v2186_v17  ;;  %vm858_vm9 = vcmp.lt.s32.totalorder %v857_v57, %v2192_v56 }
  0x85   : > { %v742_v37 = vsel %vm741_vm6, %v740_v24, %v2174_v3  ;;  %v781_v19 = vsel %vm780_vm7, %v779_v15, %v2180_v47  ;;  %v820_v36 = vsel %vm819_vm8, %v818_v12, %v2186_v17  ;;  %v859_v48 = vsel %vm858_vm9, %v857_v57, %v2192_v56 }
  0x86   : > { %vm743_vm10 = vcmp.lt.s32.totalorder %v742_v37, %v2198_v45  ;;  %vm782_vm11 = vcmp.lt.s32.totalorder %v781_v19, %v2204_v42  ;;  %vm821_vm12 = vcmp.lt.s32.totalorder %v820_v36, %v2210_v43  ;;  %vm860_vm4 = vcmp.lt.s32.totalorder %v859_v48, %v2216_v51 }
  0x87   : > { %v744_v40 = vsel %vm743_vm10, %v742_v37, %v2198_v45  ;;  %v783_v29 = vsel %vm782_vm11, %v781_v19, %v2204_v42  ;;  %v822_v3 = vsel %vm821_vm12, %v820_v36, %v2210_v43  ;;  %v861_v47 = vsel %vm860_vm4, %v859_v48, %v2216_v51 }
  0x88   : > { %vm745_vm13 = vcmp.lt.s32.totalorder %v744_v40, %v2222_v20  ;;  %vm784_vm14 = vcmp.lt.s32.totalorder %v783_v29, %v2228_v30  ;;  %vm823_vm15 = vcmp.lt.s32.totalorder %v822_v3, %v2234_v62  ;;  %vm862_vm0 = vcmp.lt.s32.totalorder %v861_v47, %v2240_v34 }
  0x89   : > { %v746_v17 = vsel %vm745_vm13, %v744_v40, %v2222_v20  ;;  %v785_v56 = vsel %vm784_vm14, %v783_v29, %v2228_v30  ;;  %v824_v45 = vsel %vm823_vm15, %v822_v3, %v2234_v62  ;;  %v863_v42 = vsel %vm862_vm0, %v861_v47, %v2240_v34 }
  0x8a   : > { %vm747_vm1 = vcmp.lt.s32.totalorder %v746_v17, %v2246_v31  ;;  %vm786_vm2 = vcmp.lt.s32.totalorder %v785_v56, %v2252_v7  ;;  %vm825_vm3 = vcmp.lt.s32.totalorder %v824_v45, %v2258_v13  ;;  %vm864_vm5 = vcmp.lt.s32.totalorder %v863_v42, %v2264_v53 }
  0x8b   : > { %v748_v43 = vsel %vm747_vm1, %v746_v17, %v2246_v31  ;;  %v787_v51 = vsel %vm786_vm2, %v785_v56, %v2252_v7  ;;  %v826_v20 = vsel %vm825_vm3, %v824_v45, %v2258_v13  ;;  %v865_v30 = vsel %vm864_vm5, %v863_v42, %v2264_v53 }
  0x8c   : > { %vm749_vm6 = vcmp.lt.s32.totalorder %v748_v43, %v2270_v26  ;;  %vm788_vm7 = vcmp.lt.s32.totalorder %v787_v51, %v2276_v35  ;;  %vm827_vm8 = vcmp.lt.s32.totalorder %v826_v20, %v2282_v63  ;;  %vm866_vm9 = vcmp.lt.s32.totalorder %v865_v30, %v2288_v50 }
  0x8d   : > { %v750_v62 = vsel %vm749_vm6, %v748_v43, %v2270_v26  ;;  %v789_v34 = vsel %vm788_vm7, %v787_v51, %v2276_v35  ;;  %v828_v31 = vsel %vm827_vm8, %v826_v20, %v2282_v63  ;;  %v867_v7 = vsel %vm866_vm9, %v865_v30, %v2288_v50 }
  0x8e   : > { %v751_v33 = vrot.slane %v750_v62, 4  ;;  %v790_v13 = vrot.slane %v789_v34, 4  ;;  %v829_v61 = vrot.slane %v828_v31, 4  ;;  %v868_v53 = vrot.slane %v867_v7, 4 }
  0x8f   : > { %v885_v6 = vcombine.low %v1914_v55, %v1916_v58  ;;  %v886_v44 = vcombine.low %v1754_v27, %v1756_v28  ;;  %v2661_v23 = vunpack.c.0.s8 %v2660_v0  ;;  %v2662_v39 = vlaneseq }
  0x90   : > { %vm752_vm10 = vcmp.lt.s32.totalorder %v750_v62, %v751_v33  ;;  %vm791_vm11 = vcmp.lt.s32.totalorder %v789_v34, %v790_v13  ;;  %vm830_vm12 = vcmp.lt.s32.totalorder %v828_v31, %v829_v61  ;;  %vm869_vm4 = vcmp.lt.s32.totalorder %v867_v7, %v868_v53 }
  0x91   : > { %v892_v26 = vsub.s32 %v2661_v23, %v1263_v1  ;;  %v753_v35 = vsel %vm752_vm10, %v750_v62, %v751_v33  ;;  %v792_v63 = vsel %vm791_vm11, %v789_v34, %v790_v13  ;;  %v831_v50 = vsel %vm830_vm12, %v828_v31, %v829_v61 }
  0x92   : > { %v870_v32 = vsel %vm869_vm4, %v867_v7, %v868_v53  ;;  %v754_v8 = vrot.slane %v753_v35, 2  ;;  %v793_v25 = vrot.slane %v792_v63, 2  ;;  %v832_v52 = vrot.slane %v831_v50, 2 }
  0x93   : > { %v871_v55 = vrot.slane %v870_v32, 2  ;;  %v893_v58 = vrot.slane %v885_v6, %v892_v26  ;;  %v900_v22 = vrot.slane %v886_v44, %v892_v26  ;;  %vm2411_vm1 = vcmp.lt.s32.totalorder %v2662_v39, 512 }
  0x94   : > { %vm755_vm13 = vcmp.lt.s32.totalorder %v753_v35, %v754_v8  ;;  %vm794_vm14 = vcmp.lt.s32.totalorder %v792_v63, %v793_v25  ;;  %vm833_vm15 = vcmp.lt.s32.totalorder %v831_v50, %v832_v52 }
  0x95   : > { %vm872_vm0 = vcmp.lt.s32.totalorder %v870_v32, %v871_v55  ;;  %v756_v1 = vsel %vm755_vm13, %v753_v35, %v754_v8  ;;  %v795_v27 = vsel %vm794_vm14, %v792_v63, %v793_v25  ;;  %v834_v28 = vsel %vm833_vm15, %v831_v50, %v832_v52 }
  0x96   : > { %v873_v41 = vsel %vm872_vm0, %v870_v32, %v871_v55  ;;  %v757_v9 = vrot.slane %v756_v1, 1  ;;  %v796_v38 = vrot.slane %v795_v27, 1  ;;  %v835_v4 = vrot.slane %v834_v28, 1 }
  0x97   : > { %v874_v14 = vrot.slane %v873_v41, 1  ;;  %v901_v18 = vcombine.low %v893_v58, %v900_v22 }
  0x98   : > { %vm758_vm2 = vcmp.lt.s32.totalorder %v756_v1, %v757_v9  ;;  %vm797_vm3 = vcmp.lt.s32.totalorder %v795_v27, %v796_v38  ;;  %vm836_vm5 = vcmp.lt.s32.totalorder %v834_v28, %v835_v4 }
  0x99   : > { %vm875_vm6 = vcmp.lt.s32.totalorder %v873_v41, %v874_v14  ;;  %v759_v11 = vsel %vm758_vm2, %v756_v1, %v757_v9  ;;  %v798_v16 = vsel %vm797_vm3, %v795_v27, %v796_v38  ;;  %v837_v46 = vsel %vm836_vm5, %v834_v28, %v835_v4 }
  0x9a   : > { %v876_v59 = vsel %vm875_vm6, %v873_v41, %v874_v14  ;;  %v908_v2 = vrot.slane %v901_v18, %v892_v26  ;;  %v915_v60 = vcombine.low %v759_v11, %v798_v16 }
  0x9b   : > { %v916_v5 = vcombine.low %v837_v46, %v876_v59 }
  0x9c   : > { %914 = vst.msk [vmem:[%s233_s30] sm:$0xf] %vm2411_vm1, %v908_v2  ;;  %v923_v49 = vrot.slane %v915_v60, %v892_v26 }
  0x9d   : > { %v930_v10 = vrot.slane %v916_v5, %v892_v26 }
  0x9f   : > { %v931_v54 = vcombine.low %v923_v49, %v930_v10 }
  0xa1   : > { %v938_v24 = vrot.slane %v931_v54, %v892_v26 }
  0xa3   : > { %939 = vst.msk [vmem:[%s237_s7] sm:$0xf] %vm2411_vm1, %v938_v24 }
  0xa4 PF: > { %s15_s17 = sadd.s32 1, %s1214_s17   ;;  %s2665_s15 = smov %s1210_s16 }
  0xa5   : > { %p12_p5 = scmp.ge.s32.totalorder %s15_s17, 4   ;;  %s2666_s16 = smov %s2668_s18 }
  0xa7   :  { %14 = sbr.rel (!%p12_p5) target bundleno = 2 (0x2), region = 82 }

// kernel: pointnet_backbone_forward.28
= control target key start
LH: loop header
LB: loop body
LE: loop exit
PB: predicated region body
PF: predicated region fallthrough
CT: control target
= control target key end

     0   :  { %v1504_v1 = vmov 0   ;;  %s2526_s1 = inlined_call_operand.vmem [shape: bf16[128,512], index: 1, kind: input, shape index: {}]   ;;  %s2527_s0 = inlined_call_operand.vmem [shape: f32[256,128], index: 0, kind: input, shape index: {}]   ;;  %s2528_s2 = inlined_call_operand.vmem [shape: f32[1,512], index: 2, kind: input, shape index: {}]   ;;  %s2529_s3 = inlined_call_operand.vmem [shape: f32[256,512], index: 3, kind: output, shape index: {0}]   ;;  %s2530_s4 = inlined_call_operand.vmem [shape: f32[1,1,512], index: 4, kind: output, shape index: {1}]   ;;  %s2531_s5 = inlined_call_operand.vmem [shape: f32[1,1,512], index: 5, kind: output, shape index: {2}]  }
   0x1   :  { %v1456_v0 = vld [vmem:[%s2526_s1 + $0x4] ss:$16 sps:$4 sm:$0xff]   ;;  %312 = vmatprep.mubr.bf16.mxu0 %v1504_v1  ;;  %505 = vmatprep.mubr.bf16.mxu1 %v1504_v1  ;;  %v1458_v2 = vld [vmem:[%s2526_s1 + $0xc] ss:$16 sps:$4 sm:$0xff]   ;;  %v1460_v3 = vld [vmem:[%s2526_s1] ss:$16 sps:$4 sm:$0xff]  }
   0x2   :  { %280 = vmatprep.subr.bf16.mxu0 %v1456_v0  ;;  %v1461_v4 = vld [vmem:[%s2526_s1 + $0x8] ss:$16 sps:$4 sm:$0xff]   ;;  %473 = vmatprep.subr.bf16.mxu1 %v1458_v2  ;;  %v1462_v5 = vld [vmem:[%s2526_s1 + $0x24] ss:$16 sps:$4 sm:$0xff]   ;;  %v1464_v6 = vld [vmem:[%s2526_s1 + $0x2c] ss:$16 sps:$4 sm:$0xff]  }
   0x3   :  { %281 = vmatpush1.bf16.msra.mxu0 %v1460_v3  ;;  %474 = vmatpush1.bf16.msra.mxu1 %v1461_v4  ;;  %v1466_v7 = vld [vmem:[%s2526_s1 + $0x20] ss:$16 sps:$4 sm:$0xff]   ;;  %v1467_v8 = vld [vmem:[%s2526_s1 + $0x28] ss:$16 sps:$4 sm:$0xff]   ;;  %v1468_v9 = vld [vmem:[%s2526_s1 + $0x44] ss:$16 sps:$4 sm:$0xff]  }
   0x4   :  { %282 = vmatprep.subr.bf16.mxu0 %v1462_v5  ;;  %475 = vmatprep.subr.bf16.mxu1 %v1464_v6  ;;  %v1470_v10 = vld [vmem:[%s2526_s1 + $0x4c] ss:$16 sps:$4 sm:$0xff]   ;;  %v1472_v11 = vld [vmem:[%s2526_s1 + $0x40] ss:$16 sps:$4 sm:$0xff]   ;;  %v1473_v12 = vld [vmem:[%s2526_s1 + $0x48] ss:$16 sps:$4 sm:$0xff]  }
   0x5   :  { %v1474_v13 = vld [vmem:[%s2526_s1 + $0x64] ss:$16 sps:$4 sm:$0xff]   ;;  %v1476_v14 = vld [vmem:[%s2526_s1 + $0x6c] ss:$16 sps:$4 sm:$0xff]   ;;  %v1478_v15 = vld [vmem:[%s2526_s1 + $0x60] ss:$16 sps:$4 sm:$0xff]  }
   0x6   :  { %v1479_v16 = vld [vmem:[%s2526_s1 + $0x68] ss:$16 sps:$4 sm:$0xff]   ;;  %v1480_v17 = vld [vmem:[%s2526_s1 + $0x84] ss:$16 sps:$4 sm:$0xff]   ;;  %v1482_v18 = vld [vmem:[%s2526_s1 + $0x8c] ss:$16 sps:$4 sm:$0xff]  }
   0x7   :  { %283 = vmatpush1.bf16.msra.mxu0 %v1466_v7  ;;  %476 = vmatpush1.bf16.msra.mxu1 %v1467_v8  ;;  %v1484_v19 = vld [vmem:[%s2526_s1 + $0x80] ss:$16 sps:$4 sm:$0xff]   ;;  %v1485_v20 = vld [vmem:[%s2526_s1 + $0x88] ss:$16 sps:$4 sm:$0xff]   ;;  %v1486_v21 = vld [vmem:[%s2526_s1 + $0xa4] ss:$16 sps:$4 sm:$0xff]  }
   0x8   :  { %284 = vmatprep.subr.bf16.mxu0 %v1468_v9  ;;  %477 = vmatprep.subr.bf16.mxu1 %v1470_v10  ;;  %v1488_v22 = vld [vmem:[%s2526_s1 + $0xac] ss:$16 sps:$4 sm:$0xff]   ;;  %v1490_v23 = vld [vmem:[%s2526_s1 + $0xa0] ss:$16 sps:$4 sm:$0xff]   ;;  %v1491_v24 = vld [vmem:[%s2526_s1 + $0xa8] ss:$16 sps:$4 sm:$0xff]  }
   0x9   :  { %v1492_v25 = vld [vmem:[%s2526_s1 + $0xc4] ss:$16 sps:$4 sm:$0xff]   ;;  %v1494_v26 = vld [vmem:[%s2526_s1 + $0xcc] ss:$16 sps:$4 sm:$0xff]   ;;  %v1496_v27 = vld [vmem:[%s2526_s1 + $0xc0] ss:$16 sps:$4 sm:$0xff]  }
   0xa   :  { %v1497_v28 = vld [vmem:[%s2526_s1 + $0xc8] ss:$16 sps:$4 sm:$0xff]   ;;  %v1498_v29 = vld [vmem:[%s2526_s1 + $0xe4] ss:$16 sps:$4 sm:$0xff]   ;;  %v1500_v30 = vld [vmem:[%s2526_s1 + $0xec] ss:$16 sps:$4 sm:$0xff]  }
   0xb   :  { %285 = vmatpush1.bf16.msra.mxu0 %v1472_v11  ;;  %478 = vmatpush1.bf16.msra.mxu1 %v1473_v12  ;;  %v1502_v31 = vld [vmem:[%s2526_s1 + $0xe0] ss:$16 sps:$4 sm:$0xff]   ;;  %v1503_v32 = vld [vmem:[%s2526_s1 + $0xe8] ss:$16 sps:$4 sm:$0xff]  }
   0xc   :  { %286 = vmatprep.subr.bf16.mxu0 %v1474_v13  ;;  %479 = vmatprep.subr.bf16.mxu1 %v1476_v14  ;;  %v18_v33 = vld [vmem:[%s2527_s0] sm:$0xff]  ;;  %v19_v34 = vld [vmem:[%s2527_s0 + $0x8] sm:$0xff]  ;;  %v20_v36 = vld [vmem:[%s2527_s0 + $0x10] sm:$0xff] }
   0xd   :  { %v50_v35 = vpack.c.bf16 %v19_v34, %v18_v33  ;;  %v21_v37 = vld [vmem:[%s2527_s0 + $0x18] sm:$0xff]  ;;  %v22_v39 = vld [vmem:[%s2527_s0 + $0x20] sm:$0xff]  ;;  %v23_v40 = vld [vmem:[%s2527_s0 + $0x28] sm:$0xff] }
   0xe   :  { %v51_v38 = vpack.c.bf16 %v21_v37, %v20_v36  ;;  %v52_v41 = vpack.c.bf16 %v23_v40, %v22_v39  ;;  %v24_v42 = vld [vmem:[%s2527_s0 + $0x30] sm:$0xff]  ;;  %v25_v43 = vld [vmem:[%s2527_s0 + $0x38] sm:$0xff]  ;;  %v26_v45 = vld [vmem:[%s2527_s0 + $0x40] sm:$0xff] }
   0xf   :  { %287 = vmatpush1.bf16.msra.mxu0 %v1478_v15  ;;  %480 = vmatpush1.bf16.msra.mxu1 %v1479_v16  ;;  %v53_v44 = vpack.c.bf16 %v25_v43, %v24_v42  ;;  %v27_v46 = vld [vmem:[%s2527_s0 + $0x48] sm:$0xff]  ;;  %v28_v48 = vld [vmem:[%s2527_s0 + $0x50] sm:$0xff]  ;;  %v29_v49 = vld [vmem:[%s2527_s0 + $0x58] sm:$0xff] }
  0x10   :  { %288 = vmatprep.subr.bf16.mxu0 %v1480_v17  ;;  %481 = vmatprep.subr.bf16.mxu1 %v1482_v18  ;;  %v54_v47 = vpack.c.bf16 %v27_v46, %v26_v45  ;;  %v55_v50 = vpack.c.bf16 %v29_v49, %v28_v48  ;;  %v30_v51 = vld [vmem:[%s2527_s0 + $0x60] sm:$0xff]  ;;  %v31_v52 = vld [vmem:[%s2527_s0 + $0x68] sm:$0xff]  ;;  %v32_v54 = vld [vmem:[%s2527_s0 + $0x70] sm:$0xff]  ;;  %v100_v18 = vlaneseq }
  0x11   :  { %v56_v53 = vpack.c.bf16 %v31_v52, %v30_v51  ;;  %v33_v55 = vld [vmem:[%s2527_s0 + $0x78] sm:$0xff]  ;;  %v34_v57 = vld [vmem:[%s2527_s0 + $0x80] sm:$0xff]  ;;  %v35_v58 = vld [vmem:[%s2527_s0 + $0x88] sm:$0xff] }
  0x12   :  { %v57_v56 = vpack.c.bf16 %v33_v55, %v32_v54  ;;  %v58_v59 = vpack.c.bf16 %v35_v58, %v34_v57  ;;  %v36_v60 = vld [vmem:[%s2527_s0 + $0x90] sm:$0xff]  ;;  %v37_v61 = vld [vmem:[%s2527_s0 + $0x98] sm:$0xff]  ;;  %v38_v63 = vld [vmem:[%s2527_s0 + $0xa0] sm:$0xff]  ;;  %vm1101_vm0 = vcmp.lt.s32.totalorder %v100_v18, 512 }
  0x13   :  { %289 = vmatpush1.bf16.msra.mxu0 %v1484_v19  ;;  %482 = vmatpush1.bf16.msra.mxu1 %v1485_v20  ;;  %v59_v62 = vpack.c.bf16 %v37_v61, %v36_v60  ;;  %v39_v0 = vld [vmem:[%s2527_s0 + $0xa8] sm:$0xff]  ;;  %v40_v3 = vld [vmem:[%s2527_s0 + $0xb0] sm:$0xff]  ;;  %v41_v4 = vld [vmem:[%s2527_s0 + $0xb8] sm:$0xff]  ;;  %v1761_v19 = vshrl.u32 %v100_v18, 7 }
  0x14   :  { %290 = vmatprep.subr.bf16.mxu0 %v1486_v21  ;;  %483 = vmatprep.subr.bf16.mxu1 %v1488_v22  ;;  %v60_v2 = vpack.c.bf16 %v39_v0, %v38_v63  ;;  %v61_v5 = vpack.c.bf16 %v41_v4, %v40_v3  ;;  %v42_v6 = vld [vmem:[%s2527_s0 + $0xc0] sm:$0xff]  ;;  %v43_v7 = vld [vmem:[%s2527_s0 + $0xc8] sm:$0xff]  ;;  %v44_v9 = vld [vmem:[%s2527_s0 + $0xd0] sm:$0xff] }
  0x15   :  { %v62_v8 = vpack.c.bf16 %v43_v7, %v42_v6  ;;  %v45_v10 = vld [vmem:[%s2527_s0 + $0xd8] sm:$0xff]  ;;  %v46_v12 = vld [vmem:[%s2527_s0 + $0xe0] sm:$0xff]  ;;  %v47_v13 = vld [vmem:[%s2527_s0 + $0xe8] sm:$0xff]  ;;  %v102_v20 = vsub.s32 0, %v1761_v19  ;;  %v110_v21 = vsub.s32 2, %v1761_v19  ;;  %v106_v22 = vsub.s32 1, %v1761_v19 }
  0x16   :  { %v63_v11 = vpack.c.bf16 %v45_v10, %v44_v9  ;;  %v64_v14 = vpack.c.bf16 %v47_v13, %v46_v12  ;;  %v48_v15 = vld [vmem:[%s2527_s0 + $0xf0] sm:$0xff]  ;;  %v49_v16 = vld [vmem:[%s2527_s0 + $0xf8] sm:$0xff] }
  0x17   :  { %291 = vmatpush1.bf16.msra.mxu0 %v1490_v23  ;;  %484 = vmatpush1.bf16.msra.mxu1 %v1491_v24  ;;  %v65_v17 = vpack.c.bf16 %v49_v16, %v48_v15  ;;  %v114_v23 = vsub.s32 3, %v1761_v19 }
  0x18   :  { %292 = vmatprep.subr.bf16.mxu0 %v1492_v25  ;;  %485 = vmatprep.subr.bf16.mxu1 %v1494_v26 }
  0x1b   :  { %293 = vmatpush1.bf16.msra.mxu0 %v1496_v27  ;;  %486 = vmatpush1.bf16.msra.mxu1 %v1497_v28 }
  0x1c   :  { %294 = vmatprep.subr.bf16.mxu0 %v1498_v29  ;;  %487 = vmatprep.subr.bf16.mxu1 %v1500_v30 }
  0x1f   :  { %295 = vmatpush1.bf16.msra.mxu0 %v1502_v31  ;;  %488 = vmatpush1.bf16.msra.mxu1 %v1503_v32 }
  0x22   :  { %313 = vmatmul.mubr.bf16.vlgmr.msra.gmra.mrb[0].mxu0 %v50_v35  ;;  %506 = vmatmul.mubr.bf16.vlgmr.msra.gmra.mrb[0].mxu1 %v50_v35 }
  0x23   :  { %322 = vmatprep.mubr.bf16.mxu0 %v1504_v1  ;;  %515 = vmatprep.mubr.bf16.mxu1 %v1504_v1 }
  0x2a   :  { %323 = vmatmul.mubr.bf16.gmra.mrb[4].mxu0 %v51_v38  ;;  %516 = vmatmul.mubr.bf16.gmra.mrb[4].mxu1 %v51_v38 }
  0x2b   :  { %332 = vmatprep.mubr.bf16.mxu0 %v1504_v1  ;;  %525 = vmatprep.mubr.bf16.mxu1 %v1504_v1 }
  0x32   :  { %333 = vmatmul.mubr.bf16.gmra.mrb[8].mxu0 %v52_v41  ;;  %526 = vmatmul.mubr.bf16.gmra.mrb[8].mxu1 %v52_v41 }
  0x33   :  { %342 = vmatprep.mubr.bf16.mxu0 %v1504_v1  ;;  %535 = vmatprep.mubr.bf16.mxu1 %v1504_v1 }
  0x3a   :  { %343 = vmatmul.mubr.bf16.gmra.mrb[12].mxu0 %v53_v44  ;;  %536 = vmatmul.mubr.bf16.gmra.mrb[12].mxu1 %v53_v44 }
  0x3b   :  { %352 = vmatprep.mubr.bf16.mxu0 %v1504_v1  ;;  %545 = vmatprep.mubr.bf16.mxu1 %v1504_v1 }
  0x42   :  { %353 = vmatmul.mubr.bf16.gmra.mrb[16].mxu0 %v54_v47  ;;  %546 = vmatmul.mubr.bf16.gmra.mrb[16].mxu1 %v54_v47 }
  0x43   :  { %362 = vmatprep.mubr.bf16.mxu0 %v1504_v1  ;;  %555 = vmatprep.mubr.bf16.mxu1 %v1504_v1 }
  0x4a   :  { %363 = vmatmul.mubr.bf16.gmra.mrb[20].mxu0 %v55_v50  ;;  %556 = vmatmul.mubr.bf16.gmra.mrb[20].mxu1 %v55_v50 }
  0x4b   :  { %372 = vmatprep.mubr.bf16.mxu0 %v1504_v1  ;;  %565 = vmatprep.mubr.bf16.mxu1 %v1504_v1 }
  0x52   :  { %373 = vmatmul.mubr.bf16.gmra.mrb[24].mxu0 %v56_v53  ;;  %566 = vmatmul.mubr.bf16.gmra.mrb[24].mxu1 %v56_v53 }
  0x53   :  { %382 = vmatprep.mubr.bf16.mxu0 %v1504_v1  ;;  %575 = vmatprep.mubr.bf16.mxu1 %v1504_v1 }
  0x5a   :  { %383 = vmatmul.mubr.bf16.gmra.mrb[28].mxu0 %v57_v56  ;;  %576 = vmatmul.mubr.bf16.gmra.mrb[28].mxu1 %v57_v56 }
  0x5b   :  { %392 = vmatprep.mubr.bf16.mxu0 %v1504_v1  ;;  %585 = vmatprep.mubr.bf16.mxu1 %v1504_v1 }
  0x62   :  { %393 = vmatmul.mubr.bf16.gmra.mrb[32].mxu0 %v58_v59  ;;  %586 = vmatmul.mubr.bf16.gmra.mrb[32].mxu1 %v58_v59 }
  0x63   :  { %402 = vmatprep.mubr.bf16.mxu0 %v1504_v1  ;;  %595 = vmatprep.mubr.bf16.mxu1 %v1504_v1 }
  0x6a   :  { %403 = vmatmul.mubr.bf16.gmra.mrb[36].mxu0 %v59_v62  ;;  %596 = vmatmul.mubr.bf16.gmra.mrb[36].mxu1 %v59_v62 }
  0x6b   :  { %412 = vmatprep.mubr.bf16.mxu0 %v1504_v1  ;;  %605 = vmatprep.mubr.bf16.mxu1 %v1504_v1 }
  0x72   :  { %413 = vmatmul.mubr.bf16.gmra.mrb[40].mxu0 %v60_v2  ;;  %606 = vmatmul.mubr.bf16.gmra.mrb[40].mxu1 %v60_v2 }
  0x73   :  { %422 = vmatprep.mubr.bf16.mxu0 %v1504_v1  ;;  %615 = vmatprep.mubr.bf16.mxu1 %v1504_v1 }
  0x7a   :  { %423 = vmatmul.mubr.bf16.gmra.mrb[44].mxu0 %v61_v5  ;;  %616 = vmatmul.mubr.bf16.gmra.mrb[44].mxu1 %v61_v5 }
  0x7b   :  { %432 = vmatprep.mubr.bf16.mxu0 %v1504_v1  ;;  %625 = vmatprep.mubr.bf16.mxu1 %v1504_v1 }
  0x82   :  { %433 = vmatmul.mubr.bf16.gmra.mrb[48].mxu0 %v62_v8  ;;  %626 = vmatmul.mubr.bf16.gmra.mrb[48].mxu1 %v62_v8 }
  0x83   :  { %442 = vmatprep.mubr.bf16.mxu0 %v1504_v1  ;;  %635 = vmatprep.mubr.bf16.mxu1 %v1504_v1 }
  0x8a   :  { %443 = vmatmul.mubr.bf16.gmra.mrb[52].mxu0 %v63_v11  ;;  %636 = vmatmul.mubr.bf16.gmra.mrb[52].mxu1 %v63_v11 }
  0x8b   :  { %452 = vmatprep.mubr.bf16.mxu0 %v1504_v1  ;;  %645 = vmatprep.mubr.bf16.mxu1 %v1504_v1 }
  0x92   :  { %453 = vmatmul.mubr.bf16.gmra.mrb[56].mxu0 %v64_v14  ;;  %646 = vmatmul.mubr.bf16.gmra.mrb[56].mxu1 %v64_v14 }
  0x93   :  { %462 = vmatprep.mubr.bf16.mxu0 %v1504_v1  ;;  %655 = vmatprep.mubr.bf16.mxu1 %v1504_v1  ;;  %v98_v1 = vld [vmem:[%s2528_s2] sm:$0xf] }
  0x94   :  { %v1770_v24 = vrot.slane %v98_v1, %v102_v20  ;;  %v1772_v25 = vrot.slane %v98_v1, %v110_v21  ;;  %v1774_v26 = vrot.slane %v98_v1, %v106_v22  ;;  %v1776_v27 = vrot.slane %v98_v1, %v114_v23 }
  0x9a   :  { %463 = vmatmul.mubr.bf16.gmra.mrb[60].mxu0 %v65_v17  ;;  %656 = vmatmul.mubr.bf16.gmra.mrb[60].mxu1 %v65_v17 }
  0xf5   :  { %v314_v28 = vpop.f32.mrb[0].mxu0  ;;  %v507_v29 = vpop.f32.mrb[0].mxu1 }
  0xf6   :  { %v315_v30 = vadd.f32 %v314_v28, %v1770_v24  ;;  %v508_v31 = vadd.f32 %v507_v29, %v1772_v25  ;;  %v316_v32 = vpop.f32.mrb[1].mxu0  ;;  %v509_v33 = vpop.f32.mrb[1].mxu1 }
  0xf7   :  { %v317_v34 = vadd.f32 %v316_v32, %v1774_v26  ;;  %v510_v35 = vadd.f32 %v509_v33, %v1776_v27  ;;  %v318_v36 = vpop.f32.mrb[2].mxu0  ;;  %v511_v37 = vpop.f32.mrb[2].mxu1 }
  0xf8   :  { %v666_v38 = vmax.f32 %v315_v30, 0.0  ;;  %v668_v39 = vmax.f32 %v508_v31, 0.0  ;;  %v319_v40 = vadd.f32 %v318_v36, %v1770_v24  ;;  %v512_v41 = vadd.f32 %v511_v37, %v1772_v25  ;;  %v320_v42 = vpop.f32.mrb[3].mxu0  ;;  %v513_v43 = vpop.f32.mrb[3].mxu1 }
  0xf9   :  { %v667_v44 = vmax.f32 %v317_v34, 0.0  ;;  %v669_v45 = vmax.f32 %v510_v35, 0.0  ;;  %v321_v46 = vadd.f32 %v320_v42, %v1774_v26  ;;  %v514_v47 = vadd.f32 %v513_v43, %v1776_v27 }
  0xfa   :  { %794 = vst [vmem:[%s2529_s3] sm:$0xff] %v666_v38  ;;  %v1104_v48 = vmul.f32 %v666_v38, %v666_v38  ;;  %796 = vst [vmem:[%s2529_s3 + $0x10] sm:$0xff] %v668_v39  ;;  %v1106_v49 = vmul.f32 %v668_v39, %v668_v39  ;;  %v670_v50 = vmax.f32 %v319_v40, 0.0  ;;  %v672_v51 = vmax.f32 %v512_v41, 0.0 }
  0xfb   :  { %795 = vst [vmem:[%s2529_s3 + $0x8] sm:$0xff] %v667_v44  ;;  %v1105_v52 = vmul.f32 %v667_v44, %v667_v44  ;;  %797 = vst [vmem:[%s2529_s3 + $0x18] sm:$0xff] %v669_v45  ;;  %v1107_v53 = vmul.f32 %v669_v45, %v669_v45  ;;  %v671_v54 = vmax.f32 %v321_v46, 0.0  ;;  %v673_v55 = vmax.f32 %v514_v47, 0.0 }
  0xfc   :  { %798 = vst [vmem:[%s2529_s3 + $0x20] sm:$0xff] %v670_v50  ;;  %v922_v56 = vadd.f32 %v670_v50, %v666_v38  ;;  %v1108_v57 = vmul.f32 %v670_v50, %v670_v50  ;;  %800 = vst [vmem:[%s2529_s3 + $0x30] sm:$0xff] %v672_v51  ;;  %v996_v58 = vadd.f32 %v672_v51, %v668_v39 }
  0xfd   :  { %v1110_v59 = vmul.f32 %v672_v51, %v672_v51  ;;  %799 = vst [vmem:[%s2529_s3 + $0x28] sm:$0xff] %v671_v54  ;;  %v959_v60 = vadd.f32 %v671_v54, %v667_v44  ;;  %v1109_v61 = vmul.f32 %v671_v54, %v671_v54  ;;  %801 = vst [vmem:[%s2529_s3 + $0x38] sm:$0xff] %v673_v55  ;;  %v324_v0 = vpop.f32.mrb[4].mxu0  ;;  %v517_v2 = vpop.f32.mrb[4].mxu1 }
  0xfe   :  { %v1033_v62 = vadd.f32 %v673_v55, %v669_v45  ;;  %v1111_v63 = vmul.f32 %v673_v55, %v673_v55  ;;  %v1232_v3 = vadd.f32 %v1108_v57, %v1104_v48  ;;  %v325_v5 = vadd.f32 %v324_v0, %v1770_v24  ;;  %v326_v7 = vpop.f32.mrb[5].mxu0  ;;  %v519_v8 = vpop.f32.mrb[5].mxu1 }
  0xff   :  { %v1306_v4 = vadd.f32 %v1110_v59, %v1106_v49  ;;  %v518_v6 = vadd.f32 %v517_v2, %v1772_v25  ;;  %v1269_v9 = vadd.f32 %v1109_v61, %v1105_v52  ;;  %v327_v11 = vadd.f32 %v326_v7, %v1774_v26  ;;  %v328_v13 = vpop.f32.mrb[6].mxu0  ;;  %v521_v14 = vpop.f32.mrb[6].mxu1 }
 0x100   :  { %v1343_v10 = vadd.f32 %v1111_v63, %v1107_v53  ;;  %v520_v12 = vadd.f32 %v519_v8, %v1776_v27  ;;  %v674_v15 = vmax.f32 %v325_v5, 0.0  ;;  %v329_v17 = vadd.f32 %v328_v13, %v1770_v24  ;;  %v330_v21 = vpop.f32.mrb[7].mxu0  ;;  %v523_v1 = vpop.f32.mrb[7].mxu1 }
 0x101   :  { %v676_v16 = vmax.f32 %v518_v6, 0.0  ;;  %v522_v20 = vadd.f32 %v521_v14, %v1772_v25  ;;  %v675_v22 = vmax.f32 %v327_v11, 0.0  ;;  %v331_v28 = vadd.f32 %v330_v21, %v1774_v26 }
 0x102   :  { %v677_v23 = vmax.f32 %v520_v12, 0.0  ;;  %v524_v29 = vadd.f32 %v523_v1, %v1776_v27  ;;  %802 = vst [vmem:[%s2529_s3 + $0x40] sm:$0xff] %v674_v15  ;;  %v923_v30 = vadd.f32 %v922_v56, %v674_v15  ;;  %v1112_v31 = vmul.f32 %v674_v15, %v674_v15 }
 0x103   :  { %804 = vst [vmem:[%s2529_s3 + $0x50] sm:$0xff] %v676_v16  ;;  %v997_v32 = vadd.f32 %v996_v58, %v676_v16  ;;  %v1114_v33 = vmul.f32 %v676_v16, %v676_v16  ;;  %803 = vst [vmem:[%s2529_s3 + $0x48] sm:$0xff] %v675_v22  ;;  %v960_v34 = vadd.f32 %v959_v60, %v675_v22  ;;  %v678_v40 = vmax.f32 %v329_v17, 0.0 }
 0x104   :  { %v1113_v35 = vmul.f32 %v675_v22, %v675_v22  ;;  %805 = vst [vmem:[%s2529_s3 + $0x58] sm:$0xff] %v677_v23  ;;  %v1034_v36 = vadd.f32 %v1033_v62, %v677_v23  ;;  %v1115_v37 = vmul.f32 %v677_v23, %v677_v23  ;;  %v1233_v38 = vadd.f32 %v1232_v3, %v1112_v31 }
 0x105   :  { %v1307_v39 = vadd.f32 %v1306_v4, %v1114_v33  ;;  %v680_v41 = vmax.f32 %v522_v20, 0.0  ;;  %v679_v44 = vmax.f32 %v331_v28, 0.0  ;;  %v681_v45 = vmax.f32 %v524_v29, 0.0  ;;  %v334_v46 = vpop.f32.mrb[8].mxu0  ;;  %v527_v47 = vpop.f32.mrb[8].mxu1  ;;  %806 = vst [vmem:[%s2529_s3 + $0x60] sm:$0xff] %v678_v40 }
 0x106   :  { %v1270_v42 = vadd.f32 %v1269_v9, %v1113_v35  ;;  %v1344_v43 = vadd.f32 %v1343_v10, %v1115_v37  ;;  %v924_v48 = vadd.f32 %v923_v30, %v678_v40  ;;  %v1116_v49 = vmul.f32 %v678_v40, %v678_v40  ;;  %v336_v52 = vpop.f32.mrb[9].mxu0  ;;  %v529_v53 = vpop.f32.mrb[9].mxu1 }
 0x107   :  { %808 = vst [vmem:[%s2529_s3 + $0x70] sm:$0xff] %v680_v41  ;;  %v998_v50 = vadd.f32 %v997_v32, %v680_v41  ;;  %v1118_v51 = vmul.f32 %v680_v41, %v680_v41  ;;  %807 = vst [vmem:[%s2529_s3 + $0x68] sm:$0xff] %v679_v44  ;;  %v961_v54 = vadd.f32 %v960_v34, %v679_v44  ;;  %v338_v58 = vpop.f32.mrb[10].mxu0  ;;  %v531_v59 = vpop.f32.mrb[10].mxu1 }
 0x108   :  { %v1117_v55 = vmul.f32 %v679_v44, %v679_v44  ;;  %809 = vst [vmem:[%s2529_s3 + $0x78] sm:$0xff] %v681_v45  ;;  %v1035_v56 = vadd.f32 %v1034_v36, %v681_v45  ;;  %v1119_v57 = vmul.f32 %v681_v45, %v681_v45  ;;  %v1234_v60 = vadd.f32 %v1233_v38, %v1116_v49  ;;  %v340_v0 = vpop.f32.mrb[11].mxu0  ;;  %v533_v2 = vpop.f32.mrb[11].mxu1 }
 0x109   :  { %v1308_v61 = vadd.f32 %v1307_v39, %v1118_v51  ;;  %v335_v62 = vadd.f32 %v334_v46, %v1770_v24  ;;  %v528_v63 = vadd.f32 %v527_v47, %v1772_v25  ;;  %v337_v5 = vadd.f32 %v336_v52, %v1774_v26 }
 0x10a   :  { %v1271_v3 = vadd.f32 %v1270_v42, %v1117_v55  ;;  %v1345_v4 = vadd.f32 %v1344_v43, %v1119_v57  ;;  %v530_v6 = vadd.f32 %v529_v53, %v1776_v27  ;;  %v339_v9 = vadd.f32 %v338_v58, %v1770_v24 }
 0x10b   :  { %v682_v7 = vmax.f32 %v335_v62, 0.0  ;;  %v684_v8 = vmax.f32 %v528_v63, 0.0  ;;  %v532_v10 = vadd.f32 %v531_v59, %v1772_v25  ;;  %v683_v11 = vmax.f32 %v337_v5, 0.0 }
 0x10c   :  { %v685_v12 = vmax.f32 %v530_v6, 0.0  ;;  %v341_v13 = vadd.f32 %v340_v0, %v1774_v26  ;;  %v534_v14 = vadd.f32 %v533_v2, %v1776_v27  ;;  %v686_v32 = vmax.f32 %v339_v9, 0.0 }
 0x10d   :  { %810 = vst [vmem:[%s2529_s3 + $0x80] sm:$0xff] %v682_v7  ;;  %v925_v15 = vadd.f32 %v924_v48, %v682_v7  ;;  %v1120_v16 = vmul.f32 %v682_v7, %v682_v7  ;;  %812 = vst [vmem:[%s2529_s3 + $0x90] sm:$0xff] %v684_v8  ;;  %v999_v17 = vadd.f32 %v998_v50, %v684_v8  ;;  %v344_v28 = vpop.f32.mrb[12].mxu0  ;;  %v537_v29 = vpop.f32.mrb[12].mxu1  ;;  %v688_v33 = vmax.f32 %v532_v10, 0.0 }
 0x10e   :  { %v1122_v20 = vmul.f32 %v684_v8, %v684_v8  ;;  %811 = vst [vmem:[%s2529_s3 + $0x88] sm:$0xff] %v683_v11  ;;  %v962_v21 = vadd.f32 %v961_v54, %v683_v11  ;;  %v1121_v1 = vmul.f32 %v683_v11, %v683_v11  ;;  %813 = vst [vmem:[%s2529_s3 + $0x98] sm:$0xff] %v685_v12  ;;  %v346_v34 = vpop.f32.mrb[13].mxu0  ;;  %v539_v35 = vpop.f32.mrb[13].mxu1  ;;  %v687_v38 = vmax.f32 %v341_v13, 0.0 }
 0x10f   :  { %v1036_v22 = vadd.f32 %v1035_v56, %v685_v12  ;;  %v1123_v23 = vmul.f32 %v685_v12, %v685_v12  ;;  %v1235_v30 = vadd.f32 %v1234_v60, %v1120_v16  ;;  %v689_v39 = vmax.f32 %v534_v14, 0.0  ;;  %v348_v40 = vpop.f32.mrb[14].mxu0  ;;  %v541_v41 = vpop.f32.mrb[14].mxu1  ;;  %814 = vst [vmem:[%s2529_s3 + $0xa0] sm:$0xff] %v686_v32  ;;  %816 = vst [vmem:[%s2529_s3 + $0xb0] sm:$0xff] %v688_v33 }
 0x110   :  { %v1309_v31 = vadd.f32 %v1308_v61, %v1122_v20  ;;  %v1272_v36 = vadd.f32 %v1271_v3, %v1121_v1  ;;  %v926_v42 = vadd.f32 %v925_v15, %v686_v32  ;;  %v1124_v43 = vmul.f32 %v686_v32, %v686_v32  ;;  %v350_v46 = vpop.f32.mrb[15].mxu0  ;;  %v543_v47 = vpop.f32.mrb[15].mxu1  ;;  %815 = vst [vmem:[%s2529_s3 + $0xa8] sm:$0xff] %v687_v38 }
 0x111   :  { %v1346_v37 = vadd.f32 %v1345_v4, %v1123_v23  ;;  %v1000_v44 = vadd.f32 %v999_v17, %v688_v33  ;;  %v1126_v45 = vmul.f32 %v688_v33, %v688_v33  ;;  %v963_v48 = vadd.f32 %v962_v21, %v687_v38  ;;  %817 = vst [vmem:[%s2529_s3 + $0xb8] sm:$0xff] %v689_v39 }
 0x112   :  { %v1125_v49 = vmul.f32 %v687_v38, %v687_v38  ;;  %v1037_v50 = vadd.f32 %v1036_v22, %v689_v39  ;;  %v1127_v51 = vmul.f32 %v689_v39, %v689_v39  ;;  %v1236_v52 = vadd.f32 %v1235_v30, %v1124_v43 }
 0x113   :  { %v1310_v53 = vadd.f32 %v1309_v31, %v1126_v45  ;;  %v345_v54 = vadd.f32 %v344_v28, %v1770_v24  ;;  %v538_v55 = vadd.f32 %v537_v29, %v1772_v25  ;;  %v347_v58 = vadd.f32 %v346_v34, %v1774_v26 }
 0x114   :  { %v1273_v56 = vadd.f32 %v1272_v36, %v1125_v49  ;;  %v1347_v57 = vadd.f32 %v1346_v37, %v1127_v51  ;;  %v540_v59 = vadd.f32 %v539_v35, %v1776_v27  ;;  %v349_v62 = vadd.f32 %v348_v40, %v1770_v24 }
 0x115   :  { %v690_v60 = vmax.f32 %v345_v54, 0.0  ;;  %v692_v61 = vmax.f32 %v538_v55, 0.0  ;;  %v542_v63 = vadd.f32 %v541_v41, %v1772_v25  ;;  %v691_v0 = vmax.f32 %v347_v58, 0.0  ;;  %v354_v5 = vpop.f32.mrb[16].mxu0  ;;  %v547_v6 = vpop.f32.mrb[16].mxu1 }
 0x116   :  { %v693_v2 = vmax.f32 %v540_v59, 0.0  ;;  %v351_v3 = vadd.f32 %v350_v46, %v1774_v26  ;;  %v544_v4 = vadd.f32 %v543_v47, %v1776_v27  ;;  %v356_v11 = vpop.f32.mrb[17].mxu0  ;;  %v549_v12 = vpop.f32.mrb[17].mxu1  ;;  %v694_v22 = vmax.f32 %v349_v62, 0.0 }
 0x117   :  { %818 = vst [vmem:[%s2529_s3 + $0xc0] sm:$0xff] %v690_v60  ;;  %v927_v7 = vadd.f32 %v926_v42, %v690_v60  ;;  %v1128_v8 = vmul.f32 %v690_v60, %v690_v60  ;;  %820 = vst [vmem:[%s2529_s3 + $0xd0] sm:$0xff] %v692_v61  ;;  %v1001_v9 = vadd.f32 %v1000_v44, %v692_v61  ;;  %v358_v17 = vpop.f32.mrb[18].mxu0  ;;  %v551_v20 = vpop.f32.mrb[18].mxu1  ;;  %v696_v23 = vmax.f32 %v542_v63, 0.0 }
 0x118   :  { %v1130_v10 = vmul.f32 %v692_v61, %v692_v61  ;;  %819 = vst [vmem:[%s2529_s3 + $0xc8] sm:$0xff] %v691_v0  ;;  %v964_v13 = vadd.f32 %v963_v48, %v691_v0  ;;  %v1129_v14 = vmul.f32 %v691_v0, %v691_v0  ;;  %821 = vst [vmem:[%s2529_s3 + $0xd8] sm:$0xff] %v693_v2  ;;  %v360_v28 = vpop.f32.mrb[19].mxu0  ;;  %v553_v29 = vpop.f32.mrb[19].mxu1  ;;  %v695_v32 = vmax.f32 %v351_v3, 0.0 }
 0x119   :  { %v1038_v15 = vadd.f32 %v1037_v50, %v693_v2  ;;  %v1131_v16 = vmul.f32 %v693_v2, %v693_v2  ;;  %v1237_v21 = vadd.f32 %v1236_v52, %v1128_v8  ;;  %v697_v33 = vmax.f32 %v544_v4, 0.0  ;;  %822 = vst [vmem:[%s2529_s3 + $0xe0] sm:$0xff] %v694_v22  ;;  %824 = vst [vmem:[%s2529_s3 + $0xf0] sm:$0xff] %v696_v23 }
 0x11a   :  { %v1311_v1 = vadd.f32 %v1310_v53, %v1130_v10  ;;  %v1274_v30 = vadd.f32 %v1273_v56, %v1129_v14  ;;  %v928_v34 = vadd.f32 %v927_v7, %v694_v22  ;;  %v1132_v35 = vmul.f32 %v694_v22, %v694_v22  ;;  %823 = vst [vmem:[%s2529_s3 + $0xe8] sm:$0xff] %v695_v32 }
 0x11b   :  { %v1348_v31 = vadd.f32 %v1347_v57, %v1131_v16  ;;  %v1002_v36 = vadd.f32 %v1001_v9, %v696_v23  ;;  %v1134_v37 = vmul.f32 %v696_v23, %v696_v23  ;;  %v965_v38 = vadd.f32 %v964_v13, %v695_v32  ;;  %825 = vst [vmem:[%s2529_s3 + $0xf8] sm:$0xff] %v697_v33 }
 0x11c   :  { %v1133_v39 = vmul.f32 %v695_v32, %v695_v32  ;;  %v1039_v40 = vadd.f32 %v1038_v15, %v697_v33  ;;  %v1135_v41 = vmul.f32 %v697_v33, %v697_v33  ;;  %v1238_v42 = vadd.f32 %v1237_v21, %v1132_v35 }
 0x11d   :  { %v1312_v43 = vadd.f32 %v1311_v1, %v1134_v37  ;;  %v355_v44 = vadd.f32 %v354_v5, %v1770_v24  ;;  %v548_v45 = vadd.f32 %v547_v6, %v1772_v25  ;;  %v357_v48 = vadd.f32 %v356_v11, %v1774_v26  ;;  %v364_v50 = vpop.f32.mrb[20].mxu0  ;;  %v557_v51 = vpop.f32.mrb[20].mxu1 }
 0x11e   :  { %v1275_v46 = vadd.f32 %v1274_v30, %v1133_v39  ;;  %v1349_v47 = vadd.f32 %v1348_v31, %v1135_v41  ;;  %v550_v49 = vadd.f32 %v549_v12, %v1776_v27  ;;  %v359_v54 = vadd.f32 %v358_v17, %v1770_v24  ;;  %v366_v56 = vpop.f32.mrb[21].mxu0  ;;  %v559_v57 = vpop.f32.mrb[21].mxu1 }
 0x11f   :  { %v698_v52 = vmax.f32 %v355_v44, 0.0  ;;  %v700_v53 = vmax.f32 %v548_v45, 0.0  ;;  %v552_v55 = vadd.f32 %v551_v20, %v1772_v25  ;;  %v699_v58 = vmax.f32 %v357_v48, 0.0  ;;  %v368_v62 = vpop.f32.mrb[22].mxu0  ;;  %v561_v63 = vpop.f32.mrb[22].mxu1 }
 0x120   :  { %v701_v59 = vmax.f32 %v550_v49, 0.0  ;;  %v361_v60 = vadd.f32 %v360_v28, %v1774_v26  ;;  %v554_v61 = vadd.f32 %v553_v29, %v1776_v27  ;;  %v370_v5 = vpop.f32.mrb[23].mxu0  ;;  %v563_v6 = vpop.f32.mrb[23].mxu1  ;;  %v702_v13 = vmax.f32 %v359_v54, 0.0 }
 0x121   :  { %826 = vst [vmem:[%s2529_s3 + $0x100] sm:$0xff] %v698_v52  ;;  %v929_v0 = vadd.f32 %v928_v34, %v698_v52  ;;  %v1136_v2 = vmul.f32 %v698_v52, %v698_v52  ;;  %828 = vst [vmem:[%s2529_s3 + $0x110] sm:$0xff] %v700_v53  ;;  %v1003_v3 = vadd.f32 %v1002_v36, %v700_v53  ;;  %v704_v14 = vmax.f32 %v552_v55, 0.0 }
 0x122   :  { %v1138_v4 = vmul.f32 %v700_v53, %v700_v53  ;;  %827 = vst [vmem:[%s2529_s3 + $0x108] sm:$0xff] %v699_v58  ;;  %v966_v7 = vadd.f32 %v965_v38, %v699_v58  ;;  %v1137_v8 = vmul.f32 %v699_v58, %v699_v58  ;;  %829 = vst [vmem:[%s2529_s3 + $0x118] sm:$0xff] %v701_v59  ;;  %v703_v17 = vmax.f32 %v361_v60, 0.0 }
 0x123   :  { %v1040_v9 = vadd.f32 %v1039_v40, %v701_v59  ;;  %v1139_v10 = vmul.f32 %v701_v59, %v701_v59  ;;  %v1239_v11 = vadd.f32 %v1238_v42, %v1136_v2  ;;  %v705_v20 = vmax.f32 %v554_v61, 0.0  ;;  %830 = vst [vmem:[%s2529_s3 + $0x120] sm:$0xff] %v702_v13  ;;  %832 = vst [vmem:[%s2529_s3 + $0x130] sm:$0xff] %v704_v14 }
 0x124   :  { %v1313_v12 = vadd.f32 %v1312_v43, %v1138_v4  ;;  %v1276_v15 = vadd.f32 %v1275_v46, %v1137_v8  ;;  %v930_v21 = vadd.f32 %v929_v0, %v702_v13  ;;  %v1140_v1 = vmul.f32 %v702_v13, %v702_v13  ;;  %831 = vst [vmem:[%s2529_s3 + $0x128] sm:$0xff] %v703_v17 }
 0x125   :  { %v1350_v16 = vadd.f32 %v1349_v47, %v1139_v10  ;;  %v1004_v22 = vadd.f32 %v1003_v3, %v704_v14  ;;  %v1142_v23 = vmul.f32 %v704_v14, %v704_v14  ;;  %v967_v28 = vadd.f32 %v966_v7, %v703_v17  ;;  %833 = vst [vmem:[%s2529_s3 + $0x138] sm:$0xff] %v705_v20  ;;  %v1938_v32 = vpop.f32.mrb[24].mxu0  ;;  %v1940_v33 = vpop.f32.mrb[24].mxu1 }
 0x126   :  { %v1141_v29 = vmul.f32 %v703_v17, %v703_v17  ;;  %v1041_v30 = vadd.f32 %v1040_v9, %v705_v20  ;;  %v1143_v31 = vmul.f32 %v705_v20, %v705_v20  ;;  %v1240_v34 = vadd.f32 %v1239_v11, %v1140_v1  ;;  %v1944_v38 = vpop.f32.mrb[25].mxu0  ;;  %v1946_v39 = vpop.f32.mrb[25].mxu1 }
 0x127   :  { %v1314_v35 = vadd.f32 %v1313_v12, %v1142_v23  ;;  %v365_v36 = vadd.f32 %v364_v50, %v1770_v24  ;;  %v558_v37 = vadd.f32 %v557_v51, %v1772_v25  ;;  %v367_v42 = vadd.f32 %v366_v56, %v1774_v26  ;;  %v378_v44 = vpop.f32.mrb[26].mxu0  ;;  %v571_v45 = vpop.f32.mrb[26].mxu1 }
 0x128   :  { %v1277_v40 = vadd.f32 %v1276_v15, %v1141_v29  ;;  %v1351_v41 = vadd.f32 %v1350_v16, %v1143_v31  ;;  %v560_v43 = vadd.f32 %v559_v57, %v1776_v27  ;;  %v369_v48 = vadd.f32 %v368_v62, %v1770_v24  ;;  %v380_v50 = vpop.f32.mrb[27].mxu0  ;;  %v573_v51 = vpop.f32.mrb[27].mxu1 }
 0x129   :  { %v706_v46 = vmax.f32 %v365_v36, 0.0  ;;  %v708_v47 = vmax.f32 %v558_v37, 0.0  ;;  %v562_v49 = vadd.f32 %v561_v63, %v1772_v25  ;;  %v707_v52 = vmax.f32 %v367_v42, 0.0 }
 0x12a   :  { %v709_v53 = vmax.f32 %v560_v43, 0.0  ;;  %v371_v54 = vadd.f32 %v370_v5, %v1774_v26  ;;  %v564_v55 = vadd.f32 %v563_v6, %v1776_v27  ;;  %v710_v3 = vmax.f32 %v369_v48, 0.0 }
 0x12b   :  { %834 = vst [vmem:[%s2529_s3 + $0x140] sm:$0xff] %v706_v46  ;;  %v931_v56 = vadd.f32 %v930_v21, %v706_v46  ;;  %v1144_v57 = vmul.f32 %v706_v46, %v706_v46  ;;  %836 = vst [vmem:[%s2529_s3 + $0x150] sm:$0xff] %v708_v47  ;;  %v1005_v58 = vadd.f32 %v1004_v22, %v708_v47  ;;  %v712_v4 = vmax.f32 %v562_v49, 0.0 }
 0x12c   :  { %v1146_v59 = vmul.f32 %v708_v47, %v708_v47  ;;  %835 = vst [vmem:[%s2529_s3 + $0x148] sm:$0xff] %v707_v52  ;;  %v968_v60 = vadd.f32 %v967_v28, %v707_v52  ;;  %v1145_v61 = vmul.f32 %v707_v52, %v707_v52  ;;  %837 = vst [vmem:[%s2529_s3 + $0x158] sm:$0xff] %v709_v53  ;;  %v711_v7 = vmax.f32 %v371_v54, 0.0 }
 0x12d   :  { %v1042_v62 = vadd.f32 %v1041_v30, %v709_v53  ;;  %v1147_v63 = vmul.f32 %v709_v53, %v709_v53  ;;  %v1241_v0 = vadd.f32 %v1240_v34, %v1144_v57  ;;  %v713_v8 = vmax.f32 %v564_v55, 0.0  ;;  %v1966_v9 = vpop.f32.mrb[28].mxu0  ;;  %v1968_v10 = vpop.f32.mrb[28].mxu1  ;;  %838 = vst [vmem:[%s2529_s3 + $0x160] sm:$0xff] %v710_v3  ;;  %840 = vst [vmem:[%s2529_s3 + $0x170] sm:$0xff] %v712_v4 }
 0x12e   :  { %v1315_v2 = vadd.f32 %v1314_v35, %v1146_v59  ;;  %v1278_v5 = vadd.f32 %v1277_v40, %v1145_v61  ;;  %v932_v11 = vadd.f32 %v931_v56, %v710_v3  ;;  %v1148_v12 = vmul.f32 %v710_v3, %v710_v3  ;;  %v1976_v15 = vpop.f32.mrb[29].mxu0  ;;  %v1978_v16 = vpop.f32.mrb[29].mxu1  ;;  %839 = vst [vmem:[%s2529_s3 + $0x168] sm:$0xff] %v711_v7 }
 0x12f   :  { %v1352_v6 = vadd.f32 %v1351_v41, %v1147_v63  ;;  %v1006_v13 = vadd.f32 %v1005_v58, %v712_v4  ;;  %v1150_v14 = vmul.f32 %v712_v4, %v712_v4  ;;  %v969_v17 = vadd.f32 %v968_v60, %v711_v7  ;;  %841 = vst [vmem:[%s2529_s3 + $0x178] sm:$0xff] %v713_v8  ;;  %v1986_v22 = vpop.f32.mrb[30].mxu0  ;;  %v1988_v23 = vpop.f32.mrb[30].mxu1 }
 0x130   :  { %v1149_v20 = vmul.f32 %v711_v7, %v711_v7  ;;  %v1043_v21 = vadd.f32 %v1042_v62, %v713_v8  ;;  %v1151_v1 = vmul.f32 %v713_v8, %v713_v8  ;;  %v1242_v28 = vadd.f32 %v1241_v0, %v1148_v12  ;;  %v1994_v34 = vpop.f32.mrb[31].mxu0  ;;  %v1996_v35 = vpop.f32.mrb[31].mxu1 }
 0x131   :  { %v1316_v29 = vadd.f32 %v1315_v2, %v1150_v14  ;;  %v375_v30 = vadd.f32 %v1938_v32, %v1770_v24  ;;  %v568_v31 = vadd.f32 %v1940_v33, %v1772_v25  ;;  %v377_v40 = vadd.f32 %v1944_v38, %v1774_v26 }
 0x132   :  { %v1279_v36 = vadd.f32 %v1278_v5, %v1149_v20  ;;  %v1353_v37 = vadd.f32 %v1352_v6, %v1151_v1  ;;  %v570_v41 = vadd.f32 %v1946_v39, %v1776_v27  ;;  %v379_v46 = vadd.f32 %v378_v44, %v1770_v24 }
 0x133   :  { %v714_v42 = vmax.f32 %v375_v30, 0.0  ;;  %v716_v43 = vmax.f32 %v568_v31, 0.0  ;;  %v572_v32 = vadd.f32 %v571_v45, %v1772_v25  ;;  %v715_v47 = vmax.f32 %v377_v40, 0.0 }
 0x134   :  { %v717_v33 = vmax.f32 %v570_v41, 0.0  ;;  %v381_v48 = vadd.f32 %v380_v50, %v1774_v26  ;;  %v574_v49 = vadd.f32 %v573_v51, %v1776_v27  ;;  %v718_v58 = vmax.f32 %v379_v46, 0.0 }
 0x135   :  { %842 = vst [vmem:[%s2529_s3 + $0x180] sm:$0xff] %v714_v42  ;;  %v933_v38 = vadd.f32 %v932_v11, %v714_v42  ;;  %v1152_v52 = vmul.f32 %v714_v42, %v714_v42  ;;  %844 = vst [vmem:[%s2529_s3 + $0x190] sm:$0xff] %v716_v43  ;;  %v1007_v39 = vadd.f32 %v1006_v13, %v716_v43  ;;  %v2018_v54 = vpop.f32.mrb[32].mxu0  ;;  %v2020_v55 = vpop.f32.mrb[32].mxu1  ;;  %v720_v59 = vmax.f32 %v572_v32, 0.0 }
 0x136   :  { %v1154_v44 = vmul.f32 %v716_v43, %v716_v43  ;;  %843 = vst [vmem:[%s2529_s3 + $0x188] sm:$0xff] %v715_v47  ;;  %v970_v45 = vadd.f32 %v969_v17, %v715_v47  ;;  %v1153_v50 = vmul.f32 %v715_v47, %v715_v47  ;;  %845 = vst [vmem:[%s2529_s3 + $0x198] sm:$0xff] %v717_v33  ;;  %v2022_v60 = vpop.f32.mrb[33].mxu0  ;;  %v2024_v61 = vpop.f32.mrb[33].mxu1  ;;  %v719_v0 = vmax.f32 %v381_v48, 0.0 }
 0x137   :  { %v1044_v51 = vadd.f32 %v1043_v21, %v717_v33  ;;  %v1155_v53 = vmul.f32 %v717_v33, %v717_v33  ;;  %v1243_v56 = vadd.f32 %v1242_v28, %v1152_v52  ;;  %v721_v2 = vmax.f32 %v574_v49, 0.0  ;;  %v2026_v3 = vpop.f32.mrb[34].mxu0  ;;  %v2028_v4 = vpop.f32.mrb[34].mxu1  ;;  %846 = vst [vmem:[%s2529_s3 + $0x1a0] sm:$0xff] %v718_v58  ;;  %848 = vst [vmem:[%s2529_s3 + $0x1b0] sm:$0xff] %v720_v59 }
 0x138   :  { %v1317_v57 = vadd.f32 %v1316_v29, %v1154_v44  ;;  %v1280_v62 = vadd.f32 %v1279_v36, %v1153_v50  ;;  %v934_v5 = vadd.f32 %v933_v38, %v718_v58  ;;  %v1156_v6 = vmul.f32 %v718_v58, %v718_v58  ;;  %v2036_v11 = vpop.f32.mrb[35].mxu0  ;;  %v2038_v12 = vpop.f32.mrb[35].mxu1  ;;  %847 = vst [vmem:[%s2529_s3 + $0x1a8] sm:$0xff] %v719_v0 }
 0x139   :  { %v1354_v63 = vadd.f32 %v1353_v37, %v1155_v53  ;;  %v1008_v7 = vadd.f32 %v1007_v39, %v720_v59  ;;  %v1158_v8 = vmul.f32 %v720_v59, %v720_v59  ;;  %v971_v13 = vadd.f32 %v970_v45, %v719_v0  ;;  %849 = vst [vmem:[%s2529_s3 + $0x1b8] sm:$0xff] %v721_v2 }
 0x13a   :  { %v1157_v14 = vmul.f32 %v719_v0, %v719_v0  ;;  %v1045_v17 = vadd.f32 %v1044_v51, %v721_v2  ;;  %v1159_v20 = vmul.f32 %v721_v2, %v721_v2  ;;  %v1244_v21 = vadd.f32 %v1243_v56, %v1156_v6 }
 0x13b   :  { %v1318_v1 = vadd.f32 %v1317_v57, %v1158_v8  ;;  %v385_v28 = vadd.f32 %v1966_v9, %v1770_v24  ;;  %v578_v29 = vadd.f32 %v1968_v10, %v1772_v25  ;;  %v387_v36 = vadd.f32 %v1976_v15, %v1774_v26 }
 0x13c   :  { %v1281_v30 = vadd.f32 %v1280_v62, %v1157_v14  ;;  %v1355_v31 = vadd.f32 %v1354_v63, %v1159_v20  ;;  %v580_v37 = vadd.f32 %v1978_v16, %v1776_v27  ;;  %v389_v42 = vadd.f32 %v1986_v22, %v1770_v24 }
 0x13d   :  { %v722_v40 = vmax.f32 %v385_v28, 0.0  ;;  %v724_v41 = vmax.f32 %v578_v29, 0.0  ;;  %v582_v43 = vadd.f32 %v1988_v23, %v1772_v25  ;;  %v723_v9 = vmax.f32 %v387_v36, 0.0  ;;  %v2062_v15 = vpop.f32.mrb[36].mxu0  ;;  %v2064_v47 = vpop.f32.mrb[36].mxu1 }
 0x13e   :  { %v725_v46 = vmax.f32 %v580_v37, 0.0  ;;  %v391_v10 = vadd.f32 %v1994_v34, %v1774_v26  ;;  %v584_v32 = vadd.f32 %v1996_v35, %v1776_v27  ;;  %v2072_v34 = vpop.f32.mrb[37].mxu0  ;;  %v2074_v48 = vpop.f32.mrb[37].mxu1  ;;  %v726_v51 = vmax.f32 %v389_v42, 0.0 }
 0x13f   :  { %850 = vst [vmem:[%s2529_s3 + $0x1c0] sm:$0xff] %v722_v40  ;;  %v935_v16 = vadd.f32 %v934_v5, %v722_v40  ;;  %v1160_v22 = vmul.f32 %v722_v40, %v722_v40  ;;  %852 = vst [vmem:[%s2529_s3 + $0x1d0] sm:$0xff] %v724_v41  ;;  %v1009_v23 = vadd.f32 %v1008_v7, %v724_v41  ;;  %v2082_v39 = vpop.f32.mrb[38].mxu0  ;;  %v2084_v44 = vpop.f32.mrb[38].mxu1  ;;  %v728_v53 = vmax.f32 %v582_v43, 0.0 }
 0x140   :  { %v1162_v33 = vmul.f32 %v724_v41, %v724_v41  ;;  %851 = vst [vmem:[%s2529_s3 + $0x1c8] sm:$0xff] %v723_v9  ;;  %v972_v35 = vadd.f32 %v971_v13, %v723_v9  ;;  %v1161_v49 = vmul.f32 %v723_v9, %v723_v9  ;;  %853 = vst [vmem:[%s2529_s3 + $0x1d8] sm:$0xff] %v725_v46  ;;  %v2086_v56 = vpop.f32.mrb[39].mxu0  ;;  %v2088_v57 = vpop.f32.mrb[39].mxu1  ;;  %v727_v62 = vmax.f32 %v391_v10, 0.0 }
 0x141   :  { %v1046_v38 = vadd.f32 %v1045_v17, %v725_v46  ;;  %v1163_v52 = vmul.f32 %v725_v46, %v725_v46  ;;  %v1245_v45 = vadd.f32 %v1244_v21, %v1160_v22  ;;  %v729_v63 = vmax.f32 %v584_v32, 0.0  ;;  %854 = vst [vmem:[%s2529_s3 + $0x1e0] sm:$0xff] %v726_v51  ;;  %856 = vst [vmem:[%s2529_s3 + $0x1f0] sm:$0xff] %v728_v53 }
 0x142   :  { %v1319_v50 = vadd.f32 %v1318_v1, %v1162_v33  ;;  %v1282_v58 = vadd.f32 %v1281_v30, %v1161_v49  ;;  %v936_v0 = vadd.f32 %v935_v16, %v726_v51  ;;  %v1164_v2 = vmul.f32 %v726_v51, %v726_v51  ;;  %855 = vst [vmem:[%s2529_s3 + $0x1e8] sm:$0xff] %v727_v62 }
 0x143   :  { %v1356_v59 = vadd.f32 %v1355_v31, %v1163_v52  ;;  %v1010_v5 = vadd.f32 %v1009_v23, %v728_v53  ;;  %v1166_v6 = vmul.f32 %v728_v53, %v728_v53  ;;  %v973_v7 = vadd.f32 %v972_v35, %v727_v62  ;;  %857 = vst [vmem:[%s2529_s3 + $0x1f8] sm:$0xff] %v729_v63 }
 0x144   :  { %v1165_v8 = vmul.f32 %v727_v62, %v727_v62  ;;  %v1047_v13 = vadd.f32 %v1046_v38, %v729_v63  ;;  %v1167_v14 = vmul.f32 %v729_v63, %v729_v63  ;;  %v1246_v17 = vadd.f32 %v1245_v45, %v1164_v2 }
 0x145   :  { %v1320_v20 = vadd.f32 %v1319_v50, %v1166_v6  ;;  %v395_v21 = vadd.f32 %v2018_v54, %v1770_v24  ;;  %v588_v1 = vadd.f32 %v2020_v55, %v1772_v25  ;;  %v397_v30 = vadd.f32 %v2022_v60, %v1774_v26  ;;  %v2110_v36 = vpop.f32.mrb[40].mxu0  ;;  %v2112_v37 = vpop.f32.mrb[40].mxu1 }
 0x146   :  { %v1283_v28 = vadd.f32 %v1282_v58, %v1165_v8  ;;  %v1357_v29 = vadd.f32 %v1356_v59, %v1167_v14  ;;  %v590_v31 = vadd.f32 %v2024_v61, %v1776_v27  ;;  %v399_v54 = vadd.f32 %v2026_v3, %v1770_v24  ;;  %v2118_v42 = vpop.f32.mrb[41].mxu0  ;;  %v2120_v43 = vpop.f32.mrb[41].mxu1 }
 0x147   :  { %v730_v40 = vmax.f32 %v395_v21, 0.0  ;;  %v732_v41 = vmax.f32 %v588_v1, 0.0  ;;  %v592_v55 = vadd.f32 %v2028_v4, %v1772_v25  ;;  %v731_v60 = vmax.f32 %v397_v30, 0.0  ;;  %v2126_v10 = vpop.f32.mrb[42].mxu0  ;;  %v2128_v32 = vpop.f32.mrb[42].mxu1 }
 0x148   :  { %v733_v9 = vmax.f32 %v590_v31, 0.0  ;;  %v401_v61 = vadd.f32 %v2036_v11, %v1774_v26  ;;  %v594_v46 = vadd.f32 %v2038_v12, %v1776_v27  ;;  %v2136_v11 = vpop.f32.mrb[43].mxu0  ;;  %v2138_v23 = vpop.f32.mrb[43].mxu1  ;;  %v734_v45 = vmax.f32 %v399_v54, 0.0 }
 0x149   :  { %858 = vst [vmem:[%s2529_s3 + $0x200] sm:$0xff] %v730_v40  ;;  %v937_v3 = vadd.f32 %v936_v0, %v730_v40  ;;  %v1168_v4 = vmul.f32 %v730_v40, %v730_v40  ;;  %860 = vst [vmem:[%s2529_s3 + $0x210] sm:$0xff] %v732_v41  ;;  %v1011_v16 = vadd.f32 %v1010_v5, %v732_v41  ;;  %v736_v50 = vmax.f32 %v592_v55, 0.0 }
 0x14a   :  { %v1170_v22 = vmul.f32 %v732_v41, %v732_v41  ;;  %859 = vst [vmem:[%s2529_s3 + $0x208] sm:$0xff] %v731_v60  ;;  %v974_v12 = vadd.f32 %v973_v7, %v731_v60  ;;  %v1169_v33 = vmul.f32 %v731_v60, %v731_v60  ;;  %861 = vst [vmem:[%s2529_s3 + $0x218] sm:$0xff] %v733_v9  ;;  %v735_v58 = vmax.f32 %v401_v61, 0.0 }
 0x14b   :  { %v1048_v35 = vadd.f32 %v1047_v13, %v733_v9  ;;  %v1171_v49 = vmul.f32 %v733_v9, %v733_v9  ;;  %v1247_v38 = vadd.f32 %v1246_v17, %v1168_v4  ;;  %v737_v59 = vmax.f32 %v594_v46, 0.0  ;;  %862 = vst [vmem:[%s2529_s3 + $0x220] sm:$0xff] %v734_v45  ;;  %864 = vst [vmem:[%s2529_s3 + $0x230] sm:$0xff] %v736_v50 }
 0x14c   :  { %v1321_v52 = vadd.f32 %v1320_v20, %v1170_v22  ;;  %v1284_v51 = vadd.f32 %v1283_v28, %v1169_v33  ;;  %v938_v62 = vadd.f32 %v937_v3, %v734_v45  ;;  %v1172_v63 = vmul.f32 %v734_v45, %v734_v45  ;;  %863 = vst [vmem:[%s2529_s3 + $0x228] sm:$0xff] %v735_v58 }
 0x14d   :  { %v1358_v53 = vadd.f32 %v1357_v29, %v1171_v49  ;;  %v1012_v0 = vadd.f32 %v1011_v16, %v736_v50  ;;  %v1174_v2 = vmul.f32 %v736_v50, %v736_v50  ;;  %v975_v5 = vadd.f32 %v974_v12, %v735_v58  ;;  %865 = vst [vmem:[%s2529_s3 + $0x238] sm:$0xff] %v737_v59  ;;  %v2158_v13 = vpop.f32.mrb[44].mxu0  ;;  %v2160_v14 = vpop.f32.mrb[44].mxu1 }
 0x14e   :  { %v1173_v6 = vmul.f32 %v735_v58, %v735_v58  ;;  %v1049_v7 = vadd.f32 %v1048_v35, %v737_v59  ;;  %v1175_v8 = vmul.f32 %v737_v59, %v737_v59  ;;  %v1248_v17 = vadd.f32 %v1247_v38, %v1172_v63  ;;  %v2166_v28 = vpop.f32.mrb[45].mxu0  ;;  %v2168_v29 = vpop.f32.mrb[45].mxu1 }
 0x14f   :  { %v1322_v20 = vadd.f32 %v1321_v52, %v1174_v2  ;;  %v405_v21 = vadd.f32 %v2062_v15, %v1770_v24  ;;  %v598_v1 = vadd.f32 %v2064_v47, %v1772_v25  ;;  %v407_v40 = vadd.f32 %v2072_v34, %v1774_v26  ;;  %v2174_v54 = vpop.f32.mrb[46].mxu0  ;;  %v2176_v55 = vpop.f32.mrb[46].mxu1 }
 0x150   :  { %v1285_v30 = vadd.f32 %v1284_v51, %v1173_v6  ;;  %v1359_v31 = vadd.f32 %v1358_v53, %v1175_v8  ;;  %v600_v41 = vadd.f32 %v2074_v48, %v1776_v27  ;;  %v409_v47 = vadd.f32 %v2082_v39, %v1770_v24  ;;  %v2182_v61 = vpop.f32.mrb[47].mxu0  ;;  %v2184_v46 = vpop.f32.mrb[47].mxu1 }
 0x151   :  { %v738_v15 = vmax.f32 %v405_v21, 0.0  ;;  %v740_v60 = vmax.f32 %v598_v1, 0.0  ;;  %v602_v9 = vadd.f32 %v2084_v44, %v1772_v25  ;;  %v739_v34 = vmax.f32 %v407_v40, 0.0 }
 0x152   :  { %v741_v3 = vmax.f32 %v600_v41, 0.0  ;;  %v411_v48 = vadd.f32 %v2086_v56, %v1774_v26  ;;  %v604_v4 = vadd.f32 %v2088_v57, %v1776_v27  ;;  %v742_v38 = vmax.f32 %v409_v47, 0.0 }
 0x153   :  { %866 = vst [vmem:[%s2529_s3 + $0x240] sm:$0xff] %v738_v15  ;;  %v939_v39 = vadd.f32 %v938_v62, %v738_v15  ;;  %v1176_v16 = vmul.f32 %v738_v15, %v738_v15  ;;  %868 = vst [vmem:[%s2529_s3 + $0x250] sm:$0xff] %v740_v60  ;;  %v1013_v44 = vadd.f32 %v1012_v0, %v740_v60  ;;  %v744_v52 = vmax.f32 %v602_v9, 0.0 }
 0x154   :  { %v1178_v22 = vmul.f32 %v740_v60, %v740_v60  ;;  %867 = vst [vmem:[%s2529_s3 + $0x248] sm:$0xff] %v739_v34  ;;  %v976_v56 = vadd.f32 %v975_v5, %v739_v34  ;;  %v1177_v12 = vmul.f32 %v739_v34, %v739_v34  ;;  %869 = vst [vmem:[%s2529_s3 + $0x258] sm:$0xff] %v741_v3  ;;  %v743_v51 = vmax.f32 %v411_v48, 0.0 }
 0x155   :  { %v1050_v57 = vadd.f32 %v1049_v7, %v741_v3  ;;  %v1179_v33 = vmul.f32 %v741_v3, %v741_v3  ;;  %v1249_v35 = vadd.f32 %v1248_v17, %v1176_v16  ;;  %v745_v53 = vmax.f32 %v604_v4, 0.0  ;;  %v2202_v58 = vpop.f32.mrb[48].mxu0  ;;  %v2204_v59 = vpop.f32.mrb[48].mxu1  ;;  %870 = vst [vmem:[%s2529_s3 + $0x260] sm:$0xff] %v742_v38  ;;  %872 = vst [vmem:[%s2529_s3 + $0x270] sm:$0xff] %v744_v52 }
 0x156   :  { %v1323_v49 = vadd.f32 %v1322_v20, %v1178_v22  ;;  %v1286_v45 = vadd.f32 %v1285_v30, %v1177_v12  ;;  %v940_v62 = vadd.f32 %v939_v39, %v742_v38  ;;  %v1180_v63 = vmul.f32 %v742_v38, %v742_v38  ;;  %v2212_v5 = vpop.f32.mrb[49].mxu0  ;;  %v2214_v6 = vpop.f32.mrb[49].mxu1  ;;  %871 = vst [vmem:[%s2529_s3 + $0x268] sm:$0xff] %v743_v51 }
 0x157   :  { %v1360_v50 = vadd.f32 %v1359_v31, %v1179_v33  ;;  %v1014_v0 = vadd.f32 %v1013_v44, %v744_v52  ;;  %v1182_v2 = vmul.f32 %v744_v52, %v744_v52  ;;  %v977_v7 = vadd.f32 %v976_v56, %v743_v51  ;;  %873 = vst [vmem:[%s2529_s3 + $0x278] sm:$0xff] %v745_v53  ;;  %v2222_v21 = vpop.f32.mrb[50].mxu0  ;;  %v2224_v1 = vpop.f32.mrb[50].mxu1 }
 0x158   :  { %v1181_v8 = vmul.f32 %v743_v51, %v743_v51  ;;  %v1051_v17 = vadd.f32 %v1050_v57, %v745_v53  ;;  %v1183_v20 = vmul.f32 %v745_v53, %v745_v53  ;;  %v1250_v30 = vadd.f32 %v1249_v35, %v1180_v63  ;;  %v2230_v15 = vpop.f32.mrb[51].mxu0  ;;  %v2232_v60 = vpop.f32.mrb[51].mxu1 }
 0x159   :  { %v1324_v31 = vadd.f32 %v1323_v49, %v1182_v2  ;;  %v415_v40 = vadd.f32 %v2110_v36, %v1770_v24  ;;  %v608_v41 = vadd.f32 %v2112_v37, %v1772_v25  ;;  %v417_v34 = vadd.f32 %v2118_v42, %v1774_v26 }
 0x15a   :  { %v1287_v47 = vadd.f32 %v1286_v45, %v1181_v8  ;;  %v1361_v9 = vadd.f32 %v1360_v50, %v1183_v20  ;;  %v610_v3 = vadd.f32 %v2120_v43, %v1776_v27  ;;  %v419_v36 = vadd.f32 %v2126_v10, %v1770_v24 }
 0x15b   :  { %v746_v48 = vmax.f32 %v415_v40, 0.0  ;;  %v748_v4 = vmax.f32 %v608_v41, 0.0  ;;  %v612_v37 = vadd.f32 %v2128_v32, %v1772_v25  ;;  %v747_v39 = vmax.f32 %v417_v34, 0.0 }
 0x15c   :  { %v749_v16 = vmax.f32 %v610_v3, 0.0  ;;  %v421_v44 = vadd.f32 %v2136_v11, %v1774_v26  ;;  %v614_v22 = vadd.f32 %v2138_v23, %v1776_v27  ;;  %v750_v38 = vmax.f32 %v419_v36, 0.0 }
 0x15d   :  { %874 = vst [vmem:[%s2529_s3 + $0x280] sm:$0xff] %v746_v48  ;;  %v941_v42 = vadd.f32 %v940_v62, %v746_v48  ;;  %v1184_v43 = vmul.f32 %v746_v48, %v746_v48  ;;  %876 = vst [vmem:[%s2529_s3 + $0x290] sm:$0xff] %v748_v4  ;;  %v1015_v10 = vadd.f32 %v1014_v0, %v748_v4  ;;  %v2258_v57 = vpop.f32.mrb[52].mxu0  ;;  %v2260_v33 = vpop.f32.mrb[52].mxu1  ;;  %v752_v52 = vmax.f32 %v612_v37, 0.0 }
 0x15e   :  { %v1186_v32 = vmul.f32 %v748_v4, %v748_v4  ;;  %875 = vst [vmem:[%s2529_s3 + $0x288] sm:$0xff] %v747_v39  ;;  %v978_v11 = vadd.f32 %v977_v7, %v747_v39  ;;  %v1185_v56 = vmul.f32 %v747_v39, %v747_v39  ;;  %877 = vst [vmem:[%s2529_s3 + $0x298] sm:$0xff] %v749_v16  ;;  %v2262_v45 = vpop.f32.mrb[53].mxu0  ;;  %v2264_v50 = vpop.f32.mrb[53].mxu1  ;;  %v751_v62 = vmax.f32 %v421_v44, 0.0 }
 0x15f   :  { %v1052_v23 = vadd.f32 %v1051_v17, %v749_v16  ;;  %v1187_v12 = vmul.f32 %v749_v16, %v749_v16  ;;  %v1251_v35 = vadd.f32 %v1250_v30, %v1184_v43  ;;  %v753_v63 = vmax.f32 %v614_v22, 0.0  ;;  %v2266_v0 = vpop.f32.mrb[54].mxu0  ;;  %v2268_v2 = vpop.f32.mrb[54].mxu1  ;;  %878 = vst [vmem:[%s2529_s3 + $0x2a0] sm:$0xff] %v750_v38  ;;  %880 = vst [vmem:[%s2529_s3 + $0x2b0] sm:$0xff] %v752_v52 }
 0x160   :  { %v1325_v49 = vadd.f32 %v1324_v31, %v1186_v32  ;;  %v1288_v51 = vadd.f32 %v1287_v47, %v1185_v56  ;;  %v942_v7 = vadd.f32 %v941_v42, %v750_v38  ;;  %v1188_v8 = vmul.f32 %v750_v38, %v750_v38  ;;  %v2276_v30 = vpop.f32.mrb[55].mxu0  ;;  %v2278_v31 = vpop.f32.mrb[55].mxu1  ;;  %879 = vst [vmem:[%s2529_s3 + $0x2a8] sm:$0xff] %v751_v62 }
 0x161   :  { %v1362_v53 = vadd.f32 %v1361_v9, %v1187_v12  ;;  %v1016_v17 = vadd.f32 %v1015_v10, %v752_v52  ;;  %v1190_v20 = vmul.f32 %v752_v52, %v752_v52  ;;  %v979_v40 = vadd.f32 %v978_v11, %v751_v62  ;;  %881 = vst [vmem:[%s2529_s3 + $0x2b8] sm:$0xff] %v753_v63 }
 0x162   :  { %v1189_v41 = vmul.f32 %v751_v62, %v751_v62  ;;  %v1053_v47 = vadd.f32 %v1052_v23, %v753_v63  ;;  %v1191_v9 = vmul.f32 %v753_v63, %v753_v63  ;;  %v1252_v34 = vadd.f32 %v1251_v35, %v1188_v8 }
 0x163   :  { %v1326_v3 = vadd.f32 %v1325_v49, %v1190_v20  ;;  %v425_v48 = vadd.f32 %v2158_v13, %v1770_v24  ;;  %v618_v4 = vadd.f32 %v2160_v14, %v1772_v25  ;;  %v427_v39 = vadd.f32 %v2166_v28, %v1774_v26 }
 0x164   :  { %v1289_v36 = vadd.f32 %v1288_v51, %v1189_v41  ;;  %v1363_v37 = vadd.f32 %v1362_v53, %v1191_v9  ;;  %v620_v16 = vadd.f32 %v2168_v29, %v1776_v27  ;;  %v429_v42 = vadd.f32 %v2174_v54, %v1770_v24 }
 0x165   :  { %v754_v44 = vmax.f32 %v425_v48, 0.0  ;;  %v756_v22 = vmax.f32 %v618_v4, 0.0  ;;  %v622_v43 = vadd.f32 %v2176_v55, %v1772_v25  ;;  %v755_v13 = vmax.f32 %v427_v39, 0.0  ;;  %v2302_v28 = vpop.f32.mrb[56].mxu0  ;;  %v2304_v11 = vpop.f32.mrb[56].mxu1 }
 0x166   :  { %v757_v10 = vmax.f32 %v620_v16, 0.0  ;;  %v431_v14 = vadd.f32 %v2182_v61, %v1774_v26  ;;  %v624_v32 = vadd.f32 %v2184_v46, %v1776_v27  ;;  %v2312_v61 = vpop.f32.mrb[57].mxu0  ;;  %v2314_v23 = vpop.f32.mrb[57].mxu1  ;;  %v758_v62 = vmax.f32 %v429_v42, 0.0 }
 0x167   :  { %882 = vst [vmem:[%s2529_s3 + $0x2c0] sm:$0xff] %v754_v44  ;;  %v943_v29 = vadd.f32 %v942_v7, %v754_v44  ;;  %v1192_v54 = vmul.f32 %v754_v44, %v754_v44  ;;  %884 = vst [vmem:[%s2529_s3 + $0x2d0] sm:$0xff] %v756_v22  ;;  %v1017_v55 = vadd.f32 %v1016_v17, %v756_v22  ;;  %v2322_v38 = vpop.f32.mrb[58].mxu0  ;;  %v2324_v52 = vpop.f32.mrb[58].mxu1  ;;  %v760_v63 = vmax.f32 %v622_v43, 0.0 }
 0x168   :  { %v1194_v56 = vmul.f32 %v756_v22, %v756_v22  ;;  %883 = vst [vmem:[%s2529_s3 + $0x2c8] sm:$0xff] %v755_v13  ;;  %v980_v46 = vadd.f32 %v979_v40, %v755_v13  ;;  %v1193_v12 = vmul.f32 %v755_v13, %v755_v13  ;;  %885 = vst [vmem:[%s2529_s3 + $0x2d8] sm:$0xff] %v757_v10  ;;  %v2326_v7 = vpop.f32.mrb[59].mxu0  ;;  %v2328_v8 = vpop.f32.mrb[59].mxu1  ;;  %v759_v40 = vmax.f32 %v431_v14, 0.0 }
 0x169   :  { %v1054_v35 = vadd.f32 %v1053_v47, %v757_v10  ;;  %v1195_v49 = vmul.f32 %v757_v10, %v757_v10  ;;  %v1253_v51 = vadd.f32 %v1252_v34, %v1192_v54  ;;  %v761_v41 = vmax.f32 %v624_v32, 0.0  ;;  %886 = vst [vmem:[%s2529_s3 + $0x2e0] sm:$0xff] %v758_v62  ;;  %888 = vst [vmem:[%s2529_s3 + $0x2f0] sm:$0xff] %v760_v63 }
 0x16a   :  { %v1327_v53 = vadd.f32 %v1326_v3, %v1194_v56  ;;  %v1290_v17 = vadd.f32 %v1289_v36, %v1193_v12  ;;  %v944_v47 = vadd.f32 %v943_v29, %v758_v62  ;;  %v1196_v9 = vmul.f32 %v758_v62, %v758_v62  ;;  %887 = vst [vmem:[%s2529_s3 + $0x2e8] sm:$0xff] %v759_v40 }
 0x16b   :  { %v1364_v20 = vadd.f32 %v1363_v37, %v1195_v49  ;;  %v1018_v34 = vadd.f32 %v1017_v55, %v760_v63  ;;  %v1198_v3 = vmul.f32 %v760_v63, %v760_v63  ;;  %v981_v48 = vadd.f32 %v980_v46, %v759_v40  ;;  %889 = vst [vmem:[%s2529_s3 + $0x2f8] sm:$0xff] %v761_v41 }
 0x16c   :  { %v1197_v4 = vmul.f32 %v759_v40, %v759_v40  ;;  %v1055_v36 = vadd.f32 %v1054_v35, %v761_v41  ;;  %v1199_v37 = vmul.f32 %v761_v41, %v761_v41  ;;  %v1254_v39 = vadd.f32 %v1253_v51, %v1196_v9 }
 0x16d   :  { %v1328_v16 = vadd.f32 %v1327_v53, %v1198_v3  ;;  %v435_v44 = vadd.f32 %v2202_v58, %v1770_v24  ;;  %v628_v22 = vadd.f32 %v2204_v59, %v1772_v25  ;;  %v437_v13 = vadd.f32 %v2212_v5, %v1774_v26  ;;  %v2350_v14 = vpop.f32.mrb[60].mxu0  ;;  %v2352_v32 = vpop.f32.mrb[60].mxu1 }
 0x16e   :  { %v1291_v42 = vadd.f32 %v1290_v17, %v1197_v4  ;;  %v1365_v43 = vadd.f32 %v1364_v20, %v1199_v37  ;;  %v630_v10 = vadd.f32 %v2214_v6, %v1776_v27  ;;  %v439_v58 = vadd.f32 %v2222_v21, %v1770_v24  ;;  %v2358_v55 = vpop.f32.mrb[61].mxu0  ;;  %v2360_v56 = vpop.f32.mrb[61].mxu1 }
 0x16f   :  { %v762_v29 = vmax.f32 %v435_v44, 0.0  ;;  %v764_v54 = vmax.f32 %v628_v22, 0.0  ;;  %v632_v59 = vadd.f32 %v2224_v1, %v1772_v25  ;;  %v763_v5 = vmax.f32 %v437_v13, 0.0  ;;  %v2366_v35 = vpop.f32.mrb[62].mxu0  ;;  %v2368_v49 = vpop.f32.mrb[62].mxu1 }
 0x170   :  { %v765_v46 = vmax.f32 %v630_v10, 0.0  ;;  %v441_v6 = vadd.f32 %v2230_v15, %v1774_v26  ;;  %v634_v12 = vadd.f32 %v2232_v60, %v1776_v27  ;;  %v2376_v15 = vpop.f32.mrb[63].mxu0  ;;  %v2378_v62 = vpop.f32.mrb[63].mxu1 }
 0x171   :  { %890 = vst [vmem:[%s2529_s3 + $0x300] sm:$0xff] %v762_v29  ;;  %v945_v21 = vadd.f32 %v944_v47, %v762_v29  ;;  %v1200_v1 = vmul.f32 %v762_v29, %v762_v29  ;;  %892 = vst [vmem:[%s2529_s3 + $0x310] sm:$0xff] %v764_v54  ;;  %v1019_v51 = vadd.f32 %v1018_v34, %v764_v54  ;;  %v766_v47 = vmax.f32 %v439_v58, 0.0 }
 0x172   :  { %v1202_v53 = vmul.f32 %v764_v54, %v764_v54  ;;  %891 = vst [vmem:[%s2529_s3 + $0x308] sm:$0xff] %v763_v5  ;;  %v982_v60 = vadd.f32 %v981_v48, %v763_v5  ;;  %v1201_v63 = vmul.f32 %v763_v5, %v763_v5  ;;  %893 = vst [vmem:[%s2529_s3 + $0x318] sm:$0xff] %v765_v46  ;;  %v768_v9 = vmax.f32 %v632_v59, 0.0 }
 0x173   :  { %v1056_v17 = vadd.f32 %v1055_v36, %v765_v46  ;;  %v1203_v20 = vmul.f32 %v765_v46, %v765_v46  ;;  %v1255_v40 = vadd.f32 %v1254_v39, %v1200_v1  ;;  %v767_v4 = vmax.f32 %v441_v6, 0.0  ;;  %894 = vst [vmem:[%s2529_s3 + $0x320] sm:$0xff] %v766_v47 }
 0x174   :  { %v1329_v41 = vadd.f32 %v1328_v16, %v1202_v53  ;;  %v1292_v34 = vadd.f32 %v1291_v42, %v1201_v63  ;;  %v769_v37 = vmax.f32 %v634_v12, 0.0  ;;  %v946_v48 = vadd.f32 %v945_v21, %v766_v47  ;;  %896 = vst [vmem:[%s2529_s3 + $0x330] sm:$0xff] %v768_v9 }
 0x175   :  { %v1366_v3 = vadd.f32 %v1365_v43, %v1203_v20  ;;  %v1204_v44 = vmul.f32 %v766_v47, %v766_v47  ;;  %v1020_v36 = vadd.f32 %v1019_v51, %v768_v9  ;;  %v1206_v22 = vmul.f32 %v768_v9, %v768_v9  ;;  %895 = vst [vmem:[%s2529_s3 + $0x328] sm:$0xff] %v767_v4 }
 0x176   :  { %v983_v39 = vadd.f32 %v982_v60, %v767_v4  ;;  %v1205_v16 = vmul.f32 %v767_v4, %v767_v4  ;;  %897 = vst [vmem:[%s2529_s3 + $0x338] sm:$0xff] %v769_v37  ;;  %v1057_v42 = vadd.f32 %v1056_v17, %v769_v37  ;;  %v1207_v43 = vmul.f32 %v769_v37, %v769_v37 }
 0x177   :  { %v1256_v13 = vadd.f32 %v1255_v40, %v1204_v44  ;;  %v1330_v10 = vadd.f32 %v1329_v41, %v1206_v22  ;;  %v445_v29 = vadd.f32 %v2258_v57, %v1770_v24  ;;  %v638_v54 = vadd.f32 %v2260_v33, %v1772_v25 }
 0x178   :  { %v1293_v58 = vadd.f32 %v1292_v34, %v1205_v16  ;;  %v1367_v59 = vadd.f32 %v1366_v3, %v1207_v43  ;;  %v447_v5 = vadd.f32 %v2262_v45, %v1774_v26  ;;  %v640_v46 = vadd.f32 %v2264_v50, %v1776_v27 }
 0x179   :  { %v770_v6 = vmax.f32 %v445_v29, 0.0  ;;  %v772_v12 = vmax.f32 %v638_v54, 0.0  ;;  %v449_v21 = vadd.f32 %v2266_v0, %v1770_v24  ;;  %v642_v1 = vadd.f32 %v2268_v2, %v1772_v25 }
 0x17a   :  { %v771_v57 = vmax.f32 %v447_v5, 0.0  ;;  %v773_v51 = vmax.f32 %v640_v46, 0.0  ;;  %v451_v33 = vadd.f32 %v2276_v30, %v1774_v26  ;;  %v644_v53 = vadd.f32 %v2278_v31, %v1776_v27 }
 0x17b   :  { %898 = vst [vmem:[%s2529_s3 + $0x340] sm:$0xff] %v770_v6  ;;  %v947_v45 = vadd.f32 %v946_v48, %v770_v6  ;;  %v1208_v50 = vmul.f32 %v770_v6, %v770_v6  ;;  %900 = vst [vmem:[%s2529_s3 + $0x350] sm:$0xff] %v772_v12  ;;  %v1021_v0 = vadd.f32 %v1020_v36, %v772_v12  ;;  %v774_v40 = vmax.f32 %v449_v21, 0.0 }
 0x17c   :  { %v1210_v2 = vmul.f32 %v772_v12, %v772_v12  ;;  %899 = vst [vmem:[%s2529_s3 + $0x348] sm:$0xff] %v771_v57  ;;  %v984_v30 = vadd.f32 %v983_v39, %v771_v57  ;;  %v1209_v60 = vmul.f32 %v771_v57, %v771_v57  ;;  %901 = vst [vmem:[%s2529_s3 + $0x358] sm:$0xff] %v773_v51  ;;  %v776_v41 = vmax.f32 %v642_v1, 0.0 }
 0x17d   :  { %v1058_v31 = vadd.f32 %v1057_v42, %v773_v51  ;;  %v1211_v63 = vmul.f32 %v773_v51, %v773_v51  ;;  %v1257_v17 = vadd.f32 %v1256_v13, %v1208_v50  ;;  %v775_v34 = vmax.f32 %v451_v33, 0.0  ;;  %902 = vst [vmem:[%s2529_s3 + $0x360] sm:$0xff] %v774_v40 }
 0x17e   :  { %v1331_v20 = vadd.f32 %v1330_v10, %v1210_v2  ;;  %v1294_v47 = vadd.f32 %v1293_v58, %v1209_v60  ;;  %v777_v3 = vmax.f32 %v644_v53, 0.0  ;;  %v948_v4 = vadd.f32 %v947_v45, %v774_v40  ;;  %904 = vst [vmem:[%s2529_s3 + $0x370] sm:$0xff] %v776_v41 }
 0x17f   :  { %v1368_v9 = vadd.f32 %v1367_v59, %v1211_v63  ;;  %v1212_v37 = vmul.f32 %v774_v40, %v774_v40  ;;  %v1022_v48 = vadd.f32 %v1021_v0, %v776_v41  ;;  %v1214_v44 = vmul.f32 %v776_v41, %v776_v41  ;;  %903 = vst [vmem:[%s2529_s3 + $0x368] sm:$0xff] %v775_v34 }
 0x180   :  { %v985_v36 = vadd.f32 %v984_v30, %v775_v34  ;;  %v1213_v22 = vmul.f32 %v775_v34, %v775_v34  ;;  %905 = vst [vmem:[%s2529_s3 + $0x378] sm:$0xff] %v777_v3  ;;  %v1059_v39 = vadd.f32 %v1058_v31, %v777_v3  ;;  %v1215_v16 = vmul.f32 %v777_v3, %v777_v3 }
 0x181   :  { %v1258_v42 = vadd.f32 %v1257_v17, %v1212_v37  ;;  %v1332_v43 = vadd.f32 %v1331_v20, %v1214_v44  ;;  %v455_v13 = vadd.f32 %v2302_v28, %v1770_v24  ;;  %v648_v10 = vadd.f32 %v2304_v11, %v1772_v25 }
 0x182   :  { %v1295_v29 = vadd.f32 %v1294_v47, %v1213_v22  ;;  %v1369_v54 = vadd.f32 %v1368_v9, %v1215_v16  ;;  %v457_v58 = vadd.f32 %v2312_v61, %v1774_v26  ;;  %v650_v59 = vadd.f32 %v2314_v23, %v1776_v27 }
 0x183   :  { %v778_v5 = vmax.f32 %v455_v13, 0.0  ;;  %v780_v46 = vmax.f32 %v648_v10, 0.0  ;;  %v459_v6 = vadd.f32 %v2322_v38, %v1770_v24  ;;  %v652_v12 = vadd.f32 %v2324_v52, %v1772_v25 }
 0x184   :  { %v779_v28 = vmax.f32 %v457_v58, 0.0  ;;  %v781_v21 = vmax.f32 %v650_v59, 0.0  ;;  %v461_v11 = vadd.f32 %v2326_v7, %v1774_v26  ;;  %v654_v1 = vadd.f32 %v2328_v8, %v1776_v27 }
 0x185   :  { %906 = vst [vmem:[%s2529_s3 + $0x380] sm:$0xff] %v778_v5  ;;  %v949_v61 = vadd.f32 %v948_v4, %v778_v5  ;;  %v1216_v23 = vmul.f32 %v778_v5, %v778_v5  ;;  %908 = vst [vmem:[%s2529_s3 + $0x390] sm:$0xff] %v780_v46  ;;  %v1023_v38 = vadd.f32 %v1022_v48, %v780_v46  ;;  %v782_v45 = vmax.f32 %v459_v6, 0.0 }
 0x186   :  { %v1218_v52 = vmul.f32 %v780_v46, %v780_v46  ;;  %907 = vst [vmem:[%s2529_s3 + $0x388] sm:$0xff] %v779_v28  ;;  %v986_v7 = vadd.f32 %v985_v36, %v779_v28  ;;  %v1217_v57 = vmul.f32 %v779_v28, %v779_v28  ;;  %909 = vst [vmem:[%s2529_s3 + $0x398] sm:$0xff] %v781_v21  ;;  %v784_v50 = vmax.f32 %v652_v12, 0.0 }
 0x187   :  { %v1060_v8 = vadd.f32 %v1059_v39, %v781_v21  ;;  %v1219_v51 = vmul.f32 %v781_v21, %v781_v21  ;;  %v1259_v33 = vadd.f32 %v1258_v42, %v1216_v23  ;;  %v783_v30 = vmax.f32 %v461_v11, 0.0  ;;  %910 = vst [vmem:[%s2529_s3 + $0x3a0] sm:$0xff] %v782_v45 }
 0x188   :  { %v1333_v53 = vadd.f32 %v1332_v43, %v1218_v52  ;;  %v1296_v0 = vadd.f32 %v1295_v29, %v1217_v57  ;;  %v785_v60 = vmax.f32 %v654_v1, 0.0  ;;  %v950_v31 = vadd.f32 %v949_v61, %v782_v45  ;;  %912 = vst [vmem:[%s2529_s3 + $0x3b0] sm:$0xff] %v784_v50 }
 0x189   :  { %v1370_v2 = vadd.f32 %v1369_v54, %v1219_v51  ;;  %v1220_v63 = vmul.f32 %v782_v45, %v782_v45  ;;  %v1024_v17 = vadd.f32 %v1023_v38, %v784_v50  ;;  %v1222_v20 = vmul.f32 %v784_v50, %v784_v50  ;;  %911 = vst [vmem:[%s2529_s3 + $0x3a8] sm:$0xff] %v783_v30 }
 0x18a   :  { %v987_v40 = vadd.f32 %v986_v7, %v783_v30  ;;  %v1221_v41 = vmul.f32 %v783_v30, %v783_v30  ;;  %913 = vst [vmem:[%s2529_s3 + $0x3b8] sm:$0xff] %v785_v60  ;;  %v1061_v47 = vadd.f32 %v1060_v8, %v785_v60  ;;  %v1223_v9 = vmul.f32 %v785_v60, %v785_v60 }
 0x18b   :  { %v1260_v34 = vadd.f32 %v1259_v33, %v1220_v63  ;;  %v1334_v3 = vadd.f32 %v1333_v53, %v1222_v20  ;;  %v465_v4 = vadd.f32 %v2350_v14, %v1770_v24  ;;  %v658_v37 = vadd.f32 %v2352_v32, %v1772_v25 }
 0x18c   :  { %v1297_v48 = vadd.f32 %v1296_v0, %v1221_v41  ;;  %v1371_v44 = vadd.f32 %v1370_v2, %v1223_v9  ;;  %v467_v36 = vadd.f32 %v2358_v55, %v1774_v26  ;;  %v660_v22 = vadd.f32 %v2360_v56, %v1776_v27 }
 0x18d   :  { %v786_v39 = vmax.f32 %v465_v4, 0.0  ;;  %v788_v16 = vmax.f32 %v658_v37, 0.0  ;;  %v469_v42 = vadd.f32 %v2366_v35, %v1770_v24  ;;  %v662_v43 = vadd.f32 %v2368_v49, %v1772_v25 }
 0x18e   :  { %v787_v14 = vmax.f32 %v467_v36, 0.0  ;;  %v789_v13 = vmax.f32 %v660_v22, 0.0  ;;  %v471_v32 = vadd.f32 %v2376_v15, %v1774_v26  ;;  %v1505_v1 = vmov 1966171168  }
 0x18f   :  { %914 = vst [vmem:[%s2529_s3 + $0x3c0] sm:$0xff] %v786_v39  ;;  %v951_v55 = vadd.f32 %v950_v31, %v786_v39  ;;  %v1224_v10 = vmul.f32 %v786_v39, %v786_v39  ;;  %916 = vst [vmem:[%s2529_s3 + $0x3d0] sm:$0xff] %v788_v16  ;;  %v1025_v56 = vadd.f32 %v1024_v17, %v788_v16  ;;  %v790_v54 = vmax.f32 %v469_v42, 0.0 }
 0x190   :  { %v1226_v24 = vmul.f32 %v788_v16, %v788_v16  ;;  %915 = vst [vmem:[%s2529_s3 + $0x3c8] sm:$0xff] %v787_v14  ;;  %v988_v25 = vadd.f32 %v987_v40, %v787_v14  ;;  %v1225_v35 = vmul.f32 %v787_v14, %v787_v14  ;;  %917 = vst [vmem:[%s2529_s3 + $0x3d8] sm:$0xff] %v789_v13  ;;  %v792_v58 = vmax.f32 %v662_v43, 0.0 }
 0x191   :  { %v1062_v26 = vadd.f32 %v1061_v47, %v789_v13  ;;  %v1227_v49 = vmul.f32 %v789_v13, %v789_v13  ;;  %v1261_v15 = vadd.f32 %v1260_v34, %v1224_v10  ;;  %v791_v46 = vmax.f32 %v471_v32, 0.0  ;;  %918 = vst [vmem:[%s2529_s3 + $0x3e0] sm:$0xff] %v790_v54 }
 0x192   :  { %v1335_v29 = vadd.f32 %v1334_v3, %v1226_v24  ;;  %v1298_v59 = vadd.f32 %v1297_v48, %v1225_v35  ;;  %v952_v6 = vadd.f32 %v951_v55, %v790_v54  ;;  %v1228_v12 = vmul.f32 %v790_v54, %v790_v54  ;;  %920 = vst [vmem:[%s2529_s3 + $0x3f0] sm:$0xff] %v792_v58 }
 0x193   :  { %v1372_v5 = vadd.f32 %v1371_v44, %v1227_v49  ;;  %v1026_v28 = vadd.f32 %v1025_v56, %v792_v58  ;;  %v1230_v21 = vmul.f32 %v792_v58, %v792_v58  ;;  %919 = vst [vmem:[%s2529_s3 + $0x3e8] sm:$0xff] %v791_v46  ;;  %v989_v11 = vadd.f32 %v988_v25, %v791_v46 }
 0x194   :  { %v1077_v61 = vunpack.c.l.s4 %v1505_v1  ;;  %v1229_v23 = vmul.f32 %v791_v46, %v791_v46  ;;  %v664_v38 = vadd.f32 %v2378_v62, %v1776_v27  ;;  %v953_v52 = vrot.slane %v952_v6, 4 }
 0x195   :  { %v1262_v7 = vadd.f32 %v1261_v15, %v1228_v12  ;;  %v1027_v57 = vrot.slane %v1026_v28, 4  ;;  %v1336_v8 = vadd.f32 %v1335_v29, %v1230_v21  ;;  %v990_v51 = vrot.slane %v989_v11, 4 }
 0x196   :  { %v1299_v33 = vadd.f32 %v1298_v59, %v1229_v23  ;;  %v793_v53 = vmax.f32 %v664_v38, 0.0  ;;  %v954_v45 = vadd.f32 %v953_v52, %v952_v6  ;;  %v1078_v60 = vunpack.c.0.s8 %v1077_v61 }
 0x197   :  { %v1263_v50 = vrot.slane %v1262_v7, 4  ;;  %v1028_v0 = vadd.f32 %v1027_v57, %v1026_v28  ;;  %v1337_v2 = vrot.slane %v1336_v8, 4  ;;  %v991_v30 = vadd.f32 %v990_v51, %v989_v11 }
 0x198   :  { %v1300_v31 = vrot.slane %v1299_v33, 4  ;;  %921 = vst [vmem:[%s2529_s3 + $0x3f8] sm:$0xff] %v793_v53  ;;  %v1063_v63 = vadd.f32 %v1062_v26, %v793_v53  ;;  %v955_v27 = vrot.slane %v954_v45, 2  ;;  %v1231_v9 = vmul.f32 %v793_v53, %v793_v53 }
 0x199   :  { %v1264_v62 = vadd.f32 %v1263_v50, %v1262_v7  ;;  %v1029_v17 = vrot.slane %v1028_v0, 2  ;;  %v1338_v20 = vadd.f32 %v1337_v2, %v1336_v8  ;;  %v992_v40 = vrot.slane %v991_v30, 2 }
 0x19a   :  { %v1301_v41 = vadd.f32 %v1300_v31, %v1299_v33  ;;  %v1064_v47 = vrot.slane %v1063_v63, 4  ;;  %v956_v34 = vadd.f32 %v955_v27, %v954_v45  ;;  %v1373_v22 = vadd.f32 %v1372_v5, %v1231_v9 }
 0x19b   :  { %v1265_v3 = vrot.slane %v1264_v62, 2  ;;  %v1030_v4 = vadd.f32 %v1029_v17, %v1028_v0  ;;  %v1339_v37 = vrot.slane %v1338_v20, 2  ;;  %v993_v48 = vadd.f32 %v992_v40, %v991_v30 }
 0x19c   :  { %v1302_v44 = vrot.slane %v1301_v41, 2  ;;  %v1065_v36 = vadd.f32 %v1064_v47, %v1063_v63  ;;  %v957_v39 = vrot.slane %v956_v34, 1  ;;  %v1374_v55 = vrot.slane %v1373_v22, 4 }
 0x19d   :  { %v1266_v16 = vadd.f32 %v1265_v3, %v1264_v62  ;;  %v1031_v42 = vrot.slane %v1030_v4, 1  ;;  %v1340_v43 = vadd.f32 %v1339_v37, %v1338_v20  ;;  %v994_v14 = vrot.slane %v993_v48, 1 }
 0x19e   :  { %v1303_v13 = vadd.f32 %v1302_v44, %v1301_v41  ;;  %v1066_v32 = vrot.slane %v1065_v36, 2  ;;  %v958_v10 = vadd.f32 %v957_v39, %v956_v34  ;;  %v1375_v26 = vadd.f32 %v1374_v55, %v1373_v22 }
 0x19f   :  { %v1267_v56 = vrot.slane %v1266_v16, 1  ;;  %v995_v24 = vadd.f32 %v994_v14, %v993_v48  ;;  %v1032_v15 = vadd.f32 %v1031_v42, %v1030_v4  ;;  %v1341_v29 = vrot.slane %v1340_v43, 1 }
 0x1a0   :  { %v1304_v25 = vrot.slane %v1303_v13, 1  ;;  %v1067_v35 = vadd.f32 %v1066_v32, %v1065_v36  ;;  %v1081_v54 = vsub.s32 %v1078_v60, %v1761_v19  ;;  %v1376_v46 = vrot.slane %v1375_v26, 2 }
 0x1a1   :  { %v1268_v49 = vadd.f32 %v1267_v56, %v1266_v16  ;;  %v1074_v58 = vcombine.low %v958_v10, %v995_v24  ;;  %v1342_v21 = vadd.f32 %v1341_v29, %v1340_v43 }
 0x1a2   :  { %v1305_v59 = vadd.f32 %v1304_v25, %v1303_v13  ;;  %v1068_v5 = vrot.slane %v1067_v35, 1  ;;  %v1377_v28 = vadd.f32 %v1376_v46, %v1375_v26 }
 0x1a3   :  { %v1082_v11 = vrot.slane %v1074_v58, %v1081_v54 }
 0x1a4   :  { %v1384_v6 = vcombine.low %v1268_v49, %v1305_v59  ;;  %v1069_v12 = vadd.f32 %v1068_v5, %v1067_v35  ;;  %v1378_v61 = vrot.slane %v1377_v28, 1 }
 0x1a6   :  { %v1075_v1 = vcombine.low %v1032_v15, %v1069_v12  ;;  %v1379_v38 = vadd.f32 %v1378_v61, %v1377_v28  ;;  %v1392_v52 = vrot.slane %v1384_v6, %v1081_v54 }
 0x1a8   :  { %v1089_v23 = vrot.slane %v1075_v1, %v1081_v54  ;;  %v1385_v57 = vcombine.low %v1342_v21, %v1379_v38 }
 0x1aa   :  { %v1090_v7 = vcombine.low %v1082_v11, %v1089_v23  ;;  %v1399_v19 = vrot.slane %v1385_v57, %v1081_v54 }
 0x1ac   :  { %v1097_v8 = vrot.slane %v1090_v7, %v1081_v54  ;;  %v1400_v51 = vcombine.low %v1392_v52, %v1399_v19 }
 0x1ae   :  { %1103 = vst.msk [vmem:[%s2530_s4] sm:$0xf] %vm1101_vm0, %v1097_v8  ;;  %v1407_v33 = vrot.slane %v1400_v51, %v1081_v54 }
 0x1b0   :  { %1409 = vst.msk [vmem:[%s2531_s5] sm:$0xf] %vm1101_vm0, %v1407_v33 }

</bundles_post_ra>
